<compile_context>
chip_gen: v6e
topology: v6e:2x2x1
jax: 0.10.0
libtpu: 0.0.40
codegen_flags: <defaults>
</compile_context>

<pallas_src>
import numpy as np
import jax
import jax.numpy as jnp
from jax.experimental import pallas as pl
from jax.experimental.pallas import tpu as pltpu


# ----------------------------------------------------------------------------
# Constant 0/1 spatial operators (built once in numpy from static shapes).
# ----------------------------------------------------------------------------
def _conv3x3_s2_gather(Hi, Wi):
    """G[t, oy*Wo+ox, iy*Wi+ix] = 1 iff tap t=(dy,dx) of output (oy,ox) reads input (iy,ix).
    Zero rows encode the padding=1 border (taps that fall outside the image)."""
    Ho, Wo = Hi // 2, Wi // 2
    G = np.zeros((9, Ho * Wo, Hi * Wi), np.float32)
    for dy in range(3):
        for dx in range(3):
            t = dy * 3 + dx
            for oy in range(Ho):
                iy = 2 * oy + dy - 1
                if iy < 0 or iy >= Hi:
                    continue
                for ox in range(Wo):
                    ix = 2 * ox + dx - 1
                    if ix < 0 or ix >= Wi:
                        continue
                    G[t, oy * Wo + ox, iy * Wi + ix] = 1.0
    return G


def _convT2x2_s2_scatter(Hi, Wi):
    """S[k, (2iy+ky)*(2Wi)+(2ix+kx), iy*Wi+ix] = 1 : places phase k=(ky,kx) of a
    ConvTranspose2d(k=2, s=2) into the interleaved full-resolution output."""
    Wo = 2 * Wi
    S = np.zeros((4, (2 * Hi) * Wo, Hi * Wi), np.float32)
    for ky in range(2):
        for kx in range(2):
            k = ky * 2 + kx
            for iy in range(Hi):
                for ix in range(Wi):
                    S[k, (2 * iy + ky) * Wo + (2 * ix + kx), iy * Wi + ix] = 1.0
    return S


def build_spatial_plan(H, W, bottle_neck):
    plan = {}
    h, w = H, W
    enc_hw = []
    for i in range(bottle_neck):
        plan[f"g{i}"] = jnp.asarray(_conv3x3_s2_gather(h, w), jnp.bfloat16)
        h, w = h // 2, w // 2
        enc_hw.append((h, w))
    for i in range(bottle_neck - 1, -1, -1):
        hi, wi = enc_hw[i]  # decoder i input resolution == encoder i output resolution
        plan[f"sc{i}"] = jnp.asarray(_convT2x2_s2_scatter(hi, wi), jnp.bfloat16)
    return plan


# ----------------------------------------------------------------------------
# The single fused Pallas kernel (one grid step == one batch sample).
# ----------------------------------------------------------------------------
def _make_fcn_kernel(bottle_neck, dec_split):
    nE = bottle_neck

    def kernel(*refs):
        x_ref = refs[0]
        enc_refs = refs[1:1 + 3 * nE]
        dec_refs = refs[1 + 3 * nE:1 + 6 * nE]
        out_ref = refs[1 + 6 * nE]

        x = x_ref[0].astype(jnp.bfloat16)                     # (S0, Cin0)

        # ---------------- encoders: Conv2d(k=3, s=2, p=1) ----------------
        encs = []
        for i in range(nE):
            w_ref, b_ref, g_ref = enc_refs[3 * i:3 * i + 3]
            So, Cout = g_ref.shape[1], w_ref.shape[2]
            acc = jnp.zeros((So, Cout), jnp.float32)
            for t in range(9):                                # 9 taps: gather rows, then weight
                tap = jnp.dot(g_ref[t], x, preferred_element_type=jnp.float32)
                acc = acc + jnp.dot(tap.astype(jnp.bfloat16), w_ref[t],
                                    preferred_element_type=jnp.float32)
            acc = acc + b_ref[...]
            x = acc.astype(jnp.bfloat16)
            encs.append(x)

        # -------- decoders: ConvTranspose2d(k=2, s=2) with skip concats --------
        y_f32 = None
        for j in range(nE):
            i = nE - 1 - j
            w_ref, b_ref, sc_ref = dec_refs[3 * j:3 * j + 3]
            So, Dout = sc_ref.shape[1], w_ref.shape[2]
            skip = None if i == nE - 1 else encs[i]
            split = dec_split[i]                              # rows of W fed by decoder path
            acc = jnp.zeros((So, Dout), jnp.float32)
            for k in range(4):                                # 4 sub-lattice phases
                wk = w_ref[k]                                 # (Din, Dout)
                if skip is None:
                    u = jnp.dot(x, wk, preferred_element_type=jnp.float32)
                else:
                    # torch.cat([x, enc], dim=1) expressed as a split-K matmul
                    u = (jnp.dot(x, wk[:split, :], preferred_element_type=jnp.float32)
                         + jnp.dot(skip, wk[split:, :], preferred_element_type=jnp.float32))
                acc = acc + jnp.dot(sc_ref[k], u.astype(jnp.bfloat16),
                                    preferred_element_type=jnp.float32)
            y_f32 = acc + b_ref[...]
            x = y_f32.astype(jnp.bfloat16)

        out_ref[0] = y_f32.astype(out_ref.dtype)

    return kernel


# ----------------------------------------------------------------------------
# Parameters (deterministic synthetic init, kernel-friendly layout).
# ----------------------------------------------------------------------------
def init_fcn_params(key, layers=8, in_channels=6, out_channels=3):
    bottle_neck = layers // 2
    hidden = [32 * 2 ** i for i in range(bottle_neck)]
    params = {}
    cin = in_channels
    for i in range(bottle_neck):
        key, k1, k2 = jax.random.split(key, 3)
        # (9, Cin, Cout), tap t = dy*3+dx.
        # TODO(synk): real PyTorch Conv2d weights (Cout,Cin,3,3) map via
        #             w.transpose(2,3,1,0).reshape(9,Cin,Cout).
        params[f"e{i}_w"] = (0.05 * jax.random.normal(k1, (9, cin, hidden[i]), jnp.float32)
                             ).astype(jnp.bfloat16)
        params[f"e{i}_b"] = 0.01 * jax.random.normal(k2, (1, hidden[i]), jnp.float32)
        cin = hidden[i]
    dec_split = {}
    for i in range(bottle_neck - 1, -1, -1):
        if i == bottle_neck - 1:
            din, dout = hidden[i], hidden[i]
            dec_split[i] = din
        elif i == 0:
            din, dout = hidden[i] + hidden[i + 1], out_channels
            dec_split[i] = hidden[i + 1]
        else:
            din, dout = hidden[i] + hidden[i + 1], hidden[i]
            dec_split[i] = hidden[i + 1]
        key, k1, k2 = jax.random.split(key, 3)
        # (4, Din, Dout), phase k = ky*2+kx.
        # TODO(synk): real PyTorch ConvTranspose2d weights (Cin,Cout,2,2) map via
        #             w.transpose(2,3,0,1).reshape(4,Din,Dout).
        params[f"d{i}_w"] = (0.05 * jax.random.normal(k1, (4, din, dout), jnp.float32)
                             ).astype(jnp.bfloat16)
        params[f"d{i}_b"] = 0.01 * jax.random.normal(k2, (1, dout), jnp.float32)
    return params, bottle_neck, dec_split


# ----------------------------------------------------------------------------
# Forward pass: one pallas_call for the whole network.
# ----------------------------------------------------------------------------
def fcn_forward(params, plan, rays_o, rays_d, bottle_neck, dec_split):
    B, _, H, W = rays_o.shape
    assert H % (1 << bottle_neck) == 0 and W % (1 << bottle_neck) == 0
    cin0 = rays_o.shape[1] + rays_d.shape[1]
    S0 = H * W

    x = jnp.concatenate([rays_o, rays_d], axis=1)              # (B, 6, H, W)
    x = jnp.transpose(x, (0, 2, 3, 1)).reshape(B, S0, cin0)    # rows = (y*W + x)

    args = [x]
    in_specs = [pl.BlockSpec((1, S0, cin0), lambda b: (b, 0, 0))]

    def add_shared(a):
        args.append(a)
        idx = (0,) * a.ndim
        in_specs.append(pl.BlockSpec(a.shape, lambda b, idx=idx: idx))

    for i in range(bottle_neck):
        add_shared(params[f"e{i}_w"])
        add_shared(params[f"e{i}_b"])
        add_shared(plan[f"g{i}"])
    for i in range(bottle_neck - 1, -1, -1):
        add_shared(params[f"d{i}_w"])
        add_shared(params[f"d{i}_b"])
        add_shared(plan[f"sc{i}"])

    out_channels = params["d0_w"].shape[2]

    # advisory cost estimate (lets XLA schedule glue ops around the custom call)
    flops = 0
    for i in range(bottle_neck):
        g, wgt = plan[f"g{i}"], params[f"e{i}_w"]
        So, Si = g.shape[1], g.shape[2]
        Cin, Cout = wgt.shape[1], wgt.shape[2]
        flops += B * 9 * 2 * (So * Si * Cin + So * Cin * Cout)
    for i in range(bottle_neck):
        sc, wgt = plan[f"sc{i}"], params[f"d{i}_w"]
        So, Si = sc.shape[1], sc.shape[2]
        Din, Dout = wgt.shape[1], wgt.shape[2]
        flops += B * 4 * 2 * (Si * Din * Dout + So * Si * Dout)
    bytes_accessed = int(sum(int(np.prod(a.shape)) * a.dtype.itemsize for a in args)
                         + B * S0 * out_channels * 4)

    out = pl.pallas_call(
        _make_fcn_kernel(bottle_neck, dec_split),
        out_shape=jax.ShapeDtypeStruct((B, S0, out_channels), jnp.float32),
        grid=(B,),
        in_specs=in_specs,
        out_specs=pl.BlockSpec((1, S0, out_channels), lambda b: (b, 0, 0)),
        compiler_params=pltpu.CompilerParams(
            dimension_semantics=("parallel",),          # v7x: one batch sample per TC
            vmem_limit_bytes=32 * 1024 * 1024),
        cost_estimate=pl.CostEstimate(flops=int(flops), transcendentals=0,
                                      bytes_accessed=bytes_accessed),
    )(*args)

    out = out.reshape(B, H, W, out_channels)
    return jnp.transpose(out, (0, 3, 1, 2))                    # NHWC -> NCHW


# ----------------------------------------------------------------------------
# Pure-JAX reference (mirrors the PyTorch module) for a structural sanity check.
# ----------------------------------------------------------------------------
def _fcn_reference(params, rays_o, rays_d, bottle_neck):
    x = jnp.concatenate([rays_o, rays_d], axis=1)
    x = jnp.transpose(x, (0, 2, 3, 1)).astype(jnp.float32)     # NHWC
    encs = []
    for i in range(bottle_neck):
        B, H, W, _ = x.shape
        Ho, Wo = H // 2, W // 2
        w = params[f"e{i}_w"].astype(jnp.float32)
        b = params[f"e{i}_b"][0]
        xp = jnp.pad(x, ((0, 0), (1, 1), (1, 1), (0, 0)))
        acc = jnp.zeros((B, Ho, Wo, w.shape[2]), jnp.float32) + b
        for dy in range(3):
            for dx in range(3):
                tap = xp[:, dy:dy + 2 * Ho:2, dx:dx + 2 * Wo:2, :]
                acc = acc + jnp.einsum('bhwc,cd->bhwd', tap, w[dy * 3 + dx])
        x = acc
        encs.append(x)
    for i in range(bottle_neck - 1, -1, -1):
        if i != bottle_neck - 1:
            x = jnp.concatenate([x, encs[i]], axis=-1)
        w = params[f"d{i}_w"].astype(jnp.float32)
        b = params[f"d{i}_b"][0]
        B, H, W, _ = x.shape
        Dout = w.shape[2]
        y = jnp.einsum('bhwc,kcd->bhwkd', x, w).reshape(B, H, W, 2, 2, Dout)
        x = jnp.transpose(y, (0, 1, 3, 2, 4, 5)).reshape(B, 2 * H, 2 * W, Dout) + b
    return jnp.transpose(x, (0, 3, 1, 2))


if __name__ == "__main__":
    key = jax.random.PRNGKey(0)
    kp, ko, kd = jax.random.split(key, 3)

    params, bottle_neck, dec_split = init_fcn_params(kp, layers=8, in_channels=6,
                                                     out_channels=3)
    B, H, W = 2, 16, 16                                        # divisible by 2**bottle_neck
    plan = build_spatial_plan(H, W, bottle_neck)

    rays_o = jax.random.normal(ko, (B, 3, H, W), jnp.float32)
    rays_d = jax.random.normal(kd, (B, 3, H, W), jnp.float32)

    fwd = jax.jit(lambda p, s, a, b: fcn_forward(p, s, a, b, bottle_neck, dec_split))
    out = jax.block_until_ready(fwd(params, rays_o=rays_o, rays_d=rays_d, s=plan)
                                if False else fwd(params, plan, rays_o, rays_d))

    assert out.shape == (B, 3, H, W), out.shape
    assert out.dtype == jnp.float32
    assert bool(jnp.all(jnp.isfinite(out)))

    # structural correctness check against a pure-JAX reference (bf16 activations in the
    # kernel vs f32 reference -> generous tolerance)
    ref = jax.block_until_ready(_fcn_reference(params, rays_o, rays_d, bottle_neck))
    np.testing.assert_allclose(np.asarray(out), np.asarray(ref), rtol=5e-2, atol=1e-2)

    print("KERNEL_OK")
</pallas_src>

<mosaic_0001>
module attributes {stable_mosaic.version = 11 : i64} {
  func.func @kernel(%arg0: i32, %arg1: memref<1x256x6xf32, #tpu.memory_space<vmem>>, %arg2: memref<9x6x32xbf16, #tpu.memory_space<vmem>>, %arg3: memref<1x32xf32, #tpu.memory_space<vmem>>, %arg4: memref<9x64x256xbf16, #tpu.memory_space<vmem>>, %arg5: memref<9x32x64xbf16, #tpu.memory_space<vmem>>, %arg6: memref<1x64xf32, #tpu.memory_space<vmem>>, %arg7: memref<9x16x64xbf16, #tpu.memory_space<vmem>>, %arg8: memref<9x64x128xbf16, #tpu.memory_space<vmem>>, %arg9: memref<1x128xf32, #tpu.memory_space<vmem>>, %arg10: memref<9x4x16xbf16, #tpu.memory_space<vmem>>, %arg11: memref<9x128x256xbf16, #tpu.memory_space<vmem>>, %arg12: memref<1x256xf32, #tpu.memory_space<vmem>>, %arg13: memref<9x1x4xbf16, #tpu.memory_space<vmem>>, %arg14: memref<4x256x256xbf16, #tpu.memory_space<vmem>>, %arg15: memref<1x256xf32, #tpu.memory_space<vmem>>, %arg16: memref<4x4x1xbf16, #tpu.memory_space<vmem>>, %arg17: memref<4x384x128xbf16, #tpu.memory_space<vmem>>, %arg18: memref<1x128xf32, #tpu.memory_space<vmem>>, %arg19: memref<4x16x4xbf16, #tpu.memory_space<vmem>>, %arg20: memref<4x192x64xbf16, #tpu.memory_space<vmem>>, %arg21: memref<1x64xf32, #tpu.memory_space<vmem>>, %arg22: memref<4x64x16xbf16, #tpu.memory_space<vmem>>, %arg23: memref<4x96x3xbf16, #tpu.memory_space<vmem>>, %arg24: memref<1x3xf32, #tpu.memory_space<vmem>>, %arg25: memref<4x256x64xbf16, #tpu.memory_space<vmem>>, %arg26: memref<1x256x3xf32, #tpu.memory_space<vmem>>) attributes {dimension_semantics = [#tpu.dimension_semantics<parallel>], iteration_bounds = array<i64: 2>, scalar_prefetch = 0 : i64, scratch_operands = 0 : i64, tpu.core_type = #tpu.core_type<tc>, window_params = [{transform_indices = @transform_0, window_bounds = array<i64: 1, 256, 6>}, {pipeline_mode = #tpu.pipeline_mode<synchronous>, transform_indices = @transform_1, window_bounds = array<i64: 9, 6, 32>}, {pipeline_mode = #tpu.pipeline_mode<synchronous>, transform_indices = @transform_2, window_bounds = array<i64: 1, 32>}, {pipeline_mode = #tpu.pipeline_mode<synchronous>, transform_indices = @transform_3, window_bounds = array<i64: 9, 64, 256>}, {pipeline_mode = #tpu.pipeline_mode<synchronous>, transform_indices = @transform_4, window_bounds = array<i64: 9, 32, 64>}, {pipeline_mode = #tpu.pipeline_mode<synchronous>, transform_indices = @transform_5, window_bounds = array<i64: 1, 64>}, {pipeline_mode = #tpu.pipeline_mode<synchronous>, transform_indices = @transform_6, window_bounds = array<i64: 9, 16, 64>}, {pipeline_mode = #tpu.pipeline_mode<synchronous>, transform_indices = @transform_7, window_bounds = array<i64: 9, 64, 128>}, {pipeline_mode = #tpu.pipeline_mode<synchronous>, transform_indices = @transform_8, window_bounds = array<i64: 1, 128>}, {pipeline_mode = #tpu.pipeline_mode<synchronous>, transform_indices = @transform_9, window_bounds = array<i64: 9, 4, 16>}, {pipeline_mode = #tpu.pipeline_mode<synchronous>, transform_indices = @transform_10, window_bounds = array<i64: 9, 128, 256>}, {pipeline_mode = #tpu.pipeline_mode<synchronous>, transform_indices = @transform_11, window_bounds = array<i64: 1, 256>}, {pipeline_mode = #tpu.pipeline_mode<synchronous>, transform_indices = @transform_12, window_bounds = array<i64: 9, 1, 4>}, {pipeline_mode = #tpu.pipeline_mode<synchronous>, transform_indices = @transform_13, window_bounds = array<i64: 4, 256, 256>}, {pipeline_mode = #tpu.pipeline_mode<synchronous>, transform_indices = @transform_14, window_bounds = array<i64: 1, 256>}, {pipeline_mode = #tpu.pipeline_mode<synchronous>, transform_indices = @transform_15, window_bounds = array<i64: 4, 4, 1>}, {pipeline_mode = #tpu.pipeline_mode<synchronous>, transform_indices = @transform_16, window_bounds = array<i64: 4, 384, 128>}, {pipeline_mode = #tpu.pipeline_mode<synchronous>, transform_indices = @transform_17, window_bounds = array<i64: 1, 128>}, {pipeline_mode = #tpu.pipeline_mode<synchronous>, transform_indices = @transform_18, window_bounds = array<i64: 4, 16, 4>}, {pipeline_mode = #tpu.pipeline_mode<synchronous>, transform_indices = @transform_19, window_bounds = array<i64: 4, 192, 64>}, {pipeline_mode = #tpu.pipeline_mode<synchronous>, transform_indices = @transform_20, window_bounds = array<i64: 1, 64>}, {pipeline_mode = #tpu.pipeline_mode<synchronous>, transform_indices = @transform_21, window_bounds = array<i64: 4, 64, 16>}, {pipeline_mode = #tpu.pipeline_mode<synchronous>, transform_indices = @transform_22, window_bounds = array<i64: 4, 96, 3>}, {pipeline_mode = #tpu.pipeline_mode<synchronous>, transform_indices = @transform_23, window_bounds = array<i64: 1, 3>}, {pipeline_mode = #tpu.pipeline_mode<synchronous>, transform_indices = @transform_24, window_bounds = array<i64: 4, 256, 64>}, {transform_indices = @transform_25, window_bounds = array<i64: 1, 256, 3>}]} {
    %c0 = arith.constant 0 : index
    %c0_0 = arith.constant 0 : index
    %c0_1 = arith.constant 0 : index
    %0 = vector.load %arg1[%c0, %c0_0, %c0_1] : memref<1x256x6xf32, #tpu.memory_space<vmem>>, vector<1x256x6xf32>
    %1 = vector.shape_cast %0 : vector<1x256x6xf32> to vector<256x6xf32>
    %2 = arith.truncf %1 : vector<256x6xf32> to vector<256x6xbf16>
    %cst = arith.constant 0.000000e+00 : f32
    %3 = vector.broadcast %cst : f32 to vector<64x32xf32>
    %c0_2 = arith.constant 0 : index
    %c0_3 = arith.constant 0 : index
    %c0_4 = arith.constant 0 : index
    %4 = vector.load %arg4[%c0_2, %c0_3, %c0_4] : memref<9x64x256xbf16, #tpu.memory_space<vmem>>, vector<1x64x256xbf16>
    %5 = vector.shape_cast %4 : vector<1x64x256xbf16> to vector<64x256xbf16>
    %cst_5 = arith.constant dense<0.000000e+00> : vector<64x6xf32>
    %6 = tpu.matmul %5, %2, %cst_5 {dimension_numbers = #tpu.dot_dimension_numbers<[1], [0], [0], [1], [0, 0, 1, 1], [], []>} : vector<64x256xbf16>, vector<256x6xbf16>, vector<64x6xf32> -> vector<64x6xf32>
    %7 = arith.truncf %6 : vector<64x6xf32> to vector<64x6xbf16>
    %c0_6 = arith.constant 0 : index
    %c0_7 = arith.constant 0 : index
    %c0_8 = arith.constant 0 : index
    %8 = vector.load %arg2[%c0_6, %c0_7, %c0_8] : memref<9x6x32xbf16, #tpu.memory_space<vmem>>, vector<1x6x32xbf16>
    %9 = vector.shape_cast %8 : vector<1x6x32xbf16> to vector<6x32xbf16>
    %cst_9 = arith.constant dense<0.000000e+00> : vector<64x32xf32>
    %10 = tpu.matmul %7, %9, %cst_9 {dimension_numbers = #tpu.dot_dimension_numbers<[1], [0], [0], [1], [0, 0, 1, 1], [], []>} : vector<64x6xbf16>, vector<6x32xbf16>, vector<64x32xf32> -> vector<64x32xf32>
    %11 = arith.addf %3, %10 : vector<64x32xf32>
    %c1 = arith.constant 1 : index
    %c0_10 = arith.constant 0 : index
    %c0_11 = arith.constant 0 : index
    %12 = vector.load %arg4[%c1, %c0_10, %c0_11] : memref<9x64x256xbf16, #tpu.memory_space<vmem>>, vector<1x64x256xbf16>
    %13 = vector.shape_cast %12 : vector<1x64x256xbf16> to vector<64x256xbf16>
    %cst_12 = arith.constant dense<0.000000e+00> : vector<64x6xf32>
    %14 = tpu.matmul %13, %2, %cst_12 {dimension_numbers = #tpu.dot_dimension_numbers<[1], [0], [0], [1], [0, 0, 1, 1], [], []>} : vector<64x256xbf16>, vector<256x6xbf16>, vector<64x6xf32> -> vector<64x6xf32>
    %15 = arith.truncf %14 : vector<64x6xf32> to vector<64x6xbf16>
    %c1_13 = arith.constant 1 : index
    %c0_14 = arith.constant 0 : index
    %c0_15 = arith.constant 0 : index
    %16 = vector.load %arg2[%c1_13, %c0_14, %c0_15] : memref<9x6x32xbf16, #tpu.memory_space<vmem>>, vector<1x6x32xbf16>
    %17 = vector.shape_cast %16 : vector<1x6x32xbf16> to vector<6x32xbf16>
    %cst_16 = arith.constant dense<0.000000e+00> : vector<64x32xf32>
    %18 = tpu.matmul %15, %17, %cst_16 {dimension_numbers = #tpu.dot_dimension_numbers<[1], [0], [0], [1], [0, 0, 1, 1], [], []>} : vector<64x6xbf16>, vector<6x32xbf16>, vector<64x32xf32> -> vector<64x32xf32>
    %19 = arith.addf %11, %18 : vector<64x32xf32>
    %c2 = arith.constant 2 : index
    %c0_17 = arith.constant 0 : index
    %c0_18 = arith.constant 0 : index
    %20 = vector.load %arg4[%c2, %c0_17, %c0_18] : memref<9x64x256xbf16, #tpu.memory_space<vmem>>, vector<1x64x256xbf16>
    %21 = vector.shape_cast %20 : vector<1x64x256xbf16> to vector<64x256xbf16>
    %cst_19 = arith.constant dense<0.000000e+00> : vector<64x6xf32>
    %22 = tpu.matmul %21, %2, %cst_19 {dimension_numbers = #tpu.dot_dimension_numbers<[1], [0], [0], [1], [0, 0, 1, 1], [], []>} : vector<64x256xbf16>, vector<256x6xbf16>, vector<64x6xf32> -> vector<64x6xf32>
    %23 = arith.truncf %22 : vector<64x6xf32> to vector<64x6xbf16>
    %c2_20 = arith.constant 2 : index
    %c0_21 = arith.constant 0 : index
    %c0_22 = arith.constant 0 : index
    %24 = vector.load %arg2[%c2_20, %c0_21, %c0_22] : memref<9x6x32xbf16, #tpu.memory_space<vmem>>, vector<1x6x32xbf16>
    %25 = vector.shape_cast %24 : vector<1x6x32xbf16> to vector<6x32xbf16>
    %cst_23 = arith.constant dense<0.000000e+00> : vector<64x32xf32>
    %26 = tpu.matmul %23, %25, %cst_23 {dimension_numbers = #tpu.dot_dimension_numbers<[1], [0], [0], [1], [0, 0, 1, 1], [], []>} : vector<64x6xbf16>, vector<6x32xbf16>, vector<64x32xf32> -> vector<64x32xf32>
    %27 = arith.addf %19, %26 : vector<64x32xf32>
    %c3 = arith.constant 3 : index
    %c0_24 = arith.constant 0 : index
    %c0_25 = arith.constant 0 : index
    %28 = vector.load %arg4[%c3, %c0_24, %c0_25] : memref<9x64x256xbf16, #tpu.memory_space<vmem>>, vector<1x64x256xbf16>
    %29 = vector.shape_cast %28 : vector<1x64x256xbf16> to vector<64x256xbf16>
    %cst_26 = arith.constant dense<0.000000e+00> : vector<64x6xf32>
    %30 = tpu.matmul %29, %2, %cst_26 {dimension_numbers = #tpu.dot_dimension_numbers<[1], [0], [0], [1], [0, 0, 1, 1], [], []>} : vector<64x256xbf16>, vector<256x6xbf16>, vector<64x6xf32> -> vector<64x6xf32>
    %31 = arith.truncf %30 : vector<64x6xf32> to vector<64x6xbf16>
    %c3_27 = arith.constant 3 : index
    %c0_28 = arith.constant 0 : index
    %c0_29 = arith.constant 0 : index
    %32 = vector.load %arg2[%c3_27, %c0_28, %c0_29] : memref<9x6x32xbf16, #tpu.memory_space<vmem>>, vector<1x6x32xbf16>
    %33 = vector.shape_cast %32 : vector<1x6x32xbf16> to vector<6x32xbf16>
    %cst_30 = arith.constant dense<0.000000e+00> : vector<64x32xf32>
    %34 = tpu.matmul %31, %33, %cst_30 {dimension_numbers = #tpu.dot_dimension_numbers<[1], [0], [0], [1], [0, 0, 1, 1], [], []>} : vector<64x6xbf16>, vector<6x32xbf16>, vector<64x32xf32> -> vector<64x32xf32>
    %35 = arith.addf %27, %34 : vector<64x32xf32>
    %c4 = arith.constant 4 : index
    %c0_31 = arith.constant 0 : index
    %c0_32 = arith.constant 0 : index
    %36 = vector.load %arg4[%c4, %c0_31, %c0_32] : memref<9x64x256xbf16, #tpu.memory_space<vmem>>, vector<1x64x256xbf16>
    %37 = vector.shape_cast %36 : vector<1x64x256xbf16> to vector<64x256xbf16>
    %cst_33 = arith.constant dense<0.000000e+00> : vector<64x6xf32>
    %38 = tpu.matmul %37, %2, %cst_33 {dimension_numbers = #tpu.dot_dimension_numbers<[1], [0], [0], [1], [0, 0, 1, 1], [], []>} : vector<64x256xbf16>, vector<256x6xbf16>, vector<64x6xf32> -> vector<64x6xf32>
    %39 = arith.truncf %38 : vector<64x6xf32> to vector<64x6xbf16>
    %c4_34 = arith.constant 4 : index
    %c0_35 = arith.constant 0 : index
    %c0_36 = arith.constant 0 : index
    %40 = vector.load %arg2[%c4_34, %c0_35, %c0_36] : memref<9x6x32xbf16, #tpu.memory_space<vmem>>, vector<1x6x32xbf16>
    %41 = vector.shape_cast %40 : vector<1x6x32xbf16> to vector<6x32xbf16>
    %cst_37 = arith.constant dense<0.000000e+00> : vector<64x32xf32>
    %42 = tpu.matmul %39, %41, %cst_37 {dimension_numbers = #tpu.dot_dimension_numbers<[1], [0], [0], [1], [0, 0, 1, 1], [], []>} : vector<64x6xbf16>, vector<6x32xbf16>, vector<64x32xf32> -> vector<64x32xf32>
    %43 = arith.addf %35, %42 : vector<64x32xf32>
    %c5 = arith.constant 5 : index
    %c0_38 = arith.constant 0 : index
    %c0_39 = arith.constant 0 : index
    %44 = vector.load %arg4[%c5, %c0_38, %c0_39] : memref<9x64x256xbf16, #tpu.memory_space<vmem>>, vector<1x64x256xbf16>
    %45 = vector.shape_cast %44 : vector<1x64x256xbf16> to vector<64x256xbf16>
    %cst_40 = arith.constant dense<0.000000e+00> : vector<64x6xf32>
    %46 = tpu.matmul %45, %2, %cst_40 {dimension_numbers = #tpu.dot_dimension_numbers<[1], [0], [0], [1], [0, 0, 1, 1], [], []>} : vector<64x256xbf16>, vector<256x6xbf16>, vector<64x6xf32> -> vector<64x6xf32>
    %47 = arith.truncf %46 : vector<64x6xf32> to vector<64x6xbf16>
    %c5_41 = arith.constant 5 : index
    %c0_42 = arith.constant 0 : index
    %c0_43 = arith.constant 0 : index
    %48 = vector.load %arg2[%c5_41, %c0_42, %c0_43] : memref<9x6x32xbf16, #tpu.memory_space<vmem>>, vector<1x6x32xbf16>
    %49 = vector.shape_cast %48 : vector<1x6x32xbf16> to vector<6x32xbf16>
    %cst_44 = arith.constant dense<0.000000e+00> : vector<64x32xf32>
    %50 = tpu.matmul %47, %49, %cst_44 {dimension_numbers = #tpu.dot_dimension_numbers<[1], [0], [0], [1], [0, 0, 1, 1], [], []>} : vector<64x6xbf16>, vector<6x32xbf16>, vector<64x32xf32> -> vector<64x32xf32>
    %51 = arith.addf %43, %50 : vector<64x32xf32>
    %c6 = arith.constant 6 : index
    %c0_45 = arith.constant 0 : index
    %c0_46 = arith.constant 0 : index
    %52 = vector.load %arg4[%c6, %c0_45, %c0_46] : memref<9x64x256xbf16, #tpu.memory_space<vmem>>, vector<1x64x256xbf16>
    %53 = vector.shape_cast %52 : vector<1x64x256xbf16> to vector<64x256xbf16>
    %cst_47 = arith.constant dense<0.000000e+00> : vector<64x6xf32>
    %54 = tpu.matmul %53, %2, %cst_47 {dimension_numbers = #tpu.dot_dimension_numbers<[1], [0], [0], [1], [0, 0, 1, 1], [], []>} : vector<64x256xbf16>, vector<256x6xbf16>, vector<64x6xf32> -> vector<64x6xf32>
    %55 = arith.truncf %54 : vector<64x6xf32> to vector<64x6xbf16>
    %c6_48 = arith.constant 6 : index
    %c0_49 = arith.constant 0 : index
    %c0_50 = arith.constant 0 : index
    %56 = vector.load %arg2[%c6_48, %c0_49, %c0_50] : memref<9x6x32xbf16, #tpu.memory_space<vmem>>, vector<1x6x32xbf16>
    %57 = vector.shape_cast %56 : vector<1x6x32xbf16> to vector<6x32xbf16>
    %cst_51 = arith.constant dense<0.000000e+00> : vector<64x32xf32>
    %58 = tpu.matmul %55, %57, %cst_51 {dimension_numbers = #tpu.dot_dimension_numbers<[1], [0], [0], [1], [0, 0, 1, 1], [], []>} : vector<64x6xbf16>, vector<6x32xbf16>, vector<64x32xf32> -> vector<64x32xf32>
    %59 = arith.addf %51, %58 : vector<64x32xf32>
    %c7 = arith.constant 7 : index
    %c0_52 = arith.constant 0 : index
    %c0_53 = arith.constant 0 : index
    %60 = vector.load %arg4[%c7, %c0_52, %c0_53] : memref<9x64x256xbf16, #tpu.memory_space<vmem>>, vector<1x64x256xbf16>
    %61 = vector.shape_cast %60 : vector<1x64x256xbf16> to vector<64x256xbf16>
    %cst_54 = arith.constant dense<0.000000e+00> : vector<64x6xf32>
    %62 = tpu.matmul %61, %2, %cst_54 {dimension_numbers = #tpu.dot_dimension_numbers<[1], [0], [0], [1], [0, 0, 1, 1], [], []>} : vector<64x256xbf16>, vector<256x6xbf16>, vector<64x6xf32> -> vector<64x6xf32>
    %63 = arith.truncf %62 : vector<64x6xf32> to vector<64x6xbf16>
    %c7_55 = arith.constant 7 : index
    %c0_56 = arith.constant 0 : index
    %c0_57 = arith.constant 0 : index
    %64 = vector.load %arg2[%c7_55, %c0_56, %c0_57] : memref<9x6x32xbf16, #tpu.memory_space<vmem>>, vector<1x6x32xbf16>
    %65 = vector.shape_cast %64 : vector<1x6x32xbf16> to vector<6x32xbf16>
    %cst_58 = arith.constant dense<0.000000e+00> : vector<64x32xf32>
    %66 = tpu.matmul %63, %65, %cst_58 {dimension_numbers = #tpu.dot_dimension_numbers<[1], [0], [0], [1], [0, 0, 1, 1], [], []>} : vector<64x6xbf16>, vector<6x32xbf16>, vector<64x32xf32> -> vector<64x32xf32>
    %67 = arith.addf %59, %66 : vector<64x32xf32>
    %c8 = arith.constant 8 : index
    %c0_59 = arith.constant 0 : index
    %c0_60 = arith.constant 0 : index
    %68 = vector.load %arg4[%c8, %c0_59, %c0_60] : memref<9x64x256xbf16, #tpu.memory_space<vmem>>, vector<1x64x256xbf16>
    %69 = vector.shape_cast %68 : vector<1x64x256xbf16> to vector<64x256xbf16>
    %cst_61 = arith.constant dense<0.000000e+00> : vector<64x6xf32>
    %70 = tpu.matmul %69, %2, %cst_61 {dimension_numbers = #tpu.dot_dimension_numbers<[1], [0], [0], [1], [0, 0, 1, 1], [], []>} : vector<64x256xbf16>, vector<256x6xbf16>, vector<64x6xf32> -> vector<64x6xf32>
    %71 = arith.truncf %70 : vector<64x6xf32> to vector<64x6xbf16>
    %c8_62 = arith.constant 8 : index
    %c0_63 = arith.constant 0 : index
    %c0_64 = arith.constant 0 : index
    %72 = vector.load %arg2[%c8_62, %c0_63, %c0_64] : memref<9x6x32xbf16, #tpu.memory_space<vmem>>, vector<1x6x32xbf16>
    %73 = vector.shape_cast %72 : vector<1x6x32xbf16> to vector<6x32xbf16>
    %cst_65 = arith.constant dense<0.000000e+00> : vector<64x32xf32>
    %74 = tpu.matmul %71, %73, %cst_65 {dimension_numbers = #tpu.dot_dimension_numbers<[1], [0], [0], [1], [0, 0, 1, 1], [], []>} : vector<64x6xbf16>, vector<6x32xbf16>, vector<64x32xf32> -> vector<64x32xf32>
    %75 = arith.addf %67, %74 : vector<64x32xf32>
    %c0_66 = arith.constant 0 : index
    %c0_67 = arith.constant 0 : index
    %76 = vector.load %arg3[%c0_66, %c0_67] : memref<1x32xf32, #tpu.memory_space<vmem>>, vector<1x32xf32>
    %77 = vector.broadcast %76 : vector<1x32xf32> to vector<64x32xf32>
    %78 = arith.addf %75, %77 : vector<64x32xf32>
    %79 = arith.truncf %78 : vector<64x32xf32> to vector<64x32xbf16>
    %cst_68 = arith.constant 0.000000e+00 : f32
    %80 = vector.broadcast %cst_68 : f32 to vector<16x64xf32>
    %c0_69 = arith.constant 0 : index
    %c0_70 = arith.constant 0 : index
    %c0_71 = arith.constant 0 : index
    %81 = vector.load %arg7[%c0_69, %c0_70, %c0_71] : memref<9x16x64xbf16, #tpu.memory_space<vmem>>, vector<1x16x64xbf16>
    %82 = vector.shape_cast %81 : vector<1x16x64xbf16> to vector<16x64xbf16>
    %cst_72 = arith.constant dense<0.000000e+00> : vector<16x32xf32>
    %83 = tpu.matmul %82, %79, %cst_72 {dimension_numbers = #tpu.dot_dimension_numbers<[1], [0], [0], [1], [0, 0, 1, 1], [], []>} : vector<16x64xbf16>, vector<64x32xbf16>, vector<16x32xf32> -> vector<16x32xf32>
    %84 = arith.truncf %83 : vector<16x32xf32> to vector<16x32xbf16>
    %c0_73 = arith.constant 0 : index
    %c0_74 = arith.constant 0 : index
    %c0_75 = arith.constant 0 : index
    %85 = vector.load %arg5[%c0_73, %c0_74, %c0_75] : memref<9x32x64xbf16, #tpu.memory_space<vmem>>, vector<1x32x64xbf16>
    %86 = vector.shape_cast %85 : vector<1x32x64xbf16> to vector<32x64xbf16>
    %cst_76 = arith.constant dense<0.000000e+00> : vector<16x64xf32>
    %87 = tpu.matmul %84, %86, %cst_76 {dimension_numbers = #tpu.dot_dimension_numbers<[1], [0], [0], [1], [0, 0, 1, 1], [], []>} : vector<16x32xbf16>, vector<32x64xbf16>, vector<16x64xf32> -> vector<16x64xf32>
    %88 = arith.addf %80, %87 : vector<16x64xf32>
    %c1_77 = arith.constant 1 : index
    %c0_78 = arith.constant 0 : index
    %c0_79 = arith.constant 0 : index
    %89 = vector.load %arg7[%c1_77, %c0_78, %c0_79] : memref<9x16x64xbf16, #tpu.memory_space<vmem>>, vector<1x16x64xbf16>
    %90 = vector.shape_cast %89 : vector<1x16x64xbf16> to vector<16x64xbf16>
    %cst_80 = arith.constant dense<0.000000e+00> : vector<16x32xf32>
    %91 = tpu.matmul %90, %79, %cst_80 {dimension_numbers = #tpu.dot_dimension_numbers<[1], [0], [0], [1], [0, 0, 1, 1], [], []>} : vector<16x64xbf16>, vector<64x32xbf16>, vector<16x32xf32> -> vector<16x32xf32>
    %92 = arith.truncf %91 : vector<16x32xf32> to vector<16x32xbf16>
    %c1_81 = arith.constant 1 : index
    %c0_82 = arith.constant 0 : index
    %c0_83 = arith.constant 0 : index
    %93 = vector.load %arg5[%c1_81, %c0_82, %c0_83] : memref<9x32x64xbf16, #tpu.memory_space<vmem>>, vector<1x32x64xbf16>
    %94 = vector.shape_cast %93 : vector<1x32x64xbf16> to vector<32x64xbf16>
    %cst_84 = arith.constant dense<0.000000e+00> : vector<16x64xf32>
    %95 = tpu.matmul %92, %94, %cst_84 {dimension_numbers = #tpu.dot_dimension_numbers<[1], [0], [0], [1], [0, 0, 1, 1], [], []>} : vector<16x32xbf16>, vector<32x64xbf16>, vector<16x64xf32> -> vector<16x64xf32>
    %96 = arith.addf %88, %95 : vector<16x64xf32>
    %c2_85 = arith.constant 2 : index
    %c0_86 = arith.constant 0 : index
    %c0_87 = arith.constant 0 : index
    %97 = vector.load %arg7[%c2_85, %c0_86, %c0_87] : memref<9x16x64xbf16, #tpu.memory_space<vmem>>, vector<1x16x64xbf16>
    %98 = vector.shape_cast %97 : vector<1x16x64xbf16> to vector<16x64xbf16>
    %cst_88 = arith.constant dense<0.000000e+00> : vector<16x32xf32>
    %99 = tpu.matmul %98, %79, %cst_88 {dimension_numbers = #tpu.dot_dimension_numbers<[1], [0], [0], [1], [0, 0, 1, 1], [], []>} : vector<16x64xbf16>, vector<64x32xbf16>, vector<16x32xf32> -> vector<16x32xf32>
    %100 = arith.truncf %99 : vector<16x32xf32> to vector<16x32xbf16>
    %c2_89 = arith.constant 2 : index
    %c0_90 = arith.constant 0 : index
    %c0_91 = arith.constant 0 : index
    %101 = vector.load %arg5[%c2_89, %c0_90, %c0_91] : memref<9x32x64xbf16, #tpu.memory_space<vmem>>, vector<1x32x64xbf16>
    %102 = vector.shape_cast %101 : vector<1x32x64xbf16> to vector<32x64xbf16>
    %cst_92 = arith.constant dense<0.000000e+00> : vector<16x64xf32>
    %103 = tpu.matmul %100, %102, %cst_92 {dimension_numbers = #tpu.dot_dimension_numbers<[1], [0], [0], [1], [0, 0, 1, 1], [], []>} : vector<16x32xbf16>, vector<32x64xbf16>, vector<16x64xf32> -> vector<16x64xf32>
    %104 = arith.addf %96, %103 : vector<16x64xf32>
    %c3_93 = arith.constant 3 : index
    %c0_94 = arith.constant 0 : index
    %c0_95 = arith.constant 0 : index
    %105 = vector.load %arg7[%c3_93, %c0_94, %c0_95] : memref<9x16x64xbf16, #tpu.memory_space<vmem>>, vector<1x16x64xbf16>
    %106 = vector.shape_cast %105 : vector<1x16x64xbf16> to vector<16x64xbf16>
    %cst_96 = arith.constant dense<0.000000e+00> : vector<16x32xf32>
    %107 = tpu.matmul %106, %79, %cst_96 {dimension_numbers = #tpu.dot_dimension_numbers<[1], [0], [0], [1], [0, 0, 1, 1], [], []>} : vector<16x64xbf16>, vector<64x32xbf16>, vector<16x32xf32> -> vector<16x32xf32>
    %108 = arith.truncf %107 : vector<16x32xf32> to vector<16x32xbf16>
    %c3_97 = arith.constant 3 : index
    %c0_98 = arith.constant 0 : index
    %c0_99 = arith.constant 0 : index
    %109 = vector.load %arg5[%c3_97, %c0_98, %c0_99] : memref<9x32x64xbf16, #tpu.memory_space<vmem>>, vector<1x32x64xbf16>
    %110 = vector.shape_cast %109 : vector<1x32x64xbf16> to vector<32x64xbf16>
    %cst_100 = arith.constant dense<0.000000e+00> : vector<16x64xf32>
    %111 = tpu.matmul %108, %110, %cst_100 {dimension_numbers = #tpu.dot_dimension_numbers<[1], [0], [0], [1], [0, 0, 1, 1], [], []>} : vector<16x32xbf16>, vector<32x64xbf16>, vector<16x64xf32> -> vector<16x64xf32>
    %112 = arith.addf %104, %111 : vector<16x64xf32>
    %c4_101 = arith.constant 4 : index
    %c0_102 = arith.constant 0 : index
    %c0_103 = arith.constant 0 : index
    %113 = vector.load %arg7[%c4_101, %c0_102, %c0_103] : memref<9x16x64xbf16, #tpu.memory_space<vmem>>, vector<1x16x64xbf16>
    %114 = vector.shape_cast %113 : vector<1x16x64xbf16> to vector<16x64xbf16>
    %cst_104 = arith.constant dense<0.000000e+00> : vector<16x32xf32>
    %115 = tpu.matmul %114, %79, %cst_104 {dimension_numbers = #tpu.dot_dimension_numbers<[1], [0], [0], [1], [0, 0, 1, 1], [], []>} : vector<16x64xbf16>, vector<64x32xbf16>, vector<16x32xf32> -> vector<16x32xf32>
    %116 = arith.truncf %115 : vector<16x32xf32> to vector<16x32xbf16>
    %c4_105 = arith.constant 4 : index
    %c0_106 = arith.constant 0 : index
    %c0_107 = arith.constant 0 : index
    %117 = vector.load %arg5[%c4_105, %c0_106, %c0_107] : memref<9x32x64xbf16, #tpu.memory_space<vmem>>, vector<1x32x64xbf16>
    %118 = vector.shape_cast %117 : vector<1x32x64xbf16> to vector<32x64xbf16>
    %cst_108 = arith.constant dense<0.000000e+00> : vector<16x64xf32>
    %119 = tpu.matmul %116, %118, %cst_108 {dimension_numbers = #tpu.dot_dimension_numbers<[1], [0], [0], [1], [0, 0, 1, 1], [], []>} : vector<16x32xbf16>, vector<32x64xbf16>, vector<16x64xf32> -> vector<16x64xf32>
    %120 = arith.addf %112, %119 : vector<16x64xf32>
    %c5_109 = arith.constant 5 : index
    %c0_110 = arith.constant 0 : index
    %c0_111 = arith.constant 0 : index
    %121 = vector.load %arg7[%c5_109, %c0_110, %c0_111] : memref<9x16x64xbf16, #tpu.memory_space<vmem>>, vector<1x16x64xbf16>
    %122 = vector.shape_cast %121 : vector<1x16x64xbf16> to vector<16x64xbf16>
    %cst_112 = arith.constant dense<0.000000e+00> : vector<16x32xf32>
    %123 = tpu.matmul %122, %79, %cst_112 {dimension_numbers = #tpu.dot_dimension_numbers<[1], [0], [0], [1], [0, 0, 1, 1], [], []>} : vector<16x64xbf16>, vector<64x32xbf16>, vector<16x32xf32> -> vector<16x32xf32>
    %124 = arith.truncf %123 : vector<16x32xf32> to vector<16x32xbf16>
    %c5_113 = arith.constant 5 : index
    %c0_114 = arith.constant 0 : index
    %c0_115 = arith.constant 0 : index
    %125 = vector.load %arg5[%c5_113, %c0_114, %c0_115] : memref<9x32x64xbf16, #tpu.memory_space<vmem>>, vector<1x32x64xbf16>
    %126 = vector.shape_cast %125 : vector<1x32x64xbf16> to vector<32x64xbf16>
    %cst_116 = arith.constant dense<0.000000e+00> : vector<16x64xf32>
    %127 = tpu.matmul %124, %126, %cst_116 {dimension_numbers = #tpu.dot_dimension_numbers<[1], [0], [0], [1], [0, 0, 1, 1], [], []>} : vector<16x32xbf16>, vector<32x64xbf16>, vector<16x64xf32> -> vector<16x64xf32>
    %128 = arith.addf %120, %127 : vector<16x64xf32>
    %c6_117 = arith.constant 6 : index
    %c0_118 = arith.constant 0 : index
    %c0_119 = arith.constant 0 : index
    %129 = vector.load %arg7[%c6_117, %c0_118, %c0_119] : memref<9x16x64xbf16, #tpu.memory_space<vmem>>, vector<1x16x64xbf16>
    %130 = vector.shape_cast %129 : vector<1x16x64xbf16> to vector<16x64xbf16>
    %cst_120 = arith.constant dense<0.000000e+00> : vector<16x32xf32>
    %131 = tpu.matmul %130, %79, %cst_120 {dimension_numbers = #tpu.dot_dimension_numbers<[1], [0], [0], [1], [0, 0, 1, 1], [], []>} : vector<16x64xbf16>, vector<64x32xbf16>, vector<16x32xf32> -> vector<16x32xf32>
    %132 = arith.truncf %131 : vector<16x32xf32> to vector<16x32xbf16>
    %c6_121 = arith.constant 6 : index
    %c0_122 = arith.constant 0 : index
    %c0_123 = arith.constant 0 : index
    %133 = vector.load %arg5[%c6_121, %c0_122, %c0_123] : memref<9x32x64xbf16, #tpu.memory_space<vmem>>, vector<1x32x64xbf16>
    %134 = vector.shape_cast %133 : vector<1x32x64xbf16> to vector<32x64xbf16>
    %cst_124 = arith.constant dense<0.000000e+00> : vector<16x64xf32>
    %135 = tpu.matmul %132, %134, %cst_124 {dimension_numbers = #tpu.dot_dimension_numbers<[1], [0], [0], [1], [0, 0, 1, 1], [], []>} : vector<16x32xbf16>, vector<32x64xbf16>, vector<16x64xf32> -> vector<16x64xf32>
    %136 = arith.addf %128, %135 : vector<16x64xf32>
    %c7_125 = arith.constant 7 : index
    %c0_126 = arith.constant 0 : index
    %c0_127 = arith.constant 0 : index
    %137 = vector.load %arg7[%c7_125, %c0_126, %c0_127] : memref<9x16x64xbf16, #tpu.memory_space<vmem>>, vector<1x16x64xbf16>
    %138 = vector.shape_cast %137 : vector<1x16x64xbf16> to vector<16x64xbf16>
    %cst_128 = arith.constant dense<0.000000e+00> : vector<16x32xf32>
    %139 = tpu.matmul %138, %79, %cst_128 {dimension_numbers = #tpu.dot_dimension_numbers<[1], [0], [0], [1], [0, 0, 1, 1], [], []>} : vector<16x64xbf16>, vector<64x32xbf16>, vector<16x32xf32> -> vector<16x32xf32>
    %140 = arith.truncf %139 : vector<16x32xf32> to vector<16x32xbf16>
    %c7_129 = arith.constant 7 : index
    %c0_130 = arith.constant 0 : index
    %c0_131 = arith.constant 0 : index
    %141 = vector.load %arg5[%c7_129, %c0_130, %c0_131] : memref<9x32x64xbf16, #tpu.memory_space<vmem>>, vector<1x32x64xbf16>
    %142 = vector.shape_cast %141 : vector<1x32x64xbf16> to vector<32x64xbf16>
    %cst_132 = arith.constant dense<0.000000e+00> : vector<16x64xf32>
    %143 = tpu.matmul %140, %142, %cst_132 {dimension_numbers = #tpu.dot_dimension_numbers<[1], [0], [0], [1], [0, 0, 1, 1], [], []>} : vector<16x32xbf16>, vector<32x64xbf16>, vector<16x64xf32> -> vector<16x64xf32>
    %144 = arith.addf %136, %143 : vector<16x64xf32>
    %c8_133 = arith.constant 8 : index
    %c0_134 = arith.constant 0 : index
    %c0_135 = arith.constant 0 : index
    %145 = vector.load %arg7[%c8_133, %c0_134, %c0_135] : memref<9x16x64xbf16, #tpu.memory_space<vmem>>, vector<1x16x64xbf16>
    %146 = vector.shape_cast %145 : vector<1x16x64xbf16> to vector<16x64xbf16>
    %cst_136 = arith.constant dense<0.000000e+00> : vector<16x32xf32>
    %147 = tpu.matmul %146, %79, %cst_136 {dimension_numbers = #tpu.dot_dimension_numbers<[1], [0], [0], [1], [0, 0, 1, 1], [], []>} : vector<16x64xbf16>, vector<64x32xbf16>, vector<16x32xf32> -> vector<16x32xf32>
    %148 = arith.truncf %147 : vector<16x32xf32> to vector<16x32xbf16>
    %c8_137 = arith.constant 8 : index
    %c0_138 = arith.constant 0 : index
    %c0_139 = arith.constant 0 : index
    %149 = vector.load %arg5[%c8_137, %c0_138, %c0_139] : memref<9x32x64xbf16, #tpu.memory_space<vmem>>, vector<1x32x64xbf16>
    %150 = vector.shape_cast %149 : vector<1x32x64xbf16> to vector<32x64xbf16>
    %cst_140 = arith.constant dense<0.000000e+00> : vector<16x64xf32>
    %151 = tpu.matmul %148, %150, %cst_140 {dimension_numbers = #tpu.dot_dimension_numbers<[1], [0], [0], [1], [0, 0, 1, 1], [], []>} : vector<16x32xbf16>, vector<32x64xbf16>, vector<16x64xf32> -> vector<16x64xf32>
    %152 = arith.addf %144, %151 : vector<16x64xf32>
    %c0_141 = arith.constant 0 : index
    %c0_142 = arith.constant 0 : index
    %153 = vector.load %arg6[%c0_141, %c0_142] : memref<1x64xf32, #tpu.memory_space<vmem>>, vector<1x64xf32>
    %154 = vector.broadcast %153 : vector<1x64xf32> to vector<16x64xf32>
    %155 = arith.addf %152, %154 : vector<16x64xf32>
    %156 = arith.truncf %155 : vector<16x64xf32> to vector<16x64xbf16>
    %cst_143 = arith.constant 0.000000e+00 : f32
    %157 = vector.broadcast %cst_143 : f32 to vector<4x128xf32>
    %c0_144 = arith.constant 0 : index
    %c0_145 = arith.constant 0 : index
    %c0_146 = arith.constant 0 : index
    %158 = vector.load %arg10[%c0_144, %c0_145, %c0_146] : memref<9x4x16xbf16, #tpu.memory_space<vmem>>, vector<1x4x16xbf16>
    %159 = vector.shape_cast %158 : vector<1x4x16xbf16> to vector<4x16xbf16>
    %cst_147 = arith.constant dense<0.000000e+00> : vector<4x64xf32>
    %160 = tpu.matmul %159, %156, %cst_147 {dimension_numbers = #tpu.dot_dimension_numbers<[1], [0], [0], [1], [0, 0, 1, 1], [], []>} : vector<4x16xbf16>, vector<16x64xbf16>, vector<4x64xf32> -> vector<4x64xf32>
    %161 = arith.truncf %160 : vector<4x64xf32> to vector<4x64xbf16>
    %c0_148 = arith.constant 0 : index
    %c0_149 = arith.constant 0 : index
    %c0_150 = arith.constant 0 : index
    %162 = vector.load %arg8[%c0_148, %c0_149, %c0_150] : memref<9x64x128xbf16, #tpu.memory_space<vmem>>, vector<1x64x128xbf16>
    %163 = vector.shape_cast %162 : vector<1x64x128xbf16> to vector<64x128xbf16>
    %cst_151 = arith.constant dense<0.000000e+00> : vector<4x128xf32>
    %164 = tpu.matmul %161, %163, %cst_151 {dimension_numbers = #tpu.dot_dimension_numbers<[1], [0], [0], [1], [0, 0, 1, 1], [], []>} : vector<4x64xbf16>, vector<64x128xbf16>, vector<4x128xf32> -> vector<4x128xf32>
    %165 = arith.addf %157, %164 : vector<4x128xf32>
    %c1_152 = arith.constant 1 : index
    %c0_153 = arith.constant 0 : index
    %c0_154 = arith.constant 0 : index
    %166 = vector.load %arg10[%c1_152, %c0_153, %c0_154] : memref<9x4x16xbf16, #tpu.memory_space<vmem>>, vector<1x4x16xbf16>
    %167 = vector.shape_cast %166 : vector<1x4x16xbf16> to vector<4x16xbf16>
    %cst_155 = arith.constant dense<0.000000e+00> : vector<4x64xf32>
    %168 = tpu.matmul %167, %156, %cst_155 {dimension_numbers = #tpu.dot_dimension_numbers<[1], [0], [0], [1], [0, 0, 1, 1], [], []>} : vector<4x16xbf16>, vector<16x64xbf16>, vector<4x64xf32> -> vector<4x64xf32>
    %169 = arith.truncf %168 : vector<4x64xf32> to vector<4x64xbf16>
    %c1_156 = arith.constant 1 : index
    %c0_157 = arith.constant 0 : index
    %c0_158 = arith.constant 0 : index
    %170 = vector.load %arg8[%c1_156, %c0_157, %c0_158] : memref<9x64x128xbf16, #tpu.memory_space<vmem>>, vector<1x64x128xbf16>
    %171 = vector.shape_cast %170 : vector<1x64x128xbf16> to vector<64x128xbf16>
    %cst_159 = arith.constant dense<0.000000e+00> : vector<4x128xf32>
    %172 = tpu.matmul %169, %171, %cst_159 {dimension_numbers = #tpu.dot_dimension_numbers<[1], [0], [0], [1], [0, 0, 1, 1], [], []>} : vector<4x64xbf16>, vector<64x128xbf16>, vector<4x128xf32> -> vector<4x128xf32>
    %173 = arith.addf %165, %172 : vector<4x128xf32>
    %c2_160 = arith.constant 2 : index
    %c0_161 = arith.constant 0 : index
    %c0_162 = arith.constant 0 : index
    %174 = vector.load %arg10[%c2_160, %c0_161, %c0_162] : memref<9x4x16xbf16, #tpu.memory_space<vmem>>, vector<1x4x16xbf16>
    %175 = vector.shape_cast %174 : vector<1x4x16xbf16> to vector<4x16xbf16>
    %cst_163 = arith.constant dense<0.000000e+00> : vector<4x64xf32>
    %176 = tpu.matmul %175, %156, %cst_163 {dimension_numbers = #tpu.dot_dimension_numbers<[1], [0], [0], [1], [0, 0, 1, 1], [], []>} : vector<4x16xbf16>, vector<16x64xbf16>, vector<4x64xf32> -> vector<4x64xf32>
    %177 = arith.truncf %176 : vector<4x64xf32> to vector<4x64xbf16>
    %c2_164 = arith.constant 2 : index
    %c0_165 = arith.constant 0 : index
    %c0_166 = arith.constant 0 : index
    %178 = vector.load %arg8[%c2_164, %c0_165, %c0_166] : memref<9x64x128xbf16, #tpu.memory_space<vmem>>, vector<1x64x128xbf16>
    %179 = vector.shape_cast %178 : vector<1x64x128xbf16> to vector<64x128xbf16>
    %cst_167 = arith.constant dense<0.000000e+00> : vector<4x128xf32>
    %180 = tpu.matmul %177, %179, %cst_167 {dimension_numbers = #tpu.dot_dimension_numbers<[1], [0], [0], [1], [0, 0, 1, 1], [], []>} : vector<4x64xbf16>, vector<64x128xbf16>, vector<4x128xf32> -> vector<4x128xf32>
    %181 = arith.addf %173, %180 : vector<4x128xf32>
    %c3_168 = arith.constant 3 : index
    %c0_169 = arith.constant 0 : index
    %c0_170 = arith.constant 0 : index
    %182 = vector.load %arg10[%c3_168, %c0_169, %c0_170] : memref<9x4x16xbf16, #tpu.memory_space<vmem>>, vector<1x4x16xbf16>
    %183 = vector.shape_cast %182 : vector<1x4x16xbf16> to vector<4x16xbf16>
    %cst_171 = arith.constant dense<0.000000e+00> : vector<4x64xf32>
    %184 = tpu.matmul %183, %156, %cst_171 {dimension_numbers = #tpu.dot_dimension_numbers<[1], [0], [0], [1], [0, 0, 1, 1], [], []>} : vector<4x16xbf16>, vector<16x64xbf16>, vector<4x64xf32> -> vector<4x64xf32>
    %185 = arith.truncf %184 : vector<4x64xf32> to vector<4x64xbf16>
    %c3_172 = arith.constant 3 : index
    %c0_173 = arith.constant 0 : index
    %c0_174 = arith.constant 0 : index
    %186 = vector.load %arg8[%c3_172, %c0_173, %c0_174] : memref<9x64x128xbf16, #tpu.memory_space<vmem>>, vector<1x64x128xbf16>
    %187 = vector.shape_cast %186 : vector<1x64x128xbf16> to vector<64x128xbf16>
    %cst_175 = arith.constant dense<0.000000e+00> : vector<4x128xf32>
    %188 = tpu.matmul %185, %187, %cst_175 {dimension_numbers = #tpu.dot_dimension_numbers<[1], [0], [0], [1], [0, 0, 1, 1], [], []>} : vector<4x64xbf16>, vector<64x128xbf16>, vector<4x128xf32> -> vector<4x128xf32>
    %189 = arith.addf %181, %188 : vector<4x128xf32>
    %c4_176 = arith.constant 4 : index
    %c0_177 = arith.constant 0 : index
    %c0_178 = arith.constant 0 : index
    %190 = vector.load %arg10[%c4_176, %c0_177, %c0_178] : memref<9x4x16xbf16, #tpu.memory_space<vmem>>, vector<1x4x16xbf16>
    %191 = vector.shape_cast %190 : vector<1x4x16xbf16> to vector<4x16xbf16>
    %cst_179 = arith.constant dense<0.000000e+00> : vector<4x64xf32>
    %192 = tpu.matmul %191, %156, %cst_179 {dimension_numbers = #tpu.dot_dimension_numbers<[1], [0], [0], [1], [0, 0, 1, 1], [], []>} : vector<4x16xbf16>, vector<16x64xbf16>, vector<4x64xf32> -> vector<4x64xf32>
    %193 = arith.truncf %192 : vector<4x64xf32> to vector<4x64xbf16>
    %c4_180 = arith.constant 4 : index
    %c0_181 = arith.constant 0 : index
    %c0_182 = arith.constant 0 : index
    %194 = vector.load %arg8[%c4_180, %c0_181, %c0_182] : memref<9x64x128xbf16, #tpu.memory_space<vmem>>, vector<1x64x128xbf16>
    %195 = vector.shape_cast %194 : vector<1x64x128xbf16> to vector<64x128xbf16>
    %cst_183 = arith.constant dense<0.000000e+00> : vector<4x128xf32>
    %196 = tpu.matmul %193, %195, %cst_183 {dimension_numbers = #tpu.dot_dimension_numbers<[1], [0], [0], [1], [0, 0, 1, 1], [], []>} : vector<4x64xbf16>, vector<64x128xbf16>, vector<4x128xf32> -> vector<4x128xf32>
    %197 = arith.addf %189, %196 : vector<4x128xf32>
    %c5_184 = arith.constant 5 : index
    %c0_185 = arith.constant 0 : index
    %c0_186 = arith.constant 0 : index
    %198 = vector.load %arg10[%c5_184, %c0_185, %c0_186] : memref<9x4x16xbf16, #tpu.memory_space<vmem>>, vector<1x4x16xbf16>
    %199 = vector.shape_cast %198 : vector<1x4x16xbf16> to vector<4x16xbf16>
    %cst_187 = arith.constant dense<0.000000e+00> : vector<4x64xf32>
    %200 = tpu.matmul %199, %156, %cst_187 {dimension_numbers = #tpu.dot_dimension_numbers<[1], [0], [0], [1], [0, 0, 1, 1], [], []>} : vector<4x16xbf16>, vector<16x64xbf16>, vector<4x64xf32> -> vector<4x64xf32>
    %201 = arith.truncf %200 : vector<4x64xf32> to vector<4x64xbf16>
    %c5_188 = arith.constant 5 : index
    %c0_189 = arith.constant 0 : index
    %c0_190 = arith.constant 0 : index
    %202 = vector.load %arg8[%c5_188, %c0_189, %c0_190] : memref<9x64x128xbf16, #tpu.memory_space<vmem>>, vector<1x64x128xbf16>
    %203 = vector.shape_cast %202 : vector<1x64x128xbf16> to vector<64x128xbf16>
    %cst_191 = arith.constant dense<0.000000e+00> : vector<4x128xf32>
    %204 = tpu.matmul %201, %203, %cst_191 {dimension_numbers = #tpu.dot_dimension_numbers<[1], [0], [0], [1], [0, 0, 1, 1], [], []>} : vector<4x64xbf16>, vector<64x128xbf16>, vector<4x128xf32> -> vector<4x128xf32>
    %205 = arith.addf %197, %204 : vector<4x128xf32>
    %c6_192 = arith.constant 6 : index
    %c0_193 = arith.constant 0 : index
    %c0_194 = arith.constant 0 : index
    %206 = vector.load %arg10[%c6_192, %c0_193, %c0_194] : memref<9x4x16xbf16, #tpu.memory_space<vmem>>, vector<1x4x16xbf16>
    %207 = vector.shape_cast %206 : vector<1x4x16xbf16> to vector<4x16xbf16>
    %cst_195 = arith.constant dense<0.000000e+00> : vector<4x64xf32>
    %208 = tpu.matmul %207, %156, %cst_195 {dimension_numbers = #tpu.dot_dimension_numbers<[1], [0], [0], [1], [0, 0, 1, 1], [], []>} : vector<4x16xbf16>, vector<16x64xbf16>, vector<4x64xf32> -> vector<4x64xf32>
    %209 = arith.truncf %208 : vector<4x64xf32> to vector<4x64xbf16>
    %c6_196 = arith.constant 6 : index
    %c0_197 = arith.constant 0 : index
    %c0_198 = arith.constant 0 : index
    %210 = vector.load %arg8[%c6_196, %c0_197, %c0_198] : memref<9x64x128xbf16, #tpu.memory_space<vmem>>, vector<1x64x128xbf16>
    %211 = vector.shape_cast %210 : vector<1x64x128xbf16> to vector<64x128xbf16>
    %cst_199 = arith.constant dense<0.000000e+00> : vector<4x128xf32>
    %212 = tpu.matmul %209, %211, %cst_199 {dimension_numbers = #tpu.dot_dimension_numbers<[1], [0], [0], [1], [0, 0, 1, 1], [], []>} : vector<4x64xbf16>, vector<64x128xbf16>, vector<4x128xf32> -> vector<4x128xf32>
    %213 = arith.addf %205, %212 : vector<4x128xf32>
    %c7_200 = arith.constant 7 : index
    %c0_201 = arith.constant 0 : index
    %c0_202 = arith.constant 0 : index
    %214 = vector.load %arg10[%c7_200, %c0_201, %c0_202] : memref<9x4x16xbf16, #tpu.memory_space<vmem>>, vector<1x4x16xbf16>
    %215 = vector.shape_cast %214 : vector<1x4x16xbf16> to vector<4x16xbf16>
    %cst_203 = arith.constant dense<0.000000e+00> : vector<4x64xf32>
    %216 = tpu.matmul %215, %156, %cst_203 {dimension_numbers = #tpu.dot_dimension_numbers<[1], [0], [0], [1], [0, 0, 1, 1], [], []>} : vector<4x16xbf16>, vector<16x64xbf16>, vector<4x64xf32> -> vector<4x64xf32>
    %217 = arith.truncf %216 : vector<4x64xf32> to vector<4x64xbf16>
    %c7_204 = arith.constant 7 : index
    %c0_205 = arith.constant 0 : index
    %c0_206 = arith.constant 0 : index
    %218 = vector.load %arg8[%c7_204, %c0_205, %c0_206] : memref<9x64x128xbf16, #tpu.memory_space<vmem>>, vector<1x64x128xbf16>
    %219 = vector.shape_cast %218 : vector<1x64x128xbf16> to vector<64x128xbf16>
    %cst_207 = arith.constant dense<0.000000e+00> : vector<4x128xf32>
    %220 = tpu.matmul %217, %219, %cst_207 {dimension_numbers = #tpu.dot_dimension_numbers<[1], [0], [0], [1], [0, 0, 1, 1], [], []>} : vector<4x64xbf16>, vector<64x128xbf16>, vector<4x128xf32> -> vector<4x128xf32>
    %221 = arith.addf %213, %220 : vector<4x128xf32>
    %c8_208 = arith.constant 8 : index
    %c0_209 = arith.constant 0 : index
    %c0_210 = arith.constant 0 : index
    %222 = vector.load %arg10[%c8_208, %c0_209, %c0_210] : memref<9x4x16xbf16, #tpu.memory_space<vmem>>, vector<1x4x16xbf16>
    %223 = vector.shape_cast %222 : vector<1x4x16xbf16> to vector<4x16xbf16>
    %cst_211 = arith.constant dense<0.000000e+00> : vector<4x64xf32>
    %224 = tpu.matmul %223, %156, %cst_211 {dimension_numbers = #tpu.dot_dimension_numbers<[1], [0], [0], [1], [0, 0, 1, 1], [], []>} : vector<4x16xbf16>, vector<16x64xbf16>, vector<4x64xf32> -> vector<4x64xf32>
    %225 = arith.truncf %224 : vector<4x64xf32> to vector<4x64xbf16>
    %c8_212 = arith.constant 8 : index
    %c0_213 = arith.constant 0 : index
    %c0_214 = arith.constant 0 : index
    %226 = vector.load %arg8[%c8_212, %c0_213, %c0_214] : memref<9x64x128xbf16, #tpu.memory_space<vmem>>, vector<1x64x128xbf16>
    %227 = vector.shape_cast %226 : vector<1x64x128xbf16> to vector<64x128xbf16>
    %cst_215 = arith.constant dense<0.000000e+00> : vector<4x128xf32>
    %228 = tpu.matmul %225, %227, %cst_215 {dimension_numbers = #tpu.dot_dimension_numbers<[1], [0], [0], [1], [0, 0, 1, 1], [], []>} : vector<4x64xbf16>, vector<64x128xbf16>, vector<4x128xf32> -> vector<4x128xf32>
    %229 = arith.addf %221, %228 : vector<4x128xf32>
    %c0_216 = arith.constant 0 : index
    %c0_217 = arith.constant 0 : index
    %230 = vector.load %arg9[%c0_216, %c0_217] : memref<1x128xf32, #tpu.memory_space<vmem>>, vector<1x128xf32>
    %231 = vector.broadcast %230 : vector<1x128xf32> to vector<4x128xf32>
    %232 = arith.addf %229, %231 : vector<4x128xf32>
    %233 = arith.truncf %232 : vector<4x128xf32> to vector<4x128xbf16>
    %cst_218 = arith.constant 0.000000e+00 : f32
    %234 = vector.broadcast %cst_218 : f32 to vector<1x256xf32>
    %c0_219 = arith.constant 0 : index
    %c0_220 = arith.constant 0 : index
    %c0_221 = arith.constant 0 : index
    %235 = vector.load %arg13[%c0_219, %c0_220, %c0_221] : memref<9x1x4xbf16, #tpu.memory_space<vmem>>, vector<1x1x4xbf16>
    %236 = vector.shape_cast %235 : vector<1x1x4xbf16> to vector<1x4xbf16>
    %cst_222 = arith.constant dense<0.000000e+00> : vector<1x128xf32>
    %237 = tpu.matmul %236, %233, %cst_222 {dimension_numbers = #tpu.dot_dimension_numbers<[1], [0], [0], [1], [0, 0, 1, 1], [], []>} : vector<1x4xbf16>, vector<4x128xbf16>, vector<1x128xf32> -> vector<1x128xf32>
    %238 = arith.truncf %237 : vector<1x128xf32> to vector<1x128xbf16>
    %c0_223 = arith.constant 0 : index
    %c0_224 = arith.constant 0 : index
    %c0_225 = arith.constant 0 : index
    %239 = vector.load %arg11[%c0_223, %c0_224, %c0_225] : memref<9x128x256xbf16, #tpu.memory_space<vmem>>, vector<1x128x256xbf16>
    %240 = vector.shape_cast %239 : vector<1x128x256xbf16> to vector<128x256xbf16>
    %cst_226 = arith.constant dense<0.000000e+00> : vector<1x256xf32>
    %241 = tpu.matmul %238, %240, %cst_226 {dimension_numbers = #tpu.dot_dimension_numbers<[1], [0], [0], [1], [0, 0, 1, 1], [], []>} : vector<1x128xbf16>, vector<128x256xbf16>, vector<1x256xf32> -> vector<1x256xf32>
    %242 = arith.addf %234, %241 : vector<1x256xf32>
    %c1_227 = arith.constant 1 : index
    %c0_228 = arith.constant 0 : index
    %c0_229 = arith.constant 0 : index
    %243 = vector.load %arg13[%c1_227, %c0_228, %c0_229] : memref<9x1x4xbf16, #tpu.memory_space<vmem>>, vector<1x1x4xbf16>
    %244 = vector.shape_cast %243 : vector<1x1x4xbf16> to vector<1x4xbf16>
    %cst_230 = arith.constant dense<0.000000e+00> : vector<1x128xf32>
    %245 = tpu.matmul %244, %233, %cst_230 {dimension_numbers = #tpu.dot_dimension_numbers<[1], [0], [0], [1], [0, 0, 1, 1], [], []>} : vector<1x4xbf16>, vector<4x128xbf16>, vector<1x128xf32> -> vector<1x128xf32>
    %246 = arith.truncf %245 : vector<1x128xf32> to vector<1x128xbf16>
    %c1_231 = arith.constant 1 : index
    %c0_232 = arith.constant 0 : index
    %c0_233 = arith.constant 0 : index
    %247 = vector.load %arg11[%c1_231, %c0_232, %c0_233] : memref<9x128x256xbf16, #tpu.memory_space<vmem>>, vector<1x128x256xbf16>
    %248 = vector.shape_cast %247 : vector<1x128x256xbf16> to vector<128x256xbf16>
    %cst_234 = arith.constant dense<0.000000e+00> : vector<1x256xf32>
    %249 = tpu.matmul %246, %248, %cst_234 {dimension_numbers = #tpu.dot_dimension_numbers<[1], [0], [0], [1], [0, 0, 1, 1], [], []>} : vector<1x128xbf16>, vector<128x256xbf16>, vector<1x256xf32> -> vector<1x256xf32>
    %250 = arith.addf %242, %249 : vector<1x256xf32>
    %c2_235 = arith.constant 2 : index
    %c0_236 = arith.constant 0 : index
    %c0_237 = arith.constant 0 : index
    %251 = vector.load %arg13[%c2_235, %c0_236, %c0_237] : memref<9x1x4xbf16, #tpu.memory_space<vmem>>, vector<1x1x4xbf16>
    %252 = vector.shape_cast %251 : vector<1x1x4xbf16> to vector<1x4xbf16>
    %cst_238 = arith.constant dense<0.000000e+00> : vector<1x128xf32>
    %253 = tpu.matmul %252, %233, %cst_238 {dimension_numbers = #tpu.dot_dimension_numbers<[1], [0], [0], [1], [0, 0, 1, 1], [], []>} : vector<1x4xbf16>, vector<4x128xbf16>, vector<1x128xf32> -> vector<1x128xf32>
    %254 = arith.truncf %253 : vector<1x128xf32> to vector<1x128xbf16>
    %c2_239 = arith.constant 2 : index
    %c0_240 = arith.constant 0 : index
    %c0_241 = arith.constant 0 : index
    %255 = vector.load %arg11[%c2_239, %c0_240, %c0_241] : memref<9x128x256xbf16, #tpu.memory_space<vmem>>, vector<1x128x256xbf16>
    %256 = vector.shape_cast %255 : vector<1x128x256xbf16> to vector<128x256xbf16>
    %cst_242 = arith.constant dense<0.000000e+00> : vector<1x256xf32>
    %257 = tpu.matmul %254, %256, %cst_242 {dimension_numbers = #tpu.dot_dimension_numbers<[1], [0], [0], [1], [0, 0, 1, 1], [], []>} : vector<1x128xbf16>, vector<128x256xbf16>, vector<1x256xf32> -> vector<1x256xf32>
    %258 = arith.addf %250, %257 : vector<1x256xf32>
    %c3_243 = arith.constant 3 : index
    %c0_244 = arith.constant 0 : index
    %c0_245 = arith.constant 0 : index
    %259 = vector.load %arg13[%c3_243, %c0_244, %c0_245] : memref<9x1x4xbf16, #tpu.memory_space<vmem>>, vector<1x1x4xbf16>
    %260 = vector.shape_cast %259 : vector<1x1x4xbf16> to vector<1x4xbf16>
    %cst_246 = arith.constant dense<0.000000e+00> : vector<1x128xf32>
    %261 = tpu.matmul %260, %233, %cst_246 {dimension_numbers = #tpu.dot_dimension_numbers<[1], [0], [0], [1], [0, 0, 1, 1], [], []>} : vector<1x4xbf16>, vector<4x128xbf16>, vector<1x128xf32> -> vector<1x128xf32>
    %262 = arith.truncf %261 : vector<1x128xf32> to vector<1x128xbf16>
    %c3_247 = arith.constant 3 : index
    %c0_248 = arith.constant 0 : index
    %c0_249 = arith.constant 0 : index
    %263 = vector.load %arg11[%c3_247, %c0_248, %c0_249] : memref<9x128x256xbf16, #tpu.memory_space<vmem>>, vector<1x128x256xbf16>
    %264 = vector.shape_cast %263 : vector<1x128x256xbf16> to vector<128x256xbf16>
    %cst_250 = arith.constant dense<0.000000e+00> : vector<1x256xf32>
    %265 = tpu.matmul %262, %264, %cst_250 {dimension_numbers = #tpu.dot_dimension_numbers<[1], [0], [0], [1], [0, 0, 1, 1], [], []>} : vector<1x128xbf16>, vector<128x256xbf16>, vector<1x256xf32> -> vector<1x256xf32>
    %266 = arith.addf %258, %265 : vector<1x256xf32>
    %c4_251 = arith.constant 4 : index
    %c0_252 = arith.constant 0 : index
    %c0_253 = arith.constant 0 : index
    %267 = vector.load %arg13[%c4_251, %c0_252, %c0_253] : memref<9x1x4xbf16, #tpu.memory_space<vmem>>, vector<1x1x4xbf16>
    %268 = vector.shape_cast %267 : vector<1x1x4xbf16> to vector<1x4xbf16>
    %cst_254 = arith.constant dense<0.000000e+00> : vector<1x128xf32>
    %269 = tpu.matmul %268, %233, %cst_254 {dimension_numbers = #tpu.dot_dimension_numbers<[1], [0], [0], [1], [0, 0, 1, 1], [], []>} : vector<1x4xbf16>, vector<4x128xbf16>, vector<1x128xf32> -> vector<1x128xf32>
    %270 = arith.truncf %269 : vector<1x128xf32> to vector<1x128xbf16>
    %c4_255 = arith.constant 4 : index
    %c0_256 = arith.constant 0 : index
    %c0_257 = arith.constant 0 : index
    %271 = vector.load %arg11[%c4_255, %c0_256, %c0_257] : memref<9x128x256xbf16, #tpu.memory_space<vmem>>, vector<1x128x256xbf16>
    %272 = vector.shape_cast %271 : vector<1x128x256xbf16> to vector<128x256xbf16>
    %cst_258 = arith.constant dense<0.000000e+00> : vector<1x256xf32>
    %273 = tpu.matmul %270, %272, %cst_258 {dimension_numbers = #tpu.dot_dimension_numbers<[1], [0], [0], [1], [0, 0, 1, 1], [], []>} : vector<1x128xbf16>, vector<128x256xbf16>, vector<1x256xf32> -> vector<1x256xf32>
    %274 = arith.addf %266, %273 : vector<1x256xf32>
    %c5_259 = arith.constant 5 : index
    %c0_260 = arith.constant 0 : index
    %c0_261 = arith.constant 0 : index
    %275 = vector.load %arg13[%c5_259, %c0_260, %c0_261] : memref<9x1x4xbf16, #tpu.memory_space<vmem>>, vector<1x1x4xbf16>
    %276 = vector.shape_cast %275 : vector<1x1x4xbf16> to vector<1x4xbf16>
    %cst_262 = arith.constant dense<0.000000e+00> : vector<1x128xf32>
    %277 = tpu.matmul %276, %233, %cst_262 {dimension_numbers = #tpu.dot_dimension_numbers<[1], [0], [0], [1], [0, 0, 1, 1], [], []>} : vector<1x4xbf16>, vector<4x128xbf16>, vector<1x128xf32> -> vector<1x128xf32>
    %278 = arith.truncf %277 : vector<1x128xf32> to vector<1x128xbf16>
    %c5_263 = arith.constant 5 : index
    %c0_264 = arith.constant 0 : index
    %c0_265 = arith.constant 0 : index
    %279 = vector.load %arg11[%c5_263, %c0_264, %c0_265] : memref<9x128x256xbf16, #tpu.memory_space<vmem>>, vector<1x128x256xbf16>
    %280 = vector.shape_cast %279 : vector<1x128x256xbf16> to vector<128x256xbf16>
    %cst_266 = arith.constant dense<0.000000e+00> : vector<1x256xf32>
    %281 = tpu.matmul %278, %280, %cst_266 {dimension_numbers = #tpu.dot_dimension_numbers<[1], [0], [0], [1], [0, 0, 1, 1], [], []>} : vector<1x128xbf16>, vector<128x256xbf16>, vector<1x256xf32> -> vector<1x256xf32>
    %282 = arith.addf %274, %281 : vector<1x256xf32>
    %c6_267 = arith.constant 6 : index
    %c0_268 = arith.constant 0 : index
    %c0_269 = arith.constant 0 : index
    %283 = vector.load %arg13[%c6_267, %c0_268, %c0_269] : memref<9x1x4xbf16, #tpu.memory_space<vmem>>, vector<1x1x4xbf16>
    %284 = vector.shape_cast %283 : vector<1x1x4xbf16> to vector<1x4xbf16>
    %cst_270 = arith.constant dense<0.000000e+00> : vector<1x128xf32>
    %285 = tpu.matmul %284, %233, %cst_270 {dimension_numbers = #tpu.dot_dimension_numbers<[1], [0], [0], [1], [0, 0, 1, 1], [], []>} : vector<1x4xbf16>, vector<4x128xbf16>, vector<1x128xf32> -> vector<1x128xf32>
    %286 = arith.truncf %285 : vector<1x128xf32> to vector<1x128xbf16>
    %c6_271 = arith.constant 6 : index
    %c0_272 = arith.constant 0 : index
    %c0_273 = arith.constant 0 : index
    %287 = vector.load %arg11[%c6_271, %c0_272, %c0_273] : memref<9x128x256xbf16, #tpu.memory_space<vmem>>, vector<1x128x256xbf16>
    %288 = vector.shape_cast %287 : vector<1x128x256xbf16> to vector<128x256xbf16>
    %cst_274 = arith.constant dense<0.000000e+00> : vector<1x256xf32>
    %289 = tpu.matmul %286, %288, %cst_274 {dimension_numbers = #tpu.dot_dimension_numbers<[1], [0], [0], [1], [0, 0, 1, 1], [], []>} : vector<1x128xbf16>, vector<128x256xbf16>, vector<1x256xf32> -> vector<1x256xf32>
    %290 = arith.addf %282, %289 : vector<1x256xf32>
    %c7_275 = arith.constant 7 : index
    %c0_276 = arith.constant 0 : index
    %c0_277 = arith.constant 0 : index
    %291 = vector.load %arg13[%c7_275, %c0_276, %c0_277] : memref<9x1x4xbf16, #tpu.memory_space<vmem>>, vector<1x1x4xbf16>
    %292 = vector.shape_cast %291 : vector<1x1x4xbf16> to vector<1x4xbf16>
    %cst_278 = arith.constant dense<0.000000e+00> : vector<1x128xf32>
    %293 = tpu.matmul %292, %233, %cst_278 {dimension_numbers = #tpu.dot_dimension_numbers<[1], [0], [0], [1], [0, 0, 1, 1], [], []>} : vector<1x4xbf16>, vector<4x128xbf16>, vector<1x128xf32> -> vector<1x128xf32>
    %294 = arith.truncf %293 : vector<1x128xf32> to vector<1x128xbf16>
    %c7_279 = arith.constant 7 : index
    %c0_280 = arith.constant 0 : index
    %c0_281 = arith.constant 0 : index
    %295 = vector.load %arg11[%c7_279, %c0_280, %c0_281] : memref<9x128x256xbf16, #tpu.memory_space<vmem>>, vector<1x128x256xbf16>
    %296 = vector.shape_cast %295 : vector<1x128x256xbf16> to vector<128x256xbf16>
    %cst_282 = arith.constant dense<0.000000e+00> : vector<1x256xf32>
    %297 = tpu.matmul %294, %296, %cst_282 {dimension_numbers = #tpu.dot_dimension_numbers<[1], [0], [0], [1], [0, 0, 1, 1], [], []>} : vector<1x128xbf16>, vector<128x256xbf16>, vector<1x256xf32> -> vector<1x256xf32>
    %298 = arith.addf %290, %297 : vector<1x256xf32>
    %c8_283 = arith.constant 8 : index
    %c0_284 = arith.constant 0 : index
    %c0_285 = arith.constant 0 : index
    %299 = vector.load %arg13[%c8_283, %c0_284, %c0_285] : memref<9x1x4xbf16, #tpu.memory_space<vmem>>, vector<1x1x4xbf16>
    %300 = vector.shape_cast %299 : vector<1x1x4xbf16> to vector<1x4xbf16>
    %cst_286 = arith.constant dense<0.000000e+00> : vector<1x128xf32>
    %301 = tpu.matmul %300, %233, %cst_286 {dimension_numbers = #tpu.dot_dimension_numbers<[1], [0], [0], [1], [0, 0, 1, 1], [], []>} : vector<1x4xbf16>, vector<4x128xbf16>, vector<1x128xf32> -> vector<1x128xf32>
    %302 = arith.truncf %301 : vector<1x128xf32> to vector<1x128xbf16>
    %c8_287 = arith.constant 8 : index
    %c0_288 = arith.constant 0 : index
    %c0_289 = arith.constant 0 : index
    %303 = vector.load %arg11[%c8_287, %c0_288, %c0_289] : memref<9x128x256xbf16, #tpu.memory_space<vmem>>, vector<1x128x256xbf16>
    %304 = vector.shape_cast %303 : vector<1x128x256xbf16> to vector<128x256xbf16>
    %cst_290 = arith.constant dense<0.000000e+00> : vector<1x256xf32>
    %305 = tpu.matmul %302, %304, %cst_290 {dimension_numbers = #tpu.dot_dimension_numbers<[1], [0], [0], [1], [0, 0, 1, 1], [], []>} : vector<1x128xbf16>, vector<128x256xbf16>, vector<1x256xf32> -> vector<1x256xf32>
    %306 = arith.addf %298, %305 : vector<1x256xf32>
    %c0_291 = arith.constant 0 : index
    %c0_292 = arith.constant 0 : index
    %307 = vector.load %arg12[%c0_291, %c0_292] : memref<1x256xf32, #tpu.memory_space<vmem>>, vector<1x256xf32>
    %308 = arith.addf %306, %307 : vector<1x256xf32>
    %309 = arith.truncf %308 : vector<1x256xf32> to vector<1x256xbf16>
    %cst_293 = arith.constant 0.000000e+00 : f32
    %310 = vector.broadcast %cst_293 : f32 to vector<4x256xf32>
    %c0_294 = arith.constant 0 : index
    %c0_295 = arith.constant 0 : index
    %c0_296 = arith.constant 0 : index
    %311 = vector.load %arg14[%c0_294, %c0_295, %c0_296] : memref<4x256x256xbf16, #tpu.memory_space<vmem>>, vector<1x256x256xbf16>
    %312 = vector.shape_cast %311 : vector<1x256x256xbf16> to vector<256x256xbf16>
    %cst_297 = arith.constant dense<0.000000e+00> : vector<1x256xf32>
    %313 = tpu.matmul %309, %312, %cst_297 {dimension_numbers = #tpu.dot_dimension_numbers<[1], [0], [0], [1], [0, 0, 1, 1], [], []>} : vector<1x256xbf16>, vector<256x256xbf16>, vector<1x256xf32> -> vector<1x256xf32>
    %c0_298 = arith.constant 0 : index
    %c0_299 = arith.constant 0 : index
    %c0_300 = arith.constant 0 : index
    %314 = vector.load %arg16[%c0_298, %c0_299, %c0_300] : memref<4x4x1xbf16, #tpu.memory_space<vmem>>, vector<1x4x1xbf16>
    %315 = vector.shape_cast %314 : vector<1x4x1xbf16> to vector<4x1xbf16>
    %316 = arith.truncf %313 : vector<1x256xf32> to vector<1x256xbf16>
    %cst_301 = arith.constant dense<0.000000e+00> : vector<4x256xf32>
    %317 = tpu.matmul %315, %316, %cst_301 {dimension_numbers = #tpu.dot_dimension_numbers<[1], [0], [0], [1], [0, 0, 1, 1], [], []>} : vector<4x1xbf16>, vector<1x256xbf16>, vector<4x256xf32> -> vector<4x256xf32>
    %318 = arith.addf %310, %317 : vector<4x256xf32>
    %c1_302 = arith.constant 1 : index
    %c0_303 = arith.constant 0 : index
    %c0_304 = arith.constant 0 : index
    %319 = vector.load %arg14[%c1_302, %c0_303, %c0_304] : memref<4x256x256xbf16, #tpu.memory_space<vmem>>, vector<1x256x256xbf16>
    %320 = vector.shape_cast %319 : vector<1x256x256xbf16> to vector<256x256xbf16>
    %cst_305 = arith.constant dense<0.000000e+00> : vector<1x256xf32>
    %321 = tpu.matmul %309, %320, %cst_305 {dimension_numbers = #tpu.dot_dimension_numbers<[1], [0], [0], [1], [0, 0, 1, 1], [], []>} : vector<1x256xbf16>, vector<256x256xbf16>, vector<1x256xf32> -> vector<1x256xf32>
    %c1_306 = arith.constant 1 : index
    %c0_307 = arith.constant 0 : index
    %c0_308 = arith.constant 0 : index
    %322 = vector.load %arg16[%c1_306, %c0_307, %c0_308] : memref<4x4x1xbf16, #tpu.memory_space<vmem>>, vector<1x4x1xbf16>
    %323 = vector.shape_cast %322 : vector<1x4x1xbf16> to vector<4x1xbf16>
    %324 = arith.truncf %321 : vector<1x256xf32> to vector<1x256xbf16>
    %cst_309 = arith.constant dense<0.000000e+00> : vector<4x256xf32>
    %325 = tpu.matmul %323, %324, %cst_309 {dimension_numbers = #tpu.dot_dimension_numbers<[1], [0], [0], [1], [0, 0, 1, 1], [], []>} : vector<4x1xbf16>, vector<1x256xbf16>, vector<4x256xf32> -> vector<4x256xf32>
    %326 = arith.addf %318, %325 : vector<4x256xf32>
    %c2_310 = arith.constant 2 : index
    %c0_311 = arith.constant 0 : index
    %c0_312 = arith.constant 0 : index
    %327 = vector.load %arg14[%c2_310, %c0_311, %c0_312] : memref<4x256x256xbf16, #tpu.memory_space<vmem>>, vector<1x256x256xbf16>
    %328 = vector.shape_cast %327 : vector<1x256x256xbf16> to vector<256x256xbf16>
    %cst_313 = arith.constant dense<0.000000e+00> : vector<1x256xf32>
    %329 = tpu.matmul %309, %328, %cst_313 {dimension_numbers = #tpu.dot_dimension_numbers<[1], [0], [0], [1], [0, 0, 1, 1], [], []>} : vector<1x256xbf16>, vector<256x256xbf16>, vector<1x256xf32> -> vector<1x256xf32>
    %c2_314 = arith.constant 2 : index
    %c0_315 = arith.constant 0 : index
    %c0_316 = arith.constant 0 : index
    %330 = vector.load %arg16[%c2_314, %c0_315, %c0_316] : memref<4x4x1xbf16, #tpu.memory_space<vmem>>, vector<1x4x1xbf16>
    %331 = vector.shape_cast %330 : vector<1x4x1xbf16> to vector<4x1xbf16>
    %332 = arith.truncf %329 : vector<1x256xf32> to vector<1x256xbf16>
    %cst_317 = arith.constant dense<0.000000e+00> : vector<4x256xf32>
    %333 = tpu.matmul %331, %332, %cst_317 {dimension_numbers = #tpu.dot_dimension_numbers<[1], [0], [0], [1], [0, 0, 1, 1], [], []>} : vector<4x1xbf16>, vector<1x256xbf16>, vector<4x256xf32> -> vector<4x256xf32>
    %334 = arith.addf %326, %333 : vector<4x256xf32>
    %c3_318 = arith.constant 3 : index
    %c0_319 = arith.constant 0 : index
    %c0_320 = arith.constant 0 : index
    %335 = vector.load %arg14[%c3_318, %c0_319, %c0_320] : memref<4x256x256xbf16, #tpu.memory_space<vmem>>, vector<1x256x256xbf16>
    %336 = vector.shape_cast %335 : vector<1x256x256xbf16> to vector<256x256xbf16>
    %cst_321 = arith.constant dense<0.000000e+00> : vector<1x256xf32>
    %337 = tpu.matmul %309, %336, %cst_321 {dimension_numbers = #tpu.dot_dimension_numbers<[1], [0], [0], [1], [0, 0, 1, 1], [], []>} : vector<1x256xbf16>, vector<256x256xbf16>, vector<1x256xf32> -> vector<1x256xf32>
    %c3_322 = arith.constant 3 : index
    %c0_323 = arith.constant 0 : index
    %c0_324 = arith.constant 0 : index
    %338 = vector.load %arg16[%c3_322, %c0_323, %c0_324] : memref<4x4x1xbf16, #tpu.memory_space<vmem>>, vector<1x4x1xbf16>
    %339 = vector.shape_cast %338 : vector<1x4x1xbf16> to vector<4x1xbf16>
    %340 = arith.truncf %337 : vector<1x256xf32> to vector<1x256xbf16>
    %cst_325 = arith.constant dense<0.000000e+00> : vector<4x256xf32>
    %341 = tpu.matmul %339, %340, %cst_325 {dimension_numbers = #tpu.dot_dimension_numbers<[1], [0], [0], [1], [0, 0, 1, 1], [], []>} : vector<4x1xbf16>, vector<1x256xbf16>, vector<4x256xf32> -> vector<4x256xf32>
    %342 = arith.addf %334, %341 : vector<4x256xf32>
    %c0_326 = arith.constant 0 : index
    %c0_327 = arith.constant 0 : index
    %343 = vector.load %arg15[%c0_326, %c0_327] : memref<1x256xf32, #tpu.memory_space<vmem>>, vector<1x256xf32>
    %344 = vector.broadcast %343 : vector<1x256xf32> to vector<4x256xf32>
    %345 = arith.addf %342, %344 : vector<4x256xf32>
    %346 = arith.truncf %345 : vector<4x256xf32> to vector<4x256xbf16>
    %cst_328 = arith.constant 0.000000e+00 : f32
    %347 = vector.broadcast %cst_328 : f32 to vector<16x128xf32>
    %c0_329 = arith.constant 0 : index
    %c0_330 = arith.constant 0 : index
    %c0_331 = arith.constant 0 : index
    %348 = vector.load %arg17[%c0_329, %c0_330, %c0_331] : memref<4x384x128xbf16, #tpu.memory_space<vmem>>, vector<1x384x128xbf16>
    %349 = vector.shape_cast %348 : vector<1x384x128xbf16> to vector<384x128xbf16>
    %350 = vector.extract_strided_slice %349 {offsets = [0, 0], sizes = [256, 128], strides = [1, 1]} : vector<384x128xbf16> to vector<256x128xbf16>
    %cst_332 = arith.constant dense<0.000000e+00> : vector<4x128xf32>
    %351 = tpu.matmul %346, %350, %cst_332 {dimension_numbers = #tpu.dot_dimension_numbers<[1], [0], [0], [1], [0, 0, 1, 1], [], []>} : vector<4x256xbf16>, vector<256x128xbf16>, vector<4x128xf32> -> vector<4x128xf32>
    %352 = vector.extract_strided_slice %349 {offsets = [256, 0], sizes = [128, 128], strides = [1, 1]} : vector<384x128xbf16> to vector<128x128xbf16>
    %cst_333 = arith.constant dense<0.000000e+00> : vector<4x128xf32>
    %353 = tpu.matmul %233, %352, %cst_333 {dimension_numbers = #tpu.dot_dimension_numbers<[1], [0], [0], [1], [0, 0, 1, 1], [], []>} : vector<4x128xbf16>, vector<128x128xbf16>, vector<4x128xf32> -> vector<4x128xf32>
    %354 = arith.addf %351, %353 : vector<4x128xf32>
    %c0_334 = arith.constant 0 : index
    %c0_335 = arith.constant 0 : index
    %c0_336 = arith.constant 0 : index
    %355 = vector.load %arg19[%c0_334, %c0_335, %c0_336] : memref<4x16x4xbf16, #tpu.memory_space<vmem>>, vector<1x16x4xbf16>
    %356 = vector.shape_cast %355 : vector<1x16x4xbf16> to vector<16x4xbf16>
    %357 = arith.truncf %354 : vector<4x128xf32> to vector<4x128xbf16>
    %cst_337 = arith.constant dense<0.000000e+00> : vector<16x128xf32>
    %358 = tpu.matmul %356, %357, %cst_337 {dimension_numbers = #tpu.dot_dimension_numbers<[1], [0], [0], [1], [0, 0, 1, 1], [], []>} : vector<16x4xbf16>, vector<4x128xbf16>, vector<16x128xf32> -> vector<16x128xf32>
    %359 = arith.addf %347, %358 : vector<16x128xf32>
    %c1_338 = arith.constant 1 : index
    %c0_339 = arith.constant 0 : index
    %c0_340 = arith.constant 0 : index
    %360 = vector.load %arg17[%c1_338, %c0_339, %c0_340] : memref<4x384x128xbf16, #tpu.memory_space<vmem>>, vector<1x384x128xbf16>
    %361 = vector.shape_cast %360 : vector<1x384x128xbf16> to vector<384x128xbf16>
    %362 = vector.extract_strided_slice %361 {offsets = [0, 0], sizes = [256, 128], strides = [1, 1]} : vector<384x128xbf16> to vector<256x128xbf16>
    %cst_341 = arith.constant dense<0.000000e+00> : vector<4x128xf32>
    %363 = tpu.matmul %346, %362, %cst_341 {dimension_numbers = #tpu.dot_dimension_numbers<[1], [0], [0], [1], [0, 0, 1, 1], [], []>} : vector<4x256xbf16>, vector<256x128xbf16>, vector<4x128xf32> -> vector<4x128xf32>
    %364 = vector.extract_strided_slice %361 {offsets = [256, 0], sizes = [128, 128], strides = [1, 1]} : vector<384x128xbf16> to vector<128x128xbf16>
    %cst_342 = arith.constant dense<0.000000e+00> : vector<4x128xf32>
    %365 = tpu.matmul %233, %364, %cst_342 {dimension_numbers = #tpu.dot_dimension_numbers<[1], [0], [0], [1], [0, 0, 1, 1], [], []>} : vector<4x128xbf16>, vector<128x128xbf16>, vector<4x128xf32> -> vector<4x128xf32>
    %366 = arith.addf %363, %365 : vector<4x128xf32>
    %c1_343 = arith.constant 1 : index
    %c0_344 = arith.constant 0 : index
    %c0_345 = arith.constant 0 : index
    %367 = vector.load %arg19[%c1_343, %c0_344, %c0_345] : memref<4x16x4xbf16, #tpu.memory_space<vmem>>, vector<1x16x4xbf16>
    %368 = vector.shape_cast %367 : vector<1x16x4xbf16> to vector<16x4xbf16>
    %369 = arith.truncf %366 : vector<4x128xf32> to vector<4x128xbf16>
    %cst_346 = arith.constant dense<0.000000e+00> : vector<16x128xf32>
    %370 = tpu.matmul %368, %369, %cst_346 {dimension_numbers = #tpu.dot_dimension_numbers<[1], [0], [0], [1], [0, 0, 1, 1], [], []>} : vector<16x4xbf16>, vector<4x128xbf16>, vector<16x128xf32> -> vector<16x128xf32>
    %371 = arith.addf %359, %370 : vector<16x128xf32>
    %c2_347 = arith.constant 2 : index
    %c0_348 = arith.constant 0 : index
    %c0_349 = arith.constant 0 : index
    %372 = vector.load %arg17[%c2_347, %c0_348, %c0_349] : memref<4x384x128xbf16, #tpu.memory_space<vmem>>, vector<1x384x128xbf16>
    %373 = vector.shape_cast %372 : vector<1x384x128xbf16> to vector<384x128xbf16>
    %374 = vector.extract_strided_slice %373 {offsets = [0, 0], sizes = [256, 128], strides = [1, 1]} : vector<384x128xbf16> to vector<256x128xbf16>
    %cst_350 = arith.constant dense<0.000000e+00> : vector<4x128xf32>
    %375 = tpu.matmul %346, %374, %cst_350 {dimension_numbers = #tpu.dot_dimension_numbers<[1], [0], [0], [1], [0, 0, 1, 1], [], []>} : vector<4x256xbf16>, vector<256x128xbf16>, vector<4x128xf32> -> vector<4x128xf32>
    %376 = vector.extract_strided_slice %373 {offsets = [256, 0], sizes = [128, 128], strides = [1, 1]} : vector<384x128xbf16> to vector<128x128xbf16>
    %cst_351 = arith.constant dense<0.000000e+00> : vector<4x128xf32>
    %377 = tpu.matmul %233, %376, %cst_351 {dimension_numbers = #tpu.dot_dimension_numbers<[1], [0], [0], [1], [0, 0, 1, 1], [], []>} : vector<4x128xbf16>, vector<128x128xbf16>, vector<4x128xf32> -> vector<4x128xf32>
    %378 = arith.addf %375, %377 : vector<4x128xf32>
    %c2_352 = arith.constant 2 : index
    %c0_353 = arith.constant 0 : index
    %c0_354 = arith.constant 0 : index
    %379 = vector.load %arg19[%c2_352, %c0_353, %c0_354] : memref<4x16x4xbf16, #tpu.memory_space<vmem>>, vector<1x16x4xbf16>
    %380 = vector.shape_cast %379 : vector<1x16x4xbf16> to vector<16x4xbf16>
    %381 = arith.truncf %378 : vector<4x128xf32> to vector<4x128xbf16>
    %cst_355 = arith.constant dense<0.000000e+00> : vector<16x128xf32>
    %382 = tpu.matmul %380, %381, %cst_355 {dimension_numbers = #tpu.dot_dimension_numbers<[1], [0], [0], [1], [0, 0, 1, 1], [], []>} : vector<16x4xbf16>, vector<4x128xbf16>, vector<16x128xf32> -> vector<16x128xf32>
    %383 = arith.addf %371, %382 : vector<16x128xf32>
    %c3_356 = arith.constant 3 : index
    %c0_357 = arith.constant 0 : index
    %c0_358 = arith.constant 0 : index
    %384 = vector.load %arg17[%c3_356, %c0_357, %c0_358] : memref<4x384x128xbf16, #tpu.memory_space<vmem>>, vector<1x384x128xbf16>
    %385 = vector.shape_cast %384 : vector<1x384x128xbf16> to vector<384x128xbf16>
    %386 = vector.extract_strided_slice %385 {offsets = [0, 0], sizes = [256, 128], strides = [1, 1]} : vector<384x128xbf16> to vector<256x128xbf16>
    %cst_359 = arith.constant dense<0.000000e+00> : vector<4x128xf32>
    %387 = tpu.matmul %346, %386, %cst_359 {dimension_numbers = #tpu.dot_dimension_numbers<[1], [0], [0], [1], [0, 0, 1, 1], [], []>} : vector<4x256xbf16>, vector<256x128xbf16>, vector<4x128xf32> -> vector<4x128xf32>
    %388 = vector.extract_strided_slice %385 {offsets = [256, 0], sizes = [128, 128], strides = [1, 1]} : vector<384x128xbf16> to vector<128x128xbf16>
    %cst_360 = arith.constant dense<0.000000e+00> : vector<4x128xf32>
    %389 = tpu.matmul %233, %388, %cst_360 {dimension_numbers = #tpu.dot_dimension_numbers<[1], [0], [0], [1], [0, 0, 1, 1], [], []>} : vector<4x128xbf16>, vector<128x128xbf16>, vector<4x128xf32> -> vector<4x128xf32>
    %390 = arith.addf %387, %389 : vector<4x128xf32>
    %c3_361 = arith.constant 3 : index
    %c0_362 = arith.constant 0 : index
    %c0_363 = arith.constant 0 : index
    %391 = vector.load %arg19[%c3_361, %c0_362, %c0_363] : memref<4x16x4xbf16, #tpu.memory_space<vmem>>, vector<1x16x4xbf16>
    %392 = vector.shape_cast %391 : vector<1x16x4xbf16> to vector<16x4xbf16>
    %393 = arith.truncf %390 : vector<4x128xf32> to vector<4x128xbf16>
    %cst_364 = arith.constant dense<0.000000e+00> : vector<16x128xf32>
    %394 = tpu.matmul %392, %393, %cst_364 {dimension_numbers = #tpu.dot_dimension_numbers<[1], [0], [0], [1], [0, 0, 1, 1], [], []>} : vector<16x4xbf16>, vector<4x128xbf16>, vector<16x128xf32> -> vector<16x128xf32>
    %395 = arith.addf %383, %394 : vector<16x128xf32>
    %c0_365 = arith.constant 0 : index
    %c0_366 = arith.constant 0 : index
    %396 = vector.load %arg18[%c0_365, %c0_366] : memref<1x128xf32, #tpu.memory_space<vmem>>, vector<1x128xf32>
    %397 = vector.broadcast %396 : vector<1x128xf32> to vector<16x128xf32>
    %398 = arith.addf %395, %397 : vector<16x128xf32>
    %399 = arith.truncf %398 : vector<16x128xf32> to vector<16x128xbf16>
    %cst_367 = arith.constant 0.000000e+00 : f32
    %400 = vector.broadcast %cst_367 : f32 to vector<64x64xf32>
    %c0_368 = arith.constant 0 : index
    %c0_369 = arith.constant 0 : index
    %c0_370 = arith.constant 0 : index
    %401 = vector.load %arg20[%c0_368, %c0_369, %c0_370] : memref<4x192x64xbf16, #tpu.memory_space<vmem>>, vector<1x192x64xbf16>
    %402 = vector.shape_cast %401 : vector<1x192x64xbf16> to vector<192x64xbf16>
    %403 = vector.extract_strided_slice %402 {offsets = [0, 0], sizes = [128, 64], strides = [1, 1]} : vector<192x64xbf16> to vector<128x64xbf16>
    %cst_371 = arith.constant dense<0.000000e+00> : vector<16x64xf32>
    %404 = tpu.matmul %399, %403, %cst_371 {dimension_numbers = #tpu.dot_dimension_numbers<[1], [0], [0], [1], [0, 0, 1, 1], [], []>} : vector<16x128xbf16>, vector<128x64xbf16>, vector<16x64xf32> -> vector<16x64xf32>
    %405 = vector.extract_strided_slice %402 {offsets = [128, 0], sizes = [64, 64], strides = [1, 1]} : vector<192x64xbf16> to vector<64x64xbf16>
    %cst_372 = arith.constant dense<0.000000e+00> : vector<16x64xf32>
    %406 = tpu.matmul %156, %405, %cst_372 {dimension_numbers = #tpu.dot_dimension_numbers<[1], [0], [0], [1], [0, 0, 1, 1], [], []>} : vector<16x64xbf16>, vector<64x64xbf16>, vector<16x64xf32> -> vector<16x64xf32>
    %407 = arith.addf %404, %406 : vector<16x64xf32>
    %c0_373 = arith.constant 0 : index
    %c0_374 = arith.constant 0 : index
    %c0_375 = arith.constant 0 : index
    %408 = vector.load %arg22[%c0_373, %c0_374, %c0_375] : memref<4x64x16xbf16, #tpu.memory_space<vmem>>, vector<1x64x16xbf16>
    %409 = vector.shape_cast %408 : vector<1x64x16xbf16> to vector<64x16xbf16>
    %410 = arith.truncf %407 : vector<16x64xf32> to vector<16x64xbf16>
    %cst_376 = arith.constant dense<0.000000e+00> : vector<64x64xf32>
    %411 = tpu.matmul %409, %410, %cst_376 {dimension_numbers = #tpu.dot_dimension_numbers<[1], [0], [0], [1], [0, 0, 1, 1], [], []>} : vector<64x16xbf16>, vector<16x64xbf16>, vector<64x64xf32> -> vector<64x64xf32>
    %412 = arith.addf %400, %411 : vector<64x64xf32>
    %c1_377 = arith.constant 1 : index
    %c0_378 = arith.constant 0 : index
    %c0_379 = arith.constant 0 : index
    %413 = vector.load %arg20[%c1_377, %c0_378, %c0_379] : memref<4x192x64xbf16, #tpu.memory_space<vmem>>, vector<1x192x64xbf16>
    %414 = vector.shape_cast %413 : vector<1x192x64xbf16> to vector<192x64xbf16>
    %415 = vector.extract_strided_slice %414 {offsets = [0, 0], sizes = [128, 64], strides = [1, 1]} : vector<192x64xbf16> to vector<128x64xbf16>
    %cst_380 = arith.constant dense<0.000000e+00> : vector<16x64xf32>
    %416 = tpu.matmul %399, %415, %cst_380 {dimension_numbers = #tpu.dot_dimension_numbers<[1], [0], [0], [1], [0, 0, 1, 1], [], []>} : vector<16x128xbf16>, vector<128x64xbf16>, vector<16x64xf32> -> vector<16x64xf32>
    %417 = vector.extract_strided_slice %414 {offsets = [128, 0], sizes = [64, 64], strides = [1, 1]} : vector<192x64xbf16> to vector<64x64xbf16>
    %cst_381 = arith.constant dense<0.000000e+00> : vector<16x64xf32>
    %418 = tpu.matmul %156, %417, %cst_381 {dimension_numbers = #tpu.dot_dimension_numbers<[1], [0], [0], [1], [0, 0, 1, 1], [], []>} : vector<16x64xbf16>, vector<64x64xbf16>, vector<16x64xf32> -> vector<16x64xf32>
    %419 = arith.addf %416, %418 : vector<16x64xf32>
    %c1_382 = arith.constant 1 : index
    %c0_383 = arith.constant 0 : index
    %c0_384 = arith.constant 0 : index
    %420 = vector.load %arg22[%c1_382, %c0_383, %c0_384] : memref<4x64x16xbf16, #tpu.memory_space<vmem>>, vector<1x64x16xbf16>
    %421 = vector.shape_cast %420 : vector<1x64x16xbf16> to vector<64x16xbf16>
    %422 = arith.truncf %419 : vector<16x64xf32> to vector<16x64xbf16>
    %cst_385 = arith.constant dense<0.000000e+00> : vector<64x64xf32>
    %423 = tpu.matmul %421, %422, %cst_385 {dimension_numbers = #tpu.dot_dimension_numbers<[1], [0], [0], [1], [0, 0, 1, 1], [], []>} : vector<64x16xbf16>, vector<16x64xbf16>, vector<64x64xf32> -> vector<64x64xf32>
    %424 = arith.addf %412, %423 : vector<64x64xf32>
    %c2_386 = arith.constant 2 : index
    %c0_387 = arith.constant 0 : index
    %c0_388 = arith.constant 0 : index
    %425 = vector.load %arg20[%c2_386, %c0_387, %c0_388] : memref<4x192x64xbf16, #tpu.memory_space<vmem>>, vector<1x192x64xbf16>
    %426 = vector.shape_cast %425 : vector<1x192x64xbf16> to vector<192x64xbf16>
    %427 = vector.extract_strided_slice %426 {offsets = [0, 0], sizes = [128, 64], strides = [1, 1]} : vector<192x64xbf16> to vector<128x64xbf16>
    %cst_389 = arith.constant dense<0.000000e+00> : vector<16x64xf32>
    %428 = tpu.matmul %399, %427, %cst_389 {dimension_numbers = #tpu.dot_dimension_numbers<[1], [0], [0], [1], [0, 0, 1, 1], [], []>} : vector<16x128xbf16>, vector<128x64xbf16>, vector<16x64xf32> -> vector<16x64xf32>
    %429 = vector.extract_strided_slice %426 {offsets = [128, 0], sizes = [64, 64], strides = [1, 1]} : vector<192x64xbf16> to vector<64x64xbf16>
    %cst_390 = arith.constant dense<0.000000e+00> : vector<16x64xf32>
    %430 = tpu.matmul %156, %429, %cst_390 {dimension_numbers = #tpu.dot_dimension_numbers<[1], [0], [0], [1], [0, 0, 1, 1], [], []>} : vector<16x64xbf16>, vector<64x64xbf16>, vector<16x64xf32> -> vector<16x64xf32>
    %431 = arith.addf %428, %430 : vector<16x64xf32>
    %c2_391 = arith.constant 2 : index
    %c0_392 = arith.constant 0 : index
    %c0_393 = arith.constant 0 : index
    %432 = vector.load %arg22[%c2_391, %c0_392, %c0_393] : memref<4x64x16xbf16, #tpu.memory_space<vmem>>, vector<1x64x16xbf16>
    %433 = vector.shape_cast %432 : vector<1x64x16xbf16> to vector<64x16xbf16>
    %434 = arith.truncf %431 : vector<16x64xf32> to vector<16x64xbf16>
    %cst_394 = arith.constant dense<0.000000e+00> : vector<64x64xf32>
    %435 = tpu.matmul %433, %434, %cst_394 {dimension_numbers = #tpu.dot_dimension_numbers<[1], [0], [0], [1], [0, 0, 1, 1], [], []>} : vector<64x16xbf16>, vector<16x64xbf16>, vector<64x64xf32> -> vector<64x64xf32>
    %436 = arith.addf %424, %435 : vector<64x64xf32>
    %c3_395 = arith.constant 3 : index
    %c0_396 = arith.constant 0 : index
    %c0_397 = arith.constant 0 : index
    %437 = vector.load %arg20[%c3_395, %c0_396, %c0_397] : memref<4x192x64xbf16, #tpu.memory_space<vmem>>, vector<1x192x64xbf16>
    %438 = vector.shape_cast %437 : vector<1x192x64xbf16> to vector<192x64xbf16>
    %439 = vector.extract_strided_slice %438 {offsets = [0, 0], sizes = [128, 64], strides = [1, 1]} : vector<192x64xbf16> to vector<128x64xbf16>
    %cst_398 = arith.constant dense<0.000000e+00> : vector<16x64xf32>
    %440 = tpu.matmul %399, %439, %cst_398 {dimension_numbers = #tpu.dot_dimension_numbers<[1], [0], [0], [1], [0, 0, 1, 1], [], []>} : vector<16x128xbf16>, vector<128x64xbf16>, vector<16x64xf32> -> vector<16x64xf32>
    %441 = vector.extract_strided_slice %438 {offsets = [128, 0], sizes = [64, 64], strides = [1, 1]} : vector<192x64xbf16> to vector<64x64xbf16>
    %cst_399 = arith.constant dense<0.000000e+00> : vector<16x64xf32>
    %442 = tpu.matmul %156, %441, %cst_399 {dimension_numbers = #tpu.dot_dimension_numbers<[1], [0], [0], [1], [0, 0, 1, 1], [], []>} : vector<16x64xbf16>, vector<64x64xbf16>, vector<16x64xf32> -> vector<16x64xf32>
    %443 = arith.addf %440, %442 : vector<16x64xf32>
    %c3_400 = arith.constant 3 : index
    %c0_401 = arith.constant 0 : index
    %c0_402 = arith.constant 0 : index
    %444 = vector.load %arg22[%c3_400, %c0_401, %c0_402] : memref<4x64x16xbf16, #tpu.memory_space<vmem>>, vector<1x64x16xbf16>
    %445 = vector.shape_cast %444 : vector<1x64x16xbf16> to vector<64x16xbf16>
    %446 = arith.truncf %443 : vector<16x64xf32> to vector<16x64xbf16>
    %cst_403 = arith.constant dense<0.000000e+00> : vector<64x64xf32>
    %447 = tpu.matmul %445, %446, %cst_403 {dimension_numbers = #tpu.dot_dimension_numbers<[1], [0], [0], [1], [0, 0, 1, 1], [], []>} : vector<64x16xbf16>, vector<16x64xbf16>, vector<64x64xf32> -> vector<64x64xf32>
    %448 = arith.addf %436, %447 : vector<64x64xf32>
    %c0_404 = arith.constant 0 : index
    %c0_405 = arith.constant 0 : index
    %449 = vector.load %arg21[%c0_404, %c0_405] : memref<1x64xf32, #tpu.memory_space<vmem>>, vector<1x64xf32>
    %450 = vector.broadcast %449 : vector<1x64xf32> to vector<64x64xf32>
    %451 = arith.addf %448, %450 : vector<64x64xf32>
    %452 = arith.truncf %451 : vector<64x64xf32> to vector<64x64xbf16>
    %cst_406 = arith.constant 0.000000e+00 : f32
    %453 = vector.broadcast %cst_406 : f32 to vector<256x3xf32>
    %c0_407 = arith.constant 0 : index
    %c0_408 = arith.constant 0 : index
    %c0_409 = arith.constant 0 : index
    %454 = vector.load %arg23[%c0_407, %c0_408, %c0_409] : memref<4x96x3xbf16, #tpu.memory_space<vmem>>, vector<1x96x3xbf16>
    %455 = vector.shape_cast %454 : vector<1x96x3xbf16> to vector<96x3xbf16>
    %456 = vector.extract_strided_slice %455 {offsets = [0, 0], sizes = [64, 3], strides = [1, 1]} : vector<96x3xbf16> to vector<64x3xbf16>
    %cst_410 = arith.constant dense<0.000000e+00> : vector<64x3xf32>
    %457 = tpu.matmul %452, %456, %cst_410 {dimension_numbers = #tpu.dot_dimension_numbers<[1], [0], [0], [1], [0, 0, 1, 1], [], []>} : vector<64x64xbf16>, vector<64x3xbf16>, vector<64x3xf32> -> vector<64x3xf32>
    %458 = vector.extract_strided_slice %455 {offsets = [64, 0], sizes = [32, 3], strides = [1, 1]} : vector<96x3xbf16> to vector<32x3xbf16>
    %cst_411 = arith.constant dense<0.000000e+00> : vector<64x3xf32>
    %459 = tpu.matmul %79, %458, %cst_411 {dimension_numbers = #tpu.dot_dimension_numbers<[1], [0], [0], [1], [0, 0, 1, 1], [], []>} : vector<64x32xbf16>, vector<32x3xbf16>, vector<64x3xf32> -> vector<64x3xf32>
    %460 = arith.addf %457, %459 : vector<64x3xf32>
    %c0_412 = arith.constant 0 : index
    %c0_413 = arith.constant 0 : index
    %c0_414 = arith.constant 0 : index
    %461 = vector.load %arg25[%c0_412, %c0_413, %c0_414] : memref<4x256x64xbf16, #tpu.memory_space<vmem>>, vector<1x256x64xbf16>
    %462 = vector.shape_cast %461 : vector<1x256x64xbf16> to vector<256x64xbf16>
    %463 = arith.truncf %460 : vector<64x3xf32> to vector<64x3xbf16>
    %cst_415 = arith.constant dense<0.000000e+00> : vector<256x3xf32>
    %464 = tpu.matmul %462, %463, %cst_415 {dimension_numbers = #tpu.dot_dimension_numbers<[1], [0], [0], [1], [0, 0, 1, 1], [], []>} : vector<256x64xbf16>, vector<64x3xbf16>, vector<256x3xf32> -> vector<256x3xf32>
    %465 = arith.addf %453, %464 : vector<256x3xf32>
    %c1_416 = arith.constant 1 : index
    %c0_417 = arith.constant 0 : index
    %c0_418 = arith.constant 0 : index
    %466 = vector.load %arg23[%c1_416, %c0_417, %c0_418] : memref<4x96x3xbf16, #tpu.memory_space<vmem>>, vector<1x96x3xbf16>
    %467 = vector.shape_cast %466 : vector<1x96x3xbf16> to vector<96x3xbf16>
    %468 = vector.extract_strided_slice %467 {offsets = [0, 0], sizes = [64, 3], strides = [1, 1]} : vector<96x3xbf16> to vector<64x3xbf16>
    %cst_419 = arith.constant dense<0.000000e+00> : vector<64x3xf32>
    %469 = tpu.matmul %452, %468, %cst_419 {dimension_numbers = #tpu.dot_dimension_numbers<[1], [0], [0], [1], [0, 0, 1, 1], [], []>} : vector<64x64xbf16>, vector<64x3xbf16>, vector<64x3xf32> -> vector<64x3xf32>
    %470 = vector.extract_strided_slice %467 {offsets = [64, 0], sizes = [32, 3], strides = [1, 1]} : vector<96x3xbf16> to vector<32x3xbf16>
    %cst_420 = arith.constant dense<0.000000e+00> : vector<64x3xf32>
    %471 = tpu.matmul %79, %470, %cst_420 {dimension_numbers = #tpu.dot_dimension_numbers<[1], [0], [0], [1], [0, 0, 1, 1], [], []>} : vector<64x32xbf16>, vector<32x3xbf16>, vector<64x3xf32> -> vector<64x3xf32>
    %472 = arith.addf %469, %471 : vector<64x3xf32>
    %c1_421 = arith.constant 1 : index
    %c0_422 = arith.constant 0 : index
    %c0_423 = arith.constant 0 : index
    %473 = vector.load %arg25[%c1_421, %c0_422, %c0_423] : memref<4x256x64xbf16, #tpu.memory_space<vmem>>, vector<1x256x64xbf16>
    %474 = vector.shape_cast %473 : vector<1x256x64xbf16> to vector<256x64xbf16>
    %475 = arith.truncf %472 : vector<64x3xf32> to vector<64x3xbf16>
    %cst_424 = arith.constant dense<0.000000e+00> : vector<256x3xf32>
    %476 = tpu.matmul %474, %475, %cst_424 {dimension_numbers = #tpu.dot_dimension_numbers<[1], [0], [0], [1], [0, 0, 1, 1], [], []>} : vector<256x64xbf16>, vector<64x3xbf16>, vector<256x3xf32> -> vector<256x3xf32>
    %477 = arith.addf %465, %476 : vector<256x3xf32>
    %c2_425 = arith.constant 2 : index
    %c0_426 = arith.constant 0 : index
    %c0_427 = arith.constant 0 : index
    %478 = vector.load %arg23[%c2_425, %c0_426, %c0_427] : memref<4x96x3xbf16, #tpu.memory_space<vmem>>, vector<1x96x3xbf16>
    %479 = vector.shape_cast %478 : vector<1x96x3xbf16> to vector<96x3xbf16>
    %480 = vector.extract_strided_slice %479 {offsets = [0, 0], sizes = [64, 3], strides = [1, 1]} : vector<96x3xbf16> to vector<64x3xbf16>
    %cst_428 = arith.constant dense<0.000000e+00> : vector<64x3xf32>
    %481 = tpu.matmul %452, %480, %cst_428 {dimension_numbers = #tpu.dot_dimension_numbers<[1], [0], [0], [1], [0, 0, 1, 1], [], []>} : vector<64x64xbf16>, vector<64x3xbf16>, vector<64x3xf32> -> vector<64x3xf32>
    %482 = vector.extract_strided_slice %479 {offsets = [64, 0], sizes = [32, 3], strides = [1, 1]} : vector<96x3xbf16> to vector<32x3xbf16>
    %cst_429 = arith.constant dense<0.000000e+00> : vector<64x3xf32>
    %483 = tpu.matmul %79, %482, %cst_429 {dimension_numbers = #tpu.dot_dimension_numbers<[1], [0], [0], [1], [0, 0, 1, 1], [], []>} : vector<64x32xbf16>, vector<32x3xbf16>, vector<64x3xf32> -> vector<64x3xf32>
    %484 = arith.addf %481, %483 : vector<64x3xf32>
    %c2_430 = arith.constant 2 : index
    %c0_431 = arith.constant 0 : index
    %c0_432 = arith.constant 0 : index
    %485 = vector.load %arg25[%c2_430, %c0_431, %c0_432] : memref<4x256x64xbf16, #tpu.memory_space<vmem>>, vector<1x256x64xbf16>
    %486 = vector.shape_cast %485 : vector<1x256x64xbf16> to vector<256x64xbf16>
    %487 = arith.truncf %484 : vector<64x3xf32> to vector<64x3xbf16>
    %cst_433 = arith.constant dense<0.000000e+00> : vector<256x3xf32>
    %488 = tpu.matmul %486, %487, %cst_433 {dimension_numbers = #tpu.dot_dimension_numbers<[1], [0], [0], [1], [0, 0, 1, 1], [], []>} : vector<256x64xbf16>, vector<64x3xbf16>, vector<256x3xf32> -> vector<256x3xf32>
    %489 = arith.addf %477, %488 : vector<256x3xf32>
    %c3_434 = arith.constant 3 : index
    %c0_435 = arith.constant 0 : index
    %c0_436 = arith.constant 0 : index
    %490 = vector.load %arg23[%c3_434, %c0_435, %c0_436] : memref<4x96x3xbf16, #tpu.memory_space<vmem>>, vector<1x96x3xbf16>
    %491 = vector.shape_cast %490 : vector<1x96x3xbf16> to vector<96x3xbf16>
    %492 = vector.extract_strided_slice %491 {offsets = [0, 0], sizes = [64, 3], strides = [1, 1]} : vector<96x3xbf16> to vector<64x3xbf16>
    %cst_437 = arith.constant dense<0.000000e+00> : vector<64x3xf32>
    %493 = tpu.matmul %452, %492, %cst_437 {dimension_numbers = #tpu.dot_dimension_numbers<[1], [0], [0], [1], [0, 0, 1, 1], [], []>} : vector<64x64xbf16>, vector<64x3xbf16>, vector<64x3xf32> -> vector<64x3xf32>
    %494 = vector.extract_strided_slice %491 {offsets = [64, 0], sizes = [32, 3], strides = [1, 1]} : vector<96x3xbf16> to vector<32x3xbf16>
    %cst_438 = arith.constant dense<0.000000e+00> : vector<64x3xf32>
    %495 = tpu.matmul %79, %494, %cst_438 {dimension_numbers = #tpu.dot_dimension_numbers<[1], [0], [0], [1], [0, 0, 1, 1], [], []>} : vector<64x32xbf16>, vector<32x3xbf16>, vector<64x3xf32> -> vector<64x3xf32>
    %496 = arith.addf %493, %495 : vector<64x3xf32>
    %c3_439 = arith.constant 3 : index
    %c0_440 = arith.constant 0 : index
    %c0_441 = arith.constant 0 : index
    %497 = vector.load %arg25[%c3_439, %c0_440, %c0_441] : memref<4x256x64xbf16, #tpu.memory_space<vmem>>, vector<1x256x64xbf16>
    %498 = vector.shape_cast %497 : vector<1x256x64xbf16> to vector<256x64xbf16>
    %499 = arith.truncf %496 : vector<64x3xf32> to vector<64x3xbf16>
    %cst_442 = arith.constant dense<0.000000e+00> : vector<256x3xf32>
    %500 = tpu.matmul %498, %499, %cst_442 {dimension_numbers = #tpu.dot_dimension_numbers<[1], [0], [0], [1], [0, 0, 1, 1], [], []>} : vector<256x64xbf16>, vector<64x3xbf16>, vector<256x3xf32> -> vector<256x3xf32>
    %501 = arith.addf %489, %500 : vector<256x3xf32>
    %c0_443 = arith.constant 0 : index
    %c0_444 = arith.constant 0 : index
    %502 = vector.load %arg24[%c0_443, %c0_444] : memref<1x3xf32, #tpu.memory_space<vmem>>, vector<1x3xf32>
    %503 = vector.broadcast %502 : vector<1x3xf32> to vector<256x3xf32>
    %504 = arith.addf %501, %503 : vector<256x3xf32>
    %c0_445 = arith.constant 0 : index
    %c0_446 = arith.constant 0 : index
    %c0_447 = arith.constant 0 : index
    %505 = vector.load %arg26[%c0_445, %c0_446, %c0_447] : memref<1x256x3xf32, #tpu.memory_space<vmem>>, vector<1x256x3xf32>
    %506 = vector.shape_cast %505 : vector<1x256x3xf32> to vector<256x3xf32>
    %507 = vector.shape_cast %504 : vector<256x3xf32> to vector<1x256x3xf32>
    tpu.vector_store %arg26[%c0_445, %c0_446, %c0_447], %507 {strides = array<i32>} : memref<1x256x3xf32, #tpu.memory_space<vmem>>, vector<1x256x3xf32>,
    return
  }
  func.func @transform_0(%arg0: i32) -> (i32, i32, i32) {
    %c0_i32 = arith.constant 0 : i32
    %c0_i32_0 = arith.constant 0 : i32
    %c0_i32_1 = arith.constant 0 : i32
    return %arg0, %c0_i32, %c0_i32_0 : i32, i32, i32
  }
  func.func @transform_1(%arg0: i32) -> (i32, i32, i32) {
    %c0_i32 = arith.constant 0 : i32
    %c0_i32_0 = arith.constant 0 : i32
    %c0_i32_1 = arith.constant 0 : i32
    %c0_i32_2 = arith.constant 0 : i32
    return %c0_i32, %c0_i32_0, %c0_i32_1 : i32, i32, i32
  }
  func.func @transform_2(%arg0: i32) -> (i32, i32) {
    %c0_i32 = arith.constant 0 : i32
    %c0_i32_0 = arith.constant 0 : i32
    %c0_i32_1 = arith.constant 0 : i32
    return %c0_i32, %c0_i32_0 : i32, i32
  }
  func.func @transform_3(%arg0: i32) -> (i32, i32, i32) {
    %c0_i32 = arith.constant 0 : i32
    %c0_i32_0 = arith.constant 0 : i32
    %c0_i32_1 = arith.constant 0 : i32
    %c0_i32_2 = arith.constant 0 : i32
    return %c0_i32, %c0_i32_0, %c0_i32_1 : i32, i32, i32
  }
  func.func @transform_4(%arg0: i32) -> (i32, i32, i32) {
    %c0_i32 = arith.constant 0 : i32
    %c0_i32_0 = arith.constant 0 : i32
    %c0_i32_1 = arith.constant 0 : i32
    %c0_i32_2 = arith.constant 0 : i32
    return %c0_i32, %c0_i32_0, %c0_i32_1 : i32, i32, i32
  }
  func.func @transform_5(%arg0: i32) -> (i32, i32) {
    %c0_i32 = arith.constant 0 : i32
    %c0_i32_0 = arith.constant 0 : i32
    %c0_i32_1 = arith.constant 0 : i32
    return %c0_i32, %c0_i32_0 : i32, i32
  }
  func.func @transform_6(%arg0: i32) -> (i32, i32, i32) {
    %c0_i32 = arith.constant 0 : i32
    %c0_i32_0 = arith.constant 0 : i32
    %c0_i32_1 = arith.constant 0 : i32
    %c0_i32_2 = arith.constant 0 : i32
    return %c0_i32, %c0_i32_0, %c0_i32_1 : i32, i32, i32
  }
  func.func @transform_7(%arg0: i32) -> (i32, i32, i32) {
    %c0_i32 = arith.constant 0 : i32
    %c0_i32_0 = arith.constant 0 : i32
    %c0_i32_1 = arith.constant 0 : i32
    %c0_i32_2 = arith.constant 0 : i32
    return %c0_i32, %c0_i32_0, %c0_i32_1 : i32, i32, i32
  }
  func.func @transform_8(%arg0: i32) -> (i32, i32) {
    %c0_i32 = arith.constant 0 : i32
    %c0_i32_0 = arith.constant 0 : i32
    %c0_i32_1 = arith.constant 0 : i32
    return %c0_i32, %c0_i32_0 : i32, i32
  }
  func.func @transform_9(%arg0: i32) -> (i32, i32, i32) {
    %c0_i32 = arith.constant 0 : i32
    %c0_i32_0 = arith.constant 0 : i32
    %c0_i32_1 = arith.constant 0 : i32
    %c0_i32_2 = arith.constant 0 : i32
    return %c0_i32, %c0_i32_0, %c0_i32_1 : i32, i32, i32
  }
  func.func @transform_10(%arg0: i32) -> (i32, i32, i32) {
    %c0_i32 = arith.constant 0 : i32
    %c0_i32_0 = arith.constant 0 : i32
    %c0_i32_1 = arith.constant 0 : i32
    %c0_i32_2 = arith.constant 0 : i32
    return %c0_i32, %c0_i32_0, %c0_i32_1 : i32, i32, i32
  }
  func.func @transform_11(%arg0: i32) -> (i32, i32) {
    %c0_i32 = arith.constant 0 : i32
    %c0_i32_0 = arith.constant 0 : i32
    %c0_i32_1 = arith.constant 0 : i32
    return %c0_i32, %c0_i32_0 : i32, i32
  }
  func.func @transform_12(%arg0: i32) -> (i32, i32, i32) {
    %c0_i32 = arith.constant 0 : i32
    %c0_i32_0 = arith.constant 0 : i32
    %c0_i32_1 = arith.constant 0 : i32
    %c0_i32_2 = arith.constant 0 : i32
    return %c0_i32, %c0_i32_0, %c0_i32_1 : i32, i32, i32
  }
  func.func @transform_13(%arg0: i32) -> (i32, i32, i32) {
    %c0_i32 = arith.constant 0 : i32
    %c0_i32_0 = arith.constant 0 : i32
    %c0_i32_1 = arith.constant 0 : i32
    %c0_i32_2 = arith.constant 0 : i32
    return %c0_i32, %c0_i32_0, %c0_i32_1 : i32, i32, i32
  }
  func.func @transform_14(%arg0: i32) -> (i32, i32) {
    %c0_i32 = arith.constant 0 : i32
    %c0_i32_0 = arith.constant 0 : i32
    %c0_i32_1 = arith.constant 0 : i32
    return %c0_i32, %c0_i32_0 : i32, i32
  }
  func.func @transform_15(%arg0: i32) -> (i32, i32, i32) {
    %c0_i32 = arith.constant 0 : i32
    %c0_i32_0 = arith.constant 0 : i32
    %c0_i32_1 = arith.constant 0 : i32
    %c0_i32_2 = arith.constant 0 : i32
    return %c0_i32, %c0_i32_0, %c0_i32_1 : i32, i32, i32
  }
  func.func @transform_16(%arg0: i32) -> (i32, i32, i32) {
    %c0_i32 = arith.constant 0 : i32
    %c0_i32_0 = arith.constant 0 : i32
    %c0_i32_1 = arith.constant 0 : i32
    %c0_i32_2 = arith.constant 0 : i32
    return %c0_i32, %c0_i32_0, %c0_i32_1 : i32, i32, i32
  }
  func.func @transform_17(%arg0: i32) -> (i32, i32) {
    %c0_i32 = arith.constant 0 : i32
    %c0_i32_0 = arith.constant 0 : i32
    %c0_i32_1 = arith.constant 0 : i32
    return %c0_i32, %c0_i32_0 : i32, i32
  }
  func.func @transform_18(%arg0: i32) -> (i32, i32, i32) {
    %c0_i32 = arith.constant 0 : i32
    %c0_i32_0 = arith.constant 0 : i32
    %c0_i32_1 = arith.constant 0 : i32
    %c0_i32_2 = arith.constant 0 : i32
    return %c0_i32, %c0_i32_0, %c0_i32_1 : i32, i32, i32
  }
  func.func @transform_19(%arg0: i32) -> (i32, i32, i32) {
    %c0_i32 = arith.constant 0 : i32
    %c0_i32_0 = arith.constant 0 : i32
    %c0_i32_1 = arith.constant 0 : i32
    %c0_i32_2 = arith.constant 0 : i32
    return %c0_i32, %c0_i32_0, %c0_i32_1 : i32, i32, i32
  }
  func.func @transform_20(%arg0: i32) -> (i32, i32) {
    %c0_i32 = arith.constant 0 : i32
    %c0_i32_0 = arith.constant 0 : i32
    %c0_i32_1 = arith.constant 0 : i32
    return %c0_i32, %c0_i32_0 : i32, i32
  }
  func.func @transform_21(%arg0: i32) -> (i32, i32, i32) {
    %c0_i32 = arith.constant 0 : i32
    %c0_i32_0 = arith.constant 0 : i32
    %c0_i32_1 = arith.constant 0 : i32
    %c0_i32_2 = arith.constant 0 : i32
    return %c0_i32, %c0_i32_0, %c0_i32_1 : i32, i32, i32
  }
  func.func @transform_22(%arg0: i32) -> (i32, i32, i32) {
    %c0_i32 = arith.constant 0 : i32
    %c0_i32_0 = arith.constant 0 : i32
    %c0_i32_1 = arith.constant 0 : i32
    %c0_i32_2 = arith.constant 0 : i32
    return %c0_i32, %c0_i32_0, %c0_i32_1 : i32, i32, i32
  }
  func.func @transform_23(%arg0: i32) -> (i32, i32) {
    %c0_i32 = arith.constant 0 : i32
    %c0_i32_0 = arith.constant 0 : i32
    %c0_i32_1 = arith.constant 0 : i32
    return %c0_i32, %c0_i32_0 : i32, i32
  }
  func.func @transform_24(%arg0: i32) -> (i32, i32, i32) {
    %c0_i32 = arith.constant 0 : i32
    %c0_i32_0 = arith.constant 0 : i32
    %c0_i32_1 = arith.constant 0 : i32
    %c0_i32_2 = arith.constant 0 : i32
    return %c0_i32, %c0_i32_0, %c0_i32_1 : i32, i32, i32
  }
  func.func @transform_25(%arg0: i32) -> (i32, i32, i32) {
    %c0_i32 = arith.constant 0 : i32
    %c0_i32_0 = arith.constant 0 : i32
    %c0_i32_1 = arith.constant 0 : i32
    return %arg0, %c0_i32, %c0_i32_0 : i32, i32, i32
  }
}

</mosaic_0001>

<bundles_post_ra>
// kernel: _lambda_.1
= control target key start
LH: loop header
LB: loop body
LE: loop exit
PB: predicated region body
PF: predicated region fallthrough
CT: control target
= control target key end

     0   :  { %s20813_s0 = inlined_call_operand.vmem [shape: f32[2,256,6], index: 0, kind: input, shape index: {}]   ;;  %s20814_s1 = inlined_call_operand.hbm [shape: bf16[9,6,32], index: 1, kind: input, shape index: {}]   ;;  %s20815_s2 = inlined_call_operand.hbm [shape: f32[1,32], index: 2, kind: input, shape index: {}]   ;;  %s20816_s3 = inlined_call_operand.vmem [shape: bf16[9,64,256], index: 3, kind: input, shape index: {}]   ;;  %s20817_s4 = inlined_call_operand.vmem [shape: bf16[9,32,64], index: 4, kind: input, shape index: {}]   ;;  %s20818_s5 = inlined_call_operand.hbm [shape: f32[1,64], index: 5, kind: input, shape index: {}]   ;;  %s20819_s6 = inlined_call_operand.hbm [shape: bf16[9,16,64], index: 6, kind: input, shape index: {}]   ;;  %s20820_s7 = inlined_call_operand.hbm [shape: bf16[9,64,128], index: 7, kind: input, shape index: {}]   ;;  %s20821_s8 = inlined_call_operand.hbm [shape: f32[1,128], index: 8, kind: input, shape index: {}]   ;;  %s20822_s9 = inlined_call_operand.hbm [shape: bf16[9,4,16], index: 9, kind: input, shape index: {}]   ;;  %s20823_s10 = inlined_call_operand.vmem [shape: bf16[9,128,256], index: 10, kind: input, shape index: {}]   ;;  %s20824_s11 = inlined_call_operand.hbm [shape: f32[1,256], index: 11, kind: input, shape index: {}]   ;;  %s20825_s12 = inlined_call_operand.vmem [shape: bf16[9,1,4], index: 12, kind: input, shape index: {}]   ;;  %s20826_s13 = inlined_call_operand.vmem [shape: bf16[4,256,256], index: 13, kind: input, shape index: {}]   ;;  %s20827_s14 = inlined_call_operand.hbm [shape: f32[1,256], index: 14, kind: input, shape index: {}]   ;;  %s20828_s15 = inlined_call_operand.vmem [shape: bf16[4,4,1], index: 15, kind: input, shape index: {}]   ;;  %s20829_s16 = inlined_call_operand.hbm [shape: bf16[4,384,128], index: 16, kind: input, shape index: {}]   ;;  %s20830_s17 = inlined_call_operand.hbm [shape: f32[1,128], index: 17, kind: input, shape index: {}]   ;;  %s20831_s18 = inlined_call_operand.vmem [shape: bf16[4,16,4], index: 18, kind: input, shape index: {}]   ;;  %s20832_s19 = inlined_call_operand.vmem [shape: bf16[4,192,64], index: 19, kind: input, shape index: {}]   ;;  %s20833_s20 = inlined_call_operand.hbm [shape: f32[1,64], index: 20, kind: input, shape index: {}]   ;;  %s20834_s21 = inlined_call_operand.vmem [shape: bf16[4,64,16], index: 21, kind: input, shape index: {}]   ;;  %s20835_s22 = inlined_call_operand.vmem [shape: bf16[4,96,3], index: 22, kind: input, shape index: {}]   ;;  %s20836_s23 = inlined_call_operand.hbm [shape: f32[1,3], index: 23, kind: input, shape index: {}]   ;;  %s20837_s24 = inlined_call_operand.vmem [shape: bf16[4,256,64], index: 24, kind: input, shape index: {}]   ;;  %s20838_s25 = inlined_call_operand.vmem [shape: f32[2,256,3], index: 25, kind: output, shape index: {}]  }
   0x1   :  { %20844 = sst [smem:[#allocation30_spill]] %s20813_s0 }
   0x2   :  { %20845 = sst [smem:[#allocation31_spill]] %s20814_s1 }
   0x3   :  { %20846 = sst [smem:[#allocation32_spill]] %s20815_s2 }
   0x4   :  { %20847 = sst [smem:[#allocation33_spill]] %s20816_s3 }
   0x5   :  { %20848 = sst [smem:[#allocation34_spill]] %s20817_s4 }
   0x6   :  { %20849 = sst [smem:[#allocation35_spill]] %s20818_s5 }
   0x7   :  { %20850 = sst [smem:[#allocation36_spill]] %s20819_s6 }
   0x8   :  { %20851 = sst [smem:[#allocation37_spill]] %s20820_s7 }
   0x9   :  { %20852 = sst [smem:[#allocation38_spill]] %s20821_s8 }
   0xa   :  { %20853 = sst [smem:[#allocation39_spill]] %s20822_s9 }
   0xb   :  { %20854 = sst [smem:[#allocation40_spill]] %s20837_s24 }
   0xc   :  { %20855 = sst [smem:[#allocation41_spill]] %s20838_s25 }
   0xd   :  { %30 = vsyncpa [#allocation3], 0 }
   0xe   :  { %31 = vsyncpa [#allocation5], 0 }
   0xf   :  { %32 = vsyncpa [#allocation8], 0 }
  0x10   :  { %33 = vsyncpa [#allocation11], 0 }
  0x11   :  { %34 = vsyncpa [#allocation14], 0 }
  0x12   :  { %35 = vsyncpa [#allocation17], 0 }
  0x13   :  { %36 = vsyncpa [#allocation20], 0  ;;  %s17671_s29 = smov 0  }
  0x14 LB: > { %20856 = sst [smem:[#allocation29_spill]] %s17519_s29  ;;  %s17521_s2 = smov [#allocation4]   ;;  %s17519_s29 = sphi %s17671_s29, %s42_s29  }
  0x15   : > { %s629_s6 = sshll.u32 %s17521_s2, 4  ;;  %s17677_s30 = sadd.s32 4294967295, %s17519_s29   ;;  %s630_s6 = int_to_ptr.vmem [resolvable:$true] %s629_s6 }
  0x16   : > { %p12757_p0 = scmp.ge.s32.totalorder %s17519_s29, 1  ;;  %p603_p1 = scmp.lt.s32.totalorder %s17519_s29, 3 }
  0x17   : > { %p20843_p2 = scmp.eq.s32.totalorder %s17677_s30, 0  ;;  %s17522_s3 = smov [#allocation7]  }
  0x18   : > { %p17682_p3 = pnand %p12757_p0, %p603_p1  ;;  %s656_s26 = sshll.u32 %s17522_s3, 4  ;;  %s17688_s26 = int_to_ptr.vmem [resolvable:$true] %s656_s26 }
  0x19   : > { %s17523_s8 = smov [#allocation10]   ;;  %s17524_s4 = smov [#allocation13]  }
  0x1a   : > { %p16222_p4 = pneg %p17682_p3  ;;  %s683_s27 = sshll.u32 %s17523_s8, 4  ;;  %s17696_s27 = int_to_ptr.vmem [resolvable:$true] %s683_s27 }
  0x1b   : > { %s17698_s28 = sshll.u32 %s17524_s4, 4  ;;  %s17158_s5 = scalar_lea.vmem %s630_s6, 16  ;;  %s711_s28 = int_to_ptr.vmem [resolvable:$true] %s17698_s28 }
  0x1c   : > { %p17692_p5 = pnand %p20843_p2, %p16222_p4  ;;  %p17159_p7 = scmp.ne.s32.totalorder %s630_s6, %s17158_s5 }
  0x1d   : > { %s17165_s0 = scalar_lea.vmem %s630_s6, 32  ;;  %p17166_p10 = scmp.lt.s32.totalorder %s630_s6, %s630_s6 }
  0x1e   : > { %p17702_p6 = pneg %p17692_p5  ;;  %p17167_p11 = scmp.lt.s32.totalorder %s17165_s0, %s17158_s5 }
  0x20   : > { %p17161_p8 = pnand %p17159_p7, %p17702_p6  ;;  %p17168_p12 = por %p17167_p11, %p17166_p10 }
  0x22   : > { %p17162_p9 = pneg %p17161_p8 }
  0x24   : > { %p17169_p13 = pnand %p17168_p12, %p17162_p9 }
  0x26   : > { %17172 = shalt.err (!%p17169_p13)
}
  0x27   : > { %s20860_s8 = sld [smem:[#allocation32_spill]]  ;;  %s17184_s4 = scalar_lea.vmem %s17688_s26, 1152 }
  0x28   : > { %p17185_p0 = scmp.ne.s32.totalorder %s17688_s26, %s17184_s4  ;;  %p17192_p7 = scmp.lt.s32.totalorder %s17688_s26, %s17688_s26 }
  0x29   : > { %p17193_p8 = scmp.lt.s32.totalorder %s17184_s4, %s17184_s4 }
  0x2a   : > { %p17187_p1 = pnand %p17185_p0, %p17702_p6 }
  0x2b   : > { %p17194_p9 = por %p17193_p8, %p17192_p7 }
  0x2c   : > { %p17188_p4 = pneg %p17187_p1 }
  0x2d   : > { %16228 = dma.hbm_to_vmem [thread:$0]  (!%p17692_p5), %s20860_s8, 16, %s630_s6, [#allocation5]  }
  0x2e   : > { %p17195_p10 = pnand %p17194_p9, %p17188_p4 }
  0x30   : > { %17198 = shalt.err (!%p17195_p10)
}
  0x31   : > { %s17525_s5 = smov 64   ;;  %s17526_s6 = smov 4  }
  0x32   : > { %s20861_s3 = sld [smem:[#allocation36_spill]]  ;;  %s17210_s8 = scalar_lea.vmem %s17696_s27, 16 }
  0x33   : > { %p17211_p11 = scmp.ne.s32.totalorder %s17696_s27, %s17210_s8  ;;  %s17217_s4 = scalar_lea.vmem %s17696_s27, 32 }
  0x34   : > { %p17218_p0 = scmp.lt.s32.totalorder %s17696_s27, %s17696_s27  ;;  %p17219_p1 = scmp.lt.s32.totalorder %s17217_s4, %s17210_s8 }
  0x35   : > { %p17213_p12 = pnand %p17211_p11, %p17702_p6 }
  0x36   : > { %p17220_p4 = por %p17219_p1, %p17218_p0 }
  0x37   : > { %p17214_p13 = pneg %p17213_p12 }
  0x38   : > { %16234 = dma.hbm_to_vmem [thread:$0]  (!%p17692_p5), %s20861_s3, 1152, %s17688_s26, [#allocation8], %s17525_s5, %s17525_s5, %s17526_s6  }
  0x39   : > { %p17221_p7 = pnand %p17220_p4, %p17214_p13 }
  0x3b   : > { %17224 = shalt.err (!%p17221_p7)
}
  0x3c   : > { %s20862_s24 = sld [smem:[#allocation38_spill]]  ;;  %s17236_s26 = scalar_lea.vmem %s711_s28, 32 }
  0x3d   : > { %p17237_p8 = scmp.ne.s32.totalorder %s711_s28, %s17236_s26  ;;  %p17244_p11 = scmp.lt.s32.totalorder %s711_s28, %s711_s28 }
  0x3e   : > { %p17245_p12 = scmp.lt.s32.totalorder %s17236_s26, %s17236_s26 }
  0x3f   : > { %p17239_p9 = pnand %p17237_p8, %p17702_p6 }
  0x40   : > { %p17246_p0 = por %p17245_p12, %p17244_p11 }
  0x41   : > { %p17240_p10 = pneg %p17239_p9 }
  0x42   : > { %16240 = dma.hbm_to_vmem [thread:$0]  (!%p17692_p5), %s20862_s24, 16, %s17696_s27, [#allocation11]  }
  0x43   : > { %p17247_p13 = pnand %p17246_p0, %p17240_p10 }
  0x45   : > { %17250 = shalt.err (!%p17247_p13)
}
  0x46   : > { %16246 = dma.hbm_to_vmem [thread:$0]  (!%p17692_p5), %s20824_s11, 32, %s711_s28, [#allocation14]  }
  0x47   : > { %s17527_s25 = smov [#allocation16]   ;;  %s17528_s29 = smov [#allocation19]  }
  0x48   : > { %s740_s24 = sshll.u32 %s17527_s25, 4  ;;  %s771_s27 = sshll.u32 %s17528_s29, 4  ;;  %s741_s24 = int_to_ptr.vmem [resolvable:$true] %s740_s24  ;;  %s772_s27 = int_to_ptr.vmem [resolvable:$true] %s771_s27 }
  0x49   : > { %s17262_s3 = scalar_lea.vmem %s741_s24, 12288  ;;  %p17270_p8 = scmp.lt.s32.totalorder %s741_s24, %s741_s24 }
  0x4a   : > { %p17263_p1 = scmp.ne.s32.totalorder %s741_s24, %s17262_s3  ;;  %p17271_p9 = scmp.lt.s32.totalorder %s17262_s3, %s17262_s3 }
  0x4c   : > { %p17265_p4 = pnand %p17263_p1, %p17702_p6  ;;  %p17272_p10 = por %p17271_p9, %p17270_p8 }
  0x4e   : > { %p17266_p7 = pneg %p17265_p4 }
  0x50   : > { %p17273_p11 = pnand %p17272_p10, %p17266_p7 }
  0x52   : > { %17276 = shalt.err (!%p17273_p11)
}
  0x53   : > { %16252 = dma.hbm_to_vmem [thread:$0]  (!%p17692_p5), %s20829_s16, 12288, %s741_s24, [#allocation17], %s17525_s5, %s17525_s5, %s17526_s6  }
  0x54   : > { %s17288_s4 = scalar_lea.vmem %s772_s27, 16  ;;  %s17295_s26 = scalar_lea.vmem %s772_s27, 32 }
  0x55   : > { %p17289_p12 = scmp.ne.s32.totalorder %s772_s27, %s17288_s4  ;;  %p17296_p1 = scmp.lt.s32.totalorder %s772_s27, %s772_s27 }
  0x56   : > { %p17297_p4 = scmp.lt.s32.totalorder %s17295_s26, %s17288_s4 }
  0x57   : > { %p17291_p0 = pnand %p17289_p12, %p17702_p6 }
  0x58   : > { %p17298_p7 = por %p17297_p4, %p17296_p1 }
  0x59   : > { %p17292_p13 = pneg %p17291_p0 }
  0x5b   : > { %p17299_p8 = pnand %p17298_p7, %p17292_p13 }
  0x5d   : > { %17302 = shalt.err (!%p17299_p8)
}
  0x5e   : > { %16258 = dma.hbm_to_vmem [thread:$0]  (!%p17692_p5), %s20833_s20, 16, %s772_s27, [#allocation20]  }
  0x5f   : > { %s17529_s25 = smov [#allocation2]   ;;  %s17530_s29 = smov [#allocation6]  }
  0x60   : > { %s615_s24 = sshll.u32 %s17529_s25, 4  ;;  %s646_s3 = sshll.u32 %s17530_s29, 4  ;;  %s616_s24 = int_to_ptr.vmem [resolvable:$true] %s615_s24  ;;  %s647_s3 = int_to_ptr.vmem [resolvable:$true] %s646_s3 }
  0x61   : > { %s17314_s28 = scalar_lea.vmem %s616_s24, 576  ;;  %p17322_p12 = scmp.lt.s32.totalorder %s616_s24, %s616_s24 }
  0x62   : > { %p17315_p9 = scmp.ne.s32.totalorder %s616_s24, %s17314_s28  ;;  %p17323_p0 = scmp.lt.s32.totalorder %s17314_s28, %s17314_s28 }
  0x64   : > { %p17317_p10 = pnand %p17315_p9, %p17702_p6  ;;  %p17324_p13 = por %p17323_p0, %p17322_p12 }
  0x66   : > { %p17318_p11 = pneg %p17317_p10 }
  0x68   : > { %p17325_p1 = pnand %p17324_p13, %p17318_p11 }
  0x6a   : > { %17328 = shalt.err (!%p17325_p1)
}
  0x6b   : > { %s20863_s4 = sld [smem:[#allocation31_spill]]  ;;  %s17340_s26 = scalar_lea.vmem %s647_s3, 16 }
  0x6c   : > { %p17341_p4 = scmp.ne.s32.totalorder %s647_s3, %s17340_s26  ;;  %s17347_s0 = scalar_lea.vmem %s647_s3, 32 }
  0x6d   : > { %p17348_p9 = scmp.lt.s32.totalorder %s647_s3, %s647_s3  ;;  %p17349_p10 = scmp.lt.s32.totalorder %s17347_s0, %s17340_s26 }
  0x6e   : > { %p17343_p7 = pnand %p17341_p4, %p17702_p6 }
  0x6f   : > { %p17350_p11 = por %p17349_p10, %p17348_p9 }
  0x70   : > { %p17344_p8 = pneg %p17343_p7 }
  0x71   : > { %16225 = dma.hbm_to_vmem [thread:$0]  (!%p17692_p5), %s20863_s4, 576, %s616_s24, [#allocation3], %s17525_s5, %s17525_s5, %s17526_s6  }
  0x72   : > { %p17351_p12 = pnand %p17350_p11, %p17344_p8 }
  0x74   : > { %17354 = shalt.err (!%p17351_p12)
}
  0x75   : > { %s20864_s29 = sld [smem:[#allocation35_spill]]  ;;  %s17531_s24 = smov [#allocation9]  }
  0x76   : > { %s669_s28 = sshll.u32 %s17531_s24, 4  ;;  %s17532_s27 = smov [#allocation12]   ;;  %s670_s28 = int_to_ptr.vmem [resolvable:$true] %s669_s28 }
  0x77   : > { %s693_s8 = sshll.u32 %s17532_s27, 4  ;;  %s17366_s4 = scalar_lea.vmem %s670_s28, 4608  ;;  %s694_s8 = int_to_ptr.vmem [resolvable:$true] %s693_s8 }
  0x78   : > { %p17367_p0 = scmp.ne.s32.totalorder %s670_s28, %s17366_s4  ;;  %p17374_p4 = scmp.lt.s32.totalorder %s670_s28, %s670_s28 }
  0x79   : > { %p17375_p7 = scmp.lt.s32.totalorder %s17366_s4, %s17366_s4 }
  0x7a   : > { %p17369_p13 = pnand %p17367_p0, %p17702_p6 }
  0x7b   : > { %16231 = dma.hbm_to_vmem [thread:$0]  (!%p17692_p5), %s20864_s29, 16, %s647_s3, [#allocation5]  }
  0x7c   : > { %p17370_p1 = pneg %p17369_p13  ;;  %p17376_p8 = por %p17375_p7, %p17374_p4 }
  0x7e   : > { %p17377_p9 = pnand %p17376_p8, %p17370_p1 }
  0x80   : > { %17380 = shalt.err (!%p17377_p9)
}
  0x81   : > { %s20865_s0 = sld [smem:[#allocation37_spill]]  ;;  %s17392_s2 = scalar_lea.vmem %s694_s8, 288 }
  0x82   : > { %p17393_p10 = scmp.ne.s32.totalorder %s694_s8, %s17392_s2  ;;  %p17400_p0 = scmp.lt.s32.totalorder %s694_s8, %s694_s8 }
  0x83   : > { %p17401_p13 = scmp.lt.s32.totalorder %s17392_s2, %s17392_s2 }
  0x84   : > { %p17395_p11 = pnand %p17393_p10, %p17702_p6 }
  0x85   : > { %p17402_p1 = por %p17401_p13, %p17400_p0 }
  0x86   : > { %p17396_p12 = pneg %p17395_p11 }
  0x87   : > { %16237 = dma.hbm_to_vmem [thread:$0]  (!%p17692_p5), %s20865_s0, 4608, %s670_s28, [#allocation8], %s17525_s5, %s17525_s5, %s17526_s6  }
  0x88   : > { %p17403_p4 = pnand %p17402_p1, %p17396_p12 }
  0x8a   : > { %17406 = shalt.err (!%p17403_p4)
}
  0x8b   : > { %s17533_s25 = smov 32   ;;  %s17534_s29 = smov 2  }
  0x8c   : > { %s20866_s4 = sld [smem:[#allocation39_spill]]  ;;  %s17535_s5 = smov [#allocation15]  }
  0x8d   : > { %s727_s6 = sshll.u32 %s17535_s5, 4  ;;  %s17536_s28 = smov [#allocation18]   ;;  %s728_s6 = int_to_ptr.vmem [resolvable:$true] %s727_s6 }
  0x8e   : > { %s754_s3 = sshll.u32 %s17536_s28, 4  ;;  %s17418_s26 = scalar_lea.vmem %s728_s6, 32  ;;  %s755_s3 = int_to_ptr.vmem [resolvable:$true] %s754_s3 }
  0x8f   : > { %p17419_p7 = scmp.ne.s32.totalorder %s728_s6, %s17418_s26  ;;  %p17426_p10 = scmp.lt.s32.totalorder %s728_s6, %s728_s6 }
  0x90   : > { %p17427_p11 = scmp.lt.s32.totalorder %s17418_s26, %s17418_s26 }
  0x91   : > { %p17421_p8 = pnand %p17419_p7, %p17702_p6 }
  0x92   : > { %16243 = dma.hbm_to_vmem [thread:$0]  (!%p17692_p5), %s20866_s4, 288, %s694_s8, [#allocation11], %s17533_s25, %s17533_s25, %s17534_s29  }
  0x93   : > { %p17422_p9 = pneg %p17421_p8  ;;  %p17428_p12 = por %p17427_p11, %p17426_p10 }
  0x95   : > { %p17429_p0 = pnand %p17428_p12, %p17422_p9 }
  0x97   : > { %17432 = shalt.err (!%p17429_p0)
}
  0x98   : > { %16249 = dma.hbm_to_vmem [thread:$0]  (!%p17692_p5), %s20827_s14, 32, %s728_s6, [#allocation14]  }
  0x99   : > { %s17444_s8 = scalar_lea.vmem %s755_s3, 16  ;;  %s17451_s25 = scalar_lea.vmem %s755_s3, 32 }
  0x9a   : > { %p17445_p13 = scmp.ne.s32.totalorder %s755_s3, %s17444_s8  ;;  %p17452_p7 = scmp.lt.s32.totalorder %s755_s3, %s755_s3 }
  0x9b   : > { %p17453_p8 = scmp.lt.s32.totalorder %s17451_s25, %s17444_s8 }
  0x9c   : > { %p17447_p1 = pnand %p17445_p13, %p17702_p6 }
  0x9d   : > { %p17454_p2 = por %p17453_p8, %p17452_p7 }
  0x9e   : > { %p17448_p4 = pneg %p17447_p1 }
  0xa0   : > { %p17455_p10 = pnand %p17454_p2, %p17448_p4 }
  0xa2   : > { %17458 = shalt.err (!%p17455_p10)
}
  0xa3   : > { %16255 = dma.hbm_to_vmem [thread:$0]  (!%p17692_p5), %s20830_s17, 16, %s755_s3, [#allocation17]  }
  0xa4   : > { %s17537_s27 = smov [#allocation21]  }
  0xa5   : > { %s788_s4 = sshll.u32 %s17537_s27, 4  ;;  %s789_s4 = int_to_ptr.vmem [resolvable:$true] %s788_s4 }
  0xa6   : > { %s17470_s5 = scalar_lea.vmem %s789_s4, 16  ;;  %s17477_s6 = scalar_lea.vmem %s789_s4, 32 }
  0xa7   : > { %p17471_p9 = scmp.ne.s32.totalorder %s789_s4, %s17470_s5  ;;  %p17478_p0 = scmp.lt.s32.totalorder %s789_s4, %s789_s4 }
  0xa8   : > { %p17479_p13 = scmp.lt.s32.totalorder %s17477_s6, %s17470_s5 }
  0xa9   : > { %p17473_p11 = pnand %p17471_p9, %p17702_p6 }
  0xaa   : > { %p17480_p2 = por %p17479_p13, %p17478_p0 }
  0xab   : > { %p17474_p12 = pneg %p17473_p11 }
  0xad   : > { %p17481_p1 = pnand %p17480_p2, %p17474_p12 }
  0xaf   : > { %17484 = shalt.err (!%p17481_p1)
}
  0xb0   : > { %16261 = dma.hbm_to_vmem [thread:$0]  (!%p17692_p5), %s20836_s23, 16, %s789_s4, [#allocation20]  }
  0xb1   : > { %812 = sbr.rel (%p17682_p3) target bundleno = 9450 (0x24ea), region = 120  ;;  %p20867_p4 = scmp.eq.s32.totalorder (!%p17682_p3), %s17677_s30, 0 }
  0xb6   : > { %17490 = dma.done.wait (%p20867_p4), [#allocation3], 576   ;;  %p20868_p6 = pmov %p20867_p4 }
  0xb7   : > { %p20869_p7 = pmov %p20867_p4 }
  0xb8   : > { %17492 = vsyncadd (%p20868_p6), [#allocation3], 4294966720 }
  0xb9   : > { %17494 = dma.done.wait (%p20869_p7), [#allocation5], 32   ;;  %p20870_p8 = pmov %p20867_p4 }
  0xba   : > { %p20871_p10 = pmov %p20867_p4 }
  0xbb   : > { %17496 = vsyncadd (%p20870_p8), [#allocation5], 4294967264 }
  0xbc   : > { %17498 = dma.done.wait (%p20871_p10), [#allocation8], 5760   ;;  %p20872_p5 = pmov %p20867_p4 }
  0xbd   : > { %p20873_p3 = pmov %p20867_p4 }
  0xbe   : > { %17500 = vsyncadd (%p20872_p5), [#allocation8], 4294961536 }
  0xbf   : > { %17502 = dma.done.wait (%p20873_p3), [#allocation11], 304   ;;  %p20874_p9 = pmov %p20873_p3 }
  0xc0   : > { %p20875_p11 = pmov %p20873_p3 }
  0xc1   : > { %17504 = vsyncadd (%p20874_p9), [#allocation11], 4294966992 }
  0xc2   : > { %17506 = dma.done.wait (%p20875_p11), [#allocation14], 64   ;;  %p20876_p12 = pmov %p20873_p3 }
  0xc3   : > { %p20877_p0 = pmov %p20873_p3 }
  0xc4   : > { %17508 = vsyncadd (%p20876_p12), [#allocation14], 4294967232 }
  0xc5   : > { %17510 = dma.done.wait (%p20877_p0), [#allocation17], 12304   ;;  %p20878_p13 = pmov %p20877_p0 }
  0xc6   : > { %p20879_p2 = pmov %p20877_p0 }
  0xc7   : > { %17512 = vsyncadd (%p20878_p13), [#allocation17], 4294954992 }
  0xc8   : > { %17514 = dma.done.wait (%p20879_p2), [#allocation20], 32   ;;  %p20880_p1 = pmov %p20877_p0 }
  0xc9   : > { %p928_p4 = scmp.lt.s32.totalorder %s17677_s30, 1  ;;  %s20881_s3 = sld [smem:[#allocation30_spill]]  ;;  %v17961_v50 = vld [vmem:[#allocation2 + $0x4] sm:$0x7]  ;;  %vm1238_vm0 = vcmask 1042432   ;;  %vm1225_vm1 = vcmask 48128  }
  0xca   : > { %17516 = vsyncadd (%p20880_p1), [#allocation20], 4294967264  ;;  %s20882_s25 = sld [smem:[#allocation33_spill]]  ;;  %vm17539_vm2 = vmmov 0   ;;  %vm2869_vm3 = vcmask 523264   ;;  %vm2989_vm4 = vcmask 261120  }
  0xcb   : > { %s20888_s30 = smov (!%p928_p4, %s17677_s30), 1  ;;  %s20883_s5 = sld [smem:[#allocation34_spill]]  ;;  %vm3913_vm5 = vcmask 130048   ;;  %vm5030_vm6 = vcmask 1041408   ;;  %vm5026_vm7 = vcmask 31744   ;;  %vm7192_vm8 = vcmask 1040384  }
  0xcc   : > { %s14227_s7 = sshll.u32 %s20888_s30, 8  ;;  %vm7188_vm9 = vcmask 7168   ;;  %s20884_s4 = sld [smem:[#allocation40_spill]]  ;;  %vm12541_vm10 = vcmask 23552  }
  0xcd   : > { %s20885_s8 = sld [smem:[#allocation41_spill]] }
  0xcf   : > { %s17861_s0 = scalar_lea.vmem %s20881_s3, %s14227_s7 }
  0xd0   : > { %v969_v0 = vld [vmem:[%s17861_s0 + $0xf0] sm:$0xff]  ;;  %v970_v1 = vld [vmem:[%s17861_s0 + $0xf8] sm:$0xff]  ;;  %v967_v5 = vld [vmem:[%s17861_s0 + $0xe0] sm:$0xff] }
  0xd1   : > { %v953_v2 = vld [vmem:[%s17861_s0 + $0x70] sm:$0xff]  ;;  %v17866_v3 = vpack.c.bf16 %v970_v1, %v969_v0  ;;  %v954_v4 = vld [vmem:[%s17861_s0 + $0x78] sm:$0xff]  ;;  %v968_v6 = vld [vmem:[%s17861_s0 + $0xe8] sm:$0xff] }
  0xd2   : > { %v17871_v7 = vpack.c.bf16 %v954_v4, %v953_v2  ;;  %v17873_v8 = vpack.c.bf16 %v968_v6, %v967_v5  ;;  %v951_v9 = vld [vmem:[%s17861_s0 + $0x60] sm:$0xff]  ;;  %v952_v10 = vld [vmem:[%s17861_s0 + $0x68] sm:$0xff]  ;;  %v965_v11 = vld [vmem:[%s17861_s0 + $0xd0] sm:$0xff] }
  0xd3   : > { %14229 = vmatprep.subr.bf16.mxu0 %v17866_v3  ;;  %14269 = vmatprep.subr.bf16.mxu1 %v17866_v3  ;;  %v966_v12 = vld [vmem:[%s17861_s0 + $0xd8] sm:$0xff]  ;;  %v17883_v13 = vpack.c.bf16 %v952_v10, %v951_v9  ;;  %v949_v15 = vld [vmem:[%s17861_s0 + $0x50] sm:$0xff]  ;;  %v963_v17 = vld [vmem:[%s17861_s0 + $0xc0] sm:$0xff]  ;;  %s20664_s29 = scalar_lea.vmem %s20885_s8, %s14227_s7 }
  0xd4   : > { %14230 = vmatpush3.bf16.msra.mxu0 %v17871_v7  ;;  %14270 = vmatpush3.bf16.msra.mxu1 %v17871_v7  ;;  %v17887_v14 = vpack.c.bf16 %v966_v12, %v965_v11  ;;  %v950_v16 = vld [vmem:[%s17861_s0 + $0x58] sm:$0xff]  ;;  %v964_v18 = vld [vmem:[%s17861_s0 + $0xc8] sm:$0xff]  ;;  %v947_v21 = vld [vmem:[%s17861_s0 + $0x40] sm:$0xff]  ;;  %v1240_v12 = vsel %vm1238_vm0, %v17961_v50, 0 }
  0xd5   : > { %14231 = vmatprep.subr.bf16.mxu0 %v17873_v8  ;;  %14271 = vmatprep.subr.bf16.mxu1 %v17873_v8  ;;  %v17895_v19 = vpack.c.bf16 %v950_v16, %v949_v15  ;;  %v17899_v20 = vpack.c.bf16 %v964_v18, %v963_v17  ;;  %v948_v22 = vld [vmem:[%s17861_s0 + $0x48] sm:$0xff]  ;;  %v961_v23 = vld [vmem:[%s17861_s0 + $0xb0] sm:$0xff]  ;;  %v962_v24 = vld [vmem:[%s17861_s0 + $0xb8] sm:$0xff] }
  0xd6   : > { %v945_v25 = vld [vmem:[%s17861_s0 + $0x30] sm:$0xff]  ;;  %v946_v26 = vld [vmem:[%s17861_s0 + $0x38] sm:$0xff]  ;;  %v16318_v27 = vld [vmem:[%s20882_s25 + $0x4] ss:$8 sps:$4 sm:$0xff]   ;;  %v17912_v28 = vpack.c.bf16 %v948_v22, %v947_v21  ;;  %v17917_v30 = vpack.c.bf16 %v962_v24, %v961_v23 }
  0xd7   : > { %v959_v29 = vld [vmem:[%s17861_s0 + $0xa0] sm:$0xff]  ;;  %v960_v32 = vld [vmem:[%s17861_s0 + $0xa8] sm:$0xff]  ;;  %1067 = vmatprep.mubr.bf16.mxu0 %v16318_v27  ;;  %v17925_v33 = vpack.c.bf16 %v946_v26, %v945_v25  ;;  %v957_v37 = vld [vmem:[%s17861_s0 + $0x90] sm:$0xff] }
  0xd8   : > { %14232 = vmatpush3.bf16.msra.mxu0 %v17883_v13  ;;  %14272 = vmatpush3.bf16.msra.mxu1 %v17883_v13  ;;  %v16321_v31 = vld [vmem:[%s20882_s25 + $0x44] ss:$8 sps:$4 sm:$0xff]   ;;  %v17930_v35 = vpack.c.bf16 %v960_v32, %v959_v29  ;;  %v958_v38 = vld [vmem:[%s17861_s0 + $0x98] sm:$0xff]  ;;  %v941_v40 = vld [vmem:[%s17861_s0 + $0x10] sm:$0xff] }
  0xd9   : > { %14233 = vmatprep.subr.bf16.mxu0 %v17887_v14  ;;  %14273 = vmatprep.subr.bf16.mxu1 %v17887_v14  ;;  %v943_v34 = vld [vmem:[%s17861_s0 + $0x20] sm:$0xff]  ;;  %v944_v36 = vld [vmem:[%s17861_s0 + $0x28] sm:$0xff]  ;;  %v17942_v41 = vpack.c.bf16 %v958_v38, %v957_v37  ;;  %v942_v42 = vld [vmem:[%s17861_s0 + $0x18] sm:$0xff] }
  0xda   : > { %1186 = vmatprep.mubr.bf16.mxu1 %v16321_v31  ;;  %v17937_v39 = vpack.c.bf16 %v944_v36, %v943_v34  ;;  %v955_v43 = vld [vmem:[%s17861_s0 + $0x80] sm:$0xff]  ;;  %v956_v44 = vld [vmem:[%s17861_s0 + $0x88] sm:$0xff]  ;;  %v17949_v45 = vpack.c.bf16 %v942_v42, %v941_v40  ;;  %v16322_v53 = vld [vmem:[%s20882_s25 + $0x14] ss:$8 sps:$4 sm:$0xff]  }
  0xdb   : > { %v939_v46 = vld [vmem:[%s17861_s0] sm:$0xff]  ;;  %v17954_v47 = vpack.c.bf16 %v956_v44, %v955_v43  ;;  %v940_v48 = vld [vmem:[%s17861_s0 + $0x8] sm:$0xff]  ;;  %v16324_v54 = vld [vmem:[%s20882_s25 + $0x54] ss:$8 sps:$4 sm:$0xff]  }
  0xdc   : > { %14234 = vmatpush3.bf16.msra.mxu0 %v17895_v19  ;;  %14274 = vmatpush3.bf16.msra.mxu1 %v17895_v19  ;;  %v17959_v49 = vpack.c.bf16 %v940_v48, %v939_v46  ;;  %v16316_v51 = vld [vmem:[%s20882_s25] ss:$8 sps:$4 sm:$0xff]   ;;  %v16326_v55 = vld [vmem:[%s20882_s25 + $0x10] ss:$8 sps:$4 sm:$0xff]   ;;  %v16328_v57 = vld [vmem:[%s20882_s25 + $0x24] ss:$8 sps:$4 sm:$0xff]  }
  0xdd   : > { %14235 = vmatprep.subr.bf16.mxu0 %v17899_v20  ;;  %14275 = vmatprep.subr.bf16.mxu1 %v17899_v20  ;;  %v16319_v52 = vld [vmem:[%s20882_s25 + $0x40] ss:$8 sps:$4 sm:$0xff]   ;;  %v16327_v56 = vld [vmem:[%s20882_s25 + $0x50] ss:$8 sps:$4 sm:$0xff]   ;;  %v16330_v58 = vld [vmem:[%s20882_s25 + $0x64] ss:$8 sps:$4 sm:$0xff]  }
  0xde   : > { %v16332_v59 = vld [vmem:[%s20882_s25 + $0x20] ss:$8 sps:$4 sm:$0xff]   ;;  %v16334_v61 = vld [vmem:[%s20882_s25 + $0x34] ss:$8 sps:$4 sm:$0xff]   ;;  %v16338_v63 = vld [vmem:[%s20882_s25 + $0x30] ss:$8 sps:$4 sm:$0xff]  }
  0xdf   : > { %v16333_v60 = vld [vmem:[%s20882_s25 + $0x60] ss:$8 sps:$4 sm:$0xff]   ;;  %v16336_v62 = vld [vmem:[%s20882_s25 + $0x74] ss:$8 sps:$4 sm:$0xff]   ;;  %v16339_v0 = vld [vmem:[%s20882_s25 + $0x70] ss:$8 sps:$4 sm:$0xff]  }
  0xe0   : > { %14236 = vmatpush3.bf16.msra.mxu0 %v17912_v28  ;;  %14276 = vmatpush3.bf16.msra.mxu1 %v17912_v28  ;;  %v16342_v1 = vld [vmem:[%s20882_s25 + $0x84] ss:$8 sps:$4 sm:$0xff]   ;;  %v16340_v2 = vld [vmem:[%s20882_s25 + $0x80] ss:$8 sps:$4 sm:$0xff]   ;;  %v16343_v4 = vld [vmem:[%s20882_s25 + $0x94] ss:$8 sps:$4 sm:$0xff]  }
  0xe1   : > { %14237 = vmatprep.subr.bf16.mxu0 %v17917_v30  ;;  %14277 = vmatprep.subr.bf16.mxu1 %v17917_v30  ;;  %v16345_v5 = vld [vmem:[%s20882_s25 + $0x90] ss:$8 sps:$4 sm:$0xff]   ;;  %v16346_v6 = vld [vmem:[%s20882_s25 + $0xa4] ss:$8 sps:$4 sm:$0xff]   ;;  %v16348_v9 = vld [vmem:[%s20882_s25 + $0xa0] ss:$8 sps:$4 sm:$0xff]  }
  0xe2   : > { %v16349_v10 = vld [vmem:[%s20882_s25 + $0xb4] ss:$8 sps:$4 sm:$0xff]   ;;  %v16351_v11 = vld [vmem:[%s20882_s25 + $0xb0] ss:$8 sps:$4 sm:$0xff]   ;;  %v1104_v15 = vld [vmem:[#allocation2] sm:$0x7] }
  0xe3   : > { %v1506_v29 = vld [vmem:[#allocation2 + $0x8] sm:$0x7]  ;;  %v1320_v42 = vsel %vm1238_vm0, %v1104_v15, 0 }
  0xe4   : > { %14238 = vmatpush3.bf16.msra.mxu0 %v17925_v33  ;;  %14278 = vmatpush3.bf16.msra.mxu1 %v17925_v33  ;;  %v1520_v43 = vsel %vm1238_vm0, %v1506_v29, 0 }
  0xe5   : > { %14239 = vmatprep.subr.bf16.mxu0 %v17930_v35  ;;  %14279 = vmatprep.subr.bf16.mxu1 %v17930_v35 }
  0xe8   : > { %14240 = vmatpush3.bf16.msra.mxu0 %v17937_v39  ;;  %14280 = vmatpush3.bf16.msra.mxu1 %v17937_v39 }
  0xe9   : > { %14241 = vmatprep.subr.bf16.mxu0 %v17942_v41  ;;  %14281 = vmatprep.subr.bf16.mxu1 %v17942_v41 }
  0xec   : > { %14242 = vmatpush3.bf16.msra.mxu0 %v17949_v45  ;;  %14282 = vmatpush3.bf16.msra.mxu1 %v17949_v45 }
  0xed   : > { %14243 = vmatprep.subr.bf16.mxu0 %v17954_v47  ;;  %14283 = vmatprep.subr.bf16.mxu1 %v17954_v47 }
  0xf0   : > { %14244 = vmatpush3.bf16.msra.mxu0 %v17959_v49  ;;  %14284 = vmatpush3.bf16.msra.mxu1 %v17959_v49 }
  0xf1   : > { %14319 = vmatprep.subr.bf16.mxu0 %v17866_v3  ;;  %16161 = vmatprep.subr.msk.bf16.mxu1 %vm1238_vm0, %v17961_v50 }
  0xf3   : > { %1068 = vmatmul.mubr.bf16.vlgmr.msra.gmra.mxu0 %v16316_v51  ;;  %1187 = vmatmul.mubr.bf16.vlgmr.msra.gmra.mxu1 %v16319_v52 }
  0xf4   : > { %14320 = vmatpush3.bf16.msra.mxu0 %v17871_v7  ;;  %1075 = vmatprep.mubr.bf16.mxu0 %v16322_v53 }
  0xf5   : > { %14321 = vmatprep.subr.bf16.mxu0 %v17873_v8  ;;  %1194 = vmatprep.mubr.bf16.mxu1 %v16324_v54 }
  0xf6   : > { %15132 = vmatpush3.bf16.msra.mxu1 %v1240_v12 }
  0xf7   : > { %16162 = vmatprep.subr.msk.bf16.mxu1 %vm1238_vm0, %v1104_v15 }
  0xf8   : > { %14322 = vmatpush3.bf16.msra.mxu0 %v17883_v13 }
  0xf9   : > { %14323 = vmatprep.subr.bf16.mxu0 %v17887_v14 }
  0xfb   : > { %1076 = vmatmul.mubr.bf16.gmra.mxu0 %v16326_v55  ;;  %1195 = vmatmul.mubr.bf16.gmra.mxu1 %v16327_v56 }
  0xfc   : > { %14324 = vmatpush3.bf16.msra.mxu0 %v17895_v19  ;;  %1083 = vmatprep.mubr.bf16.mxu0 %v16328_v57 }
  0xfd   : > { %14325 = vmatprep.subr.bf16.mxu0 %v17899_v20  ;;  %1202 = vmatprep.mubr.bf16.mxu1 %v16330_v58 }
 0x100   : > { %14326 = vmatpush3.bf16.msra.mxu0 %v17912_v28 }
 0x101   : > { %14327 = vmatprep.subr.bf16.mxu0 %v17917_v30 }
 0x103   : > { %1084 = vmatmul.mubr.bf16.gmra.mxu0 %v16332_v59  ;;  %1203 = vmatmul.mubr.bf16.gmra.mxu1 %v16333_v60 }
 0x104   : > { %14328 = vmatpush3.bf16.msra.mxu0 %v17925_v33  ;;  %1091 = vmatprep.mubr.bf16.mxu0 %v16334_v61 }
 0x105   : > { %14329 = vmatprep.subr.bf16.mxu0 %v17930_v35  ;;  %1210 = vmatprep.mubr.bf16.mxu1 %v16336_v62 }
 0x108   : > { %14330 = vmatpush3.bf16.msra.mxu0 %v17937_v39 }
 0x109   : > { %14331 = vmatprep.subr.bf16.mxu0 %v17942_v41 }
 0x10b   : > { %1092 = vmatmul.mubr.bf16.gmra.mxu0 %v16338_v63  ;;  %1211 = vmatmul.mubr.bf16.gmra.mxu1 %v16339_v0 }
 0x10c   : > { %14332 = vmatpush3.bf16.msra.mxu0 %v17949_v45  ;;  %1468 = vmatprep.mubr.bf16.mxu0 %v16342_v1 }
 0x10d   : > { %14333 = vmatprep.subr.bf16.mxu0 %v17954_v47 }
 0x110   : > { %14334 = vmatpush3.bf16.msra.mxu0 %v17959_v49 }
 0x113   : > { %1469 = vmatmul.mubr.bf16.vlgmr.msra.gmra.mxu0 %v16340_v2 }
 0x114   : > { %1476 = vmatprep.mubr.bf16.mxu0 %v16343_v4 }
 0x11b   : > { %1477 = vmatmul.mubr.bf16.gmra.mxu0 %v16345_v5 }
 0x11c   : > { %1484 = vmatprep.mubr.bf16.mxu0 %v16346_v6 }
 0x123   : > { %1485 = vmatmul.mubr.bf16.gmra.mxu0 %v16348_v9 }
 0x124   : > { %1492 = vmatprep.mubr.bf16.mxu0 %v16349_v10 }
 0x12b   : > { %1493 = vmatmul.mubr.bf16.gmra.mxu0 %v16351_v11 }
 0x1b3   : > { %v14245_v16 = vpop.f32.mrf.mxu0  ;;  %v14285_v17 = vpop.f32.mrf.mxu1 }
 0x1b5   : > { %v14246_v18 = vpop.f32.mrf.mxu0  ;;  %v14286_v21 = vpop.f32.mrf.mxu1 }
 0x1b6   : > { %v14287_v26 = vadd.f32 %v14286_v21, %v14285_v17  ;;  %v14247_v6 = vadd.f32 %v14246_v18, %v14245_v16 }
 0x1b7   : > { %v14248_v22 = vpop.f32.mrf.mxu0  ;;  %v14288_v23 = vpop.f32.mrf.mxu1 }
 0x1b9   : > { %v14249_v24 = vpop.f32.mrf.mxu0  ;;  %v14289_v25 = vpop.f32.mrf.mxu1 }
 0x1ba   : > { %v14290_v27 = vadd.f32 %v14289_v25, %v14288_v23  ;;  %v14250_v9 = vadd.f32 %v14249_v24, %v14248_v22 }
 0x1bb   : > { %v14251_v31 = vpop.f32.mrf.mxu0  ;;  %v14291_v32 = vpop.f32.mrf.mxu1 }
 0x1bc   : > { %v1219_v34 = vpack.c.bf16 %v14290_v27, %v14287_v26  ;;  %v1100_v23 = vpack.c.bf16 %v14250_v9, %v14247_v6  ;;  %v16357_v6 = vld [vmem:[%s20882_s25 + $0xd0] ss:$8 sps:$4 sm:$0xff]   ;;  %v16358_v9 = vld [vmem:[%s20882_s25 + $0xe4] ss:$8 sps:$4 sm:$0xff]  }
 0x1bd   : > { %v14252_v36 = vpop.f32.mrf.mxu0  ;;  %v14292_v37 = vpop.f32.mrf.mxu1 }
 0x1be   : > { %15133 = vmatprep.mubr.msk.bf16.mxu1 %vm1225_vm1, %v1219_v34  ;;  %v14293_v48 = vadd.f32 %v14292_v37, %v14291_v32  ;;  %v14253_v27 = vadd.f32 %v14252_v36, %v14251_v31 }
 0x1bf   : > { %v14254_v38 = vpop.f32.mrf.mxu0  ;;  %v14294_v40 = vpop.f32.mrf.mxu1 }
 0x1c1   : > { %v14255_v44 = vpop.f32.mrf.mxu0  ;;  %v14295_v46 = vpop.f32.mrf.mxu1 }
 0x1c2   : > { %v14296_v50 = vadd.f32 %v14295_v46, %v14294_v40 }
 0x1c3   : > { %v14257_v51 = vpop.f32.mrf.mxu0  ;;  %v14297_v52 = vpop.f32.mrf.mxu1 }
 0x1c4   : > { %v1220_v53 = vpack.c.bf16 %v14296_v50, %v14293_v48 }
 0x1c5   : > { %v14258_v54 = vpop.f32.mrf.mxu0  ;;  %v14298_v55 = vpop.f32.mrf.mxu1 }
 0x1c6   : > { %15134 = vmatmul.mubr.msk.bf16.vlgmr.msra.gmra.mxu1 %vm1225_vm1, %v1220_v53  ;;  %v14299_v60 = vadd.f32 %v14298_v55, %v14297_v52  ;;  %v14259_v32 = vadd.f32 %v14258_v54, %v14257_v51 }
 0x1c7   : > { %v14260_v56 = vpop.f32.mrf.mxu0  ;;  %v14300_v57 = vpop.f32.mrf.mxu1  ;;  %15142 = vmatpush3.bf16.msra.mxu1 %v1320_v42 }
 0x1c8   : > { %16163 = vmatprep.subr.msk.bf16.mxu1 %vm1238_vm0, %v1506_v29  ;;  %v14256_v29 = vadd.f32 %v14255_v44, %v14254_v38 }
 0x1c9   : > { %v14261_v58 = vpop.f32.mrf.mxu0  ;;  %v14301_v59 = vpop.f32.mrf.mxu1 }
 0x1ca   : > { %v14302_v61 = vadd.f32 %v14301_v59, %v14300_v57  ;;  %v14262_v34 = vadd.f32 %v14261_v58, %v14260_v56  ;;  %v1101_v18 = vpack.c.bf16 %v14256_v29, %v14253_v27  ;;  %v16373_v27 = vld [vmem:[%s20882_s25 + $0x134] ss:$8 sps:$4 sm:$0xff]   ;;  %v16375_v29 = vld [vmem:[%s20882_s25 + $0x130] ss:$8 sps:$4 sm:$0xff]  }
 0x1cb   : > { %v14263_v62 = vpop.f32.mrf.mxu0  ;;  %v14303_v63 = vpop.f32.mrf.mxu1 }
 0x1cc   : > { %v1221_v0 = vpack.c.bf16 %v14302_v61, %v14299_v60  ;;  %v1102_v22 = vpack.c.bf16 %v14262_v34, %v14259_v32  ;;  %v1714_v32 = vld [vmem:[#allocation2 + $0xc] sm:$0x7] }
 0x1cd   : > { %v14264_v1 = vpop.f32.mrf.mxu0  ;;  %v14304_v2 = vpop.f32.mrf.mxu1  ;;  %16164 = vmatprep.subr.msk.bf16.mxu0 %vm1238_vm0, %v1714_v32  ;;  %v1728_v34 = vsel %vm1238_vm0, %v1714_v32, 0 }
 0x1ce   : > { %15137 = vmatprep.mubr.msk.bf16.mxu1 %vm1225_vm1, %v1221_v0  ;;  %v14305_v12 = vadd.f32 %v14304_v2, %v14303_v63  ;;  %v14265_v42 = vadd.f32 %v14264_v1, %v14263_v62  ;;  %v16354_v0 = vld [vmem:[%s20882_s25 + $0xc4] ss:$8 sps:$4 sm:$0xff]   ;;  %15162 = vmatpush3.bf16.msra.mxu0 %v1728_v34 }
 0x1cf   : > { %v14266_v4 = vpop.f32.mrf.mxu0  ;;  %v14306_v5 = vpop.f32.mrf.mxu1 }
 0x1d1   : > { %v14267_v10 = vpop.f32.mrf.mxu0  ;;  %v14307_v11 = vpop.f32.mrf.mxu1 }
 0x1d2   : > { %v14308_v15 = vadd.f32 %v14307_v11, %v14306_v5  ;;  %v14268_v46 = vadd.f32 %v14267_v10, %v14266_v4  ;;  %v16352_v4 = vld [vmem:[%s20882_s25 + $0xc0] ss:$8 sps:$4 sm:$0xff]   ;;  %v16355_v5 = vld [vmem:[%s20882_s25 + $0xd4] ss:$8 sps:$4 sm:$0xff]  }
 0x1d3   : > { %v14335_v17 = vpop.f32.mrf.mxu0  ;;  %v16360_v10 = vld [vmem:[%s20882_s25 + $0xe0] ss:$8 sps:$4 sm:$0xff]   ;;  %v16361_v11 = vld [vmem:[%s20882_s25 + $0xf4] ss:$8 sps:$4 sm:$0xff]  }
 0x1d4   : > { %v1222_v21 = vpack.c.bf16 %v14308_v15, %v14305_v12  ;;  %v1103_v44 = vpack.c.bf16 %v14268_v46, %v14265_v42  ;;  %v16363_v12 = vld [vmem:[%s20882_s25 + $0xf0] ss:$8 sps:$4 sm:$0xff]   ;;  %v16366_v15 = vld [vmem:[%s20882_s25 + $0x104] ss:$8 sps:$4 sm:$0xff]  }
 0x1d5   : > { %v14336_v25 = vpop.f32.mrf.mxu0 }
 0x1d6   : > { %15138 = vmatmul.mubr.msk.bf16.gmra.mxu1 %vm1225_vm1, %v1222_v21  ;;  %v14337_v48 = vadd.f32 %v14336_v25, %v14335_v17  ;;  %v16364_v17 = vld [vmem:[%s20882_s25 + $0x100] ss:$8 sps:$4 sm:$0xff]   ;;  %v16367_v21 = vld [vmem:[%s20882_s25 + $0x114] ss:$8 sps:$4 sm:$0xff]   ;;  %v16370_v25 = vld [vmem:[%s20882_s25 + $0x124] ss:$8 sps:$4 sm:$0xff]  }
 0x1d7   : > { %15143 = vmatprep.mubr.msk.bf16.mxu1 %vm1225_vm1, %v1100_v23  ;;  %v14338_v26 = vpop.f32.mrf.mxu0  ;;  %v16369_v23 = vld [vmem:[%s20882_s25 + $0x110] ss:$8 sps:$4 sm:$0xff]  }
 0x1d9   : > { %v14339_v37 = vpop.f32.mrf.mxu0 }
 0x1da   : > { %v14340_v31 = vadd.f32 %v14339_v37, %v14338_v26  ;;  %v16372_v26 = vld [vmem:[%s20882_s25 + $0x120] ss:$8 sps:$4 sm:$0xff]   ;;  %v1922_v37 = vld [vmem:[#allocation2 + $0x10] sm:$0x7] }
 0x1db   : > { %v14341_v16 = vpop.f32.mrf.mxu0  ;;  %16165 = vmatprep.subr.msk.bf16.mxu0 %vm1238_vm0, %v1922_v37 }
 0x1dc   : > { %v1501_v50 = vpack.c.bf16 %v14340_v31, %v14337_v48 }
 0x1dd   : > { %v14342_v24 = vpop.f32.mrf.mxu0 }
 0x1de   : > { %15144 = vmatmul.mubr.msk.bf16.vlgmr.msra.gmra.mxu1 %vm1225_vm1, %v1101_v18  ;;  %v14343_v53 = vadd.f32 %v14342_v24, %v14341_v16 }
 0x1df   : > { %15147 = vmatprep.mubr.msk.bf16.mxu1 %vm1225_vm1, %v1102_v22  ;;  %v14344_v40 = vpop.f32.mrf.mxu0  ;;  %15152 = vmatpush3.bf16.msra.mxu1 %v1520_v43 }
 0x1e0   : > { %14364 = vmatprep.subr.bf16.mxu1 %v17866_v3 }
 0x1e1   : > { %v14345_v36 = vpop.f32.mrf.mxu0 }
 0x1e2   : > { %v14346_v54 = vadd.f32 %v14345_v36, %v14344_v40 }
 0x1e3   : > { %v14347_v38 = vpop.f32.mrf.mxu0 }
 0x1e4   : > { %v1502_v58 = vpack.c.bf16 %v14346_v54, %v14343_v53 }
 0x1e5   : > { %v14348_v51 = vpop.f32.mrf.mxu0 }
 0x1e6   : > { %15148 = vmatmul.mubr.msk.bf16.gmra.mxu1 %vm1225_vm1, %v1103_v44  ;;  %v14349_v55 = vadd.f32 %v14348_v51, %v14347_v38 }
 0x1e7   : > { %v14350_v52 = vpop.f32.mrf.mxu0  ;;  %15153 = vmatprep.mubr.msk.bf16.mxu1 %vm1225_vm1, %v1501_v50 }
 0x1e9   : > { %v14351_v43 = vpop.f32.mrf.mxu0 }
 0x1ea   : > { %v14352_v56 = vadd.f32 %v14351_v43, %v14350_v52 }
 0x1eb   : > { %v14353_v57 = vpop.f32.mrf.mxu0 }
 0x1ec   : > { %v1503_v59 = vpack.c.bf16 %v14352_v56, %v14349_v55 }
 0x1ed   : > { %v14354_v60 = vpop.f32.mrf.mxu0 }
 0x1ee   : > { %15154 = vmatmul.mubr.msk.bf16.vlgmr.msra.gmra.mxu1 %vm1225_vm1, %v1502_v58  ;;  %v14355_v62 = vadd.f32 %v14354_v60, %v14353_v57 }
 0x1ef   : > { %14365 = vmatpush3.bf16.msra.mxu1 %v17871_v7  ;;  %v14356_v61 = vpop.f32.mrf.mxu0  ;;  %15157 = vmatprep.mubr.msk.bf16.mxu1 %vm1225_vm1, %v1503_v59 }
 0x1f0   : > { %14366 = vmatprep.subr.bf16.mxu1 %v17873_v8 }
 0x1f1   : > { %v14357_v63 = vpop.f32.mrf.mxu0 }
 0x1f2   : > { %v14358_v1 = vadd.f32 %v14357_v63, %v14356_v61 }
 0x1f3   : > { %14367 = vmatpush3.bf16.msra.mxu1 %v17883_v13 }
 0x1f4   : > { %v1504_v2 = vpack.c.bf16 %v14358_v1, %v14355_v62  ;;  %14368 = vmatprep.subr.bf16.mxu1 %v17887_v14 }
 0x1f6   : > { %15158 = vmatmul.mubr.msk.bf16.gmra.mxu1 %vm1225_vm1, %v1504_v2 }
 0x1f7   : > { %14369 = vmatpush3.bf16.msra.mxu1 %v17895_v19  ;;  %1676 = vmatprep.mubr.bf16.mxu1 %v16354_v0 }
 0x1f8   : > { %14370 = vmatprep.subr.bf16.mxu1 %v17899_v20 }
 0x1fb   : > { %14371 = vmatpush3.bf16.msra.mxu1 %v17912_v28 }
 0x1fc   : > { %14372 = vmatprep.subr.bf16.mxu1 %v17917_v30 }
 0x1ff   : > { %14373 = vmatpush3.bf16.msra.mxu1 %v17925_v33 }
 0x200   : > { %14374 = vmatprep.subr.bf16.mxu1 %v17930_v35 }
 0x203   : > { %14375 = vmatpush3.bf16.msra.mxu1 %v17937_v39 }
 0x204   : > { %14376 = vmatprep.subr.bf16.mxu1 %v17942_v41 }
 0x207   : > { %14377 = vmatpush3.bf16.msra.mxu1 %v17949_v45 }
 0x208   : > { %14378 = vmatprep.subr.bf16.mxu1 %v17954_v47 }
 0x20b   : > { %14379 = vmatpush3.bf16.msra.mxu1 %v17959_v49 }
 0x20c   : > { %14409 = vmatprep.subr.bf16.mxu1 %v17866_v3 }
 0x20e   : > { %1677 = vmatmul.mubr.bf16.vlgmr.msra.gmra.mxu1 %v16352_v4 }
 0x20f   : > { %14410 = vmatpush3.bf16.msra.mxu1 %v17871_v7  ;;  %1684 = vmatprep.mubr.bf16.mxu1 %v16355_v5 }
 0x210   : > { %14411 = vmatprep.subr.bf16.mxu1 %v17873_v8 }
 0x213   : > { %14412 = vmatpush3.bf16.msra.mxu1 %v17883_v13 }
 0x214   : > { %14413 = vmatprep.subr.bf16.mxu1 %v17887_v14 }
 0x216   : > { %1685 = vmatmul.mubr.bf16.gmra.mxu1 %v16357_v6 }
 0x217   : > { %14414 = vmatpush3.bf16.msra.mxu1 %v17895_v19  ;;  %1692 = vmatprep.mubr.bf16.mxu1 %v16358_v9 }
 0x218   : > { %14415 = vmatprep.subr.bf16.mxu1 %v17899_v20 }
 0x21b   : > { %14416 = vmatpush3.bf16.msra.mxu1 %v17912_v28 }
 0x21c   : > { %14417 = vmatprep.subr.bf16.mxu1 %v17917_v30 }
 0x21e   : > { %1693 = vmatmul.mubr.bf16.gmra.mxu1 %v16360_v10 }
 0x21f   : > { %14418 = vmatpush3.bf16.msra.mxu1 %v17925_v33  ;;  %1700 = vmatprep.mubr.bf16.mxu1 %v16361_v11 }
 0x220   : > { %14419 = vmatprep.subr.bf16.mxu1 %v17930_v35 }
 0x223   : > { %14420 = vmatpush3.bf16.msra.mxu1 %v17937_v39 }
 0x224   : > { %14421 = vmatprep.subr.bf16.mxu1 %v17942_v41 }
 0x226   : > { %1701 = vmatmul.mubr.bf16.gmra.mxu1 %v16363_v12 }
 0x227   : > { %14422 = vmatpush3.bf16.msra.mxu1 %v17949_v45  ;;  %1884 = vmatprep.mubr.bf16.mxu1 %v16366_v15 }
 0x228   : > { %14423 = vmatprep.subr.bf16.mxu1 %v17954_v47 }
 0x22b   : > { %14424 = vmatpush3.bf16.msra.mxu1 %v17959_v49 }
 0x22e   : > { %1885 = vmatmul.mubr.bf16.vlgmr.msra.gmra.mxu1 %v16364_v17 }
 0x22f   : > { %1892 = vmatprep.mubr.bf16.mxu1 %v16367_v21 }
 0x236   : > { %1893 = vmatmul.mubr.bf16.gmra.mxu1 %v16369_v23 }
 0x237   : > { %1900 = vmatprep.mubr.bf16.mxu1 %v16370_v25 }
 0x23e   : > { %1901 = vmatmul.mubr.bf16.gmra.mxu1 %v16372_v26 }
 0x23f   : > { %1908 = vmatprep.mubr.bf16.mxu1 %v16373_v27 }
 0x246   : > { %1909 = vmatmul.mubr.bf16.gmra.mxu1 %v16375_v29 }
 0x286   : > { %v15135_v16 = vpop.f32.mrf.mxu1 }
 0x288   : > { %v1276_v18 = vpop.f32.mrf.mxu1 }
 0x28a   : > { %v15136_v22 = vpop.f32.mrf.mxu1 }
 0x28c   : > { %v18152_v24 = vpop.f32.mrf.mxu1 }
 0x296   : > { %v15139_v40 = vpop.f32.mrf.mxu1 }
 0x298   : > { %v1292_v42 = vpop.f32.mrf.mxu1 }
 0x29a   : > { %v15140_v46 = vpop.f32.mrf.mxu1 }
 0x29c   : > { %v18154_v48 = vpop.f32.mrf.mxu1 }
 0x29e   : > { %v15145_v31 = vpop.f32.mrf.mxu1 }
 0x29f   : > { %v1365_v36 = vadd.f32 %v15145_v31, %v15135_v16 }
 0x2a0   : > { %v1356_v38 = vpop.f32.mrf.mxu1 }
 0x2a1   : > { %v1357_v44 = vadd.f32 %v1356_v38, %v1276_v18 }
 0x2a2   : > { %v15146_v50 = vpop.f32.mrf.mxu1 }
 0x2a3   : > { %v1368_v51 = vadd.f32 %v15146_v50, %v15136_v22 }
 0x2a4   : > { %v18156_v52 = vpop.f32.mrf.mxu1 }
 0x2a6   : > { %v15149_v53 = vpop.f32.mrf.mxu1 }
 0x2a7   : > { %v1381_v54 = vadd.f32 %v15149_v53, %v15139_v40 }
 0x2a8   : > { %v1372_v55 = vpop.f32.mrf.mxu1 }
 0x2a9   : > { %v1373_v43 = vadd.f32 %v1372_v55, %v1292_v42  ;;  %v1936_v42 = vsel %vm1238_vm0, %v1922_v37, 0 }
 0x2aa   : > { %v15150_v56 = vpop.f32.mrf.mxu1 }
 0x2ab   : > { %v1384_v57 = vadd.f32 %v15150_v56, %v15140_v46 }
 0x2ac   : > { %v18158_v58 = vpop.f32.mrf.mxu1 }
 0x2ae   : > { %v15155_v59 = vpop.f32.mrf.mxu1 }
 0x2af   : > { %v18160_v60 = vadd.f32 %v15155_v59, %v1365_v36 }
 0x2b0   : > { %v1556_v61 = vpop.f32.mrf.mxu1 }
 0x2b1   : > { %v18162_v62 = vadd.f32 %v1556_v61, %v1357_v44 }
 0x2b2   : > { %v15156_v63 = vpop.f32.mrf.mxu1 }
 0x2b3   : > { %v18164_v0 = vadd.f32 %v15156_v63, %v1368_v51 }
 0x2b4   : > { %v18166_v1 = vpop.f32.mrf.mxu1 }
 0x2b6   : > { %v15159_v2 = vpop.f32.mrf.mxu1 }
 0x2b7   : > { %v18168_v4 = vadd.f32 %v15159_v2, %v1381_v54 }
 0x2b8   : > { %v1572_v5 = vpop.f32.mrf.mxu1 }
 0x2b9   : > { %v18170_v6 = vadd.f32 %v1572_v5, %v1373_v43 }
 0x2ba   : > { %v15160_v9 = vpop.f32.mrf.mxu1 }
 0x2bb   : > { %v18172_v10 = vadd.f32 %v15160_v9, %v1384_v57 }
 0x2bc   : > { %v18174_v11 = vpop.f32.mrf.mxu1 }
 0x2ce   : > { %v14380_v12 = vpop.f32.mrf.mxu1 }
 0x2d0   : > { %v14381_v15 = vpop.f32.mrf.mxu1 }
 0x2d1   : > { %v14382_v23 = vadd.f32 %v14381_v15, %v14380_v12 }
 0x2d2   : > { %v14383_v17 = vpop.f32.mrf.mxu1 }
 0x2d4   : > { %v14384_v21 = vpop.f32.mrf.mxu1 }
 0x2d5   : > { %v14385_v25 = vadd.f32 %v14384_v21, %v14383_v17 }
 0x2d6   : > { %v14386_v26 = vpop.f32.mrf.mxu1 }
 0x2d7   : > { %v1709_v27 = vpack.c.bf16 %v14385_v25, %v14382_v23 }
 0x2d8   : > { %v14387_v29 = vpop.f32.mrf.mxu1 }
 0x2d9   : > { %15163 = vmatprep.mubr.msk.bf16.mxu0 %vm1225_vm1, %v1709_v27  ;;  %v14388_v16 = vadd.f32 %v14387_v29, %v14386_v26 }
 0x2da   : > { %v14389_v32 = vpop.f32.mrf.mxu1 }
 0x2dc   : > { %v14390_v34 = vpop.f32.mrf.mxu1 }
 0x2dd   : > { %v14391_v18 = vadd.f32 %v14390_v34, %v14389_v32 }
 0x2de   : > { %v14392_v22 = vpop.f32.mrf.mxu1 }
 0x2df   : > { %v1710_v40 = vpack.c.bf16 %v14391_v18, %v14388_v16 }
 0x2e0   : > { %v14393_v46 = vpop.f32.mrf.mxu1 }
 0x2e1   : > { %15164 = vmatmul.mubr.msk.bf16.vlgmr.msra.gmra.mxu0 %vm1225_vm1, %v1710_v40  ;;  %v14394_v38 = vadd.f32 %v14393_v46, %v14392_v22 }
 0x2e2   : > { %v14395_v31 = vpop.f32.mrf.mxu1  ;;  %15172 = vmatpush3.bf16.msra.mxu0 %v1936_v42 }
 0x2e3   : > { %14454 = vmatprep.subr.bf16.mxu0 %v17866_v3 }
 0x2e4   : > { %v14396_v36 = vpop.f32.mrf.mxu1 }
 0x2e5   : > { %v14397_v44 = vadd.f32 %v14396_v36, %v14395_v31 }
 0x2e6   : > { %v14398_v50 = vpop.f32.mrf.mxu1 }
 0x2e7   : > { %v1711_v51 = vpack.c.bf16 %v14397_v44, %v14394_v38  ;;  %v16378_v44 = vld [vmem:[%s20882_s25 + $0x144] ss:$8 sps:$4 sm:$0xff]  }
 0x2e8   : > { %v14399_v53 = vpop.f32.mrf.mxu1 }
 0x2e9   : > { %15167 = vmatprep.mubr.msk.bf16.mxu0 %vm1225_vm1, %v1711_v51  ;;  %v14400_v43 = vadd.f32 %v14399_v53, %v14398_v50  ;;  %v16376_v51 = vld [vmem:[%s20882_s25 + $0x140] ss:$8 sps:$4 sm:$0xff]   ;;  %v16379_v53 = vld [vmem:[%s20882_s25 + $0x154] ss:$8 sps:$4 sm:$0xff]  }
 0x2ea   : > { %v14401_v54 = vpop.f32.mrf.mxu1 }
 0x2ec   : > { %v14402_v55 = vpop.f32.mrf.mxu1 }
 0x2ed   : > { %v14403_v56 = vadd.f32 %v14402_v55, %v14401_v54  ;;  %v16381_v54 = vld [vmem:[%s20882_s25 + $0x150] ss:$8 sps:$4 sm:$0xff]   ;;  %v16382_v55 = vld [vmem:[%s20882_s25 + $0x164] ss:$8 sps:$4 sm:$0xff]  }
 0x2ee   : > { %v14425_v37 = vpop.f32.mrf.mxu1 }
 0x2ef   : > { %v1712_v57 = vpack.c.bf16 %v14403_v56, %v14400_v43  ;;  %v16384_v43 = vld [vmem:[%s20882_s25 + $0x160] ss:$8 sps:$4 sm:$0xff]   ;;  %v16385_v56 = vld [vmem:[%s20882_s25 + $0x174] ss:$8 sps:$4 sm:$0xff]  }
 0x2f0   : > { %v14426_v59 = vpop.f32.mrf.mxu1 }
 0x2f1   : > { %15168 = vmatmul.mubr.msk.bf16.gmra.mxu0 %vm1225_vm1, %v1712_v57  ;;  %v14427_v2 = vadd.f32 %v14426_v59, %v14425_v37  ;;  %v16387_v37 = vld [vmem:[%s20882_s25 + $0x170] ss:$8 sps:$4 sm:$0xff]   ;;  %v16390_v57 = vld [vmem:[%s20882_s25 + $0x184] ss:$8 sps:$4 sm:$0xff]   ;;  %v16388_v59 = vld [vmem:[%s20882_s25 + $0x180] ss:$8 sps:$4 sm:$0xff]  }
 0x2f2   : > { %v14428_v61 = vpop.f32.mrf.mxu1 }
 0x2f4   : > { %v14429_v63 = vpop.f32.mrf.mxu1 }
 0x2f5   : > { %v14430_v5 = vadd.f32 %v14429_v63, %v14428_v61  ;;  %v16391_v61 = vld [vmem:[%s20882_s25 + $0x194] ss:$8 sps:$4 sm:$0xff]   ;;  %v16393_v63 = vld [vmem:[%s20882_s25 + $0x190] ss:$8 sps:$4 sm:$0xff]  }
 0x2f6   : > { %v14431_v9 = vpop.f32.mrf.mxu1 }
 0x2f7   : > { %v1917_v12 = vpack.c.bf16 %v14430_v5, %v14427_v2  ;;  %v16394_v2 = vld [vmem:[%s20882_s25 + $0x1a4] ss:$8 sps:$4 sm:$0xff]   ;;  %v16396_v5 = vld [vmem:[%s20882_s25 + $0x1a0] ss:$8 sps:$4 sm:$0xff]  }
 0x2f8   : > { %v14432_v15 = vpop.f32.mrf.mxu1 }
 0x2f9   : > { %15173 = vmatprep.mubr.msk.bf16.mxu0 %vm1225_vm1, %v1917_v12  ;;  %v14433_v23 = vadd.f32 %v14432_v15, %v14431_v9  ;;  %v16397_v9 = vld [vmem:[%s20882_s25 + $0x1b4] ss:$8 sps:$4 sm:$0xff]   ;;  %v16399_v12 = vld [vmem:[%s20882_s25 + $0x1b0] ss:$8 sps:$4 sm:$0xff]  }
 0x2fa   : > { %v14434_v17 = vpop.f32.mrf.mxu1  ;;  %v2130_v15 = vld [vmem:[#allocation2 + $0x14] sm:$0x7] }
 0x2fb   : > { %16166 = vmatprep.subr.msk.bf16.mxu1 %vm1238_vm0, %v2130_v15 }
 0x2fc   : > { %v14435_v21 = vpop.f32.mrf.mxu1 }
 0x2fd   : > { %v14436_v25 = vadd.f32 %v14435_v21, %v14434_v17  ;;  %v2144_v17 = vsel %vm1238_vm0, %v2130_v15, 0  ;;  %v2338_v21 = vld [vmem:[#allocation2 + $0x18] sm:$0x7] }
 0x2fe   : > { %v14437_v26 = vpop.f32.mrf.mxu1  ;;  %15182 = vmatpush3.bf16.msra.mxu1 %v2144_v17 }
 0x2ff   : > { %v1918_v27 = vpack.c.bf16 %v14436_v25, %v14433_v23  ;;  %16167 = vmatprep.subr.msk.bf16.mxu1 %vm1238_vm0, %v2338_v21 }
 0x300   : > { %v14438_v29 = vpop.f32.mrf.mxu1 }
 0x301   : > { %15174 = vmatmul.mubr.msk.bf16.vlgmr.msra.gmra.mxu0 %vm1225_vm1, %v1918_v27  ;;  %v14439_v34 = vadd.f32 %v14438_v29, %v14437_v26 }
 0x302   : > { %14455 = vmatpush3.bf16.msra.mxu0 %v17871_v7  ;;  %v14440_v32 = vpop.f32.mrf.mxu1 }
 0x303   : > { %14456 = vmatprep.subr.bf16.mxu0 %v17873_v8 }
 0x304   : > { %v14441_v16 = vpop.f32.mrf.mxu1 }
 0x305   : > { %v14442_v18 = vadd.f32 %v14441_v16, %v14440_v32 }
 0x306   : > { %14457 = vmatpush3.bf16.msra.mxu0 %v17883_v13  ;;  %v14443_v22 = vpop.f32.mrf.mxu1 }
 0x307   : > { %v1919_v40 = vpack.c.bf16 %v14442_v18, %v14439_v34  ;;  %14458 = vmatprep.subr.bf16.mxu0 %v17887_v14 }
 0x308   : > { %v14444_v42 = vpop.f32.mrf.mxu1 }
 0x309   : > { %15177 = vmatprep.mubr.msk.bf16.mxu0 %vm1225_vm1, %v1919_v40  ;;  %v14445_v31 = vadd.f32 %v14444_v42, %v14443_v22 }
 0x30a   : > { %14459 = vmatpush3.bf16.msra.mxu0 %v17895_v19  ;;  %v14446_v46 = vpop.f32.mrf.mxu1 }
 0x30b   : > { %14460 = vmatprep.subr.bf16.mxu0 %v17899_v20 }
 0x30c   : > { %v14447_v36 = vpop.f32.mrf.mxu1 }
 0x30d   : > { %v14448_v38 = vadd.f32 %v14447_v36, %v14446_v46 }
 0x30e   : > { %14461 = vmatpush3.bf16.msra.mxu0 %v17912_v28 }
 0x30f   : > { %v1920_v50 = vpack.c.bf16 %v14448_v38, %v14445_v31  ;;  %14462 = vmatprep.subr.bf16.mxu0 %v17917_v30 }
 0x311   : > { %15178 = vmatmul.mubr.msk.bf16.gmra.mxu0 %vm1225_vm1, %v1920_v50 }
 0x312   : > { %14463 = vmatpush3.bf16.msra.mxu0 %v17925_v33  ;;  %2092 = vmatprep.mubr.bf16.mxu0 %v16378_v44 }
 0x313   : > { %14464 = vmatprep.subr.bf16.mxu0 %v17930_v35 }
 0x316   : > { %14465 = vmatpush3.bf16.msra.mxu0 %v17937_v39 }
 0x317   : > { %14466 = vmatprep.subr.bf16.mxu0 %v17942_v41 }
 0x31a   : > { %14467 = vmatpush3.bf16.msra.mxu0 %v17949_v45 }
 0x31b   : > { %14468 = vmatprep.subr.bf16.mxu0 %v17954_v47 }
 0x31e   : > { %14469 = vmatpush3.bf16.msra.mxu0 %v17959_v49 }
 0x31f   : > { %14499 = vmatprep.subr.bf16.mxu0 %v17866_v3 }
 0x321   : > { %2093 = vmatmul.mubr.bf16.vlgmr.msra.gmra.mxu0 %v16376_v51 }
 0x322   : > { %14500 = vmatpush3.bf16.msra.mxu0 %v17871_v7  ;;  %2100 = vmatprep.mubr.bf16.mxu0 %v16379_v53 }
 0x323   : > { %14501 = vmatprep.subr.bf16.mxu0 %v17873_v8 }
 0x326   : > { %14502 = vmatpush3.bf16.msra.mxu0 %v17883_v13 }
 0x327   : > { %14503 = vmatprep.subr.bf16.mxu0 %v17887_v14 }
 0x329   : > { %2101 = vmatmul.mubr.bf16.gmra.mxu0 %v16381_v54 }
 0x32a   : > { %14504 = vmatpush3.bf16.msra.mxu0 %v17895_v19  ;;  %2108 = vmatprep.mubr.bf16.mxu0 %v16382_v55 }
 0x32b   : > { %14505 = vmatprep.subr.bf16.mxu0 %v17899_v20 }
 0x32e   : > { %14506 = vmatpush3.bf16.msra.mxu0 %v17912_v28 }
 0x32f   : > { %14507 = vmatprep.subr.bf16.mxu0 %v17917_v30 }
 0x331   : > { %2109 = vmatmul.mubr.bf16.gmra.mxu0 %v16384_v43 }
 0x332   : > { %14508 = vmatpush3.bf16.msra.mxu0 %v17925_v33  ;;  %2116 = vmatprep.mubr.bf16.mxu0 %v16385_v56 }
 0x333   : > { %14509 = vmatprep.subr.bf16.mxu0 %v17930_v35 }
 0x336   : > { %14510 = vmatpush3.bf16.msra.mxu0 %v17937_v39 }
 0x337   : > { %14511 = vmatprep.subr.bf16.mxu0 %v17942_v41 }
 0x339   : > { %2117 = vmatmul.mubr.bf16.gmra.mxu0 %v16387_v37 }
 0x33a   : > { %14512 = vmatpush3.bf16.msra.mxu0 %v17949_v45  ;;  %2300 = vmatprep.mubr.bf16.mxu0 %v16390_v57 }
 0x33b   : > { %14513 = vmatprep.subr.bf16.mxu0 %v17954_v47 }
 0x33e   : > { %14514 = vmatpush3.bf16.msra.mxu0 %v17959_v49 }
 0x341   : > { %2301 = vmatmul.mubr.bf16.vlgmr.msra.gmra.mxu0 %v16388_v59 }
 0x342   : > { %2308 = vmatprep.mubr.bf16.mxu0 %v16391_v61 }
 0x349   : > { %2309 = vmatmul.mubr.bf16.gmra.mxu0 %v16393_v63 }
 0x34a   : > { %2316 = vmatprep.mubr.bf16.mxu0 %v16394_v2 }
 0x351   : > { %2317 = vmatmul.mubr.bf16.gmra.mxu0 %v16396_v5 }
 0x352   : > { %2324 = vmatprep.mubr.bf16.mxu0 %v16397_v9 }
 0x359   : > { %2325 = vmatmul.mubr.bf16.gmra.mxu0 %v16399_v12 }
 0x3a1   : > { %v15165_v23 = vpop.f32.mrf.mxu0 }
 0x3a2   : > { %v1797_v25 = vadd.f32 %v15165_v23, %v18160_v60 }
 0x3a3   : > { %v1764_v26 = vpop.f32.mrf.mxu0 }
 0x3a4   : > { %v1795_v27 = vadd.f32 %v1764_v26, %v18162_v62  ;;  %v2352_v26 = vsel %vm1238_vm0, %v2338_v21, 0 }
 0x3a5   : > { %v15166_v29 = vpop.f32.mrf.mxu0 }
 0x3a6   : > { %v1798_v32 = vadd.f32 %v15166_v29, %v18164_v0 }
 0x3a7   : > { %v18271_v34 = vpop.f32.mrf.mxu0 }
 0x3b1   : > { %v15169_v16 = vpop.f32.mrf.mxu0 }
 0x3b2   : > { %v1801_v18 = vadd.f32 %v15169_v16, %v18168_v4 }
 0x3b3   : > { %v1780_v22 = vpop.f32.mrf.mxu0 }
 0x3b4   : > { %v1799_v40 = vadd.f32 %v1780_v22, %v18170_v6 }
 0x3b5   : > { %v15170_v42 = vpop.f32.mrf.mxu0 }
 0x3b6   : > { %v1802_v46 = vadd.f32 %v15170_v42, %v18172_v10 }
 0x3b7   : > { %v18276_v31 = vpop.f32.mrf.mxu0 }
 0x3c1   : > { %v15175_v60 = vpop.f32.mrf.mxu0 }
 0x3c2   : > { %v18278_v36 = vadd.f32 %v15175_v60, %v1797_v25 }
 0x3c3   : > { %v1972_v62 = vpop.f32.mrf.mxu0 }
 0x3c4   : > { %v18280_v38 = vadd.f32 %v1972_v62, %v1795_v27 }
 0x3c5   : > { %v15176_v0 = vpop.f32.mrf.mxu0 }
 0x3c6   : > { %v18282_v44 = vadd.f32 %v15176_v0, %v1798_v32 }
 0x3c7   : > { %v18284_v50 = vpop.f32.mrf.mxu0 }
 0x3d1   : > { %v15179_v4 = vpop.f32.mrf.mxu0 }
 0x3d2   : > { %v18286_v51 = vadd.f32 %v15179_v4, %v1801_v18 }
 0x3d3   : > { %v1988_v6 = vpop.f32.mrf.mxu0 }
 0x3d4   : > { %v18288_v53 = vadd.f32 %v1988_v6, %v1799_v40 }
 0x3d5   : > { %v15180_v10 = vpop.f32.mrf.mxu0 }
 0x3d6   : > { %v18290_v54 = vadd.f32 %v15180_v10, %v1802_v46 }
 0x3d7   : > { %v18292_v55 = vpop.f32.mrf.mxu0 }
 0x3e1   : > { %v14470_v43 = vpop.f32.mrf.mxu0 }
 0x3e3   : > { %v14471_v56 = vpop.f32.mrf.mxu0 }
 0x3e4   : > { %v14472_v59 = vadd.f32 %v14471_v56, %v14470_v43 }
 0x3e5   : > { %v14473_v37 = vpop.f32.mrf.mxu0 }
 0x3e7   : > { %v14474_v57 = vpop.f32.mrf.mxu0 }
 0x3e8   : > { %v14475_v61 = vadd.f32 %v14474_v57, %v14473_v37 }
 0x3e9   : > { %v14476_v63 = vpop.f32.mrf.mxu0 }
 0x3ea   : > { %v2125_v2 = vpack.c.bf16 %v14475_v61, %v14472_v59 }
 0x3eb   : > { %v14477_v5 = vpop.f32.mrf.mxu0 }
 0x3ec   : > { %15183 = vmatprep.mubr.msk.bf16.mxu1 %vm1225_vm1, %v2125_v2  ;;  %v14478_v15 = vadd.f32 %v14477_v5, %v14476_v63 }
 0x3ed   : > { %v14479_v9 = vpop.f32.mrf.mxu0 }
 0x3ef   : > { %v14480_v12 = vpop.f32.mrf.mxu0 }
 0x3f0   : > { %v14481_v17 = vadd.f32 %v14480_v12, %v14479_v9 }
 0x3f1   : > { %v14482_v23 = vpop.f32.mrf.mxu0 }
 0x3f2   : > { %v2126_v25 = vpack.c.bf16 %v14481_v17, %v14478_v15 }
 0x3f3   : > { %v14483_v27 = vpop.f32.mrf.mxu0 }
 0x3f4   : > { %15184 = vmatmul.mubr.msk.bf16.vlgmr.msra.gmra.mxu1 %vm1225_vm1, %v2126_v25  ;;  %v14484_v16 = vadd.f32 %v14483_v27, %v14482_v23 }
 0x3f5   : > { %v14485_v29 = vpop.f32.mrf.mxu0  ;;  %15192 = vmatpush3.bf16.msra.mxu1 %v2352_v26 }
 0x3f6   : > { %14544 = vmatprep.subr.bf16.mxu1 %v17866_v3 }
 0x3f7   : > { %v14486_v32 = vpop.f32.mrf.mxu0 }
 0x3f8   : > { %v14487_v18 = vadd.f32 %v14486_v32, %v14485_v29 }
 0x3f9   : > { %v14488_v22 = vpop.f32.mrf.mxu0 }
 0x3fa   : > { %v2127_v40 = vpack.c.bf16 %v14487_v18, %v14484_v16 }
 0x3fb   : > { %v14489_v42 = vpop.f32.mrf.mxu0 }
 0x3fc   : > { %15187 = vmatprep.mubr.msk.bf16.mxu1 %vm1225_vm1, %v2127_v40  ;;  %v14490_v62 = vadd.f32 %v14489_v42, %v14488_v22 }
 0x3fd   : > { %v14491_v46 = vpop.f32.mrf.mxu0 }
 0x3ff   : > { %v14492_v60 = vpop.f32.mrf.mxu0 }
 0x400   : > { %v14493_v0 = vadd.f32 %v14492_v60, %v14491_v46  ;;  %v16402_v46 = vld [vmem:[%s20882_s25 + $0x1c4] ss:$8 sps:$4 sm:$0xff]  }
 0x401   : > { %v14515_v21 = vpop.f32.mrf.mxu0 }
 0x402   : > { %v2128_v4 = vpack.c.bf16 %v14493_v0, %v14490_v62  ;;  %v16400_v62 = vld [vmem:[%s20882_s25 + $0x1c0] ss:$8 sps:$4 sm:$0xff]   ;;  %v16403_v0 = vld [vmem:[%s20882_s25 + $0x1d4] ss:$8 sps:$4 sm:$0xff]  }
 0x403   : > { %v14516_v6 = vpop.f32.mrf.mxu0 }
 0x404   : > { %15188 = vmatmul.mubr.msk.bf16.gmra.mxu1 %vm1225_vm1, %v2128_v4  ;;  %v14517_v56 = vadd.f32 %v14516_v6, %v14515_v21  ;;  %v16405_v21 = vld [vmem:[%s20882_s25 + $0x1d0] ss:$8 sps:$4 sm:$0xff]   ;;  %v16406_v4 = vld [vmem:[%s20882_s25 + $0x1e4] ss:$8 sps:$4 sm:$0xff]  }
 0x405   : > { %v14518_v10 = vpop.f32.mrf.mxu0 }
 0x407   : > { %v14519_v43 = vpop.f32.mrf.mxu0 }
 0x408   : > { %v14520_v37 = vadd.f32 %v14519_v43, %v14518_v10 }
 0x409   : > { %v14521_v57 = vpop.f32.mrf.mxu0 }
 0x40a   : > { %v2333_v59 = vpack.c.bf16 %v14520_v37, %v14517_v56 }
 0x40b   : > { %v14522_v61 = vpop.f32.mrf.mxu0 }
 0x40c   : > { %15193 = vmatprep.mubr.msk.bf16.mxu1 %vm1225_vm1, %v2333_v59  ;;  %v14523_v5 = vadd.f32 %v14522_v61, %v14521_v57 }
 0x40d   : > { %v14524_v63 = vpop.f32.mrf.mxu0 }
 0x40f   : > { %v14525_v2 = vpop.f32.mrf.mxu0 }
 0x410   : > { %v14526_v9 = vadd.f32 %v14525_v2, %v14524_v63 }
 0x411   : > { %v14527_v12 = vpop.f32.mrf.mxu0 }
 0x412   : > { %v2334_v15 = vpack.c.bf16 %v14526_v9, %v14523_v5 }
 0x413   : > { %v14528_v17 = vpop.f32.mrf.mxu0 }
 0x414   : > { %15194 = vmatmul.mubr.msk.bf16.vlgmr.msra.gmra.mxu1 %vm1225_vm1, %v2334_v15  ;;  %v14529_v25 = vadd.f32 %v14528_v17, %v14527_v12 }
 0x415   : > { %14545 = vmatpush3.bf16.msra.mxu1 %v17871_v7  ;;  %v14530_v23 = vpop.f32.mrf.mxu0 }
 0x416   : > { %14546 = vmatprep.subr.bf16.mxu1 %v17873_v8 }
 0x417   : > { %v14531_v26 = vpop.f32.mrf.mxu0 }
 0x418   : > { %v14532_v27 = vadd.f32 %v14531_v26, %v14530_v23 }
 0x419   : > { %14547 = vmatpush3.bf16.msra.mxu1 %v17883_v13  ;;  %v14533_v29 = vpop.f32.mrf.mxu0 }
 0x41a   : > { %v2335_v32 = vpack.c.bf16 %v14532_v27, %v14529_v25  ;;  %14548 = vmatprep.subr.bf16.mxu1 %v17887_v14 }
 0x41b   : > { %v14534_v16 = vpop.f32.mrf.mxu0 }
 0x41c   : > { %15197 = vmatprep.mubr.msk.bf16.mxu1 %vm1225_vm1, %v2335_v32  ;;  %v14535_v22 = vadd.f32 %v14534_v16, %v14533_v29 }
 0x41d   : > { %14549 = vmatpush3.bf16.msra.mxu1 %v17895_v19  ;;  %v14536_v18 = vpop.f32.mrf.mxu0 }
 0x41e   : > { %14550 = vmatprep.subr.bf16.mxu1 %v17899_v20 }
 0x41f   : > { %v14537_v40 = vpop.f32.mrf.mxu0 }
 0x420   : > { %v14538_v42 = vadd.f32 %v14537_v40, %v14536_v18 }
 0x421   : > { %14551 = vmatpush3.bf16.msra.mxu1 %v17912_v28 }
 0x422   : > { %v2336_v60 = vpack.c.bf16 %v14538_v42, %v14535_v22  ;;  %14552 = vmatprep.subr.bf16.mxu1 %v17917_v30 }
 0x424   : > { %15198 = vmatmul.mubr.msk.bf16.gmra.mxu1 %vm1225_vm1, %v2336_v60 }
 0x425   : > { %14553 = vmatpush3.bf16.msra.mxu1 %v17925_v33  ;;  %2508 = vmatprep.mubr.bf16.mxu1 %v16402_v46 }
 0x426   : > { %14554 = vmatprep.subr.bf16.mxu1 %v17930_v35 }
 0x429   : > { %14555 = vmatpush3.bf16.msra.mxu1 %v17937_v39 }
 0x42a   : > { %14556 = vmatprep.subr.bf16.mxu1 %v17942_v41 }
 0x42d   : > { %14557 = vmatpush3.bf16.msra.mxu1 %v17949_v45 }
 0x42e   : > { %14558 = vmatprep.subr.bf16.mxu1 %v17954_v47 }
 0x431   : > { %14559 = vmatpush3.bf16.msra.mxu1 %v17959_v49 }
 0x432   : > { %14589 = vmatprep.subr.bf16.mxu1 %v17866_v3  ;;  %v16408_v3 = vld [vmem:[%s20882_s25 + $0x1e0] ss:$8 sps:$4 sm:$0xff]  }
 0x434   : > { %2509 = vmatmul.mubr.bf16.vlgmr.msra.gmra.mxu1 %v16400_v62 }
 0x435   : > { %14590 = vmatpush3.bf16.msra.mxu1 %v17871_v7  ;;  %2516 = vmatprep.mubr.bf16.mxu1 %v16403_v0  ;;  %v16409_v7 = vld [vmem:[%s20882_s25 + $0x1f4] ss:$8 sps:$4 sm:$0xff]  }
 0x436   : > { %14591 = vmatprep.subr.bf16.mxu1 %v17873_v8  ;;  %v16411_v8 = vld [vmem:[%s20882_s25 + $0x1f0] ss:$8 sps:$4 sm:$0xff]  }
 0x439   : > { %14592 = vmatpush3.bf16.msra.mxu1 %v17883_v13  ;;  %v16414_v13 = vld [vmem:[%s20882_s25 + $0x204] ss:$8 sps:$4 sm:$0xff]  }
 0x43a   : > { %14593 = vmatprep.subr.bf16.mxu1 %v17887_v14  ;;  %v16412_v14 = vld [vmem:[%s20882_s25 + $0x200] ss:$8 sps:$4 sm:$0xff]  }
 0x43c   : > { %2517 = vmatmul.mubr.bf16.gmra.mxu1 %v16405_v21 }
 0x43d   : > { %14594 = vmatpush3.bf16.msra.mxu1 %v17895_v19  ;;  %2524 = vmatprep.mubr.bf16.mxu1 %v16406_v4  ;;  %v16415_v19 = vld [vmem:[%s20882_s25 + $0x214] ss:$8 sps:$4 sm:$0xff]  }
 0x43e   : > { %14595 = vmatprep.subr.bf16.mxu1 %v17899_v20  ;;  %v16417_v20 = vld [vmem:[%s20882_s25 + $0x210] ss:$8 sps:$4 sm:$0xff]  }
 0x441   : > { %14596 = vmatpush3.bf16.msra.mxu1 %v17912_v28  ;;  %v16420_v28 = vld [vmem:[%s20882_s25 + $0x224] ss:$8 sps:$4 sm:$0xff]  }
 0x442   : > { %14597 = vmatprep.subr.bf16.mxu1 %v17917_v30  ;;  %v16418_v30 = vld [vmem:[%s20882_s25 + $0x220] ss:$8 sps:$4 sm:$0xff]  }
 0x444   : > { %2525 = vmatmul.mubr.bf16.gmra.mxu1 %v16408_v3 }
 0x445   : > { %14598 = vmatpush3.bf16.msra.mxu1 %v17925_v33  ;;  %2532 = vmatprep.mubr.bf16.mxu1 %v16409_v7  ;;  %v16423_v33 = vld [vmem:[%s20882_s25 + $0x234] ss:$8 sps:$4 sm:$0xff]  }
 0x446   : > { %14599 = vmatprep.subr.bf16.mxu1 %v17930_v35  ;;  %v16421_v35 = vld [vmem:[%s20882_s25 + $0x230] ss:$8 sps:$4 sm:$0xff]  }
 0x449   : > { %14600 = vmatpush3.bf16.msra.mxu1 %v17937_v39  ;;  %v2546_v39 = vld [vmem:[#allocation2 + $0x1c] sm:$0x7] }
 0x44a   : > { %14601 = vmatprep.subr.bf16.mxu1 %v17942_v41  ;;  %16168 = vmatprep.subr.msk.bf16.mxu0 %vm1238_vm0, %v2546_v39  ;;  %v2560_v41 = vsel %vm1238_vm0, %v2546_v39, 0 }
 0x44b   : > { %15202 = vmatpush3.bf16.msra.mxu0 %v2560_v41 }
 0x44c   : > { %2533 = vmatmul.mubr.bf16.gmra.mxu1 %v16411_v8 }
 0x44d   : > { %14602 = vmatpush3.bf16.msra.mxu1 %v17949_v45  ;;  %2716 = vmatprep.mubr.bf16.mxu1 %v16414_v13  ;;  %v2754_v45 = vld [vmem:[#allocation2 + $0x20] sm:$0x7] }
 0x44e   : > { %14603 = vmatprep.subr.bf16.mxu1 %v17954_v47  ;;  %16169 = vmatprep.subr.msk.bf16.mxu0 %vm1238_vm0, %v2754_v45  ;;  %v2768_v13 = vsel %vm1238_vm0, %v2754_v45, 0 }
 0x451   : > { %14604 = vmatpush3.bf16.msra.mxu1 %v17959_v49 }
 0x454   : > { %2717 = vmatmul.mubr.bf16.vlgmr.msra.gmra.mxu1 %v16412_v14 }
 0x455   : > { %2724 = vmatprep.mubr.bf16.mxu1 %v16415_v19 }
 0x45c   : > { %2725 = vmatmul.mubr.bf16.gmra.mxu1 %v16417_v20 }
 0x45d   : > { %2732 = vmatprep.mubr.bf16.mxu1 %v16420_v28 }
 0x464   : > { %2733 = vmatmul.mubr.bf16.gmra.mxu1 %v16418_v30 }
 0x465   : > { %2740 = vmatprep.mubr.bf16.mxu1 %v16423_v33 }
 0x46c   : > { %2741 = vmatmul.mubr.bf16.gmra.mxu1 %v16421_v35 }
 0x4b4   : > { %v15185_v47 = vpop.f32.mrf.mxu1 }
 0x4b5   : > { %v2213_v49 = vadd.f32 %v15185_v47, %v18278_v36 }
 0x4b6   : > { %v2180_v6 = vpop.f32.mrf.mxu1 }
 0x4b7   : > { %v2211_v10 = vadd.f32 %v2180_v6, %v18280_v38 }
 0x4b8   : > { %v15186_v43 = vpop.f32.mrf.mxu1 }
 0x4b9   : > { %v2214_v56 = vadd.f32 %v15186_v43, %v18282_v44 }
 0x4ba   : > { %v18389_v37 = vpop.f32.mrf.mxu1 }
 0x4c4   : > { %v15189_v57 = vpop.f32.mrf.mxu1 }
 0x4c5   : > { %v2217_v59 = vadd.f32 %v15189_v57, %v18286_v51 }
 0x4c6   : > { %v2196_v61 = vpop.f32.mrf.mxu1 }
 0x4c7   : > { %v2215_v63 = vadd.f32 %v2196_v61, %v18288_v53 }
 0x4c8   : > { %v15190_v2 = vpop.f32.mrf.mxu1 }
 0x4c9   : > { %v2218_v5 = vadd.f32 %v15190_v2, %v18290_v54 }
 0x4ca   : > { %v18394_v9 = vpop.f32.mrf.mxu1 }
 0x4d4   : > { %v15195_v36 = vpop.f32.mrf.mxu1 }
 0x4d5   : > { %v18396_v12 = vadd.f32 %v15195_v36, %v2213_v49 }
 0x4d6   : > { %v2388_v38 = vpop.f32.mrf.mxu1 }
 0x4d7   : > { %v18398_v15 = vadd.f32 %v2388_v38, %v2211_v10 }
 0x4d8   : > { %v15196_v44 = vpop.f32.mrf.mxu1 }
 0x4d9   : > { %v18400_v17 = vadd.f32 %v15196_v44, %v2214_v56 }
 0x4da   : > { %v18402_v23 = vpop.f32.mrf.mxu1 }
 0x4e4   : > { %v15199_v51 = vpop.f32.mrf.mxu1 }
 0x4e5   : > { %v18404_v25 = vadd.f32 %v15199_v51, %v2217_v59 }
 0x4e6   : > { %v2404_v53 = vpop.f32.mrf.mxu1 }
 0x4e7   : > { %v18406_v26 = vadd.f32 %v2404_v53, %v2215_v63 }
 0x4e8   : > { %v15200_v54 = vpop.f32.mrf.mxu1 }
 0x4e9   : > { %v18408_v27 = vadd.f32 %v15200_v54, %v2218_v5 }
 0x4ea   : > { %v18410_v29 = vpop.f32.mrf.mxu1 }
 0x4f4   : > { %v14560_v32 = vpop.f32.mrf.mxu1 }
 0x4f6   : > { %v14561_v16 = vpop.f32.mrf.mxu1 }
 0x4f7   : > { %v14562_v40 = vadd.f32 %v14561_v16, %v14560_v32 }
 0x4f8   : > { %v14563_v18 = vpop.f32.mrf.mxu1 }
 0x4fa   : > { %v14564_v22 = vpop.f32.mrf.mxu1 }
 0x4fb   : > { %v14565_v42 = vadd.f32 %v14564_v22, %v14563_v18 }
 0x4fc   : > { %v14566_v46 = vpop.f32.mrf.mxu1 }
 0x4fd   : > { %v2541_v60 = vpack.c.bf16 %v14565_v42, %v14562_v40 }
 0x4fe   : > { %v14567_v62 = vpop.f32.mrf.mxu1 }
 0x4ff   : > { %15203 = vmatprep.mubr.msk.bf16.mxu0 %vm1225_vm1, %v2541_v60  ;;  %v14568_v4 = vadd.f32 %v14567_v62, %v14566_v46 }
 0x500   : > { %v14569_v0 = vpop.f32.mrf.mxu1 }
 0x502   : > { %v14570_v21 = vpop.f32.mrf.mxu1 }
 0x503   : > { %v14571_v3 = vadd.f32 %v14570_v21, %v14569_v0 }
 0x504   : > { %v14572_v7 = vpop.f32.mrf.mxu1 }
 0x505   : > { %v2542_v8 = vpack.c.bf16 %v14571_v3, %v14568_v4 }
 0x506   : > { %v14573_v14 = vpop.f32.mrf.mxu1 }
 0x507   : > { %15204 = vmatmul.mubr.msk.bf16.vlgmr.msra.gmra.mxu0 %vm1225_vm1, %v2542_v8  ;;  %v14574_v28 = vadd.f32 %v14573_v14, %v14572_v7  ;;  %v17538_v7 = vmov 0.0   ;;  %v16426_v8 = vld [vmem:[%s20883_s5 + $0x18] sm:$0xff]  }
 0x508   : > { %v14575_v19 = vpop.f32.mrf.mxu1  ;;  %15212 = vmatpush3.bf16.msra.mxu0 %v2768_v13  ;;  %15245 = vmatprep.subr.bf16.mxu1 %v17538_v7 }
 0x509   : > { %15221 = vmatprep.subr.bf16.mxu0 %v17538_v7  ;;  %15249 = vmatprep.mubr.msk.bf16.mxu1 %vm17539_vm2, %v17538_v7 }
 0x50a   : > { %v14576_v20 = vpop.f32.mrf.mxu1  ;;  %15246 = vmatpush3.bf16.msra.mxu1 %v16426_v8 }
 0x50b   : > { %v14577_v30 = vadd.f32 %v14576_v20, %v14575_v19  ;;  %15247 = vmatprep.subr.bf16.mxu1 %v17538_v7 }
 0x50c   : > { %v14578_v33 = vpop.f32.mrf.mxu1 }
 0x50d   : > { %v2543_v35 = vpack.c.bf16 %v14577_v30, %v14574_v28 }
 0x50e   : > { %v14579_v39 = vpop.f32.mrf.mxu1 }
 0x50f   : > { %15207 = vmatprep.mubr.msk.bf16.mxu0 %vm1225_vm1, %v2543_v35  ;;  %v14580_v49 = vadd.f32 %v14579_v39, %v14578_v33 }
 0x510   : > { %v14581_v41 = vpop.f32.mrf.mxu1 }
 0x512   : > { %v14582_v47 = vpop.f32.mrf.mxu1 }
 0x513   : > { %v14583_v6 = vadd.f32 %v14582_v47, %v14581_v41 }
 0x514   : > { %v14605_v10 = vpop.f32.mrf.mxu1 }
 0x515   : > { %v2544_v43 = vpack.c.bf16 %v14583_v6, %v14580_v49 }
 0x516   : > { %v14606_v45 = vpop.f32.mrf.mxu1 }
 0x517   : > { %15208 = vmatmul.mubr.msk.bf16.gmra.mxu0 %vm1225_vm1, %v2544_v43  ;;  %v14607_v59 = vadd.f32 %v14606_v45, %v14605_v10  ;;  %v12962_v10 = vld [vmem:[#allocation4] ss:$0 sm:$0xff] }
 0x518   : > { %v14608_v56 = vpop.f32.mrf.mxu1 }
 0x51a   : > { %v14609_v57 = vpop.f32.mrf.mxu1 }
 0x51b   : > { %v14610_v61 = vadd.f32 %v14609_v57, %v14608_v56 }
 0x51c   : > { %v14611_v63 = vpop.f32.mrf.mxu1 }
 0x51d   : > { %v2749_v2 = vpack.c.bf16 %v14610_v61, %v14607_v59  ;;  %v1376_v59 = vadd.f32 %v18158_v58, %v18154_v48 }
 0x51e   : > { %v14612_v5 = vpop.f32.mrf.mxu1 }
 0x51f   : > { %15213 = vmatprep.mubr.msk.bf16.mxu0 %vm1225_vm1, %v2749_v2  ;;  %v14613_v44 = vadd.f32 %v14612_v5, %v14611_v63  ;;  %v1592_v63 = vadd.f32 %v18174_v11, %v1376_v59 }
 0x520   : > { %v14614_v36 = vpop.f32.mrf.mxu1 }
 0x521   : > { %v1800_v2 = vadd.f32 %v18276_v31, %v1592_v63 }
 0x522   : > { %v14615_v38 = vpop.f32.mrf.mxu1 }
 0x523   : > { %v14616_v51 = vadd.f32 %v14615_v38, %v14614_v36 }
 0x524   : > { %v14617_v53 = vpop.f32.mrf.mxu1 }
 0x525   : > { %v2750_v54 = vpack.c.bf16 %v14616_v51, %v14613_v44 }
 0x526   : > { %v14618_v32 = vpop.f32.mrf.mxu1 }
 0x527   : > { %15214 = vmatmul.mubr.msk.bf16.vlgmr.msra.gmra.mxu0 %vm1225_vm1, %v2750_v54  ;;  %v14619_v22 = vadd.f32 %v14618_v32, %v14617_v53 }
 0x528   : > { %v14620_v16 = vpop.f32.mrf.mxu1 }
 0x52a   : > { %v14621_v18 = vpop.f32.mrf.mxu1 }
 0x52b   : > { %v14622_v40 = vadd.f32 %v14621_v18, %v14620_v16 }
 0x52c   : > { %v14623_v42 = vpop.f32.mrf.mxu1 }
 0x52d   : > { %v2751_v46 = vpack.c.bf16 %v14622_v40, %v14619_v22 }
 0x52e   : > { %v14624_v60 = vpop.f32.mrf.mxu1 }
 0x52f   : > { %15217 = vmatprep.mubr.msk.bf16.mxu0 %vm1225_vm1, %v2751_v46  ;;  %v14625_v21 = vadd.f32 %v14624_v60, %v14623_v42 }
 0x530   : > { %v14626_v62 = vpop.f32.mrf.mxu1 }
 0x532   : > { %v14627_v0 = vpop.f32.mrf.mxu1 }
 0x533   : > { %v14628_v4 = vadd.f32 %v14627_v0, %v14626_v62  ;;  %v16424_v0 = vld [vmem:[#allocation7] sm:$0xff]  }
 0x535   : > { %v2752_v3 = vpack.c.bf16 %v14628_v4, %v14625_v21  ;;  %v16427_v21 = vld [vmem:[%s20883_s5 + $0x8] sm:$0xff]   ;;  %v16428_v4 = vld [vmem:[%s20883_s5] sm:$0xff]  }
 0x537   : > { %15218 = vmatmul.mubr.msk.bf16.gmra.mxu0 %vm1225_vm1, %v2752_v3  ;;  %v16429_v3 = vld [vmem:[%s20883_s5 + $0x10] sm:$0xff]  }
 0x538   : > { %15229 = vmatprep.mubr.msk.bf16.mxu0 %vm17539_vm2, %v17538_v7  ;;  %15248 = vmatpush3.bf16.msra.mxu1 %v16429_v3  ;;  %v16441_v3 = vld [vmem:[%s20883_s5 + $0x50] sm:$0xff]  }
 0x539   : > { %15261 = vmatprep.subr.bf16.mxu1 %v17538_v7 }
 0x5c7   : > { %v15205_v13 = vpop.f32.mrf.mxu0 }
 0x5c8   : > { %v2629_v41 = vadd.f32 %v15205_v13, %v18396_v12  ;;  %v1360_v12 = vadd.f32 %v18156_v52, %v18152_v24 }
 0x5c9   : > { %v2596_v14 = vpop.f32.mrf.mxu0 }
 0x5ca   : > { %v1588_v36 = vadd.f32 %v18166_v1, %v1360_v12 }
 0x5cb   : > { %v15206_v19 = vpop.f32.mrf.mxu0 }
 0x5cc   : > { %v2630_v49 = vadd.f32 %v15206_v19, %v18400_v17  ;;  %v2008_v17 = vadd.f32 %v18292_v55, %v1800_v2  ;;  %v1796_v48 = vadd.f32 %v18271_v34, %v1588_v36 }
 0x5cd   : > { %v2599_v20 = vpop.f32.mrf.mxu0 }
 0x5ce   : > { %v2216_v44 = vadd.f32 %v18394_v9, %v2008_v17  ;;  %v2004_v24 = vadd.f32 %v18284_v50, %v1796_v48  ;;  %v2627_v50 = vadd.f32 %v2596_v14, %v18398_v15  ;;  %v16425_v15 = vld [vmem:[#allocation7 + $0x8] sm:$0xff]   ;;  %v16434_v48 = vld [vmem:[%s20883_s5 + $0x38] sm:$0xff]  }
 0x5d0   : > { %v2424_v11 = vadd.f32 %v18410_v29, %v2216_v44  ;;  %v2212_v32 = vadd.f32 %v18389_v37, %v2004_v24 }
 0x5d2   : > { %v2420_v22 = vadd.f32 %v18402_v23, %v2212_v32 }
 0x5d4   : > { %v2628_v40 = vadd.f32 %v2599_v20, %v2420_v22 }
 0x5d7   : > { %v15209_v28 = vpop.f32.mrf.mxu0 }
 0x5d8   : > { %v2633_v51 = vadd.f32 %v15209_v28, %v18404_v25 }
 0x5d9   : > { %v2612_v30 = vpop.f32.mrf.mxu0 }
 0x5da   : > { %v2631_v55 = vadd.f32 %v2612_v30, %v18406_v26 }
 0x5db   : > { %v15210_v33 = vpop.f32.mrf.mxu0 }
 0x5dc   : > { %v2634_v31 = vadd.f32 %v15210_v33, %v18408_v27 }
 0x5dd   : > { %v2615_v35 = vpop.f32.mrf.mxu0 }
 0x5de   : > { %v2632_v54 = vadd.f32 %v2615_v35, %v2424_v11 }
 0x5e7   : > { %v15215_v39 = vpop.f32.mrf.mxu0 }
 0x5e8   : > { %v2837_v6 = vadd.f32 %v15215_v39, %v2629_v41  ;;  %v16430_v41 = vld [vmem:[#allocation7 + $0x10] sm:$0xff]  }
 0x5e9   : > { %v2804_v47 = vpop.f32.mrf.mxu0 }
 0x5ea   : > { %v2852_v56 = vadd.f32 %v12962_v10, %v2837_v6  ;;  %v2835_v46 = vadd.f32 %v2804_v47, %v2627_v50  ;;  %v16431_v47 = vld [vmem:[%s20883_s5 + $0x28] sm:$0xff]  }
 0x5eb   : > { %v15216_v43 = vpop.f32.mrf.mxu0 }
 0x5ec   : > { %v2838_v45 = vadd.f32 %v15216_v43, %v2630_v49  ;;  %v2850_v60 = vadd.f32 %v12962_v10, %v2835_v46  ;;  %v16432_v49 = vld [vmem:[%s20883_s5 + $0x20] sm:$0xff]  }
 0x5ed   : > { %v2807_v5 = vpop.f32.mrf.mxu0 }
 0x5ee   : > { %v2853_v57 = vadd.f32 %v12962_v10, %v2838_v45  ;;  %v2836_v26 = vadd.f32 %v2807_v5, %v2628_v40 }
 0x5f0   : > { %v18435_v61 = vpack.c.bf16 %v2853_v57, %v2852_v56  ;;  %v2851_v23 = vadd.f32 %v12962_v10, %v2836_v26 }
 0x5f2   : > { %v18463_v62 = vpack.c.bf16 %v2851_v23, %v2850_v60 }
 0x5f7   : > { %v15219_v38 = vpop.f32.mrf.mxu0 }
 0x5f8   : > { %v2841_v53 = vadd.f32 %v15219_v38, %v2633_v51  ;;  %v16433_v51 = vld [vmem:[#allocation7 + $0x18] sm:$0xff]  }
 0x5f9   : > { %v2820_v58 = vpop.f32.mrf.mxu0 }
 0x5fa   : > { %v2856_v16 = vadd.f32 %v12962_v10, %v2841_v53  ;;  %v2839_v25 = vadd.f32 %v2820_v58, %v2631_v55  ;;  %v16435_v58 = vld [vmem:[%s20883_s5 + $0x30] sm:$0xff]  }
 0x5fb   : > { %v15220_v52 = vpop.f32.mrf.mxu0 }
 0x5fc   : > { %v2842_v1 = vadd.f32 %v15220_v52, %v2634_v31  ;;  %v2854_v42 = vadd.f32 %v12962_v10, %v2839_v25  ;;  %v16436_v25 = vld [vmem:[#allocation7 + $0x20] sm:$0xff]  }
 0x5fd   : > { %v2823_v9 = vpop.f32.mrf.mxu0 }
 0x5fe   : > { %v2857_v18 = vadd.f32 %v12962_v10, %v2842_v1  ;;  %v2840_v34 = vadd.f32 %v2823_v9, %v2632_v54 }
 0x600   : > { %v18452_v29 = vpack.c.bf16 %v2857_v18, %v2856_v16  ;;  %v2855_v27 = vadd.f32 %v12962_v10, %v2840_v34  ;;  %v16437_v18 = vld [vmem:[%s20883_s5 + $0x48] sm:$0xff]   ;;  %v16438_v34 = vld [vmem:[%s20883_s5 + $0x40] sm:$0xff]  }
 0x602   : > { %15222 = vmatpush3.bf16.msra.mxu0 %v18452_v29  ;;  %v18457_v37 = vpack.c.bf16 %v2855_v27, %v2854_v42 }
 0x603   : > { %15223 = vmatprep.subr.bf16.mxu0 %v17538_v7 }
 0x606   : > { %15224 = vmatpush3.bf16.msra.mxu0 %v18457_v37 }
 0x607   : > { %15225 = vmatprep.subr.bf16.mxu0 %v17538_v7 }
 0x60a   : > { %15226 = vmatpush3.bf16.msra.mxu0 %v18435_v61 }
 0x60b   : > { %15227 = vmatprep.subr.bf16.mxu0 %v17538_v7 }
 0x60e   : > { %15228 = vmatpush3.bf16.msra.mxu0 %v18463_v62 }
 0x60f   : > { %15233 = vmatprep.subr.bf16.mxu0 %v17538_v7 }
 0x611   : > { %15230 = vmatmul.mubr.msk.bf16.vlgmr.msra.gmra.mxu0 %vm2869_vm3, %v16424_v0 }
 0x612   : > { %15234 = vmatpush3.bf16.msra.mxu0 %v18452_v29  ;;  %15241 = vmatprep.mubr.msk.bf16.mxu0 %vm17539_vm2, %v17538_v7 }
 0x613   : > { %15235 = vmatprep.subr.bf16.mxu0 %v17538_v7 }
 0x616   : > { %15236 = vmatpush3.bf16.msra.mxu0 %v18457_v37 }
 0x617   : > { %15237 = vmatprep.subr.bf16.mxu0 %v17538_v7 }
 0x61a   : > { %15238 = vmatpush3.bf16.msra.mxu0 %v18435_v61 }
 0x61b   : > { %15239 = vmatprep.subr.bf16.mxu0 %v17538_v7 }
 0x61e   : > { %15240 = vmatpush3.bf16.msra.mxu0 %v18463_v62 }
 0x61f   : > { %15253 = vmatprep.subr.bf16.mxu0 %v17538_v7 }
 0x621   : > { %15242 = vmatmul.mubr.msk.bf16.vlgmr.msra.gmra.mxu0 %vm2869_vm3, %v16425_v15 }
 0x622   : > { %15257 = vmatprep.mubr.msk.bf16.mxu0 %vm17539_vm2, %v17538_v7  ;;  %15254 = vmatpush3.bf16.msra.mxu0 %v16427_v21  ;;  %v16439_v21 = vld [vmem:[#allocation7 + $0x28] sm:$0xff]  }
 0x623   : > { %15255 = vmatprep.subr.bf16.mxu0 %v17538_v7 }
 0x626   : > { %15256 = vmatpush3.bf16.msra.mxu0 %v16428_v4  ;;  %v16440_v4 = vld [vmem:[%s20883_s5 + $0x58] sm:$0xff]  }
 0x627   : > { %15273 = vmatprep.subr.bf16.mxu0 %v17538_v7 }
 0x6d1   : > { %v2907_v8 = vpop.f32.mrf.mxu0 }
 0x6d3   : > { %v15231_v13 = vpop.f32.mrf.mxu0 }
 0x6d5   : > { %v2910_v14 = vpop.f32.mrf.mxu0 }
 0x6d6   : > { %v2914_v19 = vpack.c.bf16 %v2910_v14, %v2907_v8 }
 0x6d7   : > { %v15232_v20 = vpop.f32.mrf.mxu0 }
 0x6d8   : > { %15258 = vmatmul.mubr.msk.bf16.vlgmr.msra.gmra.mxu0 %vm2989_vm4, %v2914_v19 }
 0x6d9   : > { %15277 = vmatprep.mubr.msk.bf16.mxu0 %vm17539_vm2, %v17538_v7  ;;  %15274 = vmatpush3.bf16.msra.mxu0 %v16431_v47  ;;  %v16442_v47 = vld [vmem:[#allocation7 + $0x30] sm:$0xff]  }
 0x6da   : > { %15275 = vmatprep.subr.bf16.mxu0 %v17538_v7 }
 0x6dd   : > { %15276 = vmatpush3.bf16.msra.mxu0 %v16432_v49  ;;  %v16443_v49 = vld [vmem:[%s20883_s5 + $0x68] sm:$0xff]  }
 0x6de   : > { %15281 = vmatprep.subr.bf16.mxu0 %v17538_v7 }
 0x6e1   : > { %v2964_v28 = vpop.f32.mrf.mxu0 }
 0x6e3   : > { %v15243_v30 = vpop.f32.mrf.mxu0 }
 0x6e5   : > { %v2967_v33 = vpop.f32.mrf.mxu0 }
 0x6e6   : > { %v2971_v35 = vpack.c.bf16 %v2967_v33, %v2964_v28 }
 0x6e7   : > { %v15244_v39 = vpop.f32.mrf.mxu0 }
 0x6e8   : > { %15250 = vmatmul.mubr.msk.bf16.vlgmr.msra.gmra.mxu1 %vm2989_vm4, %v2971_v35 }
 0x6e9   : > { %15262 = vmatpush3.bf16.msra.mxu1 %v18452_v29  ;;  %15269 = vmatprep.mubr.msk.bf16.mxu1 %vm17539_vm2, %v17538_v7 }
 0x6ea   : > { %15263 = vmatprep.subr.bf16.mxu1 %v17538_v7 }
 0x6ed   : > { %15264 = vmatpush3.bf16.msra.mxu1 %v18457_v37 }
 0x6ee   : > { %15265 = vmatprep.subr.bf16.mxu1 %v17538_v7 }
 0x6f1   : > { %15266 = vmatpush3.bf16.msra.mxu1 %v18435_v61 }
 0x6f2   : > { %15267 = vmatprep.subr.bf16.mxu1 %v17538_v7 }
 0x6f5   : > { %15268 = vmatpush3.bf16.msra.mxu1 %v18463_v62 }
 0x6f6   : > { %15293 = vmatprep.subr.bf16.mxu1 %v17538_v7 }
 0x6f8   : > { %15270 = vmatmul.mubr.msk.bf16.vlgmr.msra.gmra.mxu1 %vm2869_vm3, %v16430_v41 }
 0x6f9   : > { %15297 = vmatprep.mubr.msk.bf16.mxu1 %vm17539_vm2, %v17538_v7  ;;  %15294 = vmatpush3.bf16.msra.mxu1 %v16434_v48 }
 0x6fa   : > { %15295 = vmatprep.subr.bf16.mxu1 %v17538_v7 }
 0x6fd   : > { %15296 = vmatpush3.bf16.msra.mxu1 %v16435_v58 }
 0x6fe   : > { %15301 = vmatprep.subr.bf16.mxu1 %v17538_v7 }
 0x798   : > { %v3083_v6 = vpop.f32.mrf.mxu0 }
 0x79a   : > { %v15259_v10 = vpop.f32.mrf.mxu0 }
 0x79c   : > { %v3086_v43 = vpop.f32.mrf.mxu0 }
 0x79e   : > { %v15260_v45 = vpop.f32.mrf.mxu0 }
 0x7a8   : > { %v3027_v56 = vpop.f32.mrf.mxu1 }
 0x7a9   : > { %v3084_v57 = vadd.f32 %v3083_v6, %v3027_v56  ;;  %v16444_v6 = vld [vmem:[%s20883_s5 + $0x60] sm:$0xff]  }
 0x7aa   : > { %v15251_v59 = vpop.f32.mrf.mxu1 }
 0x7ac   : > { %v3030_v63 = vpop.f32.mrf.mxu1 }
 0x7ad   : > { %v3087_v2 = vadd.f32 %v3086_v43, %v3030_v63 }
 0x7ae   : > { %v15252_v12 = vpop.f32.mrf.mxu1 }
 0x7b8   : > { %v3135_v5 = vpop.f32.mrf.mxu1 }
 0x7ba   : > { %v15271_v17 = vpop.f32.mrf.mxu1 }
 0x7bc   : > { %v3138_v36 = vpop.f32.mrf.mxu1 }
 0x7bd   : > { %v3142_v38 = vpack.c.bf16 %v3138_v36, %v3135_v5  ;;  %v16445_v36 = vld [vmem:[#allocation7 + $0x38] sm:$0xff]  }
 0x7be   : > { %v15272_v44 = vpop.f32.mrf.mxu1 }
 0x7bf   : > { %15278 = vmatmul.mubr.msk.bf16.vlgmr.msra.gmra.mxu0 %vm2989_vm4, %v3142_v38  ;;  %v16446_v38 = vld [vmem:[%s20883_s5 + $0x78] sm:$0xff]   ;;  %v16447_v44 = vld [vmem:[%s20883_s5 + $0x70] sm:$0xff]  }
 0x7c0   : > { %15282 = vmatpush3.bf16.msra.mxu0 %v18452_v29  ;;  %15289 = vmatprep.mubr.msk.bf16.mxu0 %vm17539_vm2, %v17538_v7 }
 0x7c1   : > { %15283 = vmatprep.subr.bf16.mxu0 %v17538_v7 }
 0x7c4   : > { %15284 = vmatpush3.bf16.msra.mxu0 %v18457_v37 }
 0x7c5   : > { %15285 = vmatprep.subr.bf16.mxu0 %v17538_v7 }
 0x7c8   : > { %15286 = vmatpush3.bf16.msra.mxu0 %v18435_v61 }
 0x7c9   : > { %15287 = vmatprep.subr.bf16.mxu0 %v17538_v7 }
 0x7cc   : > { %15288 = vmatpush3.bf16.msra.mxu0 %v18463_v62 }
 0x7cd   : > { %15313 = vmatprep.subr.bf16.mxu0 %v17538_v7 }
 0x7cf   : > { %15290 = vmatmul.mubr.msk.bf16.vlgmr.msra.gmra.mxu0 %vm2869_vm3, %v16433_v51 }
 0x7d0   : > { %15317 = vmatprep.mubr.msk.bf16.mxu0 %vm17539_vm2, %v17538_v7  ;;  %15314 = vmatpush3.bf16.msra.mxu0 %v16437_v18 }
 0x7d1   : > { %15315 = vmatprep.subr.bf16.mxu0 %v17538_v7 }
 0x7d4   : > { %15316 = vmatpush3.bf16.msra.mxu0 %v16438_v34 }
 0x7d5   : > { %15321 = vmatprep.subr.bf16.mxu0 %v17538_v7 }
 0x87f   : > { %v3197_v11 = vpop.f32.mrf.mxu0 }
 0x880   : > { %v3204_v31 = vadd.f32 %v3197_v11, %v3084_v57 }
 0x881   : > { %v15279_v53 = vpop.f32.mrf.mxu0 }
 0x883   : > { %v3200_v24 = vpop.f32.mrf.mxu0 }
 0x884   : > { %v3205_v52 = vadd.f32 %v3200_v24, %v3087_v2 }
 0x885   : > { %v15280_v55 = vpop.f32.mrf.mxu0 }
 0x88f   : > { %v3251_v54 = vpop.f32.mrf.mxu0 }
 0x891   : > { %v15291_v1 = vpop.f32.mrf.mxu0 }
 0x893   : > { %v3254_v32 = vpop.f32.mrf.mxu0 }
 0x894   : > { %v3258_v9 = vpack.c.bf16 %v3254_v32, %v3251_v54  ;;  %v16448_v32 = vld [vmem:[#allocation7 + $0x40] sm:$0xff]  }
 0x895   : > { %v15292_v16 = vpop.f32.mrf.mxu0 }
 0x896   : > { %15298 = vmatmul.mubr.msk.bf16.vlgmr.msra.gmra.mxu1 %vm2989_vm4, %v3258_v9  ;;  %v16449_v9 = vld [vmem:[%s20883_s5 + $0x88] sm:$0xff]   ;;  %v16450_v16 = vld [vmem:[%s20883_s5 + $0x80] sm:$0xff]  }
 0x897   : > { %15302 = vmatpush3.bf16.msra.mxu1 %v18452_v29  ;;  %15309 = vmatprep.mubr.msk.bf16.mxu1 %vm17539_vm2, %v17538_v7 }
 0x898   : > { %15303 = vmatprep.subr.bf16.mxu1 %v17538_v7 }
 0x89b   : > { %15304 = vmatpush3.bf16.msra.mxu1 %v18457_v37 }
 0x89c   : > { %15305 = vmatprep.subr.bf16.mxu1 %v17538_v7 }
 0x89f   : > { %15306 = vmatpush3.bf16.msra.mxu1 %v18435_v61 }
 0x8a0   : > { %15307 = vmatprep.subr.bf16.mxu1 %v17538_v7 }
 0x8a3   : > { %15308 = vmatpush3.bf16.msra.mxu1 %v18463_v62 }
 0x8a4   : > { %15333 = vmatprep.subr.bf16.mxu1 %v17538_v7 }
 0x8a6   : > { %15310 = vmatmul.mubr.msk.bf16.vlgmr.msra.gmra.mxu1 %vm2869_vm3, %v16436_v25 }
 0x8a7   : > { %15337 = vmatprep.mubr.msk.bf16.mxu1 %vm17539_vm2, %v17538_v7  ;;  %15334 = vmatpush3.bf16.msra.mxu1 %v16440_v4 }
 0x8a8   : > { %15335 = vmatprep.subr.bf16.mxu1 %v17538_v7 }
 0x8ab   : > { %15336 = vmatpush3.bf16.msra.mxu1 %v16441_v3 }
 0x8ac   : > { %15341 = vmatprep.subr.bf16.mxu1 %v17538_v7 }
 0x956   : > { %v3313_v22 = vpop.f32.mrf.mxu1 }
 0x957   : > { %v3320_v27 = vadd.f32 %v3313_v22, %v3204_v31 }
 0x958   : > { %v15299_v40 = vpop.f32.mrf.mxu1 }
 0x95a   : > { %v3316_v42 = vpop.f32.mrf.mxu1 }
 0x95b   : > { %v3321_v50 = vadd.f32 %v3316_v42, %v3205_v52 }
 0x95c   : > { %v15300_v26 = vpop.f32.mrf.mxu1 }
 0x966   : > { %v3367_v46 = vpop.f32.mrf.mxu1 }
 0x968   : > { %v15311_v23 = vpop.f32.mrf.mxu1 }
 0x96a   : > { %v3370_v60 = vpop.f32.mrf.mxu1 }
 0x96b   : > { %v3374_v0 = vpack.c.bf16 %v3370_v60, %v3367_v46 }
 0x96c   : > { %v15312_v15 = vpop.f32.mrf.mxu1 }
 0x96d   : > { %15318 = vmatmul.mubr.msk.bf16.vlgmr.msra.gmra.mxu0 %vm2989_vm4, %v3374_v0 }
 0x96e   : > { %15322 = vmatpush3.bf16.msra.mxu0 %v18452_v29  ;;  %15329 = vmatprep.mubr.msk.bf16.mxu0 %vm17539_vm2, %v17538_v7 }
 0x96f   : > { %15323 = vmatprep.subr.bf16.mxu0 %v17538_v7 }
 0x972   : > { %15324 = vmatpush3.bf16.msra.mxu0 %v18457_v37 }
 0x973   : > { %15325 = vmatprep.subr.bf16.mxu0 %v17538_v7 }
 0x976   : > { %15326 = vmatpush3.bf16.msra.mxu0 %v18435_v61 }
 0x977   : > { %15327 = vmatprep.subr.bf16.mxu0 %v17538_v7 }
 0x97a   : > { %15328 = vmatpush3.bf16.msra.mxu0 %v18463_v62 }
 0x97b   : > { %15353 = vmatprep.subr.bf16.mxu0 %v17538_v7 }
 0x97d   : > { %15330 = vmatmul.mubr.msk.bf16.vlgmr.msra.gmra.mxu0 %vm2869_vm3, %v16439_v21  ;;  %v13040_v21 = vld [vmem:[#allocation6] ss:$0 sm:$0xff] }
 0x97e   : > { %15357 = vmatprep.mubr.msk.bf16.mxu0 %vm17539_vm2, %v17538_v7  ;;  %15354 = vmatpush3.bf16.msra.mxu0 %v16443_v49  ;;  %v16457_v49 = vld [vmem:[#allocation9 + $0x20] sm:$0xff]  }
 0x97f   : > { %15355 = vmatprep.subr.bf16.mxu0 %v17538_v7 }
 0x982   : > { %15356 = vmatpush3.bf16.msra.mxu0 %v16444_v6  ;;  %v16458_v6 = vld [vmem:[#allocation9] sm:$0xff]  }
 0x983   : > { %15361 = vmatprep.subr.bf16.mxu0 %v17538_v7 }
 0xa2d   : > { %v3429_v8 = vpop.f32.mrf.mxu0 }
 0xa2e   : > { %v3436_v13 = vadd.f32 %v3429_v8, %v3320_v27 }
 0xa2f   : > { %v15319_v14 = vpop.f32.mrf.mxu0 }
 0xa31   : > { %v3432_v19 = vpop.f32.mrf.mxu0 }
 0xa32   : > { %v3437_v20 = vadd.f32 %v3432_v19, %v3321_v50 }
 0xa33   : > { %v15320_v28 = vpop.f32.mrf.mxu0 }
 0xa34   : > { %v3967_v28 = vld [vmem:[#allocation12 + $0x2] sm:$0x3] }
 0xa3d   : > { %v3483_v30 = vpop.f32.mrf.mxu0 }
 0xa3f   : > { %v15331_v33 = vpop.f32.mrf.mxu0 }
 0xa40   : > { %v16452_v33 = vld [vmem:[#allocation9 + $0x18] sm:$0xff]  }
 0xa41   : > { %v3486_v35 = vpop.f32.mrf.mxu0 }
 0xa42   : > { %v3490_v39 = vpack.c.bf16 %v3486_v35, %v3483_v30  ;;  %v16451_v30 = vld [vmem:[#allocation9 + $0x38] sm:$0xff]   ;;  %v16453_v35 = vld [vmem:[#allocation9 + $0x30] sm:$0xff]  }
 0xa43   : > { %v15332_v41 = vpop.f32.mrf.mxu0 }
 0xa44   : > { %15338 = vmatmul.mubr.msk.bf16.vlgmr.msra.gmra.mxu1 %vm2989_vm4, %v3490_v39  ;;  %v16454_v39 = vld [vmem:[#allocation9 + $0x10] sm:$0xff]   ;;  %v16455_v41 = vld [vmem:[#allocation9 + $0x28] sm:$0xff]  }
 0xa45   : > { %15342 = vmatpush3.bf16.msra.mxu1 %v18452_v29  ;;  %15349 = vmatprep.mubr.msk.bf16.mxu1 %vm17539_vm2, %v17538_v7 }
 0xa46   : > { %15343 = vmatprep.subr.bf16.mxu1 %v17538_v7 }
 0xa49   : > { %15344 = vmatpush3.bf16.msra.mxu1 %v18457_v37 }
 0xa4a   : > { %15345 = vmatprep.subr.bf16.mxu1 %v17538_v7 }
 0xa4d   : > { %15346 = vmatpush3.bf16.msra.mxu1 %v18435_v61 }
 0xa4e   : > { %15347 = vmatprep.subr.bf16.mxu1 %v17538_v7 }
 0xa51   : > { %15348 = vmatpush3.bf16.msra.mxu1 %v18463_v62 }
 0xa52   : > { %15373 = vmatprep.subr.bf16.mxu1 %v17538_v7 }
 0xa54   : > { %15350 = vmatmul.mubr.msk.bf16.vlgmr.msra.gmra.mxu1 %vm2869_vm3, %v16442_v47  ;;  %v16456_v47 = vld [vmem:[#allocation9 + $0x8] sm:$0xff]  }
 0xa55   : > { %15377 = vmatprep.mubr.msk.bf16.mxu1 %vm17539_vm2, %v17538_v7  ;;  %15374 = vmatpush3.bf16.msra.mxu1 %v16446_v38  ;;  %v4156_v38 = vld [vmem:[#allocation12 + $0x4] sm:$0x3] }
 0xa56   : > { %15375 = vmatprep.subr.bf16.mxu1 %v17538_v7 }
 0xa59   : > { %15376 = vmatpush3.bf16.msra.mxu1 %v16447_v44  ;;  %v4279_v44 = vld [vmem:[#allocation12 + $0x6] sm:$0x3] }
 0xa5a   : > { %15381 = vmatprep.subr.bf16.mxu1 %v17538_v7 }
 0xb04   : > { %v3545_v10 = vpop.f32.mrf.mxu1 }
 0xb05   : > { %v3552_v43 = vadd.f32 %v3545_v10, %v3436_v13 }
 0xb06   : > { %v15339_v45 = vpop.f32.mrf.mxu1 }
 0xb08   : > { %v3548_v56 = vpop.f32.mrf.mxu1 }
 0xb09   : > { %v3553_v57 = vadd.f32 %v3548_v56, %v3437_v20  ;;  %v3912_v20 = vld [vmem:[#allocation12] sm:$0x3] }
 0xb0a   : > { %v15340_v59 = vpop.f32.mrf.mxu1 }
 0xb14   : > { %v3599_v63 = vpop.f32.mrf.mxu1 }
 0xb16   : > { %v15351_v2 = vpop.f32.mrf.mxu1 }
 0xb18   : > { %v3602_v12 = vpop.f32.mrf.mxu1 }
 0xb19   : > { %v3606_v5 = vpack.c.bf16 %v3602_v12, %v3599_v63 }
 0xb1a   : > { %v15352_v17 = vpop.f32.mrf.mxu1 }
 0xb1b   : > { %15358 = vmatmul.mubr.msk.bf16.vlgmr.msra.gmra.mxu0 %vm2989_vm4, %v3606_v5  ;;  %v16460_v5 = vld [vmem:[#allocation9 + $0x50] sm:$0xff]  }
 0xb1c   : > { %15362 = vmatpush3.bf16.msra.mxu0 %v18452_v29  ;;  %15369 = vmatprep.mubr.msk.bf16.mxu0 %vm17539_vm2, %v17538_v7 }
 0xb1d   : > { %15363 = vmatprep.subr.bf16.mxu0 %v17538_v7 }
 0xb20   : > { %15364 = vmatpush3.bf16.msra.mxu0 %v18457_v37 }
 0xb21   : > { %15365 = vmatprep.subr.bf16.mxu0 %v17538_v7 }
 0xb24   : > { %15366 = vmatpush3.bf16.msra.mxu0 %v18435_v61 }
 0xb25   : > { %15367 = vmatprep.subr.bf16.mxu0 %v17538_v7 }
 0xb28   : > { %15368 = vmatpush3.bf16.msra.mxu0 %v18463_v62 }
 0xb29   : > { %15393 = vmatprep.subr.bf16.mxu0 %v17538_v7 }
 0xb2b   : > { %15370 = vmatmul.mubr.msk.bf16.vlgmr.msra.gmra.mxu0 %vm2869_vm3, %v16445_v36 }
 0xb2c   : > { %15397 = vmatprep.mubr.msk.bf16.mxu0 %vm17539_vm2, %v17538_v7  ;;  %15394 = vmatpush3.bf16.msra.mxu0 %v16449_v9 }
 0xb2d   : > { %15395 = vmatprep.subr.bf16.mxu0 %v17538_v7 }
 0xb30   : > { %15396 = vmatpush3.bf16.msra.mxu0 %v16450_v16 }
 0xb31   : > { %15401 = vmatprep.subr.bf16.mxu0 %v17538_v7 }
 0xbdb   : > { %v3661_v51 = vpop.f32.mrf.mxu0 }
 0xbdc   : > { %v3668_v48 = vadd.f32 %v3661_v51, %v3552_v43  ;;  %v16461_v51 = vld [vmem:[#allocation9 + $0x48] sm:$0xff]  }
 0xbdd   : > { %v15359_v58 = vpop.f32.mrf.mxu0 }
 0xbde   : > { %v16463_v58 = vld [vmem:[#allocation9 + $0x40] sm:$0xff]  }
 0xbdf   : > { %v3664_v11 = vpop.f32.mrf.mxu0 }
 0xbe0   : > { %v3669_v31 = vadd.f32 %v3664_v11, %v3553_v57  ;;  %v16459_v57 = vld [vmem:[#allocation9 + $0x58] sm:$0xff]   ;;  %v16464_v11 = vld [vmem:[#allocation9 + $0x70] sm:$0xff]  }
 0xbe1   : > { %v15360_v53 = vpop.f32.mrf.mxu0 }
 0xbe2   : > { %v16466_v53 = vld [vmem:[#allocation9 + $0x60] sm:$0xff]  }
 0xbeb   : > { %v3715_v24 = vpop.f32.mrf.mxu0 }
 0xbed   : > { %v15371_v52 = vpop.f32.mrf.mxu0 }
 0xbef   : > { %v3718_v55 = vpop.f32.mrf.mxu0 }
 0xbf0   : > { %v3722_v54 = vpack.c.bf16 %v3718_v55, %v3715_v24 }
 0xbf1   : > { %v15372_v1 = vpop.f32.mrf.mxu0 }
 0xbf2   : > { %15378 = vmatmul.mubr.msk.bf16.vlgmr.msra.gmra.mxu1 %vm2989_vm4, %v3722_v54 }
 0xbf3   : > { %15382 = vmatpush3.bf16.msra.mxu1 %v18452_v29  ;;  %15389 = vmatprep.mubr.msk.bf16.mxu1 %vm17539_vm2, %v17538_v7 }
 0xbf4   : > { %15383 = vmatprep.subr.bf16.mxu1 %v17538_v7 }
 0xbf7   : > { %15384 = vmatpush3.bf16.msra.mxu1 %v18457_v37 }
 0xbf8   : > { %15385 = vmatprep.subr.bf16.mxu1 %v17538_v7 }
 0xbfb   : > { %15386 = vmatpush3.bf16.msra.mxu1 %v18435_v61 }
 0xbfc   : > { %15387 = vmatprep.subr.bf16.mxu1 %v17538_v7 }
 0xbff   : > { %15388 = vmatpush3.bf16.msra.mxu1 %v18463_v62 }
 0xc00   : > { %15407 = vmatprep.subr.bf16.mxu1 %v17538_v7 }
 0xc02   : > { %15390 = vmatmul.mubr.msk.bf16.vlgmr.msra.gmra.mxu1 %vm2869_vm3, %v16448_v32 }
 0xc03   : > { %15409 = vmatprep.mubr.msk.bf16.mxu1 %vm17539_vm2, %v17538_v7 }
 0xcb2   : > { %v3777_v25 = vpop.f32.mrf.mxu1 }
 0xcb3   : > { %v3784_v18 = vadd.f32 %v3777_v25, %v3668_v48  ;;  %v16462_v48 = vld [vmem:[#allocation9 + $0x78] sm:$0xff]  }
 0xcb4   : > { %v15379_v34 = vpop.f32.mrf.mxu1 }
 0xcb6   : > { %v3780_v22 = vpop.f32.mrf.mxu1 }
 0xcb7   : > { %v3785_v27 = vadd.f32 %v3780_v22, %v3669_v31  ;;  %v16465_v31 = vld [vmem:[#allocation9 + $0x68] sm:$0xff]  }
 0xcb8   : > { %v15380_v40 = vpop.f32.mrf.mxu1 }
 0xcc2   : > { %v3831_v42 = vpop.f32.mrf.mxu1 }
 0xcc4   : > { %v15391_v50 = vpop.f32.mrf.mxu1 }
 0xcc5   : > { %v4402_v50 = vld [vmem:[#allocation12 + $0x8] sm:$0x3] }
 0xcc6   : > { %v3834_v26 = vpop.f32.mrf.mxu1 }
 0xcc7   : > { %v3838_v46 = vpack.c.bf16 %v3834_v26, %v3831_v42 }
 0xcc8   : > { %v15392_v23 = vpop.f32.mrf.mxu1 }
 0xcc9   : > { %15398 = vmatmul.mubr.msk.bf16.vlgmr.msra.gmra.mxu0 %vm2989_vm4, %v3838_v46  ;;  %v16467_v46 = vld [vmem:[#allocation9 + $0x98] sm:$0xff]  }
 0xcca   : > { %15403 = vmatprep.mubr.msk.bf16.mxu0 %vm17539_vm2, %v17538_v7 }
 0xd89   : > { %v3893_v60 = vpop.f32.mrf.mxu0 }
 0xd8a   : > { %v3900_v15 = vadd.f32 %v3893_v60, %v3784_v18 }
 0xd8b   : > { %v15399_v0 = vpop.f32.mrf.mxu0 }
 0xd8c   : > { %v3909_v13 = vadd.f32 %v13040_v21, %v3900_v15  ;;  %v16468_v0 = vld [vmem:[#allocation9 + $0x90] sm:$0xff]  }
 0xd8d   : > { %v3896_v4 = vpop.f32.mrf.mxu0 }
 0xd8e   : > { %v3901_v3 = vadd.f32 %v3896_v4, %v3785_v27  ;;  %v16469_v4 = vld [vmem:[#allocation9 + $0x88] sm:$0xff]  }
 0xd8f   : > { %v15400_v8 = vpop.f32.mrf.mxu0 }
 0xd90   : > { %v3910_v14 = vadd.f32 %v13040_v21, %v3901_v3  ;;  %v4525_v21 = vld [vmem:[#allocation12 + $0xa] sm:$0x3]  ;;  %v16470_v3 = vld [vmem:[#allocation9 + $0xb8] sm:$0xff]   ;;  %v16471_v8 = vld [vmem:[#allocation9 + $0x80] sm:$0xff]  }
 0xd92   : > { %v18653_v19 = vpack.c.bf16 %v3910_v14, %v3909_v13  ;;  %v16472_v13 = vld [vmem:[#allocation9 + $0xb0] sm:$0xff]   ;;  %v16473_v14 = vld [vmem:[#allocation9 + $0xa8] sm:$0xff]  }
 0xd94   : > { %15402 = vmatpush3.bf16.msra.mxu0 %v18653_v19  ;;  %15408 = vmatpush3.bf16.msra.mxu1 %v18653_v19 }
 0xd95   : > { %15413 = vmatprep.subr.bf16.mxu0 %v17538_v7  ;;  %15425 = vmatprep.subr.bf16.mxu1 %v17538_v7 }
 0xd97   : > { %15404 = vmatmul.mubr.msk.bf16.vlgmr.msra.gmra.mxu0 %vm3913_vm5, %v3912_v20  ;;  %15410 = vmatmul.mubr.msk.bf16.vlgmr.msra.gmra.mxu1 %vm3913_vm5, %v3967_v28  ;;  %v16474_v20 = vld [vmem:[#allocation9 + $0xa0] sm:$0xff]  }
 0xd98   : > { %15414 = vmatpush3.bf16.msra.mxu0 %v16451_v30  ;;  %15426 = vmatpush3.bf16.msra.mxu1 %v16452_v33 }
 0xd99   : > { %15415 = vmatprep.subr.bf16.mxu0 %v17538_v7  ;;  %15427 = vmatprep.subr.bf16.mxu1 %v17538_v7 }
 0xd9a   : > { %15421 = vmatprep.mubr.msk.bf16.mxu0 %vm17539_vm2, %v17538_v7  ;;  %15433 = vmatprep.mubr.msk.bf16.mxu1 %vm17539_vm2, %v17538_v7 }
 0xd9c   : > { %15416 = vmatpush3.bf16.msra.mxu0 %v16453_v35  ;;  %15428 = vmatpush3.bf16.msra.mxu1 %v16454_v39 }
 0xd9d   : > { %15417 = vmatprep.subr.bf16.mxu0 %v17538_v7  ;;  %15429 = vmatprep.subr.bf16.mxu1 %v17538_v7 }
 0xda0   : > { %15418 = vmatpush3.bf16.msra.mxu0 %v16455_v41  ;;  %15430 = vmatpush3.bf16.msra.mxu1 %v16456_v47 }
 0xda1   : > { %15419 = vmatprep.subr.bf16.mxu0 %v17538_v7  ;;  %15431 = vmatprep.subr.bf16.mxu1 %v17538_v7 }
 0xda4   : > { %15420 = vmatpush3.bf16.msra.mxu0 %v16457_v49  ;;  %15432 = vmatpush3.bf16.msra.mxu1 %v16458_v6 }
 0xda5   : > { %15437 = vmatprep.subr.bf16.mxu0 %v17538_v7  ;;  %15443 = vmatprep.subr.bf16.mxu1 %v17538_v7 }
 0xe57   : > { %v3951_v10 = vpop.f32.mrf.mxu0  ;;  %v4005_v43 = vpop.f32.mrf.mxu1 }
 0xe58   : > { %v3957_v45 = vpack.c.bf16 %v3951_v10, %v3951_v10  ;;  %v4011_v56 = vpack.c.bf16 %v4005_v43, %v4005_v43 }
 0xe59   : > { %v15411_v59 = vpop.f32.mrf.mxu1  ;;  %v15405_v63 = vpop.f32.mrf.mxu0 }
 0xe5a   : > { %15422 = vmatmul.mubr.msk.bf16.vlgmr.msra.gmra.mxu0 %vm2869_vm3, %v4011_v56  ;;  %15434 = vmatmul.mubr.msk.bf16.vlgmr.msra.gmra.mxu1 %vm2869_vm3, %v3957_v45 }
 0xe5b   : > { %15438 = vmatpush3.bf16.msra.mxu0 %v18653_v19  ;;  %v4008_v2 = vpop.f32.mrf.mxu1  ;;  %15439 = vmatprep.mubr.msk.bf16.mxu0 %vm17539_vm2, %v17538_v7  ;;  %v3954_v12 = vpop.f32.mrf.mxu0 }
 0xe5c   : > { %15455 = vmatprep.subr.bf16.mxu0 %v17538_v7  ;;  %15444 = vmatpush3.bf16.msra.mxu1 %v16459_v57  ;;  %v4648_v2 = vld [vmem:[#allocation12 + $0xc] sm:$0x3] }
 0xe5d   : > { %v15412_v17 = vpop.f32.mrf.mxu1  ;;  %v15406_v36 = vpop.f32.mrf.mxu0  ;;  %15445 = vmatprep.subr.bf16.mxu1 %v17538_v7  ;;  %15451 = vmatprep.mubr.msk.bf16.mxu1 %vm17539_vm2, %v17538_v7 }
 0xe60   : > { %15446 = vmatpush3.bf16.msra.mxu1 %v16460_v5  ;;  %v16475_v5 = vld [vmem:[#allocation9 + $0xd8] sm:$0xff]  }
 0xe61   : > { %15447 = vmatprep.subr.bf16.mxu1 %v17538_v7 }
 0xe62   : > { %15440 = vmatmul.mubr.msk.bf16.vlgmr.msra.gmra.mxu0 %vm3913_vm5, %v4156_v38  ;;  %v16476_v38 = vld [vmem:[#allocation9 + $0xd0] sm:$0xff]  }
 0xe63   : > { %15456 = vmatpush3.bf16.msra.mxu0 %v18653_v19  ;;  %15457 = vmatprep.mubr.msk.bf16.mxu0 %vm17539_vm2, %v17538_v7 }
 0xe64   : > { %15461 = vmatprep.subr.bf16.mxu0 %v17538_v7  ;;  %15448 = vmatpush3.bf16.msra.mxu1 %v16461_v51  ;;  %v4771_v51 = vld [vmem:[#allocation12 + $0xe] sm:$0x3] }
 0xe65   : > { %15449 = vmatprep.subr.bf16.mxu1 %v17538_v7 }
 0xe68   : > { %15450 = vmatpush3.bf16.msra.mxu1 %v16463_v58  ;;  %v16478_v58 = vld [vmem:[#allocation9 + $0xf8] sm:$0xff]  }
 0xe69   : > { %15473 = vmatprep.subr.bf16.mxu1 %v17538_v7 }
 0xe6a   : > { %15458 = vmatmul.mubr.msk.bf16.vlgmr.msra.gmra.mxu0 %vm3913_vm5, %v4279_v44 }
 0xe6b   : > { %15469 = vmatprep.mubr.msk.bf16.mxu0 %vm17539_vm2, %v17538_v7  ;;  %15462 = vmatpush3.bf16.msra.mxu0 %v16462_v48  ;;  %v16477_v48 = vld [vmem:[#allocation9 + $0xc8] sm:$0xff]  }
 0xe6c   : > { %15463 = vmatprep.subr.bf16.mxu0 %v17538_v7 }
 0xe6f   : > { %15464 = vmatpush3.bf16.msra.mxu0 %v16464_v11  ;;  %v16479_v11 = vld [vmem:[#allocation9 + $0xc0] sm:$0xff]  }
 0xe70   : > { %15465 = vmatprep.subr.bf16.mxu0 %v17538_v7 }
 0xe73   : > { %15466 = vmatpush3.bf16.msra.mxu0 %v16465_v31  ;;  %v16480_v31 = vld [vmem:[#allocation9 + $0xf0] sm:$0xff]  }
 0xe74   : > { %15467 = vmatprep.subr.bf16.mxu0 %v17538_v7 }
 0xe77   : > { %15468 = vmatpush3.bf16.msra.mxu0 %v16466_v53  ;;  %v16481_v53 = vld [vmem:[#allocation9 + $0xe8] sm:$0xff]  }
 0xe78   : > { %15491 = vmatprep.subr.bf16.mxu0 %v17538_v7 }
 0xf1a   : > { %v4082_v24 = vpop.f32.mrf.mxu0  ;;  %v4149_v52 = vpop.f32.mrf.mxu1 }
 0xf1b   : > { %v4150_v55 = vadd.f32 %v4149_v52, %v4082_v24  ;;  %v16482_v24 = vld [vmem:[#allocation9 + $0xe0] sm:$0xff]  }
 0xf1c   : > { %v15423_v54 = vpop.f32.mrf.mxu0  ;;  %v15435_v1 = vpop.f32.mrf.mxu1 }
 0xf1e   : > { %v4085_v32 = vpop.f32.mrf.mxu0  ;;  %v4152_v9 = vpop.f32.mrf.mxu1 }
 0xf20   : > { %v15424_v16 = vpop.f32.mrf.mxu0  ;;  %v15436_v25 = vpop.f32.mrf.mxu1 }
 0xf22   : > { %v4194_v18 = vpop.f32.mrf.mxu0 }
 0xf23   : > { %v4200_v34 = vpack.c.bf16 %v4194_v18, %v4194_v18 }
 0xf24   : > { %v15441_v22 = vpop.f32.mrf.mxu0 }
 0xf25   : > { %15452 = vmatmul.mubr.msk.bf16.vlgmr.msra.gmra.mxu1 %vm2869_vm3, %v4200_v34 }
 0xf26   : > { %15474 = vmatpush3.bf16.msra.mxu1 %v18653_v19  ;;  %v4197_v27 = vpop.f32.mrf.mxu0  ;;  %15475 = vmatprep.mubr.msk.bf16.mxu1 %vm17539_vm2, %v17538_v7 }
 0xf27   : > { %15479 = vmatprep.subr.bf16.mxu1 %v17538_v7 }
 0xf28   : > { %v15442_v40 = vpop.f32.mrf.mxu0 }
 0xf2a   : > { %v4317_v42 = vpop.f32.mrf.mxu0 }
 0xf2b   : > { %v4323_v26 = vpack.c.bf16 %v4317_v42, %v4317_v42 }
 0xf2c   : > { %v15459_v23 = vpop.f32.mrf.mxu0 }
 0xf2d   : > { %15470 = vmatmul.mubr.msk.bf16.vlgmr.msra.gmra.mxu0 %vm2869_vm3, %v4323_v26  ;;  %15476 = vmatmul.mubr.msk.bf16.vlgmr.msra.gmra.mxu1 %vm3913_vm5, %v4402_v50  ;;  %v16483_v23 = vld [vmem:[#allocation9 + $0x118] sm:$0xff]  }
 0xf2e   : > { %15492 = vmatpush3.bf16.msra.mxu0 %v18653_v19  ;;  %15493 = vmatprep.mubr.msk.bf16.mxu0 %vm17539_vm2, %v17538_v7  ;;  %v4320_v60 = vpop.f32.mrf.mxu0 }
 0xf2f   : > { %15480 = vmatpush3.bf16.msra.mxu1 %v16467_v46  ;;  %15497 = vmatprep.subr.bf16.mxu0 %v17538_v7  ;;  %v4894_v46 = vld [vmem:[#allocation12 + $0x10] sm:$0x3] }
 0xf30   : > { %15481 = vmatprep.subr.bf16.mxu1 %v17538_v7  ;;  %v15460_v15 = vpop.f32.mrf.mxu0  ;;  %15487 = vmatprep.mubr.msk.bf16.mxu1 %vm17539_vm2, %v17538_v7 }
 0xf33   : > { %15482 = vmatpush3.bf16.msra.mxu1 %v16468_v0 }
 0xf34   : > { %15483 = vmatprep.subr.bf16.mxu1 %v17538_v7 }
 0xf35   : > { %15494 = vmatmul.mubr.msk.bf16.vlgmr.msra.gmra.mxu0 %vm3913_vm5, %v4525_v21 }
 0xf36   : > { %15505 = vmatprep.mubr.msk.bf16.mxu0 %vm17539_vm2, %v17538_v7  ;;  %15498 = vmatpush3.bf16.msra.mxu0 %v16470_v3  ;;  %v16485_v3 = vld [vmem:[#allocation9 + $0x108] sm:$0xff]  }
 0xf37   : > { %15484 = vmatpush3.bf16.msra.mxu1 %v16469_v4  ;;  %15499 = vmatprep.subr.bf16.mxu0 %v17538_v7  ;;  %v16484_v4 = vld [vmem:[#allocation9 + $0x110] sm:$0xff]  }
 0xf38   : > { %15485 = vmatprep.subr.bf16.mxu1 %v17538_v7 }
 0xf3a   : > { %15500 = vmatpush3.bf16.msra.mxu0 %v16472_v13 }
 0xf3b   : > { %15486 = vmatpush3.bf16.msra.mxu1 %v16471_v8  ;;  %15501 = vmatprep.subr.bf16.mxu0 %v17538_v7  ;;  %v16486_v8 = vld [vmem:[#allocation9 + $0x100] sm:$0xff]  }
 0xf3c   : > { %15509 = vmatprep.subr.bf16.mxu1 %v17538_v7 }
 0xf3e   : > { %15502 = vmatpush3.bf16.msra.mxu0 %v16473_v14 }
 0xf3f   : > { %15503 = vmatprep.subr.bf16.mxu0 %v17538_v7 }
 0xf42   : > { %15504 = vmatpush3.bf16.msra.mxu0 %v16474_v20 }
 0xf43   : > { %15527 = vmatprep.subr.bf16.mxu0 %v17538_v7 }
 0xfe5   : > { %v4271_v28 = vpop.f32.mrf.mxu1 }
 0xfe6   : > { %v4277_v30 = vadd.f32 %v4271_v28, %v4150_v55 }
 0xfe7   : > { %v15453_v33 = vpop.f32.mrf.mxu1 }
 0xfe9   : > { %v4274_v35 = vpop.f32.mrf.mxu1 }
 0xfeb   : > { %v15454_v39 = vpop.f32.mrf.mxu1 }
 0xfed   : > { %v4394_v41 = vpop.f32.mrf.mxu0  ;;  %v4440_v47 = vpop.f32.mrf.mxu1 }
 0xfee   : > { %v4400_v49 = vadd.f32 %v4394_v41, %v4277_v30  ;;  %v4446_v6 = vpack.c.bf16 %v4440_v47, %v4440_v47 }
 0xfef   : > { %v15471_v10 = vpop.f32.mrf.mxu0  ;;  %v15477_v43 = vpop.f32.mrf.mxu1 }
 0xff0   : > { %15488 = vmatmul.mubr.msk.bf16.vlgmr.msra.gmra.mxu1 %vm2869_vm3, %v4446_v6 }
 0xff1   : > { %15510 = vmatpush3.bf16.msra.mxu1 %v18653_v19  ;;  %v4397_v45 = vpop.f32.mrf.mxu0  ;;  %v4443_v56 = vpop.f32.mrf.mxu1  ;;  %15511 = vmatprep.mubr.msk.bf16.mxu1 %vm17539_vm2, %v17538_v7 }
 0xff2   : > { %15515 = vmatprep.subr.bf16.mxu1 %v17538_v7  ;;  %v16493_v56 = vld [vmem:[%s20823_s10 + $0xf0] ss:$8 sps:$4 sm:$0xff]  }
 0xff3   : > { %v15472_v57 = vpop.f32.mrf.mxu0  ;;  %v15478_v59 = vpop.f32.mrf.mxu1 }
 0xff4   : > { %v16495_v57 = vld [vmem:[%s20823_s10 + $0xf4] ss:$8 sps:$4 sm:$0xff]   ;;  %v16499_v59 = vld [vmem:[%s20823_s10 + $0xe0] ss:$8 sps:$4 sm:$0xff]  }
 0xff5   : > { %v4563_v63 = vpop.f32.mrf.mxu0 }
 0xff6   : > { %v4569_v12 = vpack.c.bf16 %v4563_v63, %v4563_v63  ;;  %v16501_v63 = vld [vmem:[%s20823_s10 + $0xe4] ss:$8 sps:$4 sm:$0xff]  }
 0xff7   : > { %v15495_v17 = vpop.f32.mrf.mxu0 }
 0xff8   : > { %15506 = vmatmul.mubr.msk.bf16.vlgmr.msra.gmra.mxu0 %vm2869_vm3, %v4569_v12  ;;  %15512 = vmatmul.mubr.msk.bf16.vlgmr.msra.gmra.mxu1 %vm3913_vm5, %v4648_v2  ;;  %v16505_v2 = vld [vmem:[%s20823_s10 + $0xd0] ss:$8 sps:$4 sm:$0xff]   ;;  %v16507_v12 = vld [vmem:[%s20823_s10 + $0xd4] ss:$8 sps:$4 sm:$0xff]   ;;  %v16513_v17 = vld [vmem:[%s20823_s10 + $0xc4] ss:$8 sps:$4 sm:$0xff]  }
 0xff9   : > { %15528 = vmatpush3.bf16.msra.mxu0 %v18653_v19  ;;  %15529 = vmatprep.mubr.msk.bf16.mxu0 %vm17539_vm2, %v17538_v7  ;;  %v4566_v36 = vpop.f32.mrf.mxu0 }
 0xffa   : > { %15516 = vmatpush3.bf16.msra.mxu1 %v16475_v5  ;;  %15533 = vmatprep.subr.bf16.mxu0 %v17538_v7  ;;  %v16511_v5 = vld [vmem:[%s20823_s10 + $0xc0] ss:$8 sps:$4 sm:$0xff]   ;;  %v16517_v36 = vld [vmem:[%s20823_s10 + $0xb0] ss:$8 sps:$4 sm:$0xff]  }
 0xffb   : > { %15517 = vmatprep.subr.bf16.mxu1 %v17538_v7  ;;  %v15496_v44 = vpop.f32.mrf.mxu0  ;;  %15523 = vmatprep.mubr.msk.bf16.mxu1 %vm17539_vm2, %v17538_v7 }
 0xffc   : > { %v16523_v44 = vld [vmem:[%s20823_s10 + $0xa0] ss:$8 sps:$4 sm:$0xff]  }
 0xffe   : > { %15518 = vmatpush3.bf16.msra.mxu1 %v16476_v38  ;;  %v16519_v38 = vld [vmem:[%s20823_s10 + $0xb4] ss:$8 sps:$4 sm:$0xff]  }
 0xfff   : > { %15519 = vmatprep.subr.bf16.mxu1 %v17538_v7 }
0x1000   : > { %15530 = vmatmul.mubr.msk.bf16.vlgmr.msra.gmra.mxu0 %vm3913_vm5, %v4771_v51  ;;  %v16525_v51 = vld [vmem:[%s20823_s10 + $0xa4] ss:$8 sps:$4 sm:$0xff]  }
0x1001   : > { %15541 = vmatprep.mubr.msk.bf16.mxu0 %vm17539_vm2, %v17538_v7  ;;  %15534 = vmatpush3.bf16.msra.mxu0 %v16478_v58  ;;  %v13095_v58 = vld [vmem:[#allocation10] ss:$0 sm:$0xff] }
0x1002   : > { %15520 = vmatpush3.bf16.msra.mxu1 %v16477_v48  ;;  %15535 = vmatprep.subr.bf16.mxu0 %v17538_v7 }
0x1003   : > { %15521 = vmatprep.subr.bf16.mxu1 %v17538_v7 }
0x1005   : > { %15536 = vmatpush3.bf16.msra.mxu0 %v16480_v31 }
0x1006   : > { %15522 = vmatpush3.bf16.msra.mxu1 %v16479_v11  ;;  %15537 = vmatprep.subr.bf16.mxu0 %v17538_v7 }
0x1007   : > { %15545 = vmatprep.subr.bf16.mxu1 %v17538_v7 }
0x1009   : > { %15538 = vmatpush3.bf16.msra.mxu0 %v16481_v53 }
0x100a   : > { %15539 = vmatprep.subr.bf16.mxu0 %v17538_v7 }
0x100d   : > { %15540 = vmatpush3.bf16.msra.mxu0 %v16482_v24 }
0x100e   : > { %15563 = vmatprep.subr.bf16.mxu0 %v17538_v7 }
0x10b0   : > { %v4517_v52 = vpop.f32.mrf.mxu1 }
0x10b1   : > { %v4523_v55 = vadd.f32 %v4517_v52, %v4400_v49 }
0x10b2   : > { %v15489_v54 = vpop.f32.mrf.mxu1 }
0x10b4   : > { %v4520_v1 = vpop.f32.mrf.mxu1 }
0x10b5   : > { %v5025_v1 = vld [vmem:[%s20825_s12] sm:$0x1] }
0x10b6   : > { %v15490_v32 = vpop.f32.mrf.mxu1 }
0x10b7   : > { %v16489_v32 = vld [vmem:[%s20823_s10 + $0x74] ss:$8 sps:$4 sm:$0xff]  }
0x10b8   : > { %v4640_v9 = vpop.f32.mrf.mxu0  ;;  %v4686_v16 = vpop.f32.mrf.mxu1 }
0x10b9   : > { %v4646_v25 = vadd.f32 %v4640_v9, %v4523_v55  ;;  %v4692_v18 = vpack.c.bf16 %v4686_v16, %v4686_v16  ;;  %v13097_v9 = vld [vmem:[%s20825_s12 + $0x1] sm:$0x1]  ;;  %v16487_v16 = vld [vmem:[%s20823_s10 + $0x70] ss:$8 sps:$4 sm:$0xff]  }
0x10ba   : > { %v15507_v34 = vpop.f32.mrf.mxu0  ;;  %v15513_v22 = vpop.f32.mrf.mxu1 }
0x10bb   : > { %15524 = vmatmul.mubr.msk.bf16.vlgmr.msra.gmra.mxu1 %vm2869_vm3, %v4692_v18  ;;  %v16490_v18 = vld [vmem:[%s20823_s10 + $0x60] ss:$8 sps:$4 sm:$0xff]   ;;  %v16498_v34 = vld [vmem:[%s20823_s10 + $0x54] ss:$8 sps:$4 sm:$0xff]   ;;  %v16496_v22 = vld [vmem:[%s20823_s10 + $0x50] ss:$8 sps:$4 sm:$0xff]  }
0x10bc   : > { %15546 = vmatpush3.bf16.msra.mxu1 %v18653_v19  ;;  %v4643_v27 = vpop.f32.mrf.mxu0  ;;  %v4689_v40 = vpop.f32.mrf.mxu1  ;;  %15547 = vmatprep.mubr.msk.bf16.mxu1 %vm17539_vm2, %v17538_v7 }
0x10bd   : > { %15551 = vmatprep.subr.bf16.mxu1 %v17538_v7  ;;  %v16504_v27 = vld [vmem:[%s20823_s10 + $0x44] ss:$8 sps:$4 sm:$0xff]   ;;  %v16502_v40 = vld [vmem:[%s20823_s10 + $0x40] ss:$8 sps:$4 sm:$0xff]  }
0x10be   : > { %v15508_v42 = vpop.f32.mrf.mxu0  ;;  %v15514_v50 = vpop.f32.mrf.mxu1 }
0x10bf   : > { %v16510_v42 = vld [vmem:[%s20823_s10 + $0x34] ss:$8 sps:$4 sm:$0xff]   ;;  %v16508_v50 = vld [vmem:[%s20823_s10 + $0x30] ss:$8 sps:$4 sm:$0xff]  }
0x10c0   : > { %v4809_v26 = vpop.f32.mrf.mxu0 }
0x10c1   : > { %v4815_v60 = vpack.c.bf16 %v4809_v26, %v4809_v26  ;;  %v16516_v26 = vld [vmem:[%s20823_s10 + $0x24] ss:$8 sps:$4 sm:$0xff]  }
0x10c2   : > { %v15531_v0 = vpop.f32.mrf.mxu0 }
0x10c3   : > { %15542 = vmatmul.mubr.msk.bf16.vlgmr.msra.gmra.mxu0 %vm2869_vm3, %v4815_v60  ;;  %15548 = vmatmul.mubr.msk.bf16.vlgmr.msra.gmra.mxu1 %vm3913_vm5, %v4894_v46  ;;  %v16514_v46 = vld [vmem:[%s20823_s10 + $0x20] ss:$8 sps:$4 sm:$0xff]   ;;  %v16520_v60 = vld [vmem:[%s20823_s10 + $0x10] ss:$8 sps:$4 sm:$0xff]   ;;  %v16528_v0 = vld [vmem:[%s20823_s10 + $0x4] ss:$8 sps:$4 sm:$0xff]  }
0x10c4   : > { %15552 = vmatpush3.bf16.msra.mxu1 %v16483_v23  ;;  %v4812_v15 = vpop.f32.mrf.mxu0  ;;  %15559 = vmatprep.mubr.msk.bf16.mxu1 %vm17539_vm2, %v17538_v7  ;;  %v16522_v23 = vld [vmem:[%s20823_s10 + $0x14] ss:$8 sps:$4 sm:$0xff]  }
0x10c5   : > { %15553 = vmatprep.subr.bf16.mxu1 %v17538_v7  ;;  %15565 = vmatprep.mubr.msk.bf16.mxu0 %vm17539_vm2, %v17538_v7  ;;  %v16526_v15 = vld [vmem:[%s20823_s10] ss:$8 sps:$4 sm:$0xff]  }
0x10c6   : > { %v15532_v21 = vpop.f32.mrf.mxu0 }
0x10c7   : > { %v16531_v21 = vld [vmem:[%s20823_s10 + $0x94] ss:$8 sps:$4 sm:$0xff]  }
0x10c8   : > { %15554 = vmatpush3.bf16.msra.mxu1 %v16484_v4  ;;  %v16529_v4 = vld [vmem:[%s20823_s10 + $0x90] ss:$8 sps:$4 sm:$0xff]  }
0x10c9   : > { %15555 = vmatprep.subr.bf16.mxu1 %v17538_v7 }
0x10cc   : > { %15556 = vmatpush3.bf16.msra.mxu1 %v16485_v3  ;;  %v17540_v3 = vmov 0  }
0x10cd   : > { %15557 = vmatprep.subr.bf16.mxu1 %v17538_v7 }
0x10d0   : > { %15558 = vmatpush3.bf16.msra.mxu1 %v16486_v8  ;;  %v16534_v8 = vld [vmem:[%s20823_s10 + $0x84] ss:$8 sps:$4 sm:$0xff]  }
0x10d1   : > { %5234 = vmatprep.subr.bf16.mxu1 %v16495_v57 }
0x117b   : > { %v4763_v13 = vpop.f32.mrf.mxu1 }
0x117c   : > { %v4769_v14 = vadd.f32 %v4763_v13, %v4646_v25  ;;  %v16492_v25 = vld [vmem:[%s20823_s10 + $0x64] ss:$8 sps:$4 sm:$0xff]   ;;  %v16532_v13 = vld [vmem:[%s20823_s10 + $0x80] ss:$8 sps:$4 sm:$0xff]  }
0x117d   : > { %v15525_v20 = vpop.f32.mrf.mxu1 }
0x117f   : > { %v4766_v28 = vpop.f32.mrf.mxu1 }
0x1180   : > { %v16535_v28 = vld [vmem:[%s20823_s10 + $0x170] ss:$8 sps:$4 sm:$0xff]  }
0x1181   : > { %v15526_v30 = vpop.f32.mrf.mxu1 }
0x1183   : > { %v4886_v33 = vpop.f32.mrf.mxu0  ;;  %v4932_v35 = vpop.f32.mrf.mxu1 }
0x1184   : > { %v4892_v39 = vadd.f32 %v4886_v33, %v4769_v14  ;;  %v4938_v41 = vpack.c.bf16 %v4932_v35, %v4932_v35  ;;  %v16537_v14 = vld [vmem:[%s20823_s10 + $0x174] ss:$8 sps:$4 sm:$0xff]   ;;  %v16540_v33 = vld [vmem:[%s20823_s10 + $0x164] ss:$8 sps:$4 sm:$0xff]  }
0x1185   : > { %v15549_v47 = vpop.f32.mrf.mxu1  ;;  %v15543_v49 = vpop.f32.mrf.mxu0 }
0x1186   : > { %15560 = vmatmul.mubr.msk.bf16.vlgmr.msra.gmra.mxu1 %vm2869_vm3, %v4938_v41  ;;  %v16538_v41 = vld [vmem:[%s20823_s10 + $0x160] ss:$8 sps:$4 sm:$0xff]   ;;  %v16543_v47 = vld [vmem:[%s20823_s10 + $0x154] ss:$8 sps:$4 sm:$0xff]  }
0x1187   : > { %v4935_v6 = vpop.f32.mrf.mxu1  ;;  %v4889_v10 = vpop.f32.mrf.mxu0  ;;  %5235 = vmatpush1.bf16.msra.mxu1 %v16493_v56  ;;  %5266 = vmatprep.mubr.bf16.mxu1 %v17540_v3  ;;  %v16549_v56 = vld [vmem:[%s20823_s10 + $0x144] ss:$8 sps:$4 sm:$0xff]  }
0x1188   : > { %5236 = vmatprep.subr.bf16.mxu1 %v16501_v63 }
0x1189   : > { %v15550_v43 = vpop.f32.mrf.mxu1  ;;  %v15544_v45 = vpop.f32.mrf.mxu0 }
0x118a   : > { %v16541_v43 = vld [vmem:[%s20823_s10 + $0x150] ss:$8 sps:$4 sm:$0xff]  }
0x118b   : > { %5237 = vmatpush1.bf16.msra.mxu1 %v16499_v59  ;;  %v16547_v59 = vld [vmem:[%s20823_s10 + $0x140] ss:$8 sps:$4 sm:$0xff]  }
0x118c   : > { %5238 = vmatprep.subr.bf16.mxu1 %v16507_v12  ;;  %v16546_v12 = vld [vmem:[%s20823_s10 + $0x1f4] ss:$8 sps:$4 sm:$0xff]  }
0x118f   : > { %5239 = vmatpush1.bf16.msra.mxu1 %v16505_v2  ;;  %v13147_v2 = vld [vmem:[%s20825_s12 + $0x2] sm:$0x1] }
0x1190   : > { %5240 = vmatprep.subr.bf16.mxu1 %v16513_v17  ;;  %v16544_v17 = vld [vmem:[%s20823_s10 + $0x1f0] ss:$8 sps:$4 sm:$0xff]  }
0x1193   : > { %5241 = vmatpush1.bf16.msra.mxu1 %v16511_v5  ;;  %v13181_v5 = vld [vmem:[%s20825_s12 + $0x3] sm:$0x1] }
0x1194   : > { %5242 = vmatprep.subr.bf16.mxu1 %v16519_v38  ;;  %v16550_v38 = vld [vmem:[%s20823_s10 + $0x1e0] ss:$8 sps:$4 sm:$0xff]  }
0x1197   : > { %5243 = vmatpush1.bf16.msra.mxu1 %v16517_v36  ;;  %v16552_v36 = vld [vmem:[%s20823_s10 + $0x1e4] ss:$8 sps:$4 sm:$0xff]  }
0x1198   : > { %5244 = vmatprep.subr.bf16.mxu1 %v16525_v51  ;;  %v16558_v51 = vld [vmem:[%s20823_s10 + $0x1d4] ss:$8 sps:$4 sm:$0xff]  }
0x119b   : > { %5245 = vmatpush1.bf16.msra.mxu1 %v16523_v44  ;;  %v16555_v44 = vld [vmem:[%s20823_s10 + $0x134] ss:$8 sps:$4 sm:$0xff]  }
0x119c   : > { %5246 = vmatprep.subr.bf16.mxu1 %v16531_v21 }
0x119f   : > { %5247 = vmatpush1.bf16.msra.mxu1 %v16529_v4 }
0x11a0   : > { %5248 = vmatprep.subr.bf16.mxu1 %v16534_v8 }
0x11a3   : > { %5249 = vmatpush1.bf16.msra.mxu1 %v16532_v13 }
0x11a4   : > { %15575 = vmatprep.subr.bf16.mxu1 %v17538_v7 }
0x1246   : > { %v5009_v48 = vpop.f32.mrf.mxu1 }
0x1247   : > { %v5015_v11 = vadd.f32 %v5009_v48, %v4892_v39  ;;  %v16553_v48 = vld [vmem:[%s20823_s10 + $0x130] ss:$8 sps:$4 sm:$0xff]  }
0x1248   : > { %v15561_v31 = vpop.f32.mrf.mxu1 }
0x1249   : > { %v5023_v53 = vadd.f32 %v13095_v58, %v5015_v11  ;;  %v16556_v58 = vld [vmem:[%s20823_s10 + $0x1d0] ss:$8 sps:$4 sm:$0xff]   ;;  %v16561_v11 = vld [vmem:[%s20823_s10 + $0x124] ss:$8 sps:$4 sm:$0xff]  }
0x124a   : > { %v5012_v24 = vpop.f32.mrf.mxu1  ;;  %v16564_v31 = vld [vmem:[%s20823_s10 + $0x1c4] ss:$8 sps:$4 sm:$0xff]  }
0x124b   : > { %v18796_v52 = vpack.c.bf16 %v5023_v53, %v5023_v53  ;;  %v16559_v53 = vld [vmem:[%s20823_s10 + $0x120] ss:$8 sps:$4 sm:$0xff]  }
0x124c   : > { %v15562_v55 = vpop.f32.mrf.mxu1  ;;  %v16562_v24 = vld [vmem:[%s20823_s10 + $0x1c0] ss:$8 sps:$4 sm:$0xff]  }
0x124d   : > { %v18800_v54 = vsel %vm5030_vm6, %v18796_v52, 0  ;;  %v16567_v55 = vld [vmem:[%s20823_s10 + $0x114] ss:$8 sps:$4 sm:$0xff]  }
0x124e   : > { %15564 = vmatpush3.bf16.msra.mxu0 %v18800_v54 }
0x124f   : > { %15569 = vmatprep.subr.bf16.mxu0 %v17538_v7 }
0x1251   : > { %15566 = vmatmul.mubr.msk.bf16.vlgmr.msra.gmra.mxu0 %vm5026_vm7, %v5025_v1  ;;  %v16570_v1 = vld [vmem:[%s20823_s10 + $0x1b4] ss:$8 sps:$4 sm:$0xff]  }
0x1252   : > { %15570 = vmatpush3.bf16.msra.mxu0 %v18800_v54  ;;  %15571 = vmatprep.mubr.msk.bf16.mxu0 %vm17539_vm2, %v17538_v7 }
0x1253   : > { %5355 = vmatprep.subr.bf16.mxu0 %v16489_v32  ;;  %v16565_v32 = vld [vmem:[%s20823_s10 + $0x110] ss:$8 sps:$4 sm:$0xff]  }
0x1259   : > { %15572 = vmatmul.mubr.msk.bf16.vlgmr.msra.gmra.mxu0 %vm5026_vm7, %v13097_v9  ;;  %v16568_v9 = vld [vmem:[%s20823_s10 + $0x1b0] ss:$8 sps:$4 sm:$0xff]  }
0x125a   : > { %5356 = vmatpush1.bf16.msra.mxu0 %v16487_v16  ;;  %5387 = vmatprep.mubr.bf16.mxu0 %v17540_v3  ;;  %v16573_v16 = vld [vmem:[%s20823_s10 + $0x104] ss:$8 sps:$4 sm:$0xff]  }
0x125b   : > { %5357 = vmatprep.subr.bf16.mxu0 %v16492_v25  ;;  %v16576_v25 = vld [vmem:[%s20823_s10 + $0x1a4] ss:$8 sps:$4 sm:$0xff]  }
0x125e   : > { %5358 = vmatpush1.bf16.msra.mxu0 %v16490_v18  ;;  %v16571_v18 = vld [vmem:[%s20823_s10 + $0x100] ss:$8 sps:$4 sm:$0xff]  }
0x125f   : > { %5359 = vmatprep.subr.bf16.mxu0 %v16498_v34  ;;  %v16574_v34 = vld [vmem:[%s20823_s10 + $0x1a0] ss:$8 sps:$4 sm:$0xff]  }
0x1262   : > { %5360 = vmatpush1.bf16.msra.mxu0 %v16496_v22  ;;  %v16579_v22 = vld [vmem:[%s20823_s10 + $0x194] ss:$8 sps:$4 sm:$0xff]  }
0x1263   : > { %5361 = vmatprep.subr.bf16.mxu0 %v16504_v27  ;;  %v16577_v27 = vld [vmem:[%s20823_s10 + $0x190] ss:$8 sps:$4 sm:$0xff]  }
0x1266   : > { %5362 = vmatpush1.bf16.msra.mxu0 %v16502_v40  ;;  %v16582_v40 = vld [vmem:[%s20823_s10 + $0x184] ss:$8 sps:$4 sm:$0xff]  }
0x1267   : > { %5363 = vmatprep.subr.bf16.mxu0 %v16510_v42  ;;  %v16580_v42 = vld [vmem:[%s20823_s10 + $0x180] ss:$8 sps:$4 sm:$0xff]  }
0x126a   : > { %5364 = vmatpush1.bf16.msra.mxu0 %v16508_v50 }
0x126b   : > { %5365 = vmatprep.subr.bf16.mxu0 %v16516_v26 }
0x126e   : > { %5366 = vmatpush1.bf16.msra.mxu0 %v16514_v46 }
0x126f   : > { %5367 = vmatprep.subr.bf16.mxu0 %v16522_v23 }
0x1272   : > { %5368 = vmatpush1.bf16.msra.mxu0 %v16520_v60 }
0x1273   : > { %5369 = vmatprep.subr.bf16.mxu0 %v16528_v0 }
0x1276   : > { %5370 = vmatpush1.bf16.msra.mxu0 %v16526_v15 }
0x1277   : > { %5539 = vmatprep.subr.bf16.mxu0 %v16537_v14 }
0x1311   : > { %v5068_v20 = vpop.f32.mrf.mxu0 }
0x1312   : > { %v5074_v30 = vpack.c.bf16 %v5068_v20, %v5068_v20  ;;  %v16585_v20 = vld [vmem:[%s20823_s10 + $0x274] ss:$8 sps:$4 sm:$0xff]  }
0x1313   : > { %v15567_v35 = vpop.f32.mrf.mxu0 }
0x1314   : > { %5388 = vmatmul.mubr.bf16.vlgmr.msra.gmra.mxu0 %v5074_v30 }
0x1315   : > { %v5071_v39 = vpop.f32.mrf.mxu0  ;;  %5540 = vmatpush1.bf16.msra.mxu0 %v16535_v28  ;;  %5571 = vmatprep.mubr.bf16.mxu0 %v17540_v3 }
0x1316   : > { %5541 = vmatprep.subr.bf16.mxu0 %v16540_v33  ;;  %v13215_v39 = vld [vmem:[%s20825_s12 + $0x4] sm:$0x1] }
0x1317   : > { %v15568_v49 = vpop.f32.mrf.mxu0 }
0x1318   : > { %v16594_v49 = vld [vmem:[%s20823_s10 + $0x2f4] ss:$8 sps:$4 sm:$0xff]  }
0x1319   : > { %v5130_v6 = vpop.f32.mrf.mxu0  ;;  %5542 = vmatpush1.bf16.msra.mxu0 %v16538_v41 }
0x131a   : > { %v5136_v10 = vpack.c.bf16 %v5130_v6, %v5130_v6  ;;  %5543 = vmatprep.subr.bf16.mxu0 %v16543_v47  ;;  %v16583_v47 = vld [vmem:[%s20823_s10 + $0x270] ss:$8 sps:$4 sm:$0xff]   ;;  %v16588_v6 = vld [vmem:[%s20823_s10 + $0x264] ss:$8 sps:$4 sm:$0xff]  }
0x131b   : > { %v15573_v45 = vpop.f32.mrf.mxu0 }
0x131c   : > { %5267 = vmatmul.mubr.bf16.vlgmr.msra.gmra.mxu1 %v5136_v10  ;;  %v16586_v45 = vld [vmem:[%s20823_s10 + $0x260] ss:$8 sps:$4 sm:$0xff]  }
0x131d   : > { %15576 = vmatpush3.bf16.msra.mxu1 %v18800_v54  ;;  %v5133_v57 = vpop.f32.mrf.mxu0  ;;  %15577 = vmatprep.mubr.msk.bf16.mxu1 %vm17539_vm2, %v17538_v7 }
0x131e   : > { %15581 = vmatprep.subr.bf16.mxu1 %v17538_v7  ;;  %5544 = vmatpush1.bf16.msra.mxu0 %v16541_v43 }
0x131f   : > { %v15574_v63 = vpop.f32.mrf.mxu0  ;;  %5545 = vmatprep.subr.bf16.mxu0 %v16549_v56  ;;  %v16591_v56 = vld [vmem:[%s20823_s10 + $0x254] ss:$8 sps:$4 sm:$0xff]  }
0x1320   : > { %v16592_v63 = vld [vmem:[%s20823_s10 + $0x2f0] ss:$8 sps:$4 sm:$0xff]  }
0x1322   : > { %5546 = vmatpush1.bf16.msra.mxu0 %v16547_v59  ;;  %v13249_v59 = vld [vmem:[%s20825_s12 + $0x5] sm:$0x1] }
0x1323   : > { %5547 = vmatprep.subr.bf16.mxu0 %v16555_v44  ;;  %v16603_v44 = vld [vmem:[%s20823_s10 + $0x234] ss:$8 sps:$4 sm:$0xff]  }
0x1324   : > { %15578 = vmatmul.mubr.msk.bf16.vlgmr.msra.gmra.mxu1 %vm5026_vm7, %v13147_v2  ;;  %v16589_v2 = vld [vmem:[%s20823_s10 + $0x250] ss:$8 sps:$4 sm:$0xff]  }
0x1325   : > { %15582 = vmatpush3.bf16.msra.mxu1 %v18800_v54  ;;  %15583 = vmatprep.mubr.msk.bf16.mxu1 %vm17539_vm2, %v17538_v7 }
0x1326   : > { %5725 = vmatprep.subr.bf16.mxu1 %v16546_v12  ;;  %5548 = vmatpush1.bf16.msra.mxu0 %v16553_v48  ;;  %v16600_v12 = vld [vmem:[%s20823_s10 + $0x2e4] ss:$8 sps:$4 sm:$0xff]   ;;  %v16601_v48 = vld [vmem:[%s20823_s10 + $0x230] ss:$8 sps:$4 sm:$0xff]  }
0x1327   : > { %5549 = vmatprep.subr.bf16.mxu0 %v16561_v11  ;;  %v16609_v11 = vld [vmem:[%s20823_s10 + $0x224] ss:$8 sps:$4 sm:$0xff]  }
0x132a   : > { %5550 = vmatpush1.bf16.msra.mxu0 %v16559_v53  ;;  %v16607_v53 = vld [vmem:[%s20823_s10 + $0x220] ss:$8 sps:$4 sm:$0xff]  }
0x132b   : > { %5551 = vmatprep.subr.bf16.mxu0 %v16567_v55  ;;  %v16618_v55 = vld [vmem:[%s20823_s10 + $0x2b4] ss:$8 sps:$4 sm:$0xff]  }
0x132c   : > { %15584 = vmatmul.mubr.msk.bf16.vlgmr.msra.gmra.mxu1 %vm5026_vm7, %v13181_v5  ;;  %v16597_v5 = vld [vmem:[%s20823_s10 + $0x244] ss:$8 sps:$4 sm:$0xff]  }
0x132d   : > { %5726 = vmatpush1.bf16.msra.mxu1 %v16544_v17  ;;  %5757 = vmatprep.mubr.bf16.mxu1 %v17540_v3  ;;  %v16598_v17 = vld [vmem:[%s20823_s10 + $0x2e0] ss:$8 sps:$4 sm:$0xff]  }
0x132e   : > { %5727 = vmatprep.subr.bf16.mxu1 %v16552_v36  ;;  %5552 = vmatpush1.bf16.msra.mxu0 %v16565_v32  ;;  %v16595_v36 = vld [vmem:[%s20823_s10 + $0x240] ss:$8 sps:$4 sm:$0xff]   ;;  %v16616_v32 = vld [vmem:[%s20823_s10 + $0x2b0] ss:$8 sps:$4 sm:$0xff]  }
0x132f   : > { %5553 = vmatprep.subr.bf16.mxu0 %v16573_v16  ;;  %v16624_v16 = vld [vmem:[%s20823_s10 + $0x2a4] ss:$8 sps:$4 sm:$0xff]  }
0x1331   : > { %5728 = vmatpush1.bf16.msra.mxu1 %v16550_v38  ;;  %v16606_v38 = vld [vmem:[%s20823_s10 + $0x2d4] ss:$8 sps:$4 sm:$0xff]  }
0x1332   : > { %5729 = vmatprep.subr.bf16.mxu1 %v16558_v51  ;;  %5554 = vmatpush1.bf16.msra.mxu0 %v16571_v18  ;;  %v16604_v51 = vld [vmem:[%s20823_s10 + $0x2d0] ss:$8 sps:$4 sm:$0xff]   ;;  %v16622_v18 = vld [vmem:[%s20823_s10 + $0x2a0] ss:$8 sps:$4 sm:$0xff]  }
0x1333   : > { %15587 = vmatprep.subr.bf16.mxu0 %v17538_v7 }
0x1335   : > { %5730 = vmatpush1.bf16.msra.mxu1 %v16556_v58  ;;  %v16612_v58 = vld [vmem:[%s20823_s10 + $0x2c4] ss:$8 sps:$4 sm:$0xff]  }
0x1336   : > { %5731 = vmatprep.subr.bf16.mxu1 %v16564_v31  ;;  %v16610_v31 = vld [vmem:[%s20823_s10 + $0x2c0] ss:$8 sps:$4 sm:$0xff]  }
0x1339   : > { %5732 = vmatpush1.bf16.msra.mxu1 %v16562_v24  ;;  %v16615_v24 = vld [vmem:[%s20823_s10 + $0x214] ss:$8 sps:$4 sm:$0xff]  }
0x133a   : > { %5733 = vmatprep.subr.bf16.mxu1 %v16570_v1  ;;  %v16613_v1 = vld [vmem:[%s20823_s10 + $0x210] ss:$8 sps:$4 sm:$0xff]  }
0x133d   : > { %5734 = vmatpush1.bf16.msra.mxu1 %v16568_v9  ;;  %v16621_v9 = vld [vmem:[%s20823_s10 + $0x204] ss:$8 sps:$4 sm:$0xff]  }
0x133e   : > { %5735 = vmatprep.subr.bf16.mxu1 %v16576_v25  ;;  %v16619_v25 = vld [vmem:[%s20823_s10 + $0x200] ss:$8 sps:$4 sm:$0xff]  }
0x1341   : > { %5736 = vmatpush1.bf16.msra.mxu1 %v16574_v34  ;;  %v16627_v34 = vld [vmem:[%s20823_s10 + $0x294] ss:$8 sps:$4 sm:$0xff]  }
0x1342   : > { %5737 = vmatprep.subr.bf16.mxu1 %v16579_v22  ;;  %v16625_v22 = vld [vmem:[%s20823_s10 + $0x290] ss:$8 sps:$4 sm:$0xff]  }
0x1345   : > { %5738 = vmatpush1.bf16.msra.mxu1 %v16577_v27  ;;  %v16630_v27 = vld [vmem:[%s20823_s10 + $0x284] ss:$8 sps:$4 sm:$0xff]  }
0x1346   : > { %5739 = vmatprep.subr.bf16.mxu1 %v16582_v40  ;;  %v16628_v40 = vld [vmem:[%s20823_s10 + $0x280] ss:$8 sps:$4 sm:$0xff]  }
0x1349   : > { %5740 = vmatpush1.bf16.msra.mxu1 %v16580_v42 }
0x134a   : > { %15593 = vmatprep.subr.bf16.mxu1 %v17538_v7 }
0x13d4   : > { %v5389_v50 = vpop.f32.mrf.mxu0 }
0x13d6   : > { %v5391_v26 = vpop.f32.mrf.mxu0 }
0x13d8   : > { %v5393_v46 = vpop.f32.mrf.mxu0 }
0x13da   : > { %v5394_v23 = vpop.f32.mrf.mxu0 }
0x13dc   : > { %v5268_v60 = vpop.f32.mrf.mxu1 }
0x13dd   : > { %v18993_v0 = vadd.f32 %v5389_v50, %v5268_v60 }
0x13de   : > { %v5270_v15 = vpop.f32.mrf.mxu1 }
0x13df   : > { %v18995_v21 = vadd.f32 %v5391_v26, %v5270_v15 }
0x13e0   : > { %v5272_v4 = vpop.f32.mrf.mxu1 }
0x13e2   : > { %v5273_v8 = vpop.f32.mrf.mxu1 }
0x13e4   : > { %v5435_v13 = vpop.f32.mrf.mxu1 }
0x13e5   : > { %v5441_v14 = vpack.c.bf16 %v5435_v13, %v5435_v13 }
0x13e6   : > { %v15579_v28 = vpop.f32.mrf.mxu1 }
0x13e7   : > { %5572 = vmatmul.mubr.bf16.vlgmr.msra.gmra.mxu0 %v5441_v14  ;;  %v16633_v14 = vld [vmem:[%s20823_s10 + $0x374] ss:$8 sps:$4 sm:$0xff]  }
0x13e8   : > { %15588 = vmatpush3.bf16.msra.mxu0 %v18800_v54  ;;  %v5438_v30 = vpop.f32.mrf.mxu1  ;;  %15589 = vmatprep.mubr.msk.bf16.mxu0 %vm17539_vm2, %v17538_v7 }
0x13e9   : > { %5911 = vmatprep.subr.bf16.mxu0 %v16585_v20 }
0x13ea   : > { %v15580_v33 = vpop.f32.mrf.mxu1 }
0x13ec   : > { %v5621_v35 = vpop.f32.mrf.mxu1 }
0x13ed   : > { %v5627_v41 = vpack.c.bf16 %v5621_v35, %v5621_v35 }
0x13ee   : > { %v15585_v10 = vpop.f32.mrf.mxu1 }
0x13ef   : > { %5758 = vmatmul.mubr.bf16.vlgmr.msra.gmra.mxu1 %v5627_v41  ;;  %15590 = vmatmul.mubr.msk.bf16.vlgmr.msra.gmra.mxu0 %vm5026_vm7, %v13215_v39  ;;  %v13283_v41 = vld [vmem:[%s20825_s12 + $0x6] sm:$0x1] }
0x13f0   : > { %15594 = vmatpush3.bf16.msra.mxu1 %v18800_v54  ;;  %15595 = vmatprep.mubr.msk.bf16.mxu1 %vm17539_vm2, %v17538_v7  ;;  %v5624_v43 = vpop.f32.mrf.mxu1  ;;  %v16636_v10 = vld [vmem:[%s20823_s10 + $0x364] ss:$8 sps:$4 sm:$0xff]  }
0x13f1   : > { %5912 = vmatpush1.bf16.msra.mxu0 %v16583_v47  ;;  %6097 = vmatprep.subr.bf16.mxu1 %v16594_v49  ;;  %v16631_v49 = vld [vmem:[%s20823_s10 + $0x370] ss:$8 sps:$4 sm:$0xff]  }
0x13f2   : > { %5913 = vmatprep.subr.bf16.mxu0 %v16588_v6  ;;  %v15586_v57 = vpop.f32.mrf.mxu1  ;;  %5943 = vmatprep.mubr.bf16.mxu0 %v17540_v3  ;;  %v16642_v6 = vld [vmem:[%s20823_s10 + $0x3f4] ss:$8 sps:$4 sm:$0xff]  }
0x13f3   : > { %v16639_v57 = vld [vmem:[%s20823_s10 + $0x354] ss:$8 sps:$4 sm:$0xff]  }
0x13f5   : > { %5914 = vmatpush1.bf16.msra.mxu0 %v16586_v45 }
0x13f6   : > { %5915 = vmatprep.subr.bf16.mxu0 %v16591_v56  ;;  %v16634_v56 = vld [vmem:[%s20823_s10 + $0x360] ss:$8 sps:$4 sm:$0xff]  }
0x13f7   : > { %15596 = vmatmul.mubr.msk.bf16.vlgmr.msra.gmra.mxu1 %vm5026_vm7, %v13249_v59 }
0x13f8   : > { %6098 = vmatpush1.bf16.msra.mxu1 %v16592_v63  ;;  %6129 = vmatprep.mubr.bf16.mxu1 %v17540_v3  ;;  %v13317_v63 = vld [vmem:[%s20825_s12 + $0x7] sm:$0x1] }
0x13f9   : > { %5916 = vmatpush1.bf16.msra.mxu0 %v16589_v2  ;;  %6099 = vmatprep.subr.bf16.mxu1 %v16600_v12  ;;  %v16640_v2 = vld [vmem:[%s20823_s10 + $0x3f0] ss:$8 sps:$4 sm:$0xff]  }
0x13fa   : > { %5917 = vmatprep.subr.bf16.mxu0 %v16597_v5  ;;  %v16637_v12 = vld [vmem:[%s20823_s10 + $0x350] ss:$8 sps:$4 sm:$0xff]   ;;  %v16648_v5 = vld [vmem:[%s20823_s10 + $0x3e4] ss:$8 sps:$4 sm:$0xff]  }
0x13fc   : > { %6100 = vmatpush1.bf16.msra.mxu1 %v16598_v17  ;;  %v16645_v17 = vld [vmem:[%s20823_s10 + $0x344] ss:$8 sps:$4 sm:$0xff]  }
0x13fd   : > { %5918 = vmatpush1.bf16.msra.mxu0 %v16595_v36  ;;  %6101 = vmatprep.subr.bf16.mxu1 %v16606_v38  ;;  %v16646_v36 = vld [vmem:[%s20823_s10 + $0x3e0] ss:$8 sps:$4 sm:$0xff]  }
0x13fe   : > { %5919 = vmatprep.subr.bf16.mxu0 %v16603_v44  ;;  %v16643_v38 = vld [vmem:[%s20823_s10 + $0x340] ss:$8 sps:$4 sm:$0xff]   ;;  %v16654_v44 = vld [vmem:[%s20823_s10 + $0x3d4] ss:$8 sps:$4 sm:$0xff]  }
0x1400   : > { %6102 = vmatpush1.bf16.msra.mxu1 %v16604_v51  ;;  %v16651_v51 = vld [vmem:[%s20823_s10 + $0x334] ss:$8 sps:$4 sm:$0xff]  }
0x1401   : > { %5920 = vmatpush1.bf16.msra.mxu0 %v16601_v48  ;;  %6103 = vmatprep.subr.bf16.mxu1 %v16612_v58  ;;  %v16652_v48 = vld [vmem:[%s20823_s10 + $0x3d0] ss:$8 sps:$4 sm:$0xff]  }
0x1402   : > { %5921 = vmatprep.subr.bf16.mxu0 %v16609_v11  ;;  %v16649_v58 = vld [vmem:[%s20823_s10 + $0x330] ss:$8 sps:$4 sm:$0xff]   ;;  %v16660_v11 = vld [vmem:[%s20823_s10 + $0x3c4] ss:$8 sps:$4 sm:$0xff]  }
0x1404   : > { %6104 = vmatpush1.bf16.msra.mxu1 %v16610_v31  ;;  %v16657_v31 = vld [vmem:[%s20823_s10 + $0x324] ss:$8 sps:$4 sm:$0xff]  }
0x1405   : > { %5922 = vmatpush1.bf16.msra.mxu0 %v16607_v53  ;;  %6105 = vmatprep.subr.bf16.mxu1 %v16618_v55  ;;  %v16658_v53 = vld [vmem:[%s20823_s10 + $0x3c0] ss:$8 sps:$4 sm:$0xff]   ;;  %v16663_v55 = vld [vmem:[%s20823_s10 + $0x314] ss:$8 sps:$4 sm:$0xff]  }
0x1406   : > { %5923 = vmatprep.subr.bf16.mxu0 %v16615_v24  ;;  %v16655_v24 = vld [vmem:[%s20823_s10 + $0x320] ss:$8 sps:$4 sm:$0xff]  }
0x1408   : > { %6106 = vmatpush1.bf16.msra.mxu1 %v16616_v32  ;;  %v16666_v32 = vld [vmem:[%s20823_s10 + $0x3b4] ss:$8 sps:$4 sm:$0xff]  }
0x1409   : > { %5924 = vmatpush1.bf16.msra.mxu0 %v16613_v1  ;;  %6107 = vmatprep.subr.bf16.mxu1 %v16624_v16  ;;  %v16661_v1 = vld [vmem:[%s20823_s10 + $0x310] ss:$8 sps:$4 sm:$0xff]   ;;  %v16669_v16 = vld [vmem:[%s20823_s10 + $0x304] ss:$8 sps:$4 sm:$0xff]  }
0x140a   : > { %5925 = vmatprep.subr.bf16.mxu0 %v16621_v9  ;;  %v16664_v9 = vld [vmem:[%s20823_s10 + $0x3b0] ss:$8 sps:$4 sm:$0xff]  }
0x140c   : > { %6108 = vmatpush1.bf16.msra.mxu1 %v16622_v18  ;;  %v16670_v18 = vld [vmem:[%s20823_s10 + $0x3a0] ss:$8 sps:$4 sm:$0xff]  }
0x140d   : > { %5926 = vmatpush1.bf16.msra.mxu0 %v16619_v25  ;;  %6109 = vmatprep.subr.bf16.mxu1 %v16627_v34  ;;  %v16667_v25 = vld [vmem:[%s20823_s10 + $0x300] ss:$8 sps:$4 sm:$0xff]   ;;  %v16672_v34 = vld [vmem:[%s20823_s10 + $0x3a4] ss:$8 sps:$4 sm:$0xff]  }
0x140e   : > { %15599 = vmatprep.subr.bf16.mxu0 %v17538_v7 }
0x1410   : > { %6110 = vmatpush1.bf16.msra.mxu1 %v16625_v22  ;;  %v16675_v22 = vld [vmem:[%s20823_s10 + $0x394] ss:$8 sps:$4 sm:$0xff]  }
0x1411   : > { %6111 = vmatprep.subr.bf16.mxu1 %v16630_v27  ;;  %v16673_v27 = vld [vmem:[%s20823_s10 + $0x390] ss:$8 sps:$4 sm:$0xff]  }
0x1414   : > { %6112 = vmatpush1.bf16.msra.mxu1 %v16628_v40  ;;  %v16676_v40 = vld [vmem:[%s20823_s10 + $0x380] ss:$8 sps:$4 sm:$0xff]  }
0x1415   : > { %15605 = vmatprep.subr.bf16.mxu1 %v17538_v7 }
0x14a7   : > { %v5573_v42 = vpop.f32.mrf.mxu0 }
0x14a8   : > { %v5580_v50 = vadd.f32 %v5573_v42, %v18993_v0  ;;  %v16678_v42 = vld [vmem:[%s20823_s10 + $0x384] ss:$8 sps:$4 sm:$0xff]  }
0x14a9   : > { %v5575_v26 = vpop.f32.mrf.mxu0 }
0x14aa   : > { %v5581_v46 = vadd.f32 %v5575_v26, %v18995_v21 }
0x14ab   : > { %v5577_v23 = vpop.f32.mrf.mxu0 }
0x14ad   : > { %v5578_v60 = vpop.f32.mrf.mxu0 }
0x14af   : > { %v5759_v15 = vpop.f32.mrf.mxu1  ;;  %v5807_v4 = vpop.f32.mrf.mxu0 }
0x14b0   : > { %v19113_v8 = vadd.f32 %v5759_v15, %v5580_v50  ;;  %v5813_v13 = vpack.c.bf16 %v5807_v4, %v5807_v4 }
0x14b1   : > { %v5761_v20 = vpop.f32.mrf.mxu1  ;;  %v15591_v28 = vpop.f32.mrf.mxu0 }
0x14b2   : > { %v19118_v30 = vadd.f32 %v5761_v20, %v5581_v46  ;;  %5944 = vmatmul.mubr.bf16.vlgmr.msra.gmra.mxu0 %v5813_v13  ;;  %v16681_v28 = vld [vmem:[%s20823_s10 + $0x474] ss:$8 sps:$4 sm:$0xff]  }
0x14b3   : > { %15600 = vmatpush3.bf16.msra.mxu0 %v18800_v54  ;;  %v5763_v0 = vpop.f32.mrf.mxu1  ;;  %v5810_v21 = vpop.f32.mrf.mxu0  ;;  %15601 = vmatprep.mubr.msk.bf16.mxu0 %vm17539_vm2, %v17538_v7 }
0x14b4   : > { %6283 = vmatprep.subr.bf16.mxu0 %v16633_v14 }
0x14b5   : > { %v5764_v33 = vpop.f32.mrf.mxu1  ;;  %v15592_v35 = vpop.f32.mrf.mxu0 }
0x14b7   : > { %v5993_v39 = vpop.f32.mrf.mxu1 }
0x14b8   : > { %v5999_v47 = vpack.c.bf16 %v5993_v39, %v5993_v39 }
0x14b9   : > { %v15597_v43 = vpop.f32.mrf.mxu1 }
0x14ba   : > { %6130 = vmatmul.mubr.bf16.vlgmr.msra.gmra.mxu1 %v5999_v47  ;;  %15602 = vmatmul.mubr.msk.bf16.vlgmr.msra.gmra.mxu0 %vm5026_vm7, %v13283_v41  ;;  %v13351_v47 = vld [vmem:[%s20825_s12 + $0x8] sm:$0x1] }
0x14bb   : > { %15606 = vmatpush3.bf16.msra.mxu1 %v18800_v54  ;;  %15607 = vmatprep.mubr.msk.bf16.mxu1 %vm17539_vm2, %v17538_v7  ;;  %v5996_v45 = vpop.f32.mrf.mxu1  ;;  %v16682_v43 = vld [vmem:[%s20823_s10 + $0x460] ss:$8 sps:$4 sm:$0xff]  }
0x14bc   : > { %6284 = vmatpush1.bf16.msra.mxu0 %v16631_v49  ;;  %6469 = vmatprep.subr.bf16.mxu1 %v16642_v6  ;;  %v16679_v49 = vld [vmem:[%s20823_s10 + $0x470] ss:$8 sps:$4 sm:$0xff]  }
0x14bd   : > { %6285 = vmatprep.subr.bf16.mxu0 %v16636_v10  ;;  %v15598_v59 = vpop.f32.mrf.mxu1  ;;  %6315 = vmatprep.mubr.bf16.mxu0 %v17540_v3 }
0x14be   : > { %v16685_v59 = vld [vmem:[%s20823_s10 + $0x450] ss:$8 sps:$4 sm:$0xff]  }
0x14c0   : > { %6286 = vmatpush1.bf16.msra.mxu0 %v16634_v56  ;;  %v16687_v56 = vld [vmem:[%s20823_s10 + $0x454] ss:$8 sps:$4 sm:$0xff]  }
0x14c1   : > { %6287 = vmatprep.subr.bf16.mxu0 %v16639_v57 }
0x14c2   : > { %15608 = vmatmul.mubr.msk.bf16.vlgmr.msra.gmra.mxu1 %vm5026_vm7, %v13317_v63  ;;  %v16690_v63 = vld [vmem:[%s20823_s10 + $0x444] ss:$8 sps:$4 sm:$0xff]  }
0x14c3   : > { %6470 = vmatpush1.bf16.msra.mxu1 %v16640_v2  ;;  %6501 = vmatprep.mubr.bf16.mxu1 %v17540_v3  ;;  %v16688_v2 = vld [vmem:[%s20823_s10 + $0x440] ss:$8 sps:$4 sm:$0xff]  }
0x14c4   : > { %6288 = vmatpush1.bf16.msra.mxu0 %v16637_v12  ;;  %6471 = vmatprep.subr.bf16.mxu1 %v16648_v5  ;;  %v16693_v12 = vld [vmem:[%s20823_s10 + $0x434] ss:$8 sps:$4 sm:$0xff]   ;;  %v16691_v5 = vld [vmem:[%s20823_s10 + $0x430] ss:$8 sps:$4 sm:$0xff]  }
0x14c5   : > { %6289 = vmatprep.subr.bf16.mxu0 %v16645_v17  ;;  %v16696_v17 = vld [vmem:[%s20823_s10 + $0x424] ss:$8 sps:$4 sm:$0xff]  }
0x14c7   : > { %6472 = vmatpush1.bf16.msra.mxu1 %v16646_v36  ;;  %v16694_v36 = vld [vmem:[%s20823_s10 + $0x420] ss:$8 sps:$4 sm:$0xff]  }
0x14c8   : > { %6290 = vmatpush1.bf16.msra.mxu0 %v16643_v38  ;;  %6473 = vmatprep.subr.bf16.mxu1 %v16654_v44  ;;  %v16699_v38 = vld [vmem:[%s20823_s10 + $0x414] ss:$8 sps:$4 sm:$0xff]   ;;  %v16697_v44 = vld [vmem:[%s20823_s10 + $0x410] ss:$8 sps:$4 sm:$0xff]  }
0x14c9   : > { %6291 = vmatprep.subr.bf16.mxu0 %v16651_v51  ;;  %v16700_v51 = vld [vmem:[%s20823_s10 + $0x400] ss:$8 sps:$4 sm:$0xff]  }
0x14cb   : > { %6474 = vmatpush1.bf16.msra.mxu1 %v16652_v48  ;;  %v16702_v48 = vld [vmem:[%s20823_s10 + $0x404] ss:$8 sps:$4 sm:$0xff]  }
0x14cc   : > { %6292 = vmatpush1.bf16.msra.mxu0 %v16649_v58  ;;  %6475 = vmatprep.subr.bf16.mxu1 %v16660_v11  ;;  %v16703_v58 = vld [vmem:[%s20826_s13 + $0x70] ss:$8 sps:$4 sm:$0xff]   ;;  %v16705_v11 = vld [vmem:[%s20826_s13 + $0x74] ss:$8 sps:$4 sm:$0xff]  }
0x14cd   : > { %6293 = vmatprep.subr.bf16.mxu0 %v16657_v31  ;;  %v16708_v31 = vld [vmem:[%s20826_s13 + $0x174] ss:$8 sps:$4 sm:$0xff]  }
0x14cf   : > { %6476 = vmatpush1.bf16.msra.mxu1 %v16658_v53  ;;  %v16711_v53 = vld [vmem:[%s20826_s13 + $0x64] ss:$8 sps:$4 sm:$0xff]  }
0x14d0   : > { %6294 = vmatpush1.bf16.msra.mxu0 %v16655_v24  ;;  %6477 = vmatprep.subr.bf16.mxu1 %v16666_v32  ;;  %v16709_v24 = vld [vmem:[%s20826_s13 + $0x60] ss:$8 sps:$4 sm:$0xff]   ;;  %v16723_v32 = vld [vmem:[%s20826_s13 + $0x44] ss:$8 sps:$4 sm:$0xff]  }
0x14d1   : > { %6295 = vmatprep.subr.bf16.mxu0 %v16663_v55  ;;  %v16717_v55 = vld [vmem:[%s20826_s13 + $0x54] ss:$8 sps:$4 sm:$0xff]  }
0x14d3   : > { %6478 = vmatpush1.bf16.msra.mxu1 %v16664_v9  ;;  %v16721_v9 = vld [vmem:[%s20826_s13 + $0x40] ss:$8 sps:$4 sm:$0xff]  }
0x14d4   : > { %6296 = vmatpush1.bf16.msra.mxu0 %v16661_v1  ;;  %6479 = vmatprep.subr.bf16.mxu1 %v16672_v34  ;;  %v16715_v1 = vld [vmem:[%s20826_s13 + $0x50] ss:$8 sps:$4 sm:$0xff]   ;;  %v16733_v34 = vld [vmem:[%s20826_s13 + $0x20] ss:$8 sps:$4 sm:$0xff]  }
0x14d5   : > { %6297 = vmatprep.subr.bf16.mxu0 %v16669_v16  ;;  %v16729_v16 = vld [vmem:[%s20826_s13 + $0x34] ss:$8 sps:$4 sm:$0xff]  }
0x14d7   : > { %6480 = vmatpush1.bf16.msra.mxu1 %v16670_v18  ;;  %v16735_v18 = vld [vmem:[%s20826_s13 + $0x24] ss:$8 sps:$4 sm:$0xff]  }
0x14d8   : > { %6298 = vmatpush1.bf16.msra.mxu0 %v16667_v25  ;;  %6481 = vmatprep.subr.bf16.mxu1 %v16675_v22  ;;  %v16727_v25 = vld [vmem:[%s20826_s13 + $0x30] ss:$8 sps:$4 sm:$0xff]   ;;  %v16741_v22 = vld [vmem:[%s20826_s13 + $0x14] ss:$8 sps:$4 sm:$0xff]  }
0x14d9   : > { %15611 = vmatprep.subr.bf16.mxu0 %v17538_v7 }
0x14db   : > { %6482 = vmatpush1.bf16.msra.mxu1 %v16673_v27  ;;  %v16739_v27 = vld [vmem:[%s20826_s13 + $0x10] ss:$8 sps:$4 sm:$0xff]  }
0x14dc   : > { %6483 = vmatprep.subr.bf16.mxu1 %v16678_v42  ;;  %v16745_v42 = vld [vmem:[%s20826_s13] ss:$8 sps:$4 sm:$0xff]  }
0x14df   : > { %6484 = vmatpush1.bf16.msra.mxu1 %v16676_v40  ;;  %v16747_v40 = vld [vmem:[%s20826_s13 + $0x4] ss:$8 sps:$4 sm:$0xff]  }
0x14e0   : > { %6906 = vmatprep.subr.bf16.mxu1 %v16705_v11  ;;  %v16744_v11 = vld [vmem:[%s20826_s13 + $0x114] ss:$8 sps:$4 sm:$0xff]  }
0x1572   : > { %v5945_v50 = vpop.f32.mrf.mxu0 }
0x1573   : > { %v5952_v26 = vadd.f32 %v5945_v50, %v19113_v8  ;;  %v16753_v50 = vld [vmem:[%s20826_s13 + $0xf4] ss:$8 sps:$4 sm:$0xff]  }
0x1574   : > { %v5947_v46 = vpop.f32.mrf.mxu0 }
0x1575   : > { %v5953_v23 = vadd.f32 %v5947_v46, %v19118_v30  ;;  %v16759_v46 = vld [vmem:[%s20826_s13 + $0xe4] ss:$8 sps:$4 sm:$0xff]  }
0x1576   : > { %v5949_v60 = vpop.f32.mrf.mxu0 }
0x1577   : > { %v16765_v60 = vld [vmem:[%s20826_s13 + $0xd4] ss:$8 sps:$4 sm:$0xff]  }
0x1578   : > { %v5950_v15 = vpop.f32.mrf.mxu0 }
0x1579   : > { %v16763_v15 = vld [vmem:[%s20826_s13 + $0xd0] ss:$8 sps:$4 sm:$0xff]  }
0x157a   : > { %v6131_v4 = vpop.f32.mrf.mxu1  ;;  %v6179_v13 = vpop.f32.mrf.mxu0 }
0x157b   : > { %v19232_v14 = vadd.f32 %v6131_v4, %v5952_v26  ;;  %v6185_v20 = vpack.c.bf16 %v6179_v13, %v6179_v13  ;;  %v16751_v26 = vld [vmem:[%s20826_s13 + $0xf0] ss:$8 sps:$4 sm:$0xff]   ;;  %v16771_v4 = vld [vmem:[%s20826_s13 + $0xc4] ss:$8 sps:$4 sm:$0xff]   ;;  %v16769_v13 = vld [vmem:[%s20826_s13 + $0xc0] ss:$8 sps:$4 sm:$0xff]  }
0x157c   : > { %v6133_v0 = vpop.f32.mrf.mxu1  ;;  %v15603_v21 = vpop.f32.mrf.mxu0 }
0x157d   : > { %v19237_v33 = vadd.f32 %v6133_v0, %v5953_v23  ;;  %6316 = vmatmul.mubr.bf16.vlgmr.msra.gmra.mxu0 %v6185_v20  ;;  %v16757_v23 = vld [vmem:[%s20826_s13 + $0xe0] ss:$8 sps:$4 sm:$0xff]   ;;  %v16777_v20 = vld [vmem:[%s20826_s13 + $0xb4] ss:$8 sps:$4 sm:$0xff]   ;;  %v16783_v0 = vld [vmem:[%s20826_s13 + $0xa4] ss:$8 sps:$4 sm:$0xff]  }
0x157e   : > { %15612 = vmatpush3.bf16.msra.mxu0 %v18800_v54  ;;  %v6135_v8 = vpop.f32.mrf.mxu1  ;;  %v6182_v30 = vpop.f32.mrf.mxu0  ;;  %15613 = vmatprep.mubr.msk.bf16.mxu0 %vm17539_vm2, %v17538_v7  ;;  %v16684_v54 = vld [vmem:[%s20823_s10 + $0x464] ss:$8 sps:$4 sm:$0xff]   ;;  %v16781_v21 = vld [vmem:[%s20826_s13 + $0xa0] ss:$8 sps:$4 sm:$0xff]  }
0x157f   : > { %6655 = vmatprep.subr.bf16.mxu0 %v16681_v28  ;;  %v16775_v28 = vld [vmem:[%s20826_s13 + $0xb0] ss:$8 sps:$4 sm:$0xff]  }
0x1580   : > { %v6136_v35 = vpop.f32.mrf.mxu1  ;;  %v15604_v39 = vpop.f32.mrf.mxu0 }
0x1582   : > { %v6365_v41 = vpop.f32.mrf.mxu1 }
0x1583   : > { %v6371_v6 = vpack.c.bf16 %v6365_v41, %v6365_v41 }
0x1584   : > { %v15609_v10 = vpop.f32.mrf.mxu1 }
0x1585   : > { %6502 = vmatmul.mubr.bf16.vlgmr.msra.gmra.mxu1 %v6371_v6  ;;  %15614 = vmatmul.mubr.msk.bf16.vlgmr.msra.gmra.mxu0 %vm5026_vm7, %v13351_v47 }
0x1586   : > { %6656 = vmatpush1.bf16.msra.mxu0 %v16679_v49  ;;  %v6368_v45 = vpop.f32.mrf.mxu1  ;;  %6687 = vmatprep.mubr.bf16.mxu0 %v17540_v3 }
0x1587   : > { %6657 = vmatprep.subr.bf16.mxu0 %v16684_v54  ;;  %6907 = vmatpush1.bf16.msra.mxu1 %v16703_v58  ;;  %v16706_v54 = vld [vmem:[%s20826_s13 + $0x170] ss:$8 sps:$4 sm:$0xff]   ;;  %v16714_v45 = vld [vmem:[%s20826_s13 + $0x164] ss:$8 sps:$4 sm:$0xff]   ;;  %v16736_v58 = vld [vmem:[%s20826_s13 + $0x120] ss:$8 sps:$4 sm:$0xff]  }
0x1588   : > { %v15610_v57 = vpop.f32.mrf.mxu1  ;;  %6908 = vmatprep.subr.bf16.mxu1 %v16711_v53  ;;  %v16750_v53 = vld [vmem:[%s20826_s13 + $0x104] ss:$8 sps:$4 sm:$0xff]  }
0x158a   : > { %6658 = vmatpush1.bf16.msra.mxu0 %v16682_v43 }
0x158b   : > { %6659 = vmatprep.subr.bf16.mxu0 %v16687_v56  ;;  %6909 = vmatpush1.bf16.msra.mxu1 %v16709_v24  ;;  %v16748_v24 = vld [vmem:[%s20826_s13 + $0x100] ss:$8 sps:$4 sm:$0xff]  }
0x158c   : > { %6910 = vmatprep.subr.bf16.mxu1 %v16717_v55  ;;  %v16756_v55 = vld [vmem:[%s20826_s13 + $0x1f4] ss:$8 sps:$4 sm:$0xff]  }
0x158e   : > { %6660 = vmatpush1.bf16.msra.mxu0 %v16685_v59  ;;  %v16712_v59 = vld [vmem:[%s20826_s13 + $0x160] ss:$8 sps:$4 sm:$0xff]  }
0x158f   : > { %6661 = vmatprep.subr.bf16.mxu0 %v16690_v63  ;;  %6911 = vmatpush1.bf16.msra.mxu1 %v16715_v1  ;;  %v16754_v1 = vld [vmem:[%s20826_s13 + $0x1f0] ss:$8 sps:$4 sm:$0xff]  }
0x1590   : > { %6912 = vmatprep.subr.bf16.mxu1 %v16723_v32  ;;  %v16762_v32 = vld [vmem:[%s20826_s13 + $0x1e4] ss:$8 sps:$4 sm:$0xff]  }
0x1592   : > { %6662 = vmatpush1.bf16.msra.mxu0 %v16688_v2  ;;  %v16720_v2 = vld [vmem:[%s20826_s13 + $0x154] ss:$8 sps:$4 sm:$0xff]  }
0x1593   : > { %6663 = vmatprep.subr.bf16.mxu0 %v16693_v12  ;;  %6913 = vmatpush1.bf16.msra.mxu1 %v16721_v9  ;;  %v16760_v9 = vld [vmem:[%s20826_s13 + $0x1e0] ss:$8 sps:$4 sm:$0xff]  }
0x1594   : > { %6914 = vmatprep.subr.bf16.mxu1 %v16729_v16  ;;  %v16768_v16 = vld [vmem:[%s20826_s13 + $0x1d4] ss:$8 sps:$4 sm:$0xff]  }
0x1596   : > { %6664 = vmatpush1.bf16.msra.mxu0 %v16691_v5 }
0x1597   : > { %6665 = vmatprep.subr.bf16.mxu0 %v16696_v17  ;;  %6915 = vmatpush1.bf16.msra.mxu1 %v16727_v25  ;;  %v16718_v17 = vld [vmem:[%s20826_s13 + $0x150] ss:$8 sps:$4 sm:$0xff]  }
0x1598   : > { %6916 = vmatprep.subr.bf16.mxu1 %v16735_v18  ;;  %v16766_v25 = vld [vmem:[%s20826_s13 + $0x1d0] ss:$8 sps:$4 sm:$0xff]   ;;  %v16774_v18 = vld [vmem:[%s20826_s13 + $0x1c4] ss:$8 sps:$4 sm:$0xff]  }
0x159a   : > { %6666 = vmatpush1.bf16.msra.mxu0 %v16694_v36  ;;  %v16726_v36 = vld [vmem:[%s20826_s13 + $0x144] ss:$8 sps:$4 sm:$0xff]  }
0x159b   : > { %6667 = vmatprep.subr.bf16.mxu0 %v16699_v38  ;;  %6917 = vmatpush1.bf16.msra.mxu1 %v16733_v34  ;;  %v16724_v38 = vld [vmem:[%s20826_s13 + $0x140] ss:$8 sps:$4 sm:$0xff]  }
0x159c   : > { %6918 = vmatprep.subr.bf16.mxu1 %v16741_v22  ;;  %v16772_v34 = vld [vmem:[%s20826_s13 + $0x1c0] ss:$8 sps:$4 sm:$0xff]   ;;  %v16780_v22 = vld [vmem:[%s20826_s13 + $0x1b4] ss:$8 sps:$4 sm:$0xff]  }
0x159e   : > { %6668 = vmatpush1.bf16.msra.mxu0 %v16697_v44  ;;  %v16732_v44 = vld [vmem:[%s20826_s13 + $0x134] ss:$8 sps:$4 sm:$0xff]  }
0x159f   : > { %6669 = vmatprep.subr.bf16.mxu0 %v16702_v48  ;;  %6919 = vmatpush1.bf16.msra.mxu1 %v16739_v27  ;;  %v16738_v48 = vld [vmem:[%s20826_s13 + $0x124] ss:$8 sps:$4 sm:$0xff]   ;;  %v16778_v27 = vld [vmem:[%s20826_s13 + $0x1b0] ss:$8 sps:$4 sm:$0xff]  }
0x15a0   : > { %6920 = vmatprep.subr.bf16.mxu1 %v16747_v40  ;;  %v16786_v40 = vld [vmem:[%s20826_s13 + $0x1a4] ss:$8 sps:$4 sm:$0xff]  }
0x15a2   : > { %6670 = vmatpush1.bf16.msra.mxu0 %v16700_v51  ;;  %v16730_v51 = vld [vmem:[%s20826_s13 + $0x130] ss:$8 sps:$4 sm:$0xff]  }
0x15a3   : > { %7143 = vmatprep.subr.bf16.mxu0 %v16708_v31  ;;  %6921 = vmatpush1.bf16.msra.mxu1 %v16745_v42  ;;  %v16742_v31 = vld [vmem:[%s20826_s13 + $0x110] ss:$8 sps:$4 sm:$0xff]   ;;  %v16784_v42 = vld [vmem:[%s20826_s13 + $0x1a0] ss:$8 sps:$4 sm:$0xff]  }
0x15a4   : > { %6922 = vmatprep.subr.bf16.mxu1 %v16753_v50  ;;  %v16789_v50 = vld [vmem:[%s20826_s13 + $0x94] ss:$8 sps:$4 sm:$0xff]  }
0x15a7   : > { %6923 = vmatpush2.bf16.msra.mxu1 %v16751_v26  ;;  %v16792_v26 = vld [vmem:[%s20826_s13 + $0x194] ss:$8 sps:$4 sm:$0xff]  }
0x15a8   : > { %6924 = vmatprep.subr.bf16.mxu1 %v16759_v46  ;;  %v16787_v46 = vld [vmem:[%s20826_s13 + $0x90] ss:$8 sps:$4 sm:$0xff]  }
0x15ab   : > { %6925 = vmatpush2.bf16.msra.mxu1 %v16757_v23  ;;  %v16790_v23 = vld [vmem:[%s20826_s13 + $0x190] ss:$8 sps:$4 sm:$0xff]  }
0x15ac   : > { %6926 = vmatprep.subr.bf16.mxu1 %v16765_v60  ;;  %v16795_v60 = vld [vmem:[%s20826_s13 + $0x84] ss:$8 sps:$4 sm:$0xff]  }
0x15af   : > { %6927 = vmatpush2.bf16.msra.mxu1 %v16763_v15  ;;  %v16798_v15 = vld [vmem:[%s20826_s13 + $0x184] ss:$8 sps:$4 sm:$0xff]  }
0x15b0   : > { %6928 = vmatprep.subr.bf16.mxu1 %v16771_v4  ;;  %v16793_v4 = vld [vmem:[%s20826_s13 + $0x80] ss:$8 sps:$4 sm:$0xff]  }
0x15b3   : > { %6929 = vmatpush2.bf16.msra.mxu1 %v16769_v13  ;;  %v16796_v13 = vld [vmem:[%s20826_s13 + $0x180] ss:$8 sps:$4 sm:$0xff]  }
0x15b4   : > { %6930 = vmatprep.subr.bf16.mxu1 %v16777_v20  ;;  %v6700_v20 = vlaneseq }
0x15b7   : > { %6931 = vmatpush2.bf16.msra.mxu1 %v16775_v28  ;;  %v19490_v28 = vshrl.u32 %v6700_v20, 7  ;;  %v16831_v20 = vld [vmem:[%s20826_s13 + $0x2d4] ss:$8 sps:$4 sm:$0xff]  }
0x15b8   : > { %6932 = vmatprep.subr.bf16.mxu1 %v16783_v0 }
0x15b9   : > { %v6702_v0 = vsub.s32 0, %v19490_v28 }
0x15bb   : > { %6933 = vmatpush2.bf16.msra.mxu1 %v16781_v21  ;;  %v6698_v21 = vld [vmem:[#allocation13] sm:$0x3] }
0x15bc   : > { %6934 = vmatprep.subr.bf16.mxu1 %v16789_v50  ;;  %v16819_v50 = vld [vmem:[%s20826_s13 + $0x214] ss:$8 sps:$4 sm:$0xff]  }
0x15bf   : > { %6935 = vmatpush2.bf16.msra.mxu1 %v16787_v46  ;;  %v16822_v46 = vld [vmem:[%s20826_s13 + $0x204] ss:$8 sps:$4 sm:$0xff]  }
0x15c0   : > { %6936 = vmatprep.subr.bf16.mxu1 %v16795_v60  ;;  %v16825_v60 = vld [vmem:[%s20826_s13 + $0x2f4] ss:$8 sps:$4 sm:$0xff]  }
0x15c3   : > { %6937 = vmatpush2.bf16.msra.mxu1 %v16793_v4  ;;  %v16828_v4 = vld [vmem:[%s20826_s13 + $0x2e4] ss:$8 sps:$4 sm:$0xff]  }
0x163d   : > { %v6317_v8 = vpop.f32.mrf.mxu0 }
0x163e   : > { %v6324_v30 = vadd.f32 %v6317_v8, %v19232_v14  ;;  %v6706_v8 = vsub.s32 1, %v19490_v28  ;;  %v16930_v28 = vld [vmem:[#allocation16 + $0xf0] sm:$0xff]  }
0x163f   : > { %v6319_v35 = vpop.f32.mrf.mxu0 }
0x1640   : > { %v6325_v39 = vadd.f32 %v6319_v35, %v19237_v33  ;;  %v6703_v35 = vrot.slane %v6698_v21, %v6702_v0 }
0x1641   : > { %v6321_v41 = vpop.f32.mrf.mxu0 }
0x1642   : > { %v6707_v41 = vrot.slane %v6698_v21, %v6706_v8  ;;  %v16829_v21 = vld [vmem:[%s20826_s13 + $0x2d0] ss:$8 sps:$4 sm:$0xff]  }
0x1643   : > { %v6322_v47 = vpop.f32.mrf.mxu0 }
0x1645   : > { %v6503_v49 = vpop.f32.mrf.mxu1  ;;  %v6551_v6 = vpop.f32.mrf.mxu0 }
0x1646   : > { %v19384_v10 = vadd.f32 %v6503_v49, %v6324_v30  ;;  %v6557_v43 = vpack.c.bf16 %v6551_v6, %v6551_v6 }
0x1647   : > { %v6505_v56 = vpop.f32.mrf.mxu1  ;;  %v15615_v14 = vpop.f32.mrf.mxu0 }
0x1648   : > { %v19389_v57 = vadd.f32 %v6505_v56, %v6325_v39  ;;  %6688 = vmatmul.mubr.bf16.vlgmr.msra.gmra.mxu0 %v6557_v43 }
0x1649   : > { %v6554_v33 = vpop.f32.mrf.mxu0  ;;  %7144 = vmatpush1.bf16.msra.mxu0 %v16706_v54  ;;  %v6507_v63 = vpop.f32.mrf.mxu1 }
0x164a   : > { %7145 = vmatprep.subr.bf16.mxu0 %v16714_v45 }
0x164b   : > { %v15616_v12 = vpop.f32.mrf.mxu0  ;;  %v6508_v5 = vpop.f32.mrf.mxu1 }
0x164d   : > { %7146 = vmatpush1.bf16.msra.mxu0 %v16712_v59 }
0x164e   : > { %7147 = vmatprep.subr.bf16.mxu0 %v16720_v2  ;;  %v19511_v2 = vsel %vm7192_vm8, 65535, %v17540_v3 }
0x1651   : > { %7148 = vmatpush1.bf16.msra.mxu0 %v16718_v17 }
0x1652   : > { %7149 = vmatprep.subr.bf16.mxu0 %v16726_v36 }
0x1655   : > { %7150 = vmatpush1.bf16.msra.mxu0 %v16724_v38 }
0x1656   : > { %7151 = vmatprep.subr.bf16.mxu0 %v16732_v44 }
0x1659   : > { %7152 = vmatpush1.bf16.msra.mxu0 %v16730_v51 }
0x165a   : > { %7153 = vmatprep.subr.bf16.mxu0 %v16738_v48 }
0x165d   : > { %7154 = vmatpush1.bf16.msra.mxu0 %v16736_v58 }
0x165e   : > { %7155 = vmatprep.subr.bf16.mxu0 %v16744_v11 }
0x1661   : > { %7156 = vmatpush1.bf16.msra.mxu0 %v16742_v31  ;;  %v13481_v31 = vld [vmem:[%s20828_s15 + $0x2] sm:$0x3] }
0x1662   : > { %7157 = vmatprep.subr.bf16.mxu0 %v16750_v53  ;;  %v16801_v53 = vld [vmem:[%s20826_s13 + $0x274] ss:$8 sps:$4 sm:$0xff]  }
0x1665   : > { %7158 = vmatpush1.bf16.msra.mxu0 %v16748_v24 }
0x1666   : > { %7159 = vmatprep.subr.bf16.mxu0 %v16756_v55  ;;  %v16799_v55 = vld [vmem:[%s20826_s13 + $0x270] ss:$8 sps:$4 sm:$0xff]  }
0x1669   : > { %7160 = vmatpush2.bf16.msra.mxu0 %v16754_v1  ;;  %v6947_v1 = vld [vmem:[%s20828_s15] sm:$0x3] }
0x166a   : > { %7161 = vmatprep.subr.bf16.mxu0 %v16762_v32  ;;  %v16804_v32 = vld [vmem:[%s20826_s13 + $0x264] ss:$8 sps:$4 sm:$0xff]  }
0x166d   : > { %7162 = vmatpush2.bf16.msra.mxu0 %v16760_v9  ;;  %v16802_v9 = vld [vmem:[%s20826_s13 + $0x260] ss:$8 sps:$4 sm:$0xff]  }
0x166e   : > { %7163 = vmatprep.subr.bf16.mxu0 %v16768_v16  ;;  %v16807_v16 = vld [vmem:[%s20826_s13 + $0x254] ss:$8 sps:$4 sm:$0xff]  }
0x1671   : > { %7164 = vmatpush2.bf16.msra.mxu0 %v16766_v25  ;;  %v16805_v25 = vld [vmem:[%s20826_s13 + $0x250] ss:$8 sps:$4 sm:$0xff]  }
0x1672   : > { %7165 = vmatprep.subr.bf16.mxu0 %v16774_v18  ;;  %v16810_v18 = vld [vmem:[%s20826_s13 + $0x244] ss:$8 sps:$4 sm:$0xff]  }
0x1675   : > { %7166 = vmatpush2.bf16.msra.mxu0 %v16772_v34  ;;  %v16808_v34 = vld [vmem:[%s20826_s13 + $0x240] ss:$8 sps:$4 sm:$0xff]  }
0x1676   : > { %7167 = vmatprep.subr.bf16.mxu0 %v16780_v22  ;;  %v16813_v22 = vld [vmem:[%s20826_s13 + $0x234] ss:$8 sps:$4 sm:$0xff]  }
0x1679   : > { %7168 = vmatpush2.bf16.msra.mxu0 %v16778_v27  ;;  %v16811_v27 = vld [vmem:[%s20826_s13 + $0x230] ss:$8 sps:$4 sm:$0xff]  }
0x167a   : > { %7169 = vmatprep.subr.bf16.mxu0 %v16786_v40  ;;  %v16816_v40 = vld [vmem:[%s20826_s13 + $0x224] ss:$8 sps:$4 sm:$0xff]  }
0x167d   : > { %7170 = vmatpush2.bf16.msra.mxu0 %v16784_v42  ;;  %v16814_v42 = vld [vmem:[%s20826_s13 + $0x220] ss:$8 sps:$4 sm:$0xff]  }
0x167e   : > { %7171 = vmatprep.subr.bf16.mxu0 %v16792_v26  ;;  %v16817_v26 = vld [vmem:[%s20826_s13 + $0x210] ss:$8 sps:$4 sm:$0xff]  }
0x1681   : > { %7172 = vmatpush2.bf16.msra.mxu0 %v16790_v23  ;;  %v16820_v23 = vld [vmem:[%s20826_s13 + $0x200] ss:$8 sps:$4 sm:$0xff]  }
0x1682   : > { %7173 = vmatprep.subr.bf16.mxu0 %v16798_v15  ;;  %v16823_v15 = vld [vmem:[%s20826_s13 + $0x2f0] ss:$8 sps:$4 sm:$0xff]  }
0x1685   : > { %7174 = vmatpush2.bf16.msra.mxu0 %v16796_v13  ;;  %v16826_v13 = vld [vmem:[%s20826_s13 + $0x2e0] ss:$8 sps:$4 sm:$0xff]  }
0x1708   : > { %v6689_v30 = vpop.f32.mrf.mxu0 }
0x1709   : > { %v6696_v39 = vadd.f32 %v6689_v30, %v19384_v10  ;;  %v16834_v30 = vld [vmem:[%s20826_s13 + $0x2c4] ss:$8 sps:$4 sm:$0xff]  }
0x170a   : > { %v6691_v47 = vpop.f32.mrf.mxu0 }
0x170b   : > { %v6697_v49 = vadd.f32 %v6691_v47, %v19389_v57  ;;  %v6710_v6 = vadd.f32 %v6703_v35, %v6696_v39  ;;  %v16832_v35 = vld [vmem:[%s20826_s13 + $0x2c0] ss:$8 sps:$4 sm:$0xff]   ;;  %v16837_v39 = vld [vmem:[%s20826_s13 + $0x2b4] ss:$8 sps:$4 sm:$0xff]   ;;  %v16840_v47 = vld [vmem:[%s20826_s13 + $0x2a4] ss:$8 sps:$4 sm:$0xff]  }
0x170c   : > { %v6693_v54 = vpop.f32.mrf.mxu0 }
0x170d   : > { %v6711_v43 = vadd.f32 %v6707_v41, %v6697_v49  ;;  %v19502_v14 = vpack.c.bf16 %v6710_v6, %v6710_v6  ;;  %v16835_v41 = vld [vmem:[%s20826_s13 + $0x2b0] ss:$8 sps:$4 sm:$0xff]   ;;  %v16838_v49 = vld [vmem:[%s20826_s13 + $0x2a0] ss:$8 sps:$4 sm:$0xff]   ;;  %v16843_v6 = vld [vmem:[%s20826_s13 + $0x294] ss:$8 sps:$4 sm:$0xff]  }
0x170e   : > { %v6694_v45 = vpop.f32.mrf.mxu0  ;;  %v16841_v54 = vld [vmem:[%s20826_s13 + $0x290] ss:$8 sps:$4 sm:$0xff]  }
0x170f   : > { %v19500_v56 = vpack.c.bf16 %v6711_v43, %v6711_v43  ;;  %v16846_v43 = vld [vmem:[%s20826_s13 + $0x284] ss:$8 sps:$4 sm:$0xff]   ;;  %v16844_v45 = vld [vmem:[%s20826_s13 + $0x280] ss:$8 sps:$4 sm:$0xff]  }
0x1711   : > { %6938 = vmatprep.mubr.bf16.mxu1 %v19500_v56  ;;  %7175 = vmatprep.mubr.bf16.mxu0 %v19500_v56 }
0x1712   : > { %6939 = vmatmul.mubr.bf16.vlgmr.msra.gmra.mxu1 %v19502_v14  ;;  %7176 = vmatmul.mubr.bf16.vlgmr.msra.gmra.mxu0 %v19502_v14 }
0x1713   : > { %7233 = vmatprep.mubr.bf16.mxu1 %v17540_v3  ;;  %7571 = vmatprep.mubr.bf16.mxu0 %v17540_v3 }
0x17d2   : > { %v6940_v10 = vpop.f32.mrf.mxu1  ;;  %v7177_v57 = vpop.f32.mrf.mxu0 }
0x17d3   : > { %v7186_v33 = vpack.c.bf16 %v7177_v57, %v7177_v57  ;;  %v6948_v44 = vpack.c.bf16 %v6940_v10, %v6940_v10 }
0x17d4   : > { %v6942_v59 = vpop.f32.mrf.mxu1  ;;  %v7179_v63 = vpop.f32.mrf.mxu0 }
0x17d5   : > { %v6949_v12 = vpack.c.bf16 %v6942_v59, %v6942_v59  ;;  %v7187_v5 = vpack.c.bf16 %v7179_v63, %v7179_v63  ;;  %v7196_v51 = vand.u32 %v19511_v2, %v7186_v33  ;;  %v7246_v24 = vand.u32 %v19511_v2, %v6948_v44 }
0x17d6   : > { %v6944_v17 = vpop.f32.mrf.mxu1  ;;  %v7181_v36 = vpop.f32.mrf.mxu0 }
0x17d7   : > { %v7199_v38 = vand.u32 %v19511_v2, %v7187_v5  ;;  %v7249_v11 = vand.u32 %v19511_v2, %v6949_v12 }
0x17d8   : > { %v6945_v48 = vpop.f32.mrf.mxu1  ;;  %v7182_v58 = vpop.f32.mrf.mxu0 }
0x17d9   : > { %7215 = vmatprep.subr.bf16.mxu1 %v7199_v38 }
0x17da   : > { %7216 = vmatpush1.bf16.msra.mxu1 %v7196_v51 }
0x17db   : > { %7265 = vmatprep.subr.bf16.mxu1 %v7249_v11 }
0x17dd   : > { %13482 = vmatmul.mubr.msk.bf16.vlgmr.msra.gmra.mxu1 %vm7188_vm9, %v13481_v31 }
0x17de   : > { %7266 = vmatpush1.bf16.msra.mxu1 %v7246_v24  ;;  %7283 = vmatprep.mubr.bf16.mxu1 %v17540_v3 }
0x17df   : > { %7485 = vmatprep.subr.bf16.mxu1 %v16801_v53 }
0x17e5   : > { %13483 = vmatmul.mubr.msk.bf16.vlgmr.msra.gmra.mxu1 %vm7188_vm9, %v6947_v1  ;;  %v16847_v1 = vld [vmem:[%s20826_s13 + $0x370] ss:$8 sps:$4 sm:$0xff]  }
0x17e6   : > { %7486 = vmatpush1.bf16.msra.mxu1 %v16799_v55  ;;  %7517 = vmatprep.mubr.bf16.mxu1 %v19500_v56  ;;  %v13548_v55 = vld [vmem:[%s20828_s15 + $0x4] sm:$0x3] }
0x17e7   : > { %7487 = vmatprep.subr.bf16.mxu1 %v16804_v32  ;;  %v16852_v32 = vld [vmem:[%s20826_s13 + $0x364] ss:$8 sps:$4 sm:$0xff]  }
0x17ea   : > { %7488 = vmatpush1.bf16.msra.mxu1 %v16802_v9  ;;  %v16850_v9 = vld [vmem:[%s20826_s13 + $0x360] ss:$8 sps:$4 sm:$0xff]  }
0x17eb   : > { %7489 = vmatprep.subr.bf16.mxu1 %v16807_v16  ;;  %v16855_v16 = vld [vmem:[%s20826_s13 + $0x354] ss:$8 sps:$4 sm:$0xff]  }
0x17ee   : > { %7490 = vmatpush1.bf16.msra.mxu1 %v16805_v25  ;;  %v16853_v25 = vld [vmem:[%s20826_s13 + $0x350] ss:$8 sps:$4 sm:$0xff]  }
0x17ef   : > { %7491 = vmatprep.subr.bf16.mxu1 %v16810_v18  ;;  %v16858_v18 = vld [vmem:[%s20826_s13 + $0x344] ss:$8 sps:$4 sm:$0xff]  }
0x17f2   : > { %7492 = vmatpush1.bf16.msra.mxu1 %v16808_v34  ;;  %v16861_v34 = vld [vmem:[%s20826_s13 + $0x334] ss:$8 sps:$4 sm:$0xff]  }
0x17f3   : > { %7493 = vmatprep.subr.bf16.mxu1 %v16813_v22  ;;  %v16859_v22 = vld [vmem:[%s20826_s13 + $0x330] ss:$8 sps:$4 sm:$0xff]  }
0x17f6   : > { %7494 = vmatpush1.bf16.msra.mxu1 %v16811_v27  ;;  %v16864_v27 = vld [vmem:[%s20826_s13 + $0x324] ss:$8 sps:$4 sm:$0xff]  }
0x17f7   : > { %7495 = vmatprep.subr.bf16.mxu1 %v16816_v40  ;;  %v16862_v40 = vld [vmem:[%s20826_s13 + $0x320] ss:$8 sps:$4 sm:$0xff]  }
0x17fa   : > { %7496 = vmatpush1.bf16.msra.mxu1 %v16814_v42  ;;  %v16867_v42 = vld [vmem:[%s20826_s13 + $0x314] ss:$8 sps:$4 sm:$0xff]  }
0x17fb   : > { %7497 = vmatprep.subr.bf16.mxu1 %v16819_v50  ;;  %v16865_v50 = vld [vmem:[%s20826_s13 + $0x310] ss:$8 sps:$4 sm:$0xff]  }
0x17fe   : > { %7498 = vmatpush1.bf16.msra.mxu1 %v16817_v26  ;;  %v16870_v26 = vld [vmem:[%s20826_s13 + $0x304] ss:$8 sps:$4 sm:$0xff]  }
0x17ff   : > { %7499 = vmatprep.subr.bf16.mxu1 %v16822_v46  ;;  %v16868_v46 = vld [vmem:[%s20826_s13 + $0x300] ss:$8 sps:$4 sm:$0xff]  }
0x1802   : > { %7500 = vmatpush1.bf16.msra.mxu1 %v16820_v23  ;;  %v16873_v23 = vld [vmem:[%s20826_s13 + $0x3f4] ss:$8 sps:$4 sm:$0xff]  }
0x1803   : > { %7501 = vmatprep.subr.bf16.mxu1 %v16825_v60  ;;  %v16871_v60 = vld [vmem:[%s20826_s13 + $0x3f0] ss:$8 sps:$4 sm:$0xff]  }
0x1806   : > { %7502 = vmatpush2.bf16.msra.mxu1 %v16823_v15  ;;  %v16876_v15 = vld [vmem:[%s20826_s13 + $0x3e4] ss:$8 sps:$4 sm:$0xff]  }
0x1807   : > { %7503 = vmatprep.subr.bf16.mxu1 %v16828_v4  ;;  %v16874_v4 = vld [vmem:[%s20826_s13 + $0x3e0] ss:$8 sps:$4 sm:$0xff]  }
0x180a   : > { %7504 = vmatpush2.bf16.msra.mxu1 %v16826_v13  ;;  %v16879_v13 = vld [vmem:[%s20826_s13 + $0x3d4] ss:$8 sps:$4 sm:$0xff]  }
0x180b   : > { %7505 = vmatprep.subr.bf16.mxu1 %v16831_v20  ;;  %v16877_v20 = vld [vmem:[%s20826_s13 + $0x3d0] ss:$8 sps:$4 sm:$0xff]  }
0x180e   : > { %7506 = vmatpush2.bf16.msra.mxu1 %v16829_v21  ;;  %v16882_v21 = vld [vmem:[%s20826_s13 + $0x3c4] ss:$8 sps:$4 sm:$0xff]  }
0x180f   : > { %7507 = vmatprep.subr.bf16.mxu1 %v16834_v30  ;;  %v16880_v30 = vld [vmem:[%s20826_s13 + $0x3c0] ss:$8 sps:$4 sm:$0xff]  }
0x1812   : > { %7508 = vmatpush2.bf16.msra.mxu1 %v16832_v35  ;;  %v16885_v35 = vld [vmem:[%s20826_s13 + $0x3b4] ss:$8 sps:$4 sm:$0xff]  }
0x1813   : > { %7509 = vmatprep.subr.bf16.mxu1 %v16837_v39  ;;  %v16883_v39 = vld [vmem:[%s20826_s13 + $0x3b0] ss:$8 sps:$4 sm:$0xff]  }
0x1816   : > { %7510 = vmatpush2.bf16.msra.mxu1 %v16835_v41  ;;  %v16888_v41 = vld [vmem:[%s20826_s13 + $0x3a4] ss:$8 sps:$4 sm:$0xff]  }
0x1817   : > { %7511 = vmatprep.subr.bf16.mxu1 %v16840_v47  ;;  %v16886_v47 = vld [vmem:[%s20826_s13 + $0x3a0] ss:$8 sps:$4 sm:$0xff]  }
0x181a   : > { %7512 = vmatpush2.bf16.msra.mxu1 %v16838_v49  ;;  %v16891_v49 = vld [vmem:[%s20826_s13 + $0x394] ss:$8 sps:$4 sm:$0xff]  }
0x181b   : > { %7513 = vmatprep.subr.bf16.mxu1 %v16843_v6  ;;  %v16889_v6 = vld [vmem:[%s20826_s13 + $0x390] ss:$8 sps:$4 sm:$0xff]  }
0x181e   : > { %7514 = vmatpush2.bf16.msra.mxu1 %v16841_v54  ;;  %v16894_v54 = vld [vmem:[%s20826_s13 + $0x384] ss:$8 sps:$4 sm:$0xff]  }
0x181f   : > { %7515 = vmatprep.subr.bf16.mxu1 %v16846_v43  ;;  %v16892_v43 = vld [vmem:[%s20826_s13 + $0x380] ss:$8 sps:$4 sm:$0xff]  }
0x1822   : > { %7516 = vmatpush2.bf16.msra.mxu1 %v16844_v45 }
0x1825   : > { %7518 = vmatmul.mubr.bf16.vlgmr.msra.gmra.mxu1 %v19502_v14 }
0x1826   : > { %7861 = vmatprep.mubr.bf16.mxu1 %v17540_v3  ;;  %v16849_v3 = vld [vmem:[%s20826_s13 + $0x374] ss:$8 sps:$4 sm:$0xff]  }
0x189d   : > { %v7235_v10 = vpop.f32.mrf.mxu1 }
0x189f   : > { %v7237_v57 = vpop.f32.mrf.mxu1 }
0x18a1   : > { %v7239_v33 = vpop.f32.mrf.mxu1 }
0x18a3   : > { %v7240_v59 = vpop.f32.mrf.mxu1 }
0x18a5   : > { %v7285_v63 = vpop.f32.mrf.mxu1 }
0x18a6   : > { %v19625_v12 = vadd.f32 %v7285_v63, %v7235_v10 }
0x18a7   : > { %v7287_v5 = vpop.f32.mrf.mxu1 }
0x18a8   : > { %v19627_v17 = vadd.f32 %v7287_v5, %v7237_v57  ;;  %v16911_v5 = vld [vmem:[#allocation16 + $0x78] sm:$0xff]  }
0x18a9   : > { %v7289_v36 = vpop.f32.mrf.mxu1 }
0x18aa   : > { %v16912_v36 = vld [vmem:[#allocation16 + $0x38] sm:$0xff]  }
0x18ab   : > { %v7290_v38 = vpop.f32.mrf.mxu1 }
0x18ac   : > { %v16913_v38 = vld [vmem:[#allocation16 + $0x70] sm:$0xff]  }
0x18e5   : > { %v7519_v44 = vpop.f32.mrf.mxu1 }
0x18e6   : > { %v7528_v51 = vpack.c.bf16 %v7519_v44, %v7519_v44  ;;  %v16914_v44 = vld [vmem:[#allocation16 + $0x30] sm:$0xff]  }
0x18e7   : > { %v7521_v48 = vpop.f32.mrf.mxu1 }
0x18e8   : > { %v7529_v58 = vpack.c.bf16 %v7521_v48, %v7521_v48  ;;  %v7534_v53 = vand.u32 %v7528_v51, %v19511_v2  ;;  %v16915_v51 = vld [vmem:[#allocation16 + $0x68] sm:$0xff]   ;;  %v16917_v48 = vld [vmem:[#allocation16 + $0x60] sm:$0xff]  }
0x18e9   : > { %v7523_v11 = vpop.f32.mrf.mxu1 }
0x18ea   : > { %v7537_v31 = vand.u32 %v7529_v58, %v19511_v2  ;;  %v16919_v58 = vld [vmem:[#allocation16 + $0x58] sm:$0xff]   ;;  %v16921_v11 = vld [vmem:[#allocation16 + $0x50] sm:$0xff]  }
0x18eb   : > { %v7524_v24 = vpop.f32.mrf.mxu1 }
0x18ec   : > { %7553 = vmatprep.subr.bf16.mxu0 %v7537_v31  ;;  %v16922_v31 = vld [vmem:[#allocation16 + $0x10] sm:$0xff]  }
0x18ed   : > { %7554 = vmatpush1.bf16.msra.mxu0 %v7534_v53 }
0x18ee   : > { %7775 = vmatprep.subr.bf16.mxu0 %v16849_v3 }
0x18f0   : > { %13549 = vmatmul.mubr.msk.bf16.vlgmr.msra.gmra.mxu0 %vm7188_vm9, %v13548_v55 }
0x18f1   : > { %7776 = vmatpush1.bf16.msra.mxu0 %v16847_v1  ;;  %7807 = vmatprep.mubr.bf16.mxu0 %v19500_v56  ;;  %v16856_v56 = vld [vmem:[%s20826_s13 + $0x340] ss:$8 sps:$4 sm:$0xff]  }
0x18f2   : > { %7777 = vmatprep.subr.bf16.mxu0 %v16852_v32 }
0x18f5   : > { %7778 = vmatpush1.bf16.msra.mxu0 %v16850_v9 }
0x18f6   : > { %7779 = vmatprep.subr.bf16.mxu0 %v16855_v16 }
0x18f9   : > { %7780 = vmatpush1.bf16.msra.mxu0 %v16853_v25  ;;  %v13614_v25 = vld [vmem:[%s20828_s15 + $0x6] sm:$0x3] }
0x18fa   : > { %7781 = vmatprep.subr.bf16.mxu0 %v16858_v18  ;;  %v16895_v18 = vld [vmem:[#allocation16 + $0xb8] sm:$0xff]  }
0x18fd   : > { %7782 = vmatpush1.bf16.msra.mxu0 %v16856_v56  ;;  %v16896_v56 = vld [vmem:[#allocation16 + $0xb0] sm:$0xff]  }
0x18fe   : > { %7783 = vmatprep.subr.bf16.mxu0 %v16861_v34  ;;  %v16898_v34 = vld [vmem:[#allocation16 + $0xa0] sm:$0xff]  }
0x1901   : > { %7784 = vmatpush1.bf16.msra.mxu0 %v16859_v22  ;;  %v16899_v22 = vld [vmem:[#allocation16 + $0x98] sm:$0xff]  }
0x1902   : > { %7785 = vmatprep.subr.bf16.mxu0 %v16864_v27  ;;  %v16900_v27 = vld [vmem:[#allocation16 + $0x90] sm:$0xff]  }
0x1905   : > { %7786 = vmatpush1.bf16.msra.mxu0 %v16862_v40  ;;  %v16901_v40 = vld [vmem:[#allocation16 + $0x88] sm:$0xff]  }
0x1906   : > { %7787 = vmatprep.subr.bf16.mxu0 %v16867_v42  ;;  %v16902_v42 = vld [vmem:[#allocation16 + $0x80] sm:$0xff]  }
0x1909   : > { %7788 = vmatpush1.bf16.msra.mxu0 %v16865_v50  ;;  %v16903_v50 = vld [vmem:[#allocation16 + $0x178] sm:$0xff]  }
0x190a   : > { %7789 = vmatprep.subr.bf16.mxu0 %v16870_v26  ;;  %v16904_v26 = vld [vmem:[#allocation16 + $0x170] sm:$0xff]  }
0x190d   : > { %7790 = vmatpush1.bf16.msra.mxu0 %v16868_v46  ;;  %v16905_v46 = vld [vmem:[#allocation16 + $0x168] sm:$0xff]  }
0x190e   : > { %7791 = vmatprep.subr.bf16.mxu0 %v16873_v23  ;;  %v16906_v23 = vld [vmem:[#allocation16 + $0x160] sm:$0xff]  }
0x1911   : > { %7792 = vmatpush2.bf16.msra.mxu0 %v16871_v60  ;;  %v16907_v60 = vld [vmem:[#allocation16 + $0x158] sm:$0xff]  }
0x1912   : > { %7793 = vmatprep.subr.bf16.mxu0 %v16876_v15  ;;  %v16908_v15 = vld [vmem:[#allocation16 + $0x150] sm:$0xff]  }
0x1915   : > { %7794 = vmatpush2.bf16.msra.mxu0 %v16874_v4  ;;  %v16909_v4 = vld [vmem:[#allocation16 + $0x148] sm:$0xff]  }
0x1916   : > { %7795 = vmatprep.subr.bf16.mxu0 %v16879_v13  ;;  %v16910_v13 = vld [vmem:[#allocation16 + $0x140] sm:$0xff]  }
0x1919   : > { %7796 = vmatpush2.bf16.msra.mxu0 %v16877_v20  ;;  %v16923_v20 = vld [vmem:[#allocation16 + $0x48] sm:$0xff]  }
0x191a   : > { %7797 = vmatprep.subr.bf16.mxu0 %v16882_v21  ;;  %v16924_v21 = vld [vmem:[#allocation16 + $0x8] sm:$0xff]  }
0x191d   : > { %7798 = vmatpush2.bf16.msra.mxu0 %v16880_v30  ;;  %v16925_v30 = vld [vmem:[#allocation16 + $0x40] sm:$0xff]  }
0x191e   : > { %7799 = vmatprep.subr.bf16.mxu0 %v16885_v35  ;;  %v16926_v35 = vld [vmem:[#allocation16] sm:$0xff]  }
0x1921   : > { %7800 = vmatpush2.bf16.msra.mxu0 %v16883_v39  ;;  %v16927_v39 = vld [vmem:[#allocation16 + $0x138] sm:$0xff]  }
0x1922   : > { %7801 = vmatprep.subr.bf16.mxu0 %v16888_v41  ;;  %v7872_v41 = vld [vmem:[#allocation15] sm:$0x3] }
0x1925   : > { %7802 = vmatpush2.bf16.msra.mxu0 %v16886_v47 }
0x1926   : > { %7803 = vmatprep.subr.bf16.mxu0 %v16891_v49  ;;  %v7877_v49 = vrot.slane %v7872_v41, %v6702_v0  ;;  %v16931_v0 = vld [vmem:[#allocation16 + $0x128] sm:$0xff]  }
0x1929   : > { %7804 = vmatpush2.bf16.msra.mxu0 %v16889_v6 }
0x192a   : > { %7805 = vmatprep.subr.bf16.mxu0 %v16894_v54  ;;  %v7881_v54 = vrot.slane %v7872_v41, %v6706_v8  ;;  %v16932_v8 = vld [vmem:[#allocation16 + $0xe8] sm:$0xff]  }
0x192d   : > { %7806 = vmatpush2.bf16.msra.mxu0 %v16892_v43 }
0x192e   : > { %14796 = vmatprep.subr.bf16.mxu0 %v16911_v5 }
0x1930   : > { %7808 = vmatmul.mubr.bf16.vlgmr.msra.gmra.mxu0 %v19502_v14  ;;  %v16916_v14 = vld [vmem:[#allocation16 + $0x28] sm:$0xff]  }
0x1931   : > { %14797 = vmatpush3.bf16.msra.mxu0 %v16912_v36 }
0x1932   : > { %14798 = vmatprep.subr.bf16.mxu0 %v16913_v38  ;;  %v16928_v38 = vld [vmem:[#allocation16 + $0xf8] sm:$0xff]  }
0x1935   : > { %14799 = vmatpush3.bf16.msra.mxu0 %v16914_v44 }
0x1936   : > { %14800 = vmatprep.subr.bf16.mxu0 %v16915_v51  ;;  %v16929_v51 = vld [vmem:[#allocation16 + $0x130] sm:$0xff]  }
0x1939   : > { %14801 = vmatpush3.bf16.msra.mxu0 %v16916_v14  ;;  %v16935_v14 = vld [vmem:[#allocation16 + $0x118] sm:$0xff]  }
0x193a   : > { %14802 = vmatprep.subr.bf16.mxu0 %v16917_v48  ;;  %v16936_v48 = vld [vmem:[#allocation16 + $0xd8] sm:$0xff]  }
0x19b0   : > { %v7573_v45 = vpop.f32.mrf.mxu0 }
0x19b1   : > { %v19734_v10 = vadd.f32 %v7573_v45, %v19625_v12  ;;  %v16918_v12 = vld [vmem:[#allocation16 + $0x20] sm:$0xff]  }
0x19b2   : > { %v7575_v57 = vpop.f32.mrf.mxu0  ;;  %14803 = vmatpush3.bf16.msra.mxu0 %v16918_v12  ;;  %v16937_v12 = vld [vmem:[#allocation16 + $0x110] sm:$0xff]  }
0x19b3   : > { %v19737_v33 = vadd.f32 %v7575_v57, %v19627_v17  ;;  %v16920_v17 = vld [vmem:[#allocation16 + $0x18] sm:$0xff]   ;;  %14804 = vmatprep.subr.bf16.mxu0 %v16919_v58  ;;  %v16938_v58 = vld [vmem:[#allocation16 + $0xd0] sm:$0xff]  }
0x19b4   : > { %v7577_v59 = vpop.f32.mrf.mxu0 }
0x19b6   : > { %v7578_v63 = vpop.f32.mrf.mxu0  ;;  %14805 = vmatpush3.bf16.msra.mxu0 %v16920_v17  ;;  %v16939_v17 = vld [vmem:[#allocation16 + $0x108] sm:$0xff]  }
0x19b7   : > { %14806 = vmatprep.subr.bf16.mxu0 %v16921_v11  ;;  %v16940_v11 = vld [vmem:[#allocation16 + $0xc8] sm:$0xff]  }
0x19ba   : > { %14807 = vmatpush3.bf16.msra.mxu0 %v16922_v31 }
0x19bb   : > { %14808 = vmatprep.subr.bf16.mxu0 %v16923_v20 }
0x19be   : > { %14809 = vmatpush3.bf16.msra.mxu0 %v16924_v21 }
0x19bf   : > { %14810 = vmatprep.subr.bf16.mxu0 %v16925_v30 }
0x19c2   : > { %14811 = vmatpush3.bf16.msra.mxu0 %v16926_v35 }
0x19c3   : > { %14827 = vmatprep.subr.bf16.mxu0 %v16927_v39 }
0x19f0   : > { %v7809_v3 = vpop.f32.mrf.mxu0 }
0x19f1   : > { %v7818_v53 = vpack.c.bf16 %v7809_v3, %v7809_v3  ;;  %v16941_v3 = vld [vmem:[#allocation16 + $0x100] sm:$0xff]  }
0x19f2   : > { %v7811_v24 = vpop.f32.mrf.mxu0 }
0x19f3   : > { %v7819_v55 = vpack.c.bf16 %v7811_v24, %v7811_v24  ;;  %v7824_v9 = vand.u32 %v7818_v53, %v19511_v2  ;;  %v16942_v24 = vld [vmem:[#allocation16 + $0xc0] sm:$0xff]  }
0x19f4   : > { %v7813_v1 = vpop.f32.mrf.mxu0 }
0x19f5   : > { %v7827_v32 = vand.u32 %v7819_v55, %v19511_v2  ;;  %v16897_v2 = vld [vmem:[#allocation16 + $0xa8] sm:$0xff]  }
0x19f6   : > { %v7814_v16 = vpop.f32.mrf.mxu0 }
0x19f7   : > { %7843 = vmatprep.subr.bf16.mxu1 %v7827_v32  ;;  %v16943_v32 = vld [vmem:[#allocation16 + $0x238] sm:$0xff]   ;;  %v16945_v16 = vld [vmem:[#allocation16 + $0x228] sm:$0xff]  }
0x19f8   : > { %7844 = vmatpush1.bf16.msra.mxu1 %v7824_v9  ;;  %v16944_v9 = vld [vmem:[#allocation16 + $0x230] sm:$0xff]  }
0x19f9   : > { %15617 = vmatprep.subr.bf16.mxu1 %v17538_v7 }
0x19fb   : > { %13615 = vmatmul.mubr.msk.bf16.vlgmr.msra.gmra.mxu1 %vm7188_vm9, %v13614_v25  ;;  %v16946_v25 = vld [vmem:[#allocation16 + $0x220] sm:$0xff]  }
0x19fc   : > { %15618 = vmatpush3.bf16.msra.mxu1 %v16895_v18  ;;  %15633 = vmatprep.mubr.msk.bf16.mxu1 %vm17539_vm2, %v17538_v7  ;;  %v16947_v18 = vld [vmem:[#allocation16 + $0x218] sm:$0xff]  }
0x19fd   : > { %15619 = vmatprep.subr.bf16.mxu1 %v17538_v7 }
0x1a00   : > { %15620 = vmatpush3.bf16.msra.mxu1 %v16896_v56  ;;  %v16948_v56 = vld [vmem:[#allocation16 + $0x210] sm:$0xff]  }
0x1a01   : > { %15621 = vmatprep.subr.bf16.mxu1 %v17538_v7 }
0x1a04   : > { %15622 = vmatpush3.bf16.msra.mxu1 %v16897_v2  ;;  %v16949_v2 = vld [vmem:[#allocation16 + $0x208] sm:$0xff]  }
0x1a05   : > { %15623 = vmatprep.subr.bf16.mxu1 %v17538_v7 }
0x1a08   : > { %15624 = vmatpush3.bf16.msra.mxu1 %v16898_v34 }
0x1a09   : > { %15625 = vmatprep.subr.bf16.mxu1 %v17538_v7 }
0x1a0c   : > { %15626 = vmatpush3.bf16.msra.mxu1 %v16899_v22 }
0x1a0d   : > { %15627 = vmatprep.subr.bf16.mxu1 %v17538_v7 }
0x1a10   : > { %15628 = vmatpush3.bf16.msra.mxu1 %v16900_v27  ;;  %v16950_v27 = vld [vmem:[#allocation16 + $0x200] sm:$0xff]  }
0x1a11   : > { %15629 = vmatprep.subr.bf16.mxu1 %v17538_v7 }
0x1a14   : > { %15630 = vmatpush3.bf16.msra.mxu1 %v16901_v40 }
0x1a15   : > { %15631 = vmatprep.subr.bf16.mxu1 %v17538_v7 }
0x1a18   : > { %15632 = vmatpush3.bf16.msra.mxu1 %v16902_v42 }
0x1a19   : > { %15637 = vmatprep.subr.bf16.mxu1 %v17538_v7 }
0x1a1b   : > { %15634 = vmatmul.mubr.bf16.vlgmr.msra.gmra.mxu1 %v18796_v52 }
0x1a1c   : > { %15638 = vmatpush3.bf16.msra.mxu1 %v16903_v50  ;;  %15653 = vmatprep.mubr.msk.bf16.mxu1 %vm17539_vm2, %v17538_v7 }
0x1a1d   : > { %15639 = vmatprep.subr.bf16.mxu1 %v17538_v7 }
0x1a20   : > { %15640 = vmatpush3.bf16.msra.mxu1 %v16904_v26 }
0x1a21   : > { %15641 = vmatprep.subr.bf16.mxu1 %v17538_v7 }
0x1a24   : > { %15642 = vmatpush3.bf16.msra.mxu1 %v16905_v46 }
0x1a25   : > { %15643 = vmatprep.subr.bf16.mxu1 %v17538_v7 }
0x1a28   : > { %15644 = vmatpush3.bf16.msra.mxu1 %v16906_v23 }
0x1a29   : > { %15645 = vmatprep.subr.bf16.mxu1 %v17538_v7 }
0x1a2c   : > { %15646 = vmatpush3.bf16.msra.mxu1 %v16907_v60 }
0x1a2d   : > { %15647 = vmatprep.subr.bf16.mxu1 %v17538_v7 }
0x1a30   : > { %15648 = vmatpush3.bf16.msra.mxu1 %v16908_v15 }
0x1a31   : > { %15649 = vmatprep.subr.bf16.mxu1 %v17538_v7 }
0x1a34   : > { %15650 = vmatpush3.bf16.msra.mxu1 %v16909_v4 }
0x1a35   : > { %15651 = vmatprep.subr.bf16.mxu1 %v17538_v7 }
0x1a38   : > { %15652 = vmatpush3.bf16.msra.mxu1 %v16910_v13 }
0x1a39   : > { %15657 = vmatprep.subr.bf16.mxu1 %v17538_v7 }
0x1a3b   : > { %15654 = vmatmul.mubr.bf16.vlgmr.msra.gmra.mxu1 %v18796_v52 }
0x1a3c   : > { %15659 = vmatprep.mubr.msk.bf16.mxu1 %vm17539_vm2, %v17538_v7 }
0x1abb   : > { %v7863_v47 = vpop.f32.mrf.mxu1 }
0x1abc   : > { %v7870_v6 = vadd.f32 %v7863_v47, %v19734_v10  ;;  %v16933_v10 = vld [vmem:[#allocation16 + $0x120] sm:$0xff]  }
0x1abd   : > { %v7865_v43 = vpop.f32.mrf.mxu1 }
0x1abe   : > { %v7871_v45 = vadd.f32 %v7865_v43, %v19737_v33  ;;  %v7884_v57 = vadd.f32 %v7877_v49, %v7870_v6  ;;  %v16934_v33 = vld [vmem:[#allocation16 + $0xe0] sm:$0xff]   ;;  %v16952_v6 = vld [vmem:[#allocation16 + $0x1f8] sm:$0xff]  }
0x1abf   : > { %v7867_v59 = vpop.f32.mrf.mxu1  ;;  %v16951_v49 = vld [vmem:[%s20831_s18 + $0x8] sm:$0xff]   ;;  %v16953_v43 = vld [vmem:[%s20831_s18] sm:$0xff]  }
0x1ac0   : > { %v7885_v63 = vadd.f32 %v7881_v54, %v7871_v45  ;;  %v19778_v44 = vpack.c.bf16 %v7884_v57, %v7884_v57  ;;  %v16954_v45 = vld [vmem:[#allocation16 + $0x1b8] sm:$0xff]   ;;  %v16955_v57 = vld [vmem:[#allocation16 + $0x1f0] sm:$0xff]  }
0x1ac1   : > { %v7868_v5 = vpop.f32.mrf.mxu1  ;;  %v16956_v59 = vld [vmem:[#allocation16 + $0x1b0] sm:$0xff]  }
0x1ac2   : > { %v19776_v36 = vpack.c.bf16 %v7885_v63, %v7885_v63  ;;  %v16957_v63 = vld [vmem:[#allocation16 + $0x1e8] sm:$0xff]  }
0x1ac3   : > { %v16958_v5 = vld [vmem:[#allocation16 + $0x1a8] sm:$0xff]  }
0x1ac4   : > { %8152 = vmatprep.mubr.bf16.mxu0 %v19776_v36 }
0x1ac5   : > { %8153 = vmatmul.mubr.bf16.vlgmr.msra.gmra.mxu0 %v19778_v44 }
0x1ac6   : > { %14828 = vmatpush3.bf16.msra.mxu0 %v16928_v38  ;;  %8428 = vmatprep.mubr.bf16.mxu0 %v19776_v36  ;;  %v16959_v38 = vld [vmem:[#allocation16 + $0x1e0] sm:$0xff]  }
0x1ac7   : > { %14829 = vmatprep.subr.bf16.mxu0 %v16929_v51  ;;  %v16960_v51 = vld [vmem:[#allocation16 + $0x1a0] sm:$0xff]  }
0x1aca   : > { %14830 = vmatpush3.bf16.msra.mxu0 %v16930_v28  ;;  %v16961_v28 = vld [vmem:[#allocation16 + $0x1d8] sm:$0xff]  }
0x1acb   : > { %14831 = vmatprep.subr.bf16.mxu0 %v16931_v0 }
0x1ace   : > { %14832 = vmatpush3.bf16.msra.mxu0 %v16932_v8 }
0x1acf   : > { %14833 = vmatprep.subr.bf16.mxu0 %v16933_v10  ;;  %v16962_v10 = vld [vmem:[#allocation16 + $0x198] sm:$0xff]  }
0x1ad2   : > { %14834 = vmatpush3.bf16.msra.mxu0 %v16934_v33  ;;  %v16963_v33 = vld [vmem:[#allocation16 + $0x1d0] sm:$0xff]  }
0x1ad3   : > { %14835 = vmatprep.subr.bf16.mxu0 %v16935_v14 }
0x1ad6   : > { %14836 = vmatpush3.bf16.msra.mxu0 %v16936_v48 }
0x1ad7   : > { %14837 = vmatprep.subr.bf16.mxu0 %v16937_v12  ;;  %v16964_v12 = vld [vmem:[#allocation16 + $0x190] sm:$0xff]  }
0x1ada   : > { %14838 = vmatpush3.bf16.msra.mxu0 %v16938_v58  ;;  %v16965_v58 = vld [vmem:[#allocation16 + $0x1c8] sm:$0xff]  }
0x1adb   : > { %v8018_v31 = vpop.f32.mrf.mxu1  ;;  %14839 = vmatprep.subr.bf16.mxu0 %v16939_v17  ;;  %v16966_v17 = vld [vmem:[#allocation16 + $0x188] sm:$0xff]  }
0x1add   : > { %v15635_v53 = vpop.f32.mrf.mxu1 }
0x1ade   : > { %14840 = vmatpush3.bf16.msra.mxu0 %v16940_v11  ;;  %v16967_v11 = vld [vmem:[#allocation16 + $0x1c0] sm:$0xff]   ;;  %v16970_v53 = vld [vmem:[#allocation16 + $0x2f0] sm:$0xff]  }
0x1adf   : > { %v8021_v55 = vpop.f32.mrf.mxu1  ;;  %14841 = vmatprep.subr.bf16.mxu0 %v16941_v3  ;;  %v16969_v3 = vld [vmem:[#allocation16 + $0x2f8] sm:$0xff]  }
0x1ae0   : > { %v16972_v55 = vld [vmem:[#allocation16 + $0x2e0] sm:$0xff]  }
0x1ae1   : > { %v15636_v1 = vpop.f32.mrf.mxu1 }
0x1ae2   : > { %14842 = vmatpush3.bf16.msra.mxu0 %v16942_v24  ;;  %v16971_v24 = vld [vmem:[#allocation16 + $0x2e8] sm:$0xff]   ;;  %v16973_v1 = vld [vmem:[#allocation16 + $0x2d8] sm:$0xff]  }
0x1ae3   : > { %15669 = vmatprep.subr.bf16.mxu0 %v17538_v7 }
0x1ae5   : > { %8429 = vmatmul.mubr.bf16.vlgmr.msra.gmra.mxu0 %v19778_v44 }
0x1ae6   : > { %15670 = vmatpush3.bf16.msra.mxu0 %v16943_v32  ;;  %15685 = vmatprep.mubr.msk.bf16.mxu0 %vm17539_vm2, %v17538_v7  ;;  %v16974_v32 = vld [vmem:[#allocation16 + $0x2d0] sm:$0xff]  }
0x1ae7   : > { %15671 = vmatprep.subr.bf16.mxu0 %v17538_v7 }
0x1aea   : > { %15672 = vmatpush3.bf16.msra.mxu0 %v16944_v9  ;;  %v16975_v9 = vld [vmem:[#allocation16 + $0x2c8] sm:$0xff]  }
0x1aeb   : > { %15673 = vmatprep.subr.bf16.mxu0 %v17538_v7 }
0x1aee   : > { %15674 = vmatpush3.bf16.msra.mxu0 %v16945_v16  ;;  %v16976_v16 = vld [vmem:[#allocation16 + $0x2c0] sm:$0xff]  }
0x1aef   : > { %15675 = vmatprep.subr.bf16.mxu0 %v17538_v7 }
0x1af2   : > { %15676 = vmatpush3.bf16.msra.mxu0 %v16946_v25 }
0x1af3   : > { %15677 = vmatprep.subr.bf16.mxu0 %v17538_v7 }
0x1af6   : > { %15678 = vmatpush3.bf16.msra.mxu0 %v16947_v18 }
0x1af7   : > { %15679 = vmatprep.subr.bf16.mxu0 %v17538_v7 }
0x1afa   : > { %15680 = vmatpush3.bf16.msra.mxu0 %v16948_v56 }
0x1afb   : > { %v8294_v34 = vpop.f32.mrf.mxu1  ;;  %15681 = vmatprep.subr.bf16.mxu0 %v17538_v7 }
0x1afd   : > { %v15655_v22 = vpop.f32.mrf.mxu1 }
0x1afe   : > { %15682 = vmatpush3.bf16.msra.mxu0 %v16949_v2 }
0x1aff   : > { %v8297_v40 = vpop.f32.mrf.mxu1  ;;  %15683 = vmatprep.subr.bf16.mxu0 %v17538_v7 }
0x1b01   : > { %v15656_v42 = vpop.f32.mrf.mxu1 }
0x1b02   : > { %15684 = vmatpush3.bf16.msra.mxu0 %v16950_v27 }
0x1b03   : > { %15689 = vmatprep.subr.bf16.mxu0 %v17538_v7 }
0x1b05   : > { %15686 = vmatmul.mubr.bf16.vlgmr.msra.gmra.mxu0 %v18796_v52 }
0x1b06   : > { %15691 = vmatprep.mubr.msk.bf16.mxu0 %vm17539_vm2, %v17538_v7 }
0x1b85   : > { %v14812_v50 = vpop.f32.mrf.mxu0 }
0x1b87   : > { %v14813_v26 = vpop.f32.mrf.mxu0 }
0x1b88   : > { %v14814_v15 = vadd.f32 %v14813_v26, %v14812_v50 }
0x1b89   : > { %v14815_v46 = vpop.f32.mrf.mxu0 }
0x1b8a   : > { %v8155_v21 = vadd.f32 %v14814_v15, %v8018_v31  ;;  %v16968_v31 = vld [vmem:[#allocation16 + $0x180] sm:$0xff]  }
0x1b8b   : > { %v14816_v23 = vpop.f32.mrf.mxu0 }
0x1b8c   : > { %v8162_v41 = vpack.c.bf16 %v8155_v21, %v8155_v21  ;;  %v16977_v21 = vld [vmem:[%s20831_s18 + $0x10] sm:$0xff]  }
0x1b8e   : > { %v8501_v54 = vsel %vm5030_vm6, %v8162_v41, 0  ;;  %v16982_v41 = vld [vmem:[#allocation16 + $0x2a8] sm:$0xff]  }
0x1ba5   : > { %v14843_v60 = vpop.f32.mrf.mxu0 }
0x1ba7   : > { %v14844_v4 = vpop.f32.mrf.mxu0 }
0x1ba8   : > { %v14845_v13 = vadd.f32 %v14844_v4, %v14843_v60 }
0x1ba9   : > { %v14846_v20 = vpop.f32.mrf.mxu0 }
0x1baa   : > { %v8431_v30 = vadd.f32 %v14845_v13, %v8294_v34  ;;  %v16978_v13 = vld [vmem:[#allocation16 + $0x2b8] sm:$0xff]  }
0x1bab   : > { %v14847_v35 = vpop.f32.mrf.mxu0 }
0x1bac   : > { %v8439_v39 = vpack.c.bf16 %v8431_v30, %v8431_v30  ;;  %v16979_v30 = vld [vmem:[#allocation16 + $0x278] sm:$0xff]   ;;  %v16980_v35 = vld [vmem:[#allocation16 + $0x2b0] sm:$0xff]  }
0x1bae   : > { %v8449_v47 = vsel %vm5030_vm6, %v8439_v39, 0  ;;  %v16981_v39 = vld [vmem:[#allocation16 + $0x270] sm:$0xff]  }
0x1baf   : > { %15658 = vmatpush3.bf16.msra.mxu1 %v8449_v47  ;;  %v16983_v47 = vld [vmem:[#allocation16 + $0x268] sm:$0xff]  }
0x1bb0   : > { %15663 = vmatprep.subr.bf16.mxu1 %v17538_v7 }
0x1bb2   : > { %15660 = vmatmul.mubr.msk.bf16.vlgmr.msra.gmra.mxu1 %vm5026_vm7, %v16951_v49  ;;  %v16984_v49 = vld [vmem:[#allocation16 + $0x2a0] sm:$0xff]  }
0x1bb3   : > { %15664 = vmatpush3.bf16.msra.mxu1 %v8501_v54  ;;  %15665 = vmatprep.mubr.msk.bf16.mxu1 %vm17539_vm2, %v17538_v7  ;;  %v16986_v54 = vld [vmem:[#allocation16 + $0x298] sm:$0xff]  }
0x1bb4   : > { %14862 = vmatprep.subr.bf16.mxu1 %v16952_v6  ;;  %v16985_v6 = vld [vmem:[#allocation16 + $0x260] sm:$0xff]  }
0x1bba   : > { %15666 = vmatmul.mubr.msk.bf16.vlgmr.msra.gmra.mxu1 %vm5026_vm7, %v16953_v43  ;;  %v16987_v43 = vld [vmem:[#allocation16 + $0x258] sm:$0xff]  }
0x1bbb   : > { %14863 = vmatpush3.bf16.msra.mxu1 %v16954_v45  ;;  %8809 = vmatprep.mubr.bf16.mxu1 %v19776_v36  ;;  %v16988_v45 = vld [vmem:[#allocation16 + $0x290] sm:$0xff]  }
0x1bbc   : > { %14864 = vmatprep.subr.bf16.mxu1 %v16955_v57  ;;  %v16989_v57 = vld [vmem:[#allocation16 + $0x250] sm:$0xff]  }
0x1bbf   : > { %14865 = vmatpush3.bf16.msra.mxu1 %v16956_v59  ;;  %v16990_v59 = vld [vmem:[#allocation16 + $0x288] sm:$0xff]  }
0x1bc0   : > { %14866 = vmatprep.subr.bf16.mxu1 %v16957_v63 }
0x1bc3   : > { %14867 = vmatpush3.bf16.msra.mxu1 %v16958_v5  ;;  %v16991_v5 = vld [vmem:[#allocation16 + $0x248] sm:$0xff]  }
0x1bc4   : > { %14868 = vmatprep.subr.bf16.mxu1 %v16959_v38  ;;  %v16992_v38 = vld [vmem:[#allocation16 + $0x280] sm:$0xff]  }
0x1bc5   : > { %v19812_v0 = vpop.f32.mrf.mxu0 }
0x1bc7   : > { %14869 = vmatpush3.bf16.msra.mxu1 %v16960_v51  ;;  %v15687_v8 = vpop.f32.mrf.mxu0 }
0x1bc8   : > { %14870 = vmatprep.subr.bf16.mxu1 %v16961_v28  ;;  %v16994_v8 = vld [vmem:[%s20832_s19 + $0x58] sm:$0xff]  }
0x1bc9   : > { %v8678_v14 = vpop.f32.mrf.mxu0 }
0x1bca   : > { %v16998_v14 = vld [vmem:[%s20832_s19 + $0xb8] sm:$0xff]  }
0x1bcb   : > { %14871 = vmatpush3.bf16.msra.mxu1 %v16962_v10  ;;  %v15688_v48 = vpop.f32.mrf.mxu0  ;;  %v16995_v10 = vld [vmem:[%s20832_s19 + $0x50] sm:$0xff]  }
0x1bcc   : > { %14872 = vmatprep.subr.bf16.mxu1 %v16963_v33  ;;  %v16996_v33 = vld [vmem:[%s20832_s19 + $0x48] sm:$0xff]   ;;  %v16999_v48 = vld [vmem:[%s20832_s19 + $0xb0] sm:$0xff]  }
0x1bcf   : > { %14873 = vmatpush3.bf16.msra.mxu1 %v16964_v12  ;;  %v17000_v12 = vld [vmem:[%s20832_s19 + $0xa8] sm:$0xff]  }
0x1bd0   : > { %14874 = vmatprep.subr.bf16.mxu1 %v16965_v58  ;;  %v17001_v58 = vld [vmem:[%s20832_s19 + $0xa0] sm:$0xff]  }
0x1bd3   : > { %14875 = vmatpush3.bf16.msra.mxu1 %v16966_v17  ;;  %v17003_v17 = vld [vmem:[%s20832_s19 + $0x98] sm:$0xff]  }
0x1bd4   : > { %14876 = vmatprep.subr.bf16.mxu1 %v16967_v11  ;;  %v17005_v11 = vld [vmem:[%s20832_s19 + $0x90] sm:$0xff]  }
0x1bd7   : > { %14877 = vmatpush3.bf16.msra.mxu1 %v16968_v31  ;;  %v17007_v31 = vld [vmem:[%s20832_s19 + $0x88] sm:$0xff]  }
0x1bd8   : > { %15695 = vmatprep.subr.bf16.mxu1 %v17538_v7 }
0x1bda   : > { %8810 = vmatmul.mubr.bf16.vlgmr.msra.gmra.mxu1 %v19778_v44 }
0x1bdb   : > { %15696 = vmatpush3.bf16.msra.mxu1 %v16969_v3  ;;  %15711 = vmatprep.mubr.msk.bf16.mxu1 %vm17539_vm2, %v17538_v7  ;;  %v17009_v3 = vld [vmem:[%s20832_s19 + $0x80] sm:$0xff]  }
0x1bdc   : > { %15697 = vmatprep.subr.bf16.mxu1 %v17538_v7 }
0x1bdf   : > { %15698 = vmatpush3.bf16.msra.mxu1 %v16970_v53  ;;  %v17011_v53 = vld [vmem:[%s20832_s19 + $0x78] sm:$0xff]  }
0x1be0   : > { %15699 = vmatprep.subr.bf16.mxu1 %v17538_v7 }
0x1be3   : > { %15700 = vmatpush3.bf16.msra.mxu1 %v16971_v24  ;;  %v17013_v24 = vld [vmem:[%s20832_s19 + $0x70] sm:$0xff]  }
0x1be4   : > { %15701 = vmatprep.subr.bf16.mxu1 %v17538_v7 }
0x1be7   : > { %15702 = vmatpush3.bf16.msra.mxu1 %v16972_v55 }
0x1be8   : > { %15703 = vmatprep.subr.bf16.mxu1 %v17538_v7 }
0x1beb   : > { %15704 = vmatpush3.bf16.msra.mxu1 %v16973_v1 }
0x1bec   : > { %15705 = vmatprep.subr.bf16.mxu1 %v17538_v7 }
0x1bef   : > { %15706 = vmatpush3.bf16.msra.mxu1 %v16974_v32 }
0x1bf0   : > { %15707 = vmatprep.subr.bf16.mxu1 %v17538_v7 }
0x1bf3   : > { %15708 = vmatpush3.bf16.msra.mxu1 %v16975_v9 }
0x1bf4   : > { %15709 = vmatprep.subr.bf16.mxu1 %v17538_v7 }
0x1bf7   : > { %15710 = vmatpush3.bf16.msra.mxu1 %v16976_v16 }
0x1bf8   : > { %15715 = vmatprep.subr.bf16.mxu1 %v17538_v7 }
0x1bfa   : > { %15712 = vmatmul.mubr.bf16.vlgmr.msra.gmra.mxu1 %v18796_v52 }
0x1bfb   : > { %15717 = vmatprep.mubr.msk.bf16.mxu1 %vm17539_vm2, %v17538_v7 }
0x1c72   : > { %v8485_v25 = vpop.f32.mrf.mxu1 }
0x1c74   : > { %v15661_v18 = vpop.f32.mrf.mxu1 }
0x1c76   : > { %v8488_v56 = vpop.f32.mrf.mxu1 }
0x1c78   : > { %v15662_v2 = vpop.f32.mrf.mxu1 }
0x1c7a   : > { %v8537_v34 = vpop.f32.mrf.mxu1 }
0x1c7b   : > { %v19829_v22 = vadd.f32 %v8537_v34, %v8485_v25 }
0x1c7c   : > { %v15667_v27 = vpop.f32.mrf.mxu1 }
0x1c7e   : > { %v8540_v40 = vpop.f32.mrf.mxu1 }
0x1c7f   : > { %v19831_v42 = vadd.f32 %v8540_v40, %v8488_v56 }
0x1c80   : > { %v15668_v50 = vpop.f32.mrf.mxu1 }
0x1c9a   : > { %v14878_v26 = vpop.f32.mrf.mxu1 }
0x1c9c   : > { %v14879_v46 = vpop.f32.mrf.mxu1 }
0x1c9d   : > { %v14880_v23 = vadd.f32 %v14879_v46, %v14878_v26  ;;  %v17002_v46 = vld [vmem:[%s20831_s18 + $0x18] sm:$0xff]  }
0x1c9e   : > { %v14881_v60 = vpop.f32.mrf.mxu1 }
0x1c9f   : > { %v8812_v52 = vadd.f32 %v14880_v23, %v19812_v0  ;;  %v16993_v0 = vld [vmem:[#allocation16 + $0x240] sm:$0xff]  }
0x1ca0   : > { %v14882_v15 = vpop.f32.mrf.mxu1 }
0x1ca1   : > { %v8820_v4 = vpack.c.bf16 %v8812_v52, %v8812_v52  ;;  %v17008_v52 = vld [vmem:[%s20832_s19 + $0x28] sm:$0xff]  }
0x1ca3   : > { %v8830_v20 = vsel %vm5030_vm6, %v8820_v4, 0 }
0x1ca4   : > { %15690 = vmatpush3.bf16.msra.mxu0 %v8830_v20  ;;  %v17012_v20 = vld [vmem:[%s20832_s19 + $0x18] sm:$0xff]  }
0x1ca5   : > { %14895 = vmatprep.subr.bf16.mxu0 %v16978_v13  ;;  %v17010_v13 = vld [vmem:[%s20832_s19 + $0x20] sm:$0xff]  }
0x1ca7   : > { %15692 = vmatmul.mubr.msk.bf16.vlgmr.msra.gmra.mxu0 %vm5026_vm7, %v16977_v21 }
0x1ca8   : > { %14896 = vmatpush3.bf16.msra.mxu0 %v16979_v30  ;;  %9140 = vmatprep.mubr.bf16.mxu0 %v19776_v36 }
0x1ca9   : > { %14897 = vmatprep.subr.bf16.mxu0 %v16980_v35 }
0x1cac   : > { %14898 = vmatpush3.bf16.msra.mxu0 %v16981_v39 }
0x1cad   : > { %14899 = vmatprep.subr.bf16.mxu0 %v16982_v41  ;;  %v17014_v41 = vld [vmem:[%s20832_s19 + $0x10] sm:$0xff]  }
0x1cb0   : > { %14900 = vmatpush3.bf16.msra.mxu0 %v16983_v47  ;;  %v17015_v47 = vld [vmem:[%s20832_s19 + $0x68] sm:$0xff]  }
0x1cb1   : > { %14901 = vmatprep.subr.bf16.mxu0 %v16984_v49  ;;  %v17016_v49 = vld [vmem:[%s20832_s19 + $0x8] sm:$0xff]  }
0x1cb4   : > { %14902 = vmatpush3.bf16.msra.mxu0 %v16985_v6  ;;  %v17017_v6 = vld [vmem:[%s20832_s19 + $0x60] sm:$0xff]  }
0x1cb5   : > { %14903 = vmatprep.subr.bf16.mxu0 %v16986_v54  ;;  %v17018_v54 = vld [vmem:[%s20832_s19] sm:$0xff]  }
0x1cb8   : > { %14904 = vmatpush3.bf16.msra.mxu0 %v16987_v43 }
0x1cb9   : > { %14905 = vmatprep.subr.bf16.mxu0 %v16988_v45 }
0x1cba   : > { %v19840_v36 = vpop.f32.mrf.mxu1 }
0x1cbc   : > { %v15713_v63 = vpop.f32.mrf.mxu1  ;;  %14906 = vmatpush3.bf16.msra.mxu0 %v16989_v57 }
0x1cbd   : > { %14907 = vmatprep.subr.bf16.mxu0 %v16990_v59  ;;  %v13726_v59 = vld [vmem:[#allocation18] ss:$0 sm:$0xff] }
0x1cbe   : > { %v9009_v51 = vpop.f32.mrf.mxu1 }
0x1cc0   : > { %v15714_v28 = vpop.f32.mrf.mxu1  ;;  %14908 = vmatpush3.bf16.msra.mxu0 %v16991_v5 }
0x1cc1   : > { %14909 = vmatprep.subr.bf16.mxu0 %v16992_v38  ;;  %v17019_v28 = vld [vmem:[%s20832_s19 + $0xf8] sm:$0xff]  }
0x1cc4   : > { %14910 = vmatpush3.bf16.msra.mxu0 %v16993_v0 }
0x1cc5   : > { %15721 = vmatprep.subr.bf16.mxu0 %v17538_v7 }
0x1cc7   : > { %9141 = vmatmul.mubr.bf16.vlgmr.msra.gmra.mxu0 %v19778_v44  ;;  %v16997_v44 = vld [vmem:[%s20832_s19 + $0x40] sm:$0xff]  }
0x1cc8   : > { %15722 = vmatpush3.bf16.msra.mxu0 %v16994_v8  ;;  %15729 = vmatprep.mubr.msk.bf16.mxu0 %vm17539_vm2, %v17538_v7  ;;  %v17020_v8 = vld [vmem:[%s20832_s19 + $0xf0] sm:$0xff]  }
0x1cc9   : > { %15723 = vmatprep.subr.bf16.mxu0 %v17538_v7 }
0x1ccc   : > { %15724 = vmatpush3.bf16.msra.mxu0 %v16995_v10  ;;  %v17021_v10 = vld [vmem:[%s20832_s19 + $0xe8] sm:$0xff]  }
0x1ccd   : > { %15725 = vmatprep.subr.bf16.mxu0 %v17538_v7 }
0x1cd0   : > { %15726 = vmatpush3.bf16.msra.mxu0 %v16996_v33  ;;  %v17022_v33 = vld [vmem:[%s20832_s19 + $0xe0] sm:$0xff]  }
0x1cd1   : > { %15727 = vmatprep.subr.bf16.mxu0 %v17538_v7 }
0x1cd4   : > { %15728 = vmatpush3.bf16.msra.mxu0 %v16997_v44  ;;  %v17023_v44 = vld [vmem:[%s20832_s19 + $0xd8] sm:$0xff]  }
0x1cd5   : > { %15753 = vmatprep.subr.bf16.mxu0 %v17538_v7 }
0x1cd7   : > { %15730 = vmatmul.mubr.msk.bf16.vlgmr.msra.gmra.mxu0 %vm2869_vm3, %v18653_v19 }
0x1cd8   : > { %15754 = vmatpush3.bf16.msra.mxu0 %v16998_v14  ;;  %15761 = vmatprep.mubr.msk.bf16.mxu0 %vm17539_vm2, %v17538_v7  ;;  %v17024_v14 = vld [vmem:[%s20832_s19 + $0xd0] sm:$0xff]  }
0x1cd9   : > { %15755 = vmatprep.subr.bf16.mxu0 %v17538_v7 }
0x1cdc   : > { %15756 = vmatpush3.bf16.msra.mxu0 %v16999_v48  ;;  %v17025_v48 = vld [vmem:[%s20832_s19 + $0xc8] sm:$0xff]  }
0x1cdd   : > { %15757 = vmatprep.subr.bf16.mxu0 %v17538_v7 }
0x1ce0   : > { %15758 = vmatpush3.bf16.msra.mxu0 %v17000_v12  ;;  %v17026_v12 = vld [vmem:[%s20832_s19 + $0xc0] sm:$0xff]  }
0x1ce1   : > { %15759 = vmatprep.subr.bf16.mxu0 %v17538_v7 }
0x1ce4   : > { %15760 = vmatpush3.bf16.msra.mxu0 %v17001_v58  ;;  %v17027_v58 = vld [vmem:[%s20832_s19 + $0x158] sm:$0xff]  }
0x1ce5   : > { %15765 = vmatprep.subr.bf16.mxu0 %v17538_v7 }
0x1ce7   : > { %15762 = vmatmul.mubr.msk.bf16.vlgmr.msra.gmra.mxu0 %vm2869_vm3, %v18653_v19 }
0x1ce8   : > { %15781 = vmatprep.mubr.msk.bf16.mxu0 %vm17539_vm2, %v17538_v7  ;;  %15766 = vmatpush3.bf16.msra.mxu0 %v17003_v17  ;;  %v17028_v17 = vld [vmem:[%s20832_s19 + $0x150] sm:$0xff]  }
0x1ce9   : > { %15767 = vmatprep.subr.bf16.mxu0 %v17538_v7 }
0x1cec   : > { %15768 = vmatpush3.bf16.msra.mxu0 %v17005_v11  ;;  %v17029_v11 = vld [vmem:[%s20832_s19 + $0x148] sm:$0xff]  }
0x1ced   : > { %15769 = vmatprep.subr.bf16.mxu0 %v17538_v7 }
0x1cf0   : > { %15770 = vmatpush3.bf16.msra.mxu0 %v17007_v31  ;;  %v17030_v31 = vld [vmem:[%s20832_s19 + $0x140] sm:$0xff]  }
0x1cf1   : > { %15771 = vmatprep.subr.bf16.mxu0 %v17538_v7 }
0x1cf4   : > { %15772 = vmatpush3.bf16.msra.mxu0 %v17009_v3  ;;  %v17031_v3 = vld [vmem:[%s20832_s19 + $0x138] sm:$0xff]  }
0x1cf5   : > { %15773 = vmatprep.subr.bf16.mxu0 %v17538_v7 }
0x1cf8   : > { %15774 = vmatpush3.bf16.msra.mxu0 %v17011_v53  ;;  %v17032_v53 = vld [vmem:[%s20832_s19 + $0x130] sm:$0xff]  }
0x1cf9   : > { %15775 = vmatprep.subr.bf16.mxu0 %v17538_v7 }
0x1cfc   : > { %15776 = vmatpush3.bf16.msra.mxu0 %v17013_v24  ;;  %v17033_v24 = vld [vmem:[%s20832_s19 + $0x128] sm:$0xff]  }
0x1cfd   : > { %15777 = vmatprep.subr.bf16.mxu0 %v17538_v7 }
0x1d00   : > { %15778 = vmatpush3.bf16.msra.mxu0 %v17015_v47  ;;  %v17047_v47 = vld [vmem:[%s20832_s19 + $0x108] sm:$0xff]  }
0x1d01   : > { %15779 = vmatprep.subr.bf16.mxu0 %v17538_v7 }
0x1d04   : > { %15780 = vmatpush3.bf16.msra.mxu0 %v17017_v6 }
0x1d05   : > { %15817 = vmatprep.subr.bf16.mxu0 %v17538_v7 }
0x1d67   : > { %v8866_v55 = vpop.f32.mrf.mxu0 }
0x1d68   : > { %v8873_v1 = vadd.f32 %v8866_v55, %v19829_v22  ;;  %v17004_v22 = vld [vmem:[%s20832_s19 + $0x38] sm:$0xff]   ;;  %v17034_v55 = vld [vmem:[%s20832_s19 + $0x120] sm:$0xff]  }
0x1d69   : > { %v15693_v32 = vpop.f32.mrf.mxu0 }
0x1d6a   : > { %v17036_v32 = vld [vmem:[%s20835_s22 + $0x50] sm:$0xff]  }
0x1d6b   : > { %v8869_v9 = vpop.f32.mrf.mxu0 }
0x1d6c   : > { %v8874_v16 = vadd.f32 %v8869_v9, %v19831_v42  ;;  %v17006_v42 = vld [vmem:[%s20832_s19 + $0x30] sm:$0xff]   ;;  %v17037_v9 = vld [vmem:[%s20834_s21 + $0x20] sm:$0xff]  }
0x1d6d   : > { %v15694_v25 = vpop.f32.mrf.mxu0 }
0x1d87   : > { %v14911_v18 = vpop.f32.mrf.mxu0 }
0x1d89   : > { %v14912_v56 = vpop.f32.mrf.mxu0 }
0x1d8a   : > { %v14913_v2 = vadd.f32 %v14912_v56, %v14911_v18 }
0x1d8b   : > { %v14914_v34 = vpop.f32.mrf.mxu0 }
0x1d8c   : > { %v9143_v27 = vadd.f32 %v14913_v2, %v19840_v36 }
0x1d8d   : > { %v14915_v40 = vpop.f32.mrf.mxu0 }
0x1d8e   : > { %v9151_v50 = vpack.c.bf16 %v9143_v27, %v9143_v27 }
0x1d90   : > { %v9161_v26 = vsel %vm5030_vm6, %v9151_v50, 0 }
0x1d91   : > { %15716 = vmatpush3.bf16.msra.mxu1 %v9161_v26 }
0x1d92   : > { %15733 = vmatprep.subr.bf16.mxu1 %v17538_v7 }
0x1d94   : > { %15718 = vmatmul.mubr.msk.bf16.vlgmr.msra.gmra.mxu1 %vm5026_vm7, %v17002_v46 }
0x1d95   : > { %15734 = vmatpush3.bf16.msra.mxu1 %v17004_v22  ;;  %15749 = vmatprep.mubr.msk.bf16.mxu1 %vm17539_vm2, %v17538_v7 }
0x1d96   : > { %15735 = vmatprep.subr.bf16.mxu1 %v17538_v7 }
0x1d97   : > { %v19928_v23 = vpop.f32.mrf.mxu0 }
0x1d99   : > { %v15731_v60 = vpop.f32.mrf.mxu0  ;;  %15736 = vmatpush3.bf16.msra.mxu1 %v17006_v42 }
0x1d9a   : > { %15737 = vmatprep.subr.bf16.mxu1 %v17538_v7 }
0x1d9b   : > { %v19934_v15 = vpop.f32.mrf.mxu0 }
0x1d9d   : > { %v15732_v4 = vpop.f32.mrf.mxu0  ;;  %15738 = vmatpush3.bf16.msra.mxu1 %v17008_v52  ;;  %v17038_v52 = vld [vmem:[%s20834_s21 + $0x28] sm:$0xff]  }
0x1d9e   : > { %15739 = vmatprep.subr.bf16.mxu1 %v17538_v7  ;;  %v17039_v4 = vld [vmem:[%s20834_s21 + $0x30] sm:$0xff]  }
0x1da1   : > { %15740 = vmatpush3.bf16.msra.mxu1 %v17010_v13  ;;  %v17042_v13 = vld [vmem:[%s20834_s21 + $0x8] sm:$0xff]  }
0x1da2   : > { %15741 = vmatprep.subr.bf16.mxu1 %v17538_v7 }
0x1da5   : > { %15742 = vmatpush3.bf16.msra.mxu1 %v17012_v20  ;;  %v17043_v20 = vld [vmem:[%s20832_s19 + $0x118] sm:$0xff]  }
0x1da6   : > { %15743 = vmatprep.subr.bf16.mxu1 %v17538_v7 }
0x1da7   : > { %v19945_v21 = vpop.f32.mrf.mxu0 }
0x1da9   : > { %v15763_v30 = vpop.f32.mrf.mxu0  ;;  %15744 = vmatpush3.bf16.msra.mxu1 %v17014_v41 }
0x1daa   : > { %15745 = vmatprep.subr.bf16.mxu1 %v17538_v7  ;;  %v17044_v30 = vld [vmem:[%s20832_s19 + $0x110] sm:$0xff]  }
0x1dab   : > { %v19947_v35 = vpop.f32.mrf.mxu0 }
0x1dad   : > { %v15764_v39 = vpop.f32.mrf.mxu0  ;;  %15746 = vmatpush3.bf16.msra.mxu1 %v17016_v49 }
0x1dae   : > { %15747 = vmatprep.subr.bf16.mxu1 %v17538_v7  ;;  %v17046_v39 = vld [vmem:[%s20834_s21 + $0x18] sm:$0xff]  }
0x1db1   : > { %15748 = vmatpush3.bf16.msra.mxu1 %v17018_v54  ;;  %v17048_v54 = vld [vmem:[%s20832_s19 + $0x100] sm:$0xff]  }
0x1e54   : > { %v9197_v43 = vpop.f32.mrf.mxu1 }
0x1e55   : > { %v9204_v57 = vadd.f32 %v9197_v43, %v8873_v1  ;;  %v17035_v1 = vld [vmem:[%s20835_s22 + $0x58] sm:$0xff]  }
0x1e56   : > { %v15719_v45 = vpop.f32.mrf.mxu1 }
0x1e57   : > { %v9213_v38 = vadd.f32 %v13726_v59, %v9204_v57 }
0x1e58   : > { %v9200_v36 = vpop.f32.mrf.mxu1 }
0x1e59   : > { %v9205_v63 = vadd.f32 %v9200_v36, %v8874_v16  ;;  %v17049_v36 = vld [vmem:[%s20834_s21 + $0x40] sm:$0xff]  }
0x1e5a   : > { %v15720_v5 = vpop.f32.mrf.mxu1 }
0x1e5b   : > { %v9214_v51 = vadd.f32 %v13726_v59, %v9205_v63 }
0x1e5d   : > { %v9215_v0 = vpack.c.bf16 %v9214_v51, %v9213_v38 }
0x1e5f   : > { %15750 = vmatmul.mubr.bf16.vlgmr.msra.gmra.mxu1 %v9215_v0  ;;  %15782 = vmatmul.mubr.bf16.vlgmr.msra.gmra.mxu0 %v9215_v0 }
0x1e60   : > { %15818 = vmatpush3.bf16.msra.mxu0 %v17019_v28  ;;  %15833 = vmatprep.mubr.msk.bf16.mxu0 %vm17539_vm2, %v17538_v7 }
0x1e61   : > { %15819 = vmatprep.subr.bf16.mxu0 %v17538_v7  ;;  %15787 = vmatprep.mubr.msk.bf16.mxu1 %vm3913_vm5, %v17037_v9 }
0x1e64   : > { %15820 = vmatpush3.bf16.msra.mxu0 %v17020_v8 }
0x1e65   : > { %15821 = vmatprep.subr.bf16.mxu0 %v17538_v7 }
0x1e68   : > { %15822 = vmatpush3.bf16.msra.mxu0 %v17021_v10 }
0x1e69   : > { %15823 = vmatprep.subr.bf16.mxu0 %v17538_v7 }
0x1e6c   : > { %15824 = vmatpush3.bf16.msra.mxu0 %v17022_v33 }
0x1e6d   : > { %15825 = vmatprep.subr.bf16.mxu0 %v17538_v7 }
0x1e70   : > { %15826 = vmatpush3.bf16.msra.mxu0 %v17023_v44 }
0x1e71   : > { %15827 = vmatprep.subr.bf16.mxu0 %v17538_v7 }
0x1e74   : > { %15828 = vmatpush3.bf16.msra.mxu0 %v17024_v14 }
0x1e75   : > { %15829 = vmatprep.subr.bf16.mxu0 %v17538_v7 }
0x1e78   : > { %15830 = vmatpush3.bf16.msra.mxu0 %v17025_v48 }
0x1e79   : > { %15831 = vmatprep.subr.bf16.mxu0 %v17538_v7 }
0x1e7c   : > { %15832 = vmatpush3.bf16.msra.mxu0 %v17026_v12 }
0x1e7d   : > { %15859 = vmatprep.subr.bf16.mxu0 %v17538_v7 }
0x1e7f   : > { %15834 = vmatmul.mubr.bf16.vlgmr.msra.gmra.mxu0 %v9215_v0 }
0x1e80   : > { %15860 = vmatpush3.bf16.msra.mxu0 %v17027_v58  ;;  %15875 = vmatprep.mubr.msk.bf16.mxu0 %vm17539_vm2, %v17538_v7 }
0x1e81   : > { %15861 = vmatprep.subr.bf16.mxu0 %v17538_v7 }
0x1e84   : > { %15862 = vmatpush3.bf16.msra.mxu0 %v17028_v17 }
0x1e85   : > { %15863 = vmatprep.subr.bf16.mxu0 %v17538_v7 }
0x1e88   : > { %15864 = vmatpush3.bf16.msra.mxu0 %v17029_v11 }
0x1e89   : > { %15865 = vmatprep.subr.bf16.mxu0 %v17538_v7 }
0x1e8c   : > { %15866 = vmatpush3.bf16.msra.mxu0 %v17030_v31 }
0x1e8d   : > { %15867 = vmatprep.subr.bf16.mxu0 %v17538_v7 }
0x1e90   : > { %15868 = vmatpush3.bf16.msra.mxu0 %v17031_v3 }
0x1e91   : > { %15869 = vmatprep.subr.bf16.mxu0 %v17538_v7 }
0x1e94   : > { %15870 = vmatpush3.bf16.msra.mxu0 %v17032_v53 }
0x1e95   : > { %15871 = vmatprep.subr.bf16.mxu0 %v17538_v7 }
0x1e98   : > { %15872 = vmatpush3.bf16.msra.mxu0 %v17033_v24 }
0x1e99   : > { %15873 = vmatprep.subr.bf16.mxu0 %v17538_v7 }
0x1e9c   : > { %15874 = vmatpush3.bf16.msra.mxu0 %v17034_v55 }
0x1e9d   : > { %15917 = vmatprep.subr.bf16.mxu0 %v17035_v1 }
0x1e9f   : > { %15876 = vmatmul.mubr.bf16.vlgmr.msra.gmra.mxu0 %v9215_v0 }
0x1ea0   : > { %15918 = vmatpush3.bf16.msra.mxu0 %v17035_v1  ;;  %15921 = vmatprep.mubr.msk.bf16.mxu0 %vm2989_vm4, %v18463_v62 }
0x1ea1   : > { %15919 = vmatprep.subr.bf16.mxu0 %v17036_v32 }
0x1ea4   : > { %15920 = vmatpush3.bf16.msra.mxu0 %v17036_v32 }
0x1ea7   : > { %15922 = vmatmul.mubr.msk.bf16.vlgmr.msra.gmra.mxu0 %vm2989_vm4, %v18435_v61 }
0x1ea8   : > { %15925 = vmatprep.mubr.msk.bf16.mxu0 %vm2989_vm4, %v18457_v37 }
0x1eaf   : > { %15926 = vmatmul.mubr.msk.bf16.gmra.mxu0 %vm2989_vm4, %v18452_v29 }
0x1f1f   : > { %v9390_v16 = vpop.f32.mrf.mxu1  ;;  %v9578_v25 = vpop.f32.mrf.mxu0 }
0x1f20   : > { %v9579_v27 = vadd.f32 %v9578_v25, %v19945_v21  ;;  %v9391_v22 = vadd.f32 %v9390_v16, %v19928_v23  ;;  %v17040_v23 = vld [vmem:[%s20834_s21 + $0x38] sm:$0xff]   ;;  %v17045_v21 = vld [vmem:[%s20834_s21 + $0x10] sm:$0xff]  }
0x1f21   : > { %v15751_v18 = vpop.f32.mrf.mxu1  ;;  %v15783_v56 = vpop.f32.mrf.mxu0 }
0x1f23   : > { %v9393_v2 = vpop.f32.mrf.mxu1  ;;  %v9581_v34 = vpop.f32.mrf.mxu0 }
0x1f24   : > { %v9394_v40 = vadd.f32 %v9393_v2, %v19934_v15  ;;  %v9582_v50 = vadd.f32 %v9581_v34, %v19947_v35  ;;  %v17041_v15 = vld [vmem:[%s20834_s21] sm:$0xff]   ;;  %v17050_v34 = vld [vmem:[%s20834_s21 + $0x48] sm:$0xff]  }
0x1f25   : > { %v15752_v26 = vpop.f32.mrf.mxu1  ;;  %v15784_v46 = vpop.f32.mrf.mxu0 }
0x1f26   : > { %v9594_v42 = vpack.c.bf16 %v9582_v50, %v9579_v27  ;;  %v9405_v60 = vpack.c.bf16 %v9394_v40, %v9391_v22  ;;  %v17051_v27 = vld [vmem:[%s20832_s19 + $0x178] sm:$0xff]   ;;  %v17053_v40 = vld [vmem:[%s20834_s21 + $0x50] sm:$0xff]   ;;  %v17055_v46 = vld [vmem:[%s20832_s19 + $0x168] sm:$0xff]  }
0x1f27   : > { %v17052_v50 = vld [vmem:[%s20832_s19 + $0x170] sm:$0xff]   ;;  %v17054_v26 = vld [vmem:[%s20834_s21 + $0x58] sm:$0xff]   ;;  %v17056_v22 = vld [vmem:[%s20832_s19 + $0x160] sm:$0xff]  }
0x1f28   : > { %15785 = vmatprep.subr.bf16.mxu1 %v9594_v42 }
0x1f29   : > { %15786 = vmatpush3.bf16.msra.mxu1 %v9594_v42  ;;  %v17057_v42 = vld [vmem:[%s20834_s21 + $0x60] sm:$0xff]  }
0x1f2a   : > { %15795 = vmatprep.subr.bf16.mxu1 %v9405_v60 }
0x1f2c   : > { %15788 = vmatmul.mubr.msk.bf16.vlgmr.msra.gmra.mxu1 %vm3913_vm5, %v17038_v52 }
0x1f2d   : > { %15796 = vmatpush3.bf16.msra.mxu1 %v9405_v60  ;;  %15791 = vmatprep.mubr.msk.bf16.mxu1 %vm3913_vm5, %v17039_v4  ;;  %v17064_v60 = vld [vmem:[%s20835_s22 + $0x48] sm:$0xff]  }
0x1f2e   : > { %15805 = vmatprep.subr.bf16.mxu1 %v17538_v7  ;;  %15929 = vmatprep.subr.bf16.mxu0 %v17064_v60 }
0x1f2f   : > { %15930 = vmatpush3.bf16.msra.mxu0 %v17064_v60 }
0x1f34   : > { %15792 = vmatmul.mubr.msk.bf16.gmra.mxu1 %vm3913_vm5, %v17040_v23 }
0x1f35   : > { %15797 = vmatprep.mubr.msk.bf16.mxu1 %vm3913_vm5, %v17041_v15 }
0x1f3c   : > { %15798 = vmatmul.mubr.msk.bf16.vlgmr.msra.gmra.mxu1 %vm3913_vm5, %v17042_v13 }
0x1f3d   : > { %15806 = vmatpush3.bf16.msra.mxu1 %v17043_v20  ;;  %15801 = vmatprep.mubr.msk.bf16.mxu1 %vm3913_vm5, %v17045_v21 }
0x1f3e   : > { %15807 = vmatprep.subr.bf16.mxu1 %v17538_v7 }
0x1f3f   : > { %v9961_v35 = vpop.f32.mrf.mxu0 }
0x1f41   : > { %v15835_v41 = vpop.f32.mrf.mxu0  ;;  %15808 = vmatpush3.bf16.msra.mxu1 %v17044_v30 }
0x1f42   : > { %15809 = vmatprep.subr.bf16.mxu1 %v17538_v7 }
0x1f43   : > { %v9964_v49 = vpop.f32.mrf.mxu0 }
0x1f44   : > { %15802 = vmatmul.mubr.msk.bf16.gmra.mxu1 %vm3913_vm5, %v17046_v39 }
0x1f45   : > { %v15836_v6 = vpop.f32.mrf.mxu0  ;;  %15810 = vmatpush3.bf16.msra.mxu1 %v17047_v47  ;;  %15813 = vmatprep.mubr.msk.bf16.mxu1 %vm17539_vm2, %v17538_v7 }
0x1f46   : > { %15811 = vmatprep.subr.bf16.mxu1 %v17538_v7 }
0x1f49   : > { %15812 = vmatpush3.bf16.msra.mxu1 %v17048_v54 }
0x1f4c   : > { %15814 = vmatmul.mubr.msk.bf16.vlgmr.msra.gmra.mxu1 %vm2869_vm3, %v18653_v19 }
0x1f4d   : > { %15839 = vmatprep.mubr.msk.bf16.mxu1 %vm3913_vm5, %v17049_v36 }
0x1f5f   : > { %v20105_v43 = vpop.f32.mrf.mxu0 }
0x1f61   : > { %v15877_v45 = vpop.f32.mrf.mxu0 }
0x1f63   : > { %v20107_v57 = vpop.f32.mrf.mxu0 }
0x1f65   : > { %v15878_v59 = vpop.f32.mrf.mxu0 }
0x1fec   : > { %v15789_v63 = vpop.f32.mrf.mxu1 }
0x1fee   : > { %v9661_v5 = vpop.f32.mrf.mxu1 }
0x1ff0   : > { %v15790_v38 = vpop.f32.mrf.mxu1 }
0x1ff2   : > { %v20113_v51 = vpop.f32.mrf.mxu1 }
0x1ff4   : > { %v15793_v28 = vpop.f32.mrf.mxu1 }
0x1ff6   : > { %v9677_v0 = vpop.f32.mrf.mxu1 }
0x1ff8   : > { %v15794_v8 = vpop.f32.mrf.mxu1 }
0x1ffa   : > { %v20115_v10 = vpop.f32.mrf.mxu1 }
0x1ffc   : > { %v15799_v33 = vpop.f32.mrf.mxu1 }
0x1ffd   : > { %v9767_v44 = vadd.f32 %v15799_v33, %v15789_v63  ;;  %v17066_v33 = vld [vmem:[%s20835_s22 + $0x40] sm:$0xff]  }
0x1ffe   : > { %v9758_v14 = vpop.f32.mrf.mxu1  ;;  %15931 = vmatprep.subr.bf16.mxu0 %v17066_v33 }
0x1fff   : > { %v9759_v48 = vadd.f32 %v9758_v14, %v9661_v5  ;;  %v17061_v5 = vld [vmem:[%s20835_s22 + $0x28] sm:$0xff]   ;;  %15932 = vmatpush3.bf16.msra.mxu0 %v17066_v33  ;;  %v17068_v14 = vld [vmem:[%s20835_s22 + $0x38] sm:$0xff]  }
0x2000   : > { %v15800_v12 = vpop.f32.mrf.mxu1  ;;  %15933 = vmatprep.subr.bf16.mxu0 %v17068_v14 }
0x2001   : > { %v9770_v58 = vadd.f32 %v15800_v12, %v15790_v38  ;;  %v17058_v38 = vld [vmem:[%s20834_s21 + $0x68] sm:$0xff]   ;;  %v17070_v12 = vld [vmem:[%s20835_s22 + $0x30] sm:$0xff]  }
0x2002   : > { %v20117_v17 = vpop.f32.mrf.mxu1 }
0x2003   : > { %15934 = vmatpush3.bf16.msra.mxu0 %v17068_v14 }
0x2004   : > { %v15803_v11 = vpop.f32.mrf.mxu1  ;;  %15935 = vmatprep.subr.bf16.mxu0 %v17070_v12 }
0x2005   : > { %v9783_v31 = vadd.f32 %v15803_v11, %v15793_v28  ;;  %v17059_v28 = vld [vmem:[%s20834_s21 + $0x70] sm:$0xff]  }
0x2006   : > { %v9774_v3 = vpop.f32.mrf.mxu1 }
0x2007   : > { %v9775_v53 = vadd.f32 %v9774_v3, %v9677_v0  ;;  %v17060_v0 = vld [vmem:[%s20834_s21 + $0x78] sm:$0xff]   ;;  %15936 = vmatpush3.bf16.msra.mxu0 %v17070_v12 }
0x2008   : > { %v15804_v24 = vpop.f32.mrf.mxu1 }
0x2009   : > { %v9786_v55 = vadd.f32 %v15804_v24, %v15794_v8  ;;  %v17065_v8 = vld [vmem:[%s20835_s22 + $0x10] sm:$0xff]  }
0x200a   : > { %v20119_v1 = vpop.f32.mrf.mxu1 }
0x200c   : > { %v9872_v32 = vpop.f32.mrf.mxu1 }
0x200d   : > { %v9962_v25 = vadd.f32 %v9961_v35, %v9872_v32 }
0x200e   : > { %v15815_v9 = vpop.f32.mrf.mxu1 }
0x2010   : > { %v9875_v16 = vpop.f32.mrf.mxu1 }
0x2011   : > { %v9965_v18 = vadd.f32 %v9964_v49, %v9875_v16 }
0x2012   : > { %v15816_v56 = vpop.f32.mrf.mxu1 }
0x2013   : > { %v9977_v2 = vpack.c.bf16 %v9965_v18, %v9962_v25 }
0x2015   : > { %15837 = vmatprep.subr.bf16.mxu1 %v9977_v2 }
0x2016   : > { %15838 = vmatpush3.bf16.msra.mxu1 %v9977_v2 }
0x2017   : > { %15847 = vmatprep.subr.bf16.mxu1 %v17538_v7 }
0x2019   : > { %15840 = vmatmul.mubr.msk.bf16.vlgmr.msra.gmra.mxu1 %vm3913_vm5, %v17050_v34 }
0x201a   : > { %15848 = vmatpush3.bf16.msra.mxu1 %v17051_v27  ;;  %15843 = vmatprep.mubr.msk.bf16.mxu1 %vm3913_vm5, %v17053_v40 }
0x201b   : > { %15849 = vmatprep.subr.bf16.mxu1 %v17538_v7 }
0x201e   : > { %15850 = vmatpush3.bf16.msra.mxu1 %v17052_v50 }
0x201f   : > { %15851 = vmatprep.subr.bf16.mxu1 %v17538_v7 }
0x2021   : > { %15844 = vmatmul.mubr.msk.bf16.gmra.mxu1 %vm3913_vm5, %v17054_v26 }
0x2022   : > { %15852 = vmatpush3.bf16.msra.mxu1 %v17055_v46  ;;  %15855 = vmatprep.mubr.msk.bf16.mxu1 %vm17539_vm2, %v17538_v7 }
0x2023   : > { %15853 = vmatprep.subr.bf16.mxu1 %v17538_v7 }
0x2026   : > { %15854 = vmatpush3.bf16.msra.mxu1 %v17056_v22 }
0x2029   : > { %15856 = vmatmul.mubr.msk.bf16.vlgmr.msra.gmra.mxu1 %vm2869_vm3, %v18653_v19 }
0x202a   : > { %15881 = vmatprep.mubr.msk.bf16.mxu1 %vm3913_vm5, %v17057_v42 }
0x20d9   : > { %v15841_v52 = vpop.f32.mrf.mxu1 }
0x20da   : > { %v10077_v4 = vadd.f32 %v15841_v52, %v9767_v44  ;;  %v17067_v44 = vld [vmem:[%s20835_s22 + $0x8] sm:$0xff]  }
0x20db   : > { %v10044_v23 = vpop.f32.mrf.mxu1 }
0x20dc   : > { %v20160_v7 = vadd.f32 %v10044_v23, %v9759_v48  ;;  %v17069_v48 = vld [vmem:[%s20835_s22] sm:$0xff]  }
0x20dd   : > { %v15842_v15 = vpop.f32.mrf.mxu1 }
0x20de   : > { %v20162_v13 = vadd.f32 %v15842_v15, %v9770_v58 }
0x20df   : > { %v10047_v19 = vpop.f32.mrf.mxu1 }
0x20e1   : > { %v15845_v20 = vpop.f32.mrf.mxu1 }
0x20e2   : > { %v20164_v21 = vadd.f32 %v15845_v20, %v9783_v31  ;;  %v9762_v31 = vadd.f32 %v20117_v17, %v20113_v51  ;;  %v9778_v51 = vadd.f32 %v20119_v1, %v20115_v10  ;;  %v17072_v20 = vld [vmem:[%s20884_s4] sm:$0xff]  }
0x20e3   : > { %v10060_v30 = vpop.f32.mrf.mxu1 }
0x20e4   : > { %v20166_v35 = vadd.f32 %v10060_v30, %v9775_v53  ;;  %v13907_v53 = vld [vmem:[#allocation19] ss:$0 sm:$0xff] }
0x20e5   : > { %v15846_v39 = vpop.f32.mrf.mxu1 }
0x20e6   : > { %v20168_v41 = vadd.f32 %v15846_v39, %v9786_v55  ;;  %v10076_v55 = vadd.f32 %v10047_v19, %v9762_v31  ;;  %v17071_v19 = vld [vmem:[%s20884_s4 + $0x80] sm:$0xff]  }
0x20e7   : > { %v20170_v47 = vpop.f32.mrf.mxu1 }
0x20e8   : > { %v10080_v22 = vadd.f32 %v20170_v47, %v9778_v51 }
0x20e9   : > { %v10166_v49 = vpop.f32.mrf.mxu1 }
0x20ea   : > { %v10256_v45 = vadd.f32 %v20105_v43, %v10166_v49  ;;  %v17062_v43 = vld [vmem:[%s20835_s22 + $0x20] sm:$0xff]  }
0x20eb   : > { %v15857_v6 = vpop.f32.mrf.mxu1 }
0x20ed   : > { %v10169_v54 = vpop.f32.mrf.mxu1 }
0x20ee   : > { %v10259_v59 = vadd.f32 %v20107_v57, %v10169_v54  ;;  %v17063_v57 = vld [vmem:[%s20835_s22 + $0x18] sm:$0xff]  }
0x20ef   : > { %v15858_v36 = vpop.f32.mrf.mxu1 }
0x20f0   : > { %v10271_v63 = vpack.c.bf16 %v10259_v59, %v10256_v45 }
0x20f2   : > { %15879 = vmatprep.subr.bf16.mxu1 %v10271_v63 }
0x20f3   : > { %15880 = vmatpush3.bf16.msra.mxu1 %v10271_v63 }
0x20f4   : > { %15889 = vmatprep.subr.bf16.mxu1 %v17061_v5 }
0x20f6   : > { %15882 = vmatmul.mubr.msk.bf16.vlgmr.msra.gmra.mxu1 %vm3913_vm5, %v17058_v38 }
0x20f7   : > { %15885 = vmatprep.mubr.msk.bf16.mxu1 %vm3913_vm5, %v17059_v28  ;;  %15890 = vmatpush3.bf16.msra.mxu1 %v17061_v5 }
0x20f8   : > { %15891 = vmatprep.subr.bf16.mxu1 %v17062_v43 }
0x20fb   : > { %15892 = vmatpush3.bf16.msra.mxu1 %v17062_v43 }
0x20fc   : > { %15901 = vmatprep.subr.bf16.mxu1 %v17063_v57 }
0x20fe   : > { %15886 = vmatmul.mubr.msk.bf16.gmra.mxu1 %vm3913_vm5, %v17060_v0 }
0x20ff   : > { %15893 = vmatprep.mubr.msk.bf16.mxu1 %vm2989_vm4, %v18463_v62 }
0x2106   : > { %15894 = vmatmul.mubr.msk.bf16.vlgmr.msra.gmra.mxu1 %vm2989_vm4, %v18435_v61 }
0x2107   : > { %15897 = vmatprep.mubr.msk.bf16.mxu1 %vm2989_vm4, %v18457_v37  ;;  %15902 = vmatpush3.bf16.msra.mxu1 %v17063_v57 }
0x2108   : > { %15903 = vmatprep.subr.bf16.mxu1 %v17065_v8 }
0x210b   : > { %15904 = vmatpush3.bf16.msra.mxu1 %v17065_v8 }
0x210c   : > { %15905 = vmatprep.subr.bf16.mxu1 %v17067_v44 }
0x210e   : > { %15898 = vmatmul.mubr.msk.bf16.gmra.mxu1 %vm2989_vm4, %v18452_v29 }
0x210f   : > { %15906 = vmatpush3.bf16.msra.mxu1 %v17067_v44 }
0x2110   : > { %15907 = vmatprep.subr.bf16.mxu1 %v17069_v48 }
0x2113   : > { %15908 = vmatpush3.bf16.msra.mxu1 %v17069_v48 }
0x21b6   : > { %v15883_v58 = vpop.f32.mrf.mxu1 }
0x21b7   : > { %v10371_v3 = vadd.f32 %v15883_v58, %v10077_v4 }
0x21b8   : > { %v10338_v11 = vpop.f32.mrf.mxu1 }
0x21b9   : > { %v10369_v32 = vadd.f32 %v10338_v11, %v20160_v7  ;;  %v10386_v25 = vadd.f32 %v13907_v53, %v10371_v3 }
0x21ba   : > { %v15884_v24 = vpop.f32.mrf.mxu1 }
0x21bb   : > { %v10372_v9 = vadd.f32 %v15884_v24, %v20162_v13  ;;  %v10384_v34 = vadd.f32 %v13907_v53, %v10369_v32 }
0x21bc   : > { %v10341_v16 = vpop.f32.mrf.mxu1 }
0x21bd   : > { %v10387_v18 = vadd.f32 %v13907_v53, %v10372_v9  ;;  %v10370_v56 = vadd.f32 %v10341_v16, %v10076_v55 }
0x21be   : > { %v15887_v2 = vpop.f32.mrf.mxu1 }
0x21bf   : > { %v20225_v27 = vpack.c.bf16 %v10387_v18, %v10386_v25  ;;  %v10385_v40 = vadd.f32 %v13907_v53, %v10370_v56  ;;  %v10375_v26 = vadd.f32 %v15887_v2, %v20164_v21  ;;  %v15923_v21 = vpop.f32.mrf.mxu0 }
0x21c0   : > { %v10354_v50 = vpop.f32.mrf.mxu1 }
0x21c1   : > { %v20229_v17 = vpack.c.bf16 %v10385_v40, %v10384_v34  ;;  %v10373_v42 = vadd.f32 %v10354_v50, %v20166_v35  ;;  %v10390_v10 = vadd.f32 %v13907_v53, %v10375_v26  ;;  %v10693_v35 = vpop.f32.mrf.mxu0 }
0x21c2   : > { %v15888_v46 = vpop.f32.mrf.mxu1 }
0x21c3   : > { %v10376_v60 = vadd.f32 %v15888_v46, %v20168_v41  ;;  %15909 = vmatprep.mubr.msk.bf16.mxu1 %vm2869_vm3, %v20229_v17  ;;  %15937 = vmatprep.mubr.msk.bf16.mxu0 %vm2869_vm3, %v20229_v17  ;;  %v10388_v23 = vadd.f32 %v13907_v53, %v10373_v42  ;;  %v15924_v41 = vpop.f32.mrf.mxu0 }
0x21c4   : > { %v10357_v52 = vpop.f32.mrf.mxu1  ;;  %15910 = vmatmul.mubr.msk.bf16.vlgmr.msra.gmra.mxu1 %vm2869_vm3, %v20225_v27  ;;  %15938 = vmatmul.mubr.msk.bf16.vlgmr.msra.gmra.mxu0 %vm2869_vm3, %v20225_v27 }
0x21c5   : > { %v10391_v1 = vadd.f32 %v13907_v53, %v10376_v60  ;;  %v10374_v4 = vadd.f32 %v10357_v52, %v10080_v22  ;;  %v10696_v49 = vpop.f32.mrf.mxu0 }
0x21c6   : > { %v15895_v30 = vpop.f32.mrf.mxu1 }
0x21c7   : > { %v20243_v7 = vpack.c.bf16 %v10391_v1, %v10390_v10  ;;  %v10389_v15 = vadd.f32 %v13907_v53, %v10374_v4  ;;  %v15927_v54 = vpop.f32.mrf.mxu0 }
0x21c8   : > { %v10466_v39 = vpop.f32.mrf.mxu1 }
0x21c9   : > { %v20245_v13 = vpack.c.bf16 %v10389_v15, %v10388_v23  ;;  %v10709_v59 = vpop.f32.mrf.mxu0 }
0x21ca   : > { %v15896_v47 = vpop.f32.mrf.mxu1 }
0x21cb   : > { %15913 = vmatprep.mubr.msk.bf16.mxu1 %vm2869_vm3, %v20245_v13  ;;  %15941 = vmatprep.mubr.msk.bf16.mxu0 %vm2869_vm3, %v20245_v13  ;;  %v15928_v63 = vpop.f32.mrf.mxu0 }
0x21cc   : > { %15914 = vmatmul.mubr.msk.bf16.gmra.mxu1 %vm2869_vm3, %v20243_v7  ;;  %15942 = vmatmul.mubr.msk.bf16.gmra.mxu0 %vm2869_vm3, %v20243_v7  ;;  %v10469_v6 = vpop.f32.mrf.mxu1 }
0x21cd   : > { %15953 = vmatprep.mubr.msk.bf16.mxu1 %vm2869_vm3, %v17071_v19  ;;  %15993 = vmatprep.mubr.msk.bf16.mxu0 %vm2869_vm3, %v17072_v20  ;;  %v10712_v38 = vpop.f32.mrf.mxu0 }
0x21ce   : > { %v15899_v45 = vpop.f32.mrf.mxu1 }
0x21d0   : > { %v10482_v36 = vpop.f32.mrf.mxu1 }
0x21d2   : > { %v15900_v5 = vpop.f32.mrf.mxu1 }
0x21d4   : > { %v10485_v28 = vpop.f32.mrf.mxu1 }
0x2284   : > { %v15911_v43 = vpop.f32.mrf.mxu1  ;;  %v15939_v57 = vpop.f32.mrf.mxu0 }
0x2285   : > { %v10576_v42 = vadd.f32 %v15911_v43, %v15895_v30  ;;  %v10791_v60 = vadd.f32 %v15939_v57, %v15923_v21  ;;  %v17075_v21 = vld [vmem:[%s20835_s22 + $0x78] sm:$0xff]   ;;  %v17093_v30 = vld [vmem:[%s20835_s22 + $0x88] sm:$0xff]   ;;  %v17085_v57 = vld [vmem:[%s20884_s4 + $0xb0] sm:$0xff]  }
0x2286   : > { %v10567_v0 = vpop.f32.mrf.mxu1  ;;  %v10782_v8 = vpop.f32.mrf.mxu0  ;;  %v17083_v43 = vld [vmem:[%s20884_s4 + $0x28] sm:$0xff]  }
0x2287   : > { %v10568_v23 = vadd.f32 %v10567_v0, %v10466_v39  ;;  %v10783_v15 = vadd.f32 %v10782_v8, %v10693_v35  ;;  %v17073_v35 = vld [vmem:[%s20884_s4 + $0x88] sm:$0xff]   ;;  %v17086_v0 = vld [vmem:[%s20884_s4 + $0x30] sm:$0xff]   ;;  %v17087_v8 = vld [vmem:[%s20884_s4 + $0xb8] sm:$0xff]  }
0x2288   : > { %v15912_v33 = vpop.f32.mrf.mxu1  ;;  %v15940_v44 = vpop.f32.mrf.mxu0  ;;  %v17074_v39 = vld [vmem:[%s20884_s4 + $0x8] sm:$0xff]  }
0x2289   : > { %v10579_v51 = vadd.f32 %v15912_v33, %v15896_v47  ;;  %v10794_v26 = vadd.f32 %v15940_v44, %v15924_v41  ;;  %v17076_v41 = vld [vmem:[%s20884_s4 + $0x90] sm:$0xff]   ;;  %v17088_v33 = vld [vmem:[%s20884_s4 + $0x38] sm:$0xff]   ;;  %v17089_v44 = vld [vmem:[%s20884_s4 + $0xc0] sm:$0xff]  }
0x228a   : > { %v10570_v14 = vpop.f32.mrf.mxu1  ;;  %v10785_v48 = vpop.f32.mrf.mxu0  ;;  %v17077_v47 = vld [vmem:[%s20884_s4 + $0x10] sm:$0xff]  }
0x228b   : > { %v10631_v52 = vpack.c.bf16 %v10579_v51, %v10576_v42  ;;  %v10847_v10 = vpack.c.bf16 %v10794_v26, %v10791_v60  ;;  %v10571_v1 = vadd.f32 %v10570_v14, %v10469_v6  ;;  %v10786_v4 = vadd.f32 %v10785_v48, %v10696_v49  ;;  %v17084_v49 = vld [vmem:[%s20835_s22 + $0x70] sm:$0xff]   ;;  %v17108_v6 = vld [vmem:[%s20835_s22 + $0x80] sm:$0xff]   ;;  %v17091_v48 = vld [vmem:[%s20884_s4 + $0xc8] sm:$0xff]  }
0x228c   : > { %v15915_v12 = vpop.f32.mrf.mxu1  ;;  %v15943_v58 = vpop.f32.mrf.mxu0  ;;  %v17090_v14 = vld [vmem:[%s20884_s4 + $0x40] sm:$0xff]  }
0x228d   : > { %v10592_v24 = vadd.f32 %v15915_v12, %v15899_v45  ;;  %v10807_v55 = vadd.f32 %v15943_v58, %v15927_v54  ;;  %v10630_v19 = vpack.c.bf16 %v10571_v1, %v10568_v23  ;;  %v10846_v20 = vpack.c.bf16 %v10786_v4, %v10783_v15  ;;  %v17094_v54 = vld [vmem:[%s20835_s22 + $0x68] sm:$0xff]   ;;  %v17078_v45 = vld [vmem:[%s20884_s4 + $0x98] sm:$0xff]   ;;  %v17095_v58 = vld [vmem:[%s20884_s4 + $0xd0] sm:$0xff]  }
0x228e   : > { %v10583_v11 = vpop.f32.mrf.mxu1  ;;  %v10798_v31 = vpop.f32.mrf.mxu0  ;;  %v17092_v12 = vld [vmem:[%s20884_s4 + $0x48] sm:$0xff]  }
0x228f   : > { %v10584_v16 = vadd.f32 %v10583_v11, %v10482_v36  ;;  %v10799_v25 = vadd.f32 %v10798_v31, %v10709_v59  ;;  %v17079_v59 = vld [vmem:[%s20884_s4 + $0x18] sm:$0xff]   ;;  %v17080_v36 = vld [vmem:[%s20884_s4 + $0xa0] sm:$0xff]   ;;  %v17096_v11 = vld [vmem:[%s20884_s4 + $0x50] sm:$0xff]  }
0x2290   : > { %v15916_v3 = vpop.f32.mrf.mxu1  ;;  %v15944_v53 = vpop.f32.mrf.mxu0  ;;  %v17097_v31 = vld [vmem:[%s20884_s4 + $0xd8] sm:$0xff]  }
0x2291   : > { %v10595_v32 = vadd.f32 %v15916_v3, %v15900_v5  ;;  %v10810_v9 = vadd.f32 %v15944_v53, %v15928_v63  ;;  %v17081_v63 = vld [vmem:[%s20884_s4 + $0x20] sm:$0xff]   ;;  %v17098_v3 = vld [vmem:[%s20884_s4 + $0x58] sm:$0xff]  }
0x2292   : > { %v10586_v18 = vpop.f32.mrf.mxu1  ;;  %v10801_v56 = vpop.f32.mrf.mxu0  ;;  %v17103_v5 = vld [vmem:[%s20835_s22 + $0x60] sm:$0xff]  }
0x2293   : > { %v10633_v2 = vpack.c.bf16 %v10595_v32, %v10592_v24  ;;  %v10849_v34 = vpack.c.bf16 %v10810_v9, %v10807_v55  ;;  %v10587_v40 = vadd.f32 %v10586_v18, %v10485_v28  ;;  %v10802_v50 = vadd.f32 %v10801_v56, %v10712_v38  ;;  %v17109_v38 = vld [vmem:[%s20835_s22 + $0xb8] sm:$0xff]   ;;  %v17082_v28 = vld [vmem:[%s20884_s4 + $0xa8] sm:$0xff]   ;;  %v17099_v53 = vld [vmem:[%s20884_s4 + $0xe0] sm:$0xff]  }
0x2294   : > { %v17100_v24 = vld [vmem:[%s20884_s4 + $0x60] sm:$0xff]   ;;  %v17101_v55 = vld [vmem:[%s20884_s4 + $0xe8] sm:$0xff]   ;;  %v17104_v9 = vld [vmem:[%s20884_s4 + $0xf0] sm:$0xff]  }
0x2295   : > { %v10632_v46 = vpack.c.bf16 %v10587_v40, %v10584_v16  ;;  %v10848_v22 = vpack.c.bf16 %v10802_v50, %v10799_v25  ;;  %15945 = vmatprep.subr.bf16.mxu1 %v10849_v34  ;;  %15985 = vmatprep.subr.bf16.mxu0 %v10633_v2  ;;  %v17102_v32 = vld [vmem:[%s20884_s4 + $0x68] sm:$0xff]   ;;  %v17105_v16 = vld [vmem:[%s20884_s4 + $0x70] sm:$0xff]   ;;  %v17106_v25 = vld [vmem:[%s20884_s4 + $0xf8] sm:$0xff]  }
0x2296   : > { %15946 = vmatpush3.bf16.msra.mxu1 %v10849_v34  ;;  %15986 = vmatpush3.bf16.msra.mxu0 %v10633_v2  ;;  %v17107_v18 = vld [vmem:[%s20884_s4 + $0x78] sm:$0xff]   ;;  %v17110_v56 = vld [vmem:[%s20835_s22 + $0xb0] sm:$0xff]   ;;  %v17111_v2 = vld [vmem:[%s20835_s22 + $0xa8] sm:$0xff]  }
0x2297   : > { %15947 = vmatprep.subr.bf16.mxu1 %v10848_v22  ;;  %15987 = vmatprep.subr.bf16.mxu0 %v10632_v46  ;;  %v17112_v34 = vld [vmem:[%s20835_s22 + $0xa0] sm:$0xff]   ;;  %v17113_v40 = vld [vmem:[%s20835_s22 + $0x98] sm:$0xff]  }
0x229a   : > { %15948 = vmatpush3.bf16.msra.mxu1 %v10848_v22  ;;  %15988 = vmatpush3.bf16.msra.mxu0 %v10632_v46 }
0x229b   : > { %15949 = vmatprep.subr.bf16.mxu1 %v10847_v10  ;;  %15989 = vmatprep.subr.bf16.mxu0 %v10631_v52 }
0x229e   : > { %15950 = vmatpush3.bf16.msra.mxu1 %v10847_v10  ;;  %15990 = vmatpush3.bf16.msra.mxu0 %v10631_v52 }
0x229f   : > { %15951 = vmatprep.subr.bf16.mxu1 %v10846_v20  ;;  %15991 = vmatprep.subr.bf16.mxu0 %v10630_v19 }
0x22a2   : > { %15952 = vmatpush3.bf16.msra.mxu1 %v10846_v20  ;;  %15992 = vmatpush3.bf16.msra.mxu0 %v10630_v19 }
0x22a3   : > { %16037 = vmatprep.subr.bf16.mxu0 %v17075_v21  ;;  %16025 = vmatprep.subr.bf16.mxu1 %v17093_v30 }
0x22a5   : > { %15954 = vmatmul.mubr.msk.bf16.vlgmr.msra.gmra.mxu1 %vm2869_vm3, %v17073_v35  ;;  %15994 = vmatmul.mubr.msk.bf16.vlgmr.msra.gmra.mxu0 %vm2869_vm3, %v17074_v39 }
0x22a6   : > { %16038 = vmatpush3.bf16.msra.mxu0 %v17075_v21  ;;  %15957 = vmatprep.mubr.msk.bf16.mxu1 %vm2869_vm3, %v17076_v41 }
0x22a7   : > { %15997 = vmatprep.mubr.msk.bf16.mxu0 %vm2869_vm3, %v17077_v47  ;;  %16039 = vmatprep.subr.bf16.mxu0 %v17084_v49 }
0x22a8   : > { %16026 = vmatpush3.bf16.msra.mxu1 %v17093_v30 }
0x22a9   : > { %16027 = vmatprep.subr.bf16.mxu1 %v17108_v6 }
0x22aa   : > { %16040 = vmatpush3.bf16.msra.mxu0 %v17084_v49 }
0x22ab   : > { %16041 = vmatprep.subr.bf16.mxu0 %v17094_v54 }
0x22ac   : > { %16028 = vmatpush3.bf16.msra.mxu1 %v17108_v6 }
0x22ad   : > { %15958 = vmatmul.mubr.msk.bf16.gmra.mxu1 %vm2869_vm3, %v17078_v45  ;;  %15998 = vmatmul.mubr.msk.bf16.gmra.mxu0 %vm2869_vm3, %v17079_v59 }
0x22ae   : > { %15961 = vmatprep.mubr.msk.bf16.mxu1 %vm2869_vm3, %v17080_v36  ;;  %16001 = vmatprep.mubr.msk.bf16.mxu0 %vm2869_vm3, %v17081_v63 }
0x22af   : > { %16042 = vmatpush3.bf16.msra.mxu0 %v17094_v54 }
0x22b0   : > { %16043 = vmatprep.subr.bf16.mxu0 %v17103_v5 }
0x22b3   : > { %16044 = vmatpush3.bf16.msra.mxu0 %v17103_v5 }
0x22b4   : > { %16093 = vmatprep.subr.bf16.mxu0 %v17109_v38 }
0x22b5   : > { %15962 = vmatmul.mubr.msk.bf16.gmra.mxu1 %vm2869_vm3, %v17082_v28  ;;  %16002 = vmatmul.mubr.msk.bf16.gmra.mxu0 %vm2869_vm3, %v17083_v43 }
0x22b6   : > { %15965 = vmatprep.mubr.msk.bf16.mxu1 %vm2869_vm3, %v17085_v57  ;;  %16005 = vmatprep.mubr.msk.bf16.mxu0 %vm2869_vm3, %v17086_v0 }
0x22bd   : > { %15966 = vmatmul.mubr.msk.bf16.gmra.mxu1 %vm2869_vm3, %v17087_v8  ;;  %16006 = vmatmul.mubr.msk.bf16.gmra.mxu0 %vm2869_vm3, %v17088_v33 }
0x22be   : > { %15969 = vmatprep.mubr.msk.bf16.mxu1 %vm2869_vm3, %v17089_v44  ;;  %16009 = vmatprep.mubr.msk.bf16.mxu0 %vm2869_vm3, %v17090_v14 }
0x22c5   : > { %15970 = vmatmul.mubr.msk.bf16.gmra.mxu1 %vm2869_vm3, %v17091_v48  ;;  %16010 = vmatmul.mubr.msk.bf16.gmra.mxu0 %vm2869_vm3, %v17092_v12 }
0x22c6   : > { %15973 = vmatprep.mubr.msk.bf16.mxu1 %vm2869_vm3, %v17095_v58  ;;  %16013 = vmatprep.mubr.msk.bf16.mxu0 %vm2869_vm3, %v17096_v11 }
0x22cd   : > { %15974 = vmatmul.mubr.msk.bf16.gmra.mxu1 %vm2869_vm3, %v17097_v31  ;;  %16014 = vmatmul.mubr.msk.bf16.gmra.mxu0 %vm2869_vm3, %v17098_v3 }
0x22ce   : > { %15977 = vmatprep.mubr.msk.bf16.mxu1 %vm2869_vm3, %v17099_v53  ;;  %16017 = vmatprep.mubr.msk.bf16.mxu0 %vm2869_vm3, %v17100_v24 }
0x22d5   : > { %15978 = vmatmul.mubr.msk.bf16.gmra.mxu1 %vm2869_vm3, %v17101_v55  ;;  %16018 = vmatmul.mubr.msk.bf16.gmra.mxu0 %vm2869_vm3, %v17102_v32 }
0x22d6   : > { %15981 = vmatprep.mubr.msk.bf16.mxu1 %vm2869_vm3, %v17104_v9  ;;  %16021 = vmatprep.mubr.msk.bf16.mxu0 %vm2869_vm3, %v17105_v16 }
0x22dd   : > { %15982 = vmatmul.mubr.msk.bf16.gmra.mxu1 %vm2869_vm3, %v17106_v25  ;;  %16022 = vmatmul.mubr.msk.bf16.gmra.mxu0 %vm2869_vm3, %v17107_v18 }
0x22de   : > { %16029 = vmatprep.mubr.msk.bf16.mxu1 %vm2989_vm4, %v18463_v62  ;;  %16045 = vmatprep.mubr.msk.bf16.mxu0 %vm2869_vm3, %v20229_v17 }
0x22e5   : > { %16030 = vmatmul.mubr.msk.bf16.vlgmr.msra.gmra.mxu1 %vm2989_vm4, %v18435_v61  ;;  %16046 = vmatmul.mubr.msk.bf16.vlgmr.msra.gmra.mxu0 %vm2869_vm3, %v20225_v27 }
0x22e6   : > { %16033 = vmatprep.mubr.msk.bf16.mxu1 %vm2989_vm4, %v18457_v37  ;;  %16049 = vmatprep.mubr.msk.bf16.mxu0 %vm2869_vm3, %v20245_v13 }
0x22e7   : > { %16094 = vmatpush3.bf16.msra.mxu0 %v17109_v38 }
0x22e8   : > { %16095 = vmatprep.subr.bf16.mxu0 %v17110_v56 }
0x22eb   : > { %16096 = vmatpush3.bf16.msra.mxu0 %v17110_v56 }
0x22ec   : > { %16105 = vmatprep.subr.bf16.mxu0 %v17111_v2 }
0x22ed   : > { %16034 = vmatmul.mubr.msk.bf16.gmra.mxu1 %vm2989_vm4, %v18452_v29  ;;  %16050 = vmatmul.mubr.msk.bf16.gmra.mxu0 %vm2869_vm3, %v20243_v7 }
0x22ee   : > { %16097 = vmatprep.mubr.msk.bf16.mxu0 %vm2989_vm4, %v18463_v62  ;;  %v17114_v62 = vld [vmem:[%s20835_s22 + $0x90] sm:$0xff]  }
0x22f5   : > { %16098 = vmatmul.mubr.msk.bf16.vlgmr.msra.gmra.mxu0 %vm2989_vm4, %v18435_v61  ;;  %v17115_v61 = vld [vmem:[%s20884_s4 + $0x100] sm:$0xff]  }
0x22f6   : > { %16101 = vmatprep.mubr.msk.bf16.mxu0 %vm2989_vm4, %v18457_v37  ;;  %16106 = vmatpush3.bf16.msra.mxu0 %v17111_v2 }
0x22f7   : > { %16107 = vmatprep.subr.bf16.mxu0 %v17112_v34  ;;  %16061 = vmatprep.mubr.msk.bf16.mxu1 %vm2869_vm3, %v17115_v61 }
0x22fa   : > { %16108 = vmatpush3.bf16.msra.mxu0 %v17112_v34 }
0x22fb   : > { %16109 = vmatprep.subr.bf16.mxu0 %v17113_v40 }
0x22fd   : > { %16102 = vmatmul.mubr.msk.bf16.gmra.mxu0 %vm2989_vm4, %v18452_v29  ;;  %v17124_v29 = vld [vmem:[%s20884_s4 + $0x180] sm:$0xff]  }
0x22fe   : > { %16110 = vmatpush3.bf16.msra.mxu0 %v17113_v40  ;;  %16113 = vmatprep.mubr.msk.bf16.mxu0 %vm2869_vm3, %v20229_v17 }
0x22ff   : > { %16111 = vmatprep.subr.bf16.mxu0 %v17114_v62 }
0x2302   : > { %16112 = vmatpush3.bf16.msra.mxu0 %v17114_v62 }
0x2305   : > { %16114 = vmatmul.mubr.msk.bf16.vlgmr.msra.gmra.mxu0 %vm2869_vm3, %v20225_v27 }
0x2306   : > { %16117 = vmatprep.mubr.msk.bf16.mxu0 %vm2869_vm3, %v20245_v13 }
0x230d   : > { %16118 = vmatmul.mubr.msk.bf16.gmra.mxu0 %vm2869_vm3, %v20243_v7 }
0x230e   : > { %16129 = vmatprep.mubr.msk.bf16.mxu0 %vm2869_vm3, %v17124_v29 }
0x2365   : > { %v15955_v37 = vpop.f32.mrf.mxu1  ;;  %v15995_v17 = vpop.f32.mrf.mxu0 }
0x2366   : > { %v20459_v27 = vadd.f32 %v15995_v17, %v15955_v37 }
0x2367   : > { %v11012_v13 = vpop.f32.mrf.mxu1  ;;  %v11301_v50 = vpop.f32.mrf.mxu0 }
0x2368   : > { %v20461_v51 = vadd.f32 %v11301_v50, %v11012_v13 }
0x2369   : > { %v15956_v7 = vpop.f32.mrf.mxu1  ;;  %v15996_v26 = vpop.f32.mrf.mxu0 }
0x236a   : > { %v20463_v46 = vadd.f32 %v15996_v26, %v15956_v7 }
0x236b   : > { %v11015_v22 = vpop.f32.mrf.mxu1  ;;  %v11304_v42 = vpop.f32.mrf.mxu0 }
0x236c   : > { %v20465_v60 = vadd.f32 %v11304_v42, %v11015_v22 }
0x236d   : > { %v15959_v52 = vpop.f32.mrf.mxu1  ;;  %v15999_v10 = vpop.f32.mrf.mxu0 }
0x236e   : > { %v20467_v1 = vadd.f32 %v15999_v10, %v15959_v52 }
0x236f   : > { %v11028_v4 = vpop.f32.mrf.mxu1  ;;  %v11317_v23 = vpop.f32.mrf.mxu0 }
0x2370   : > { %v20469_v15 = vadd.f32 %v11317_v23, %v11028_v4 }
0x2371   : > { %v15960_v19 = vpop.f32.mrf.mxu1  ;;  %v16000_v20 = vpop.f32.mrf.mxu0 }
0x2372   : > { %v20471_v21 = vadd.f32 %v16000_v20, %v15960_v19 }
0x2373   : > { %v11031_v30 = vpop.f32.mrf.mxu1  ;;  %v11320_v35 = vpop.f32.mrf.mxu0 }
0x2374   : > { %v20473_v39 = vadd.f32 %v11320_v35, %v11031_v30 }
0x2375   : > { %v15963_v41 = vpop.f32.mrf.mxu1  ;;  %v16003_v47 = vpop.f32.mrf.mxu0 }
0x2376   : > { %v20475_v49 = vadd.f32 %v16003_v47, %v15963_v41 }
0x2377   : > { %v11044_v6 = vpop.f32.mrf.mxu1  ;;  %v11333_v54 = vpop.f32.mrf.mxu0 }
0x2378   : > { %v20477_v45 = vadd.f32 %v11333_v54, %v11044_v6 }
0x2379   : > { %v15964_v59 = vpop.f32.mrf.mxu1  ;;  %v16004_v36 = vpop.f32.mrf.mxu0 }
0x237a   : > { %v20479_v63 = vadd.f32 %v16004_v36, %v15964_v59 }
0x237b   : > { %v11047_v5 = vpop.f32.mrf.mxu1  ;;  %v11336_v38 = vpop.f32.mrf.mxu0 }
0x237c   : > { %v20481_v28 = vadd.f32 %v11336_v38, %v11047_v5 }
0x237d   : > { %v15967_v43 = vpop.f32.mrf.mxu1  ;;  %v16007_v57 = vpop.f32.mrf.mxu0 }
0x237e   : > { %v20483_v0 = vadd.f32 %v16007_v57, %v15967_v43 }
0x237f   : > { %v11060_v8 = vpop.f32.mrf.mxu1  ;;  %v11349_v33 = vpop.f32.mrf.mxu0 }
0x2380   : > { %v20485_v44 = vadd.f32 %v11349_v33, %v11060_v8 }
0x2381   : > { %v15968_v14 = vpop.f32.mrf.mxu1  ;;  %v16008_v48 = vpop.f32.mrf.mxu0 }
0x2382   : > { %v20487_v12 = vadd.f32 %v16008_v48, %v15968_v14 }
0x2383   : > { %v11063_v58 = vpop.f32.mrf.mxu1  ;;  %v11352_v11 = vpop.f32.mrf.mxu0 }
0x2384   : > { %v20489_v31 = vadd.f32 %v11352_v11, %v11063_v58 }
0x2385   : > { %v15971_v3 = vpop.f32.mrf.mxu1  ;;  %v16011_v53 = vpop.f32.mrf.mxu0 }
0x2386   : > { %v20491_v24 = vadd.f32 %v16011_v53, %v15971_v3 }
0x2387   : > { %v11076_v55 = vpop.f32.mrf.mxu1  ;;  %v11365_v32 = vpop.f32.mrf.mxu0 }
0x2388   : > { %v20493_v9 = vadd.f32 %v11365_v32, %v11076_v55 }
0x2389   : > { %v15972_v16 = vpop.f32.mrf.mxu1  ;;  %v16012_v25 = vpop.f32.mrf.mxu0 }
0x238a   : > { %v20495_v18 = vadd.f32 %v16012_v25, %v15972_v16 }
0x238b   : > { %v11079_v56 = vpop.f32.mrf.mxu1  ;;  %v11368_v2 = vpop.f32.mrf.mxu0 }
0x238c   : > { %v20497_v34 = vadd.f32 %v11368_v2, %v11079_v56 }
0x238d   : > { %v15975_v40 = vpop.f32.mrf.mxu1  ;;  %v16015_v62 = vpop.f32.mrf.mxu0 }
0x238e   : > { %v20499_v61 = vadd.f32 %v16015_v62, %v15975_v40 }
0x238f   : > { %v11092_v29 = vpop.f32.mrf.mxu1  ;;  %v11381_v37 = vpop.f32.mrf.mxu0 }
0x2390   : > { %v20501_v17 = vadd.f32 %v11381_v37, %v11092_v29 }
0x2391   : > { %v15976_v13 = vpop.f32.mrf.mxu1  ;;  %v16016_v50 = vpop.f32.mrf.mxu0 }
0x2392   : > { %v20503_v7 = vadd.f32 %v16016_v50, %v15976_v13 }
0x2393   : > { %v11095_v26 = vpop.f32.mrf.mxu1  ;;  %v11384_v22 = vpop.f32.mrf.mxu0 }
0x2394   : > { %v20505_v42 = vadd.f32 %v11384_v22, %v11095_v26 }
0x2395   : > { %v15979_v52 = vpop.f32.mrf.mxu1  ;;  %v16019_v10 = vpop.f32.mrf.mxu0 }
0x2396   : > { %v20507_v4 = vadd.f32 %v16019_v10, %v15979_v52 }
0x2397   : > { %v11108_v23 = vpop.f32.mrf.mxu1  ;;  %v11397_v19 = vpop.f32.mrf.mxu0 }
0x2398   : > { %v20509_v20 = vadd.f32 %v11397_v19, %v11108_v23 }
0x2399   : > { %v15980_v30 = vpop.f32.mrf.mxu1  ;;  %v16020_v35 = vpop.f32.mrf.mxu0 }
0x239a   : > { %v20511_v41 = vadd.f32 %v16020_v35, %v15980_v30 }
0x239b   : > { %v11111_v47 = vpop.f32.mrf.mxu1  ;;  %v11400_v6 = vpop.f32.mrf.mxu0 }
0x239c   : > { %v20513_v54 = vadd.f32 %v11400_v6, %v11111_v47 }
0x239d   : > { %v15983_v59 = vpop.f32.mrf.mxu1  ;;  %v16023_v36 = vpop.f32.mrf.mxu0 }
0x239e   : > { %v20515_v5 = vadd.f32 %v16023_v36, %v15983_v59 }
0x239f   : > { %v11124_v38 = vpop.f32.mrf.mxu1  ;;  %v11413_v43 = vpop.f32.mrf.mxu0 }
0x23a0   : > { %v20517_v57 = vadd.f32 %v11413_v43, %v11124_v38 }
0x23a1   : > { %v15984_v8 = vpop.f32.mrf.mxu1  ;;  %v16024_v33 = vpop.f32.mrf.mxu0 }
0x23a2   : > { %v20519_v14 = vadd.f32 %v16024_v33, %v15984_v8 }
0x23a3   : > { %v11127_v48 = vpop.f32.mrf.mxu1  ;;  %v11416_v58 = vpop.f32.mrf.mxu0 }
0x23a4   : > { %v20521_v11 = vadd.f32 %v11416_v58, %v11127_v48 }
0x23a5   : > { %v16031_v3 = vpop.f32.mrf.mxu1  ;;  %v16047_v53 = vpop.f32.mrf.mxu0 }
0x23a6   : > { %v11585_v36 = vadd.f32 %v16047_v53, %v16031_v3  ;;  %v17117_v53 = vld [vmem:[%s20884_s4 + $0x110] sm:$0xff]  }
0x23a7   : > { %v11487_v55 = vpop.f32.mrf.mxu1  ;;  %v11576_v32 = vpop.f32.mrf.mxu0 }
0x23a8   : > { %v11577_v48 = vadd.f32 %v11576_v32, %v11487_v55 }
0x23a9   : > { %v16032_v16 = vpop.f32.mrf.mxu1  ;;  %v16048_v25 = vpop.f32.mrf.mxu0 }
0x23aa   : > { %v11588_v47 = vadd.f32 %v16048_v25, %v16032_v16  ;;  %v17116_v16 = vld [vmem:[%s20884_s4 + $0x108] sm:$0xff]  }
0x23ab   : > { %v11490_v56 = vpop.f32.mrf.mxu1  ;;  %v11579_v2 = vpop.f32.mrf.mxu0 }
0x23ac   : > { %v11641_v43 = vpack.c.bf16 %v11588_v47, %v11585_v36  ;;  %v11580_v8 = vadd.f32 %v11579_v2, %v11490_v56  ;;  %v17118_v56 = vld [vmem:[%s20884_s4 + $0x118] sm:$0xff]  }
0x23ad   : > { %v16035_v40 = vpop.f32.mrf.mxu1  ;;  %v16051_v62 = vpop.f32.mrf.mxu0 }
0x23ae   : > { %v11601_v26 = vadd.f32 %v16051_v62, %v16035_v40  ;;  %v11640_v40 = vpack.c.bf16 %v11580_v8, %v11577_v48 }
0x23af   : > { %v11503_v29 = vpop.f32.mrf.mxu1  ;;  %v11592_v37 = vpop.f32.mrf.mxu0 }
0x23b0   : > { %v11593_v23 = vadd.f32 %v11592_v37, %v11503_v29  ;;  %v17119_v37 = vld [vmem:[%s20884_s4 + $0x120] sm:$0xff]  }
0x23b1   : > { %v16036_v13 = vpop.f32.mrf.mxu1  ;;  %v16052_v50 = vpop.f32.mrf.mxu0 }
0x23b2   : > { %v11604_v22 = vadd.f32 %v16052_v50, %v16036_v13 }
0x23b3   : > { %v11506_v52 = vpop.f32.mrf.mxu1  ;;  %v11595_v10 = vpop.f32.mrf.mxu0 }
0x23b4   : > { %v11643_v19 = vpack.c.bf16 %v11604_v22, %v11601_v26  ;;  %v11596_v30 = vadd.f32 %v11595_v10, %v11506_v52  ;;  %v17120_v10 = vld [vmem:[%s20884_s4 + $0x128] sm:$0xff]  }
0x23b5   : > { %v16099_v35 = vpop.f32.mrf.mxu0 }
0x23b6   : > { %v11642_v6 = vpack.c.bf16 %v11596_v30, %v11593_v23  ;;  %16053 = vmatprep.subr.bf16.mxu1 %v11643_v19 }
0x23b7   : > { %16054 = vmatpush3.bf16.msra.mxu1 %v11643_v19  ;;  %v12024_v59 = vpop.f32.mrf.mxu0  ;;  %v17121_v19 = vld [vmem:[%s20884_s4 + $0x130] sm:$0xff]  }
0x23b8   : > { %16055 = vmatprep.subr.bf16.mxu1 %v11642_v6 }
0x23b9   : > { %v16100_v38 = vpop.f32.mrf.mxu0 }
0x23bb   : > { %16056 = vmatpush3.bf16.msra.mxu1 %v11642_v6  ;;  %v12027_v33 = vpop.f32.mrf.mxu0 }
0x23bc   : > { %16057 = vmatprep.subr.bf16.mxu1 %v11641_v43 }
0x23bd   : > { %v16103_v58 = vpop.f32.mrf.mxu0 }
0x23bf   : > { %16058 = vmatpush3.bf16.msra.mxu1 %v11641_v43  ;;  %v12040_v62 = vpop.f32.mrf.mxu0 }
0x23c0   : > { %16059 = vmatprep.subr.bf16.mxu1 %v11640_v40 }
0x23c1   : > { %v16104_v29 = vpop.f32.mrf.mxu0 }
0x23c3   : > { %16060 = vmatpush3.bf16.msra.mxu1 %v11640_v40  ;;  %v12043_v3 = vpop.f32.mrf.mxu0  ;;  %v17122_v40 = vld [vmem:[%s20884_s4 + $0x138] sm:$0xff]  }
0x23c5   : > { %v16115_v25 = vpop.f32.mrf.mxu0 }
0x23c6   : > { %16062 = vmatmul.mubr.msk.bf16.vlgmr.msra.gmra.mxu1 %vm2869_vm3, %v17116_v16  ;;  %v12122_v8 = vadd.f32 %v16115_v25, %v16099_v35  ;;  %v17125_v35 = vld [vmem:[%s20884_s4 + $0x148] sm:$0xff]   ;;  %v17128_v16 = vld [vmem:[%s20884_s4 + $0x190] sm:$0xff]   ;;  %v17131_v25 = vld [vmem:[%s20884_s4 + $0x160] sm:$0xff]  }
0x23c7   : > { %v12113_v55 = vpop.f32.mrf.mxu0  ;;  %16065 = vmatprep.mubr.msk.bf16.mxu1 %vm2869_vm3, %v17117_v53  ;;  %v17130_v53 = vld [vmem:[%s20884_s4 + $0x198] sm:$0xff]  }
0x23c9   : > { %v16116_v32 = vpop.f32.mrf.mxu0 }
0x23ca   : > { %v12125_v36 = vadd.f32 %v16116_v32, %v16100_v38  ;;  %v17123_v38 = vld [vmem:[%s20884_s4 + $0x140] sm:$0xff]   ;;  %v17133_v32 = vld [vmem:[%s20884_s4 + $0x168] sm:$0xff]  }
0x23cb   : > { %v12116_v2 = vpop.f32.mrf.mxu0 }
0x23cc   : > { %v12178_v48 = vpack.c.bf16 %v12125_v36, %v12122_v8 }
0x23cd   : > { %v16119_v13 = vpop.f32.mrf.mxu0 }
0x23ce   : > { %16066 = vmatmul.mubr.msk.bf16.gmra.mxu1 %vm2869_vm3, %v17118_v56  ;;  %v12138_v22 = vadd.f32 %v16119_v13, %v16103_v58  ;;  %v12117_v58 = vadd.f32 %v12116_v2, %v12027_v33  ;;  %v17126_v33 = vld [vmem:[%s20884_s4 + $0x188] sm:$0xff]   ;;  %v17135_v2 = vld [vmem:[%s20884_s4 + $0x170] sm:$0xff]   ;;  %v17137_v13 = vld [vmem:[%s20884_s4 + $0x178] sm:$0xff]  }
0x23cf   : > { %v12129_v50 = vpop.f32.mrf.mxu0  ;;  %16069 = vmatprep.mubr.msk.bf16.mxu1 %vm2869_vm3, %v17119_v37  ;;  %v17134_v56 = vld [vmem:[%s20884_s4 + $0x1a8] sm:$0xff]   ;;  %v17136_v37 = vld [vmem:[%s20884_s4 + $0x1b0] sm:$0xff]  }
0x23d0   : > { %v12130_v30 = vadd.f32 %v12129_v50, %v12040_v62  ;;  %v12114_v62 = vadd.f32 %v12113_v55, %v12024_v59  ;;  %v17127_v59 = vld [vmem:[%s20884_s4 + $0x150] sm:$0xff]   ;;  %v17132_v55 = vld [vmem:[%s20884_s4 + $0x1a0] sm:$0xff]   ;;  %v17138_v50 = vld [vmem:[%s20884_s4 + $0x1b8] sm:$0xff]  }
0x23d1   : > { %v16120_v26 = vpop.f32.mrf.mxu0 }
0x23d2   : > { %v12141_v52 = vadd.f32 %v16120_v26, %v16104_v29  ;;  %v12177_v29 = vpack.c.bf16 %v12117_v58, %v12114_v62  ;;  %v17139_v26 = vld [vmem:[%s20884_s4 + $0x1c0] sm:$0xff]  }
0x23d3   : > { %v12132_v23 = vpop.f32.mrf.mxu0 }
0x23d4   : > { %v12180_v47 = vpack.c.bf16 %v12141_v52, %v12138_v22  ;;  %v12133_v6 = vadd.f32 %v12132_v23, %v12043_v3  ;;  %v17129_v3 = vld [vmem:[%s20884_s4 + $0x158] sm:$0xff]   ;;  %v17140_v22 = vld [vmem:[%s20884_s4 + $0x1c8] sm:$0xff]   ;;  %v17141_v52 = vld [vmem:[%s20884_s4 + $0x1d0] sm:$0xff]  }
0x23d5   : > { %v17143_v23 = vld [vmem:[%s20884_s4 + $0x1e0] sm:$0xff]  }
0x23d6   : > { %v12179_v43 = vpack.c.bf16 %v12133_v6, %v12130_v30  ;;  %16070 = vmatmul.mubr.msk.bf16.gmra.mxu1 %vm2869_vm3, %v17120_v10  ;;  %16121 = vmatprep.subr.bf16.mxu0 %v12180_v47  ;;  %v17142_v10 = vld [vmem:[%s20884_s4 + $0x1d8] sm:$0xff]   ;;  %v17145_v30 = vld [vmem:[%s20884_s4 + $0x1f0] sm:$0xff]  }
0x23d7   : > { %16122 = vmatpush3.bf16.msra.mxu0 %v12180_v47  ;;  %16073 = vmatprep.mubr.msk.bf16.mxu1 %vm2869_vm3, %v17121_v19  ;;  %v17144_v19 = vld [vmem:[%s20884_s4 + $0x1e8] sm:$0xff]   ;;  %v17146_v47 = vld [vmem:[%s20884_s4 + $0x1f8] sm:$0xff]  }
0x23d8   : > { %16123 = vmatprep.subr.bf16.mxu0 %v12179_v43 }
0x23db   : > { %16124 = vmatpush3.bf16.msra.mxu0 %v12179_v43 }
0x23dc   : > { %16125 = vmatprep.subr.bf16.mxu0 %v12178_v48 }
0x23de   : > { %16074 = vmatmul.mubr.msk.bf16.gmra.mxu1 %vm2869_vm3, %v17122_v40 }
0x23df   : > { %16126 = vmatpush3.bf16.msra.mxu0 %v12178_v48  ;;  %16077 = vmatprep.mubr.msk.bf16.mxu1 %vm2869_vm3, %v17123_v38 }
0x23e0   : > { %16127 = vmatprep.subr.bf16.mxu0 %v12177_v29 }
0x23e3   : > { %16128 = vmatpush3.bf16.msra.mxu0 %v12177_v29 }
0x23e6   : > { %16078 = vmatmul.mubr.msk.bf16.gmra.mxu1 %vm2869_vm3, %v17125_v35  ;;  %16130 = vmatmul.mubr.msk.bf16.vlgmr.msra.gmra.mxu0 %vm2869_vm3, %v17126_v33 }
0x23e7   : > { %16081 = vmatprep.mubr.msk.bf16.mxu1 %vm2869_vm3, %v17127_v59  ;;  %16133 = vmatprep.mubr.msk.bf16.mxu0 %vm2869_vm3, %v17128_v16 }
0x23ee   : > { %16082 = vmatmul.mubr.msk.bf16.gmra.mxu1 %vm2869_vm3, %v17129_v3  ;;  %16134 = vmatmul.mubr.msk.bf16.gmra.mxu0 %vm2869_vm3, %v17130_v53 }
0x23ef   : > { %16085 = vmatprep.mubr.msk.bf16.mxu1 %vm2869_vm3, %v17131_v25  ;;  %16137 = vmatprep.mubr.msk.bf16.mxu0 %vm2869_vm3, %v17132_v55 }
0x23f6   : > { %16086 = vmatmul.mubr.msk.bf16.gmra.mxu1 %vm2869_vm3, %v17133_v32  ;;  %16138 = vmatmul.mubr.msk.bf16.gmra.mxu0 %vm2869_vm3, %v17134_v56  ;;  %v20656_v56 = vld [vmem:[#allocation21] ss:$0 sm:$0xff] }
0x23f7   : > { %16089 = vmatprep.mubr.msk.bf16.mxu1 %vm2869_vm3, %v17135_v2  ;;  %16141 = vmatprep.mubr.msk.bf16.mxu0 %vm2869_vm3, %v17136_v37 }
0x23fe   : > { %16090 = vmatmul.mubr.msk.bf16.gmra.mxu1 %vm2869_vm3, %v17137_v13  ;;  %16142 = vmatmul.mubr.msk.bf16.gmra.mxu0 %vm2869_vm3, %v17138_v50 }
0x23ff   : > { %16145 = vmatprep.mubr.msk.bf16.mxu0 %vm2869_vm3, %v17139_v26 }
0x2406   : > { %16146 = vmatmul.mubr.msk.bf16.gmra.mxu0 %vm2869_vm3, %v17140_v22 }
0x2407   : > { %16149 = vmatprep.mubr.msk.bf16.mxu0 %vm2869_vm3, %v17141_v52 }
0x240e   : > { %16150 = vmatmul.mubr.msk.bf16.gmra.mxu0 %vm2869_vm3, %v17142_v10 }
0x240f   : > { %16153 = vmatprep.mubr.msk.bf16.mxu0 %vm2869_vm3, %v17143_v23 }
0x2416   : > { %16154 = vmatmul.mubr.msk.bf16.gmra.mxu0 %vm2869_vm3, %v17144_v19 }
0x2417   : > { %16157 = vmatprep.mubr.msk.bf16.mxu0 %vm2869_vm3, %v17145_v30 }
0x241e   : > { %16158 = vmatmul.mubr.msk.bf16.gmra.mxu0 %vm2869_vm3, %v17146_v47 }
0x2486   : > { %v16063_v6 = vpop.f32.mrf.mxu1 }
0x2487   : > { %v11935_v25 = vadd.f32 %v16063_v6, %v20459_v27 }
0x2488   : > { %v11806_v36 = vpop.f32.mrf.mxu1 }
0x2489   : > { %v11933_v2 = vadd.f32 %v11806_v36, %v20461_v51 }
0x248a   : > { %v16064_v43 = vpop.f32.mrf.mxu1 }
0x248b   : > { %v11936_v50 = vadd.f32 %v16064_v43, %v20463_v46 }
0x248c   : > { %v11809_v8 = vpop.f32.mrf.mxu1 }
0x248d   : > { %v11934_v52 = vadd.f32 %v11809_v8, %v20465_v60 }
0x248e   : > { %v16067_v48 = vpop.f32.mrf.mxu1 }
0x248f   : > { %v11939_v47 = vadd.f32 %v16067_v48, %v20467_v1 }
0x2490   : > { %v11822_v58 = vpop.f32.mrf.mxu1 }
0x2491   : > { %v11937_v60 = vadd.f32 %v11822_v58, %v20469_v15 }
0x2492   : > { %v16068_v40 = vpop.f32.mrf.mxu1 }
0x2493   : > { %v11940_v1 = vadd.f32 %v16068_v40, %v20471_v21 }
0x2494   : > { %v11825_v38 = vpop.f32.mrf.mxu1 }
0x2495   : > { %v11938_v15 = vadd.f32 %v11825_v38, %v20473_v39 }
0x2496   : > { %v16071_v62 = vpop.f32.mrf.mxu1 }
0x2497   : > { %v11943_v21 = vadd.f32 %v16071_v62, %v20475_v49 }
0x2498   : > { %v11838_v29 = vpop.f32.mrf.mxu1 }
0x2499   : > { %v11941_v39 = vadd.f32 %v11838_v29, %v20477_v45 }
0x249a   : > { %v16072_v35 = vpop.f32.mrf.mxu1 }
0x249c   : > { %v20643_v33 = vpop.f32.mrf.mxu1 }
0x249d   : > { %v11942_v45 = vadd.f32 %v20643_v33, %v20481_v28 }
0x249e   : > { %v20645_v59 = vpop.f32.mrf.mxu1 }
0x24a0   : > { %v20647_v16 = vpop.f32.mrf.mxu1 }
0x24a1   : > { %v11945_v28 = vadd.f32 %v20647_v16, %v20485_v44 }
0x24a2   : > { %v20649_v3 = vpop.f32.mrf.mxu1 }
0x24a4   : > { %v20651_v53 = vpop.f32.mrf.mxu1 }
0x24a5   : > { %v11946_v44 = vadd.f32 %v20651_v53, %v20489_v31 }
0x24a6   : > { %v20654_v55 = vpop.f32.mrf.mxu1  ;;  %v16131_v32 = vpop.f32.mrf.mxu0 }
0x24a7   : > { %v12472_v37 = vadd.f32 %v16131_v32, %v11935_v25 }
0x24a8   : > { %v20666_v13 = vpop.f32.mrf.mxu1  ;;  %v12343_v27 = vpop.f32.mrf.mxu0 }
0x24a9   : > { %v12511_v26 = vadd.f32 %v20656_v56, %v12472_v37  ;;  %v12470_v22 = vadd.f32 %v12343_v27, %v11933_v2  ;;  %v11949_v31 = vadd.f32 %v20666_v13, %v20493_v9 }
0x24aa   : > { %v16132_v51 = vpop.f32.mrf.mxu0  ;;  %v20674_v19 = vpop.f32.mrf.mxu1 }
0x24ab   : > { %12544 = vst.msk [vmem:[%s20664_s29 + $0x10] sm:$0xff] %vm12541_vm10, %v12511_v26  ;;  %v12509_v10 = vadd.f32 %v20656_v56, %v12470_v22  ;;  %v12473_v23 = vadd.f32 %v16132_v51, %v11936_v50 }
0x24ac   : > { %v12346_v30 = vpop.f32.mrf.mxu0  ;;  %v20684_v25 = vpop.f32.mrf.mxu1 }
0x24ad   : > { %12542 = vst.msk [vmem:[%s20664_s29] sm:$0xff] %vm12541_vm10, %v12509_v10  ;;  %v12512_v46 = vadd.f32 %v20656_v56, %v12473_v23  ;;  %v12471_v6 = vadd.f32 %v12346_v30, %v11934_v52  ;;  %v11944_v30 = vadd.f32 %v16072_v35, %v20479_v63  ;;  %v11947_v63 = vadd.f32 %v20645_v59, %v20483_v0 }
0x24ae   : > { %v16135_v36 = vpop.f32.mrf.mxu0  ;;  %v20694_v50 = vpop.f32.mrf.mxu1  ;;  %v11948_v0 = vadd.f32 %v20649_v3, %v20487_v12  ;;  %v11951_v12 = vadd.f32 %v20654_v55, %v20491_v24  ;;  %v11952_v24 = vadd.f32 %v20674_v19, %v20495_v18  ;;  %v11950_v9 = vadd.f32 %v20684_v25, %v20497_v34 }
0x24af   : > { %12545 = vst.msk [vmem:[%s20664_s29 + $0x18] sm:$0xff] %vm12541_vm10, %v12512_v46  ;;  %v12510_v43 = vadd.f32 %v20656_v56, %v12471_v6  ;;  %v12476_v8 = vadd.f32 %v16135_v36, %v11939_v47  ;;  %v11955_v18 = vadd.f32 %v20694_v50, %v20499_v61 }
0x24b0   : > { %v12359_v32 = vpop.f32.mrf.mxu0  ;;  %v11886_v10 = vpop.f32.mrf.mxu1 }
0x24b1   : > { %12543 = vst.msk [vmem:[%s20664_s29 + $0x8] sm:$0xff] %vm12541_vm10, %v12510_v43  ;;  %v12515_v48 = vadd.f32 %v20656_v56, %v12476_v8  ;;  %v12474_v2 = vadd.f32 %v12359_v32, %v11937_v60  ;;  %v11953_v34 = vadd.f32 %v11886_v10, %v20501_v17 }
0x24b2   : > { %v16136_v37 = vpop.f32.mrf.mxu0  ;;  %v16084_v6 = vpop.f32.mrf.mxu1 }
0x24b3   : > { %12548 = vst.msk [vmem:[%s20664_s29 + $0x30] sm:$0xff] %vm12541_vm10, %v12515_v48  ;;  %v12513_v58 = vadd.f32 %v20656_v56, %v12474_v2  ;;  %v12477_v27 = vadd.f32 %v16136_v37, %v11940_v1 }
0x24b4   : > { %v12362_v26 = vpop.f32.mrf.mxu0  ;;  %v11889_v32 = vpop.f32.mrf.mxu1 }
0x24b5   : > { %12546 = vst.msk [vmem:[%s20664_s29 + $0x20] sm:$0xff] %vm12541_vm10, %v12513_v58  ;;  %v12516_v40 = vadd.f32 %v20656_v56, %v12477_v27  ;;  %v12475_v22 = vadd.f32 %v12362_v26, %v11938_v15 }
0x24b6   : > { %v16139_v51 = vpop.f32.mrf.mxu0  ;;  %v16087_v15 = vpop.f32.mrf.mxu1 }
0x24b7   : > { %12549 = vst.msk [vmem:[%s20664_s29 + $0x38] sm:$0xff] %vm12541_vm10, %v12516_v40  ;;  %v12514_v38 = vadd.f32 %v20656_v56, %v12475_v22  ;;  %v12480_v52 = vadd.f32 %v16139_v51, %v11943_v21 }
0x24b8   : > { %v12375_v23 = vpop.f32.mrf.mxu0  ;;  %v11902_v40 = vpop.f32.mrf.mxu1 }
0x24b9   : > { %12547 = vst.msk [vmem:[%s20664_s29 + $0x28] sm:$0xff] %vm12541_vm10, %v12514_v38  ;;  %v12519_v49 = vadd.f32 %v20656_v56, %v12480_v52  ;;  %v12478_v62 = vadd.f32 %v12375_v23, %v11941_v39 }
0x24ba   : > { %v16140_v47 = vpop.f32.mrf.mxu0  ;;  %v16088_v52 = vpop.f32.mrf.mxu1 }
0x24bb   : > { %12552 = vst.msk [vmem:[%s20664_s29 + $0x50] sm:$0xff] %vm12541_vm10, %v12519_v49  ;;  %v12517_v29 = vadd.f32 %v20656_v56, %v12478_v62  ;;  %v12481_v46 = vadd.f32 %v16140_v47, %v11944_v30 }
0x24bc   : > { %v12378_v36 = vpop.f32.mrf.mxu0  ;;  %v11905_v47 = vpop.f32.mrf.mxu1 }
0x24bd   : > { %12550 = vst.msk [vmem:[%s20664_s29 + $0x40] sm:$0xff] %vm12541_vm10, %v12517_v29  ;;  %v12520_v35 = vadd.f32 %v20656_v56, %v12481_v46  ;;  %v12479_v60 = vadd.f32 %v12378_v36, %v11942_v45  ;;  %v11956_v29 = vadd.f32 %v16084_v6, %v20503_v7  ;;  %v11954_v36 = vadd.f32 %v11889_v32, %v20505_v42 }
0x24be   : > { %v16143_v43 = vpop.f32.mrf.mxu0 }
0x24bf   : > { %12553 = vst.msk [vmem:[%s20664_s29 + $0x58] sm:$0xff] %vm12541_vm10, %v12520_v35  ;;  %v12518_v33 = vadd.f32 %v20656_v56, %v12479_v60  ;;  %v12484_v8 = vadd.f32 %v16143_v43, %v11947_v63  ;;  %v16091_v63 = vpop.f32.mrf.mxu1  ;;  %v11959_v60 = vadd.f32 %v16087_v15, %v20507_v4 }
0x24c0   : > { %v12391_v1 = vpop.f32.mrf.mxu0 }
0x24c1   : > { %12551 = vst.msk [vmem:[%s20664_s29 + $0x48] sm:$0xff] %vm12541_vm10, %v12518_v33  ;;  %v12523_v59 = vadd.f32 %v20656_v56, %v12484_v8  ;;  %v12482_v48 = vadd.f32 %v12391_v1, %v11945_v28  ;;  %v11957_v28 = vadd.f32 %v11902_v40, %v20509_v20  ;;  %v11918_v8 = vpop.f32.mrf.mxu1  ;;  %v11960_v1 = vadd.f32 %v16088_v52, %v20511_v41 }
0x24c2   : > { %v16144_v2 = vpop.f32.mrf.mxu0 }
0x24c3   : > { %12556 = vst.msk [vmem:[%s20664_s29 + $0x70] sm:$0xff] %vm12541_vm10, %v12523_v59  ;;  %v12521_v16 = vadd.f32 %v20656_v56, %v12482_v48  ;;  %v12485_v37 = vadd.f32 %v16144_v2, %v11948_v0  ;;  %v11958_v48 = vadd.f32 %v11905_v47, %v20513_v54 }
0x24c4   : > { %v12394_v58 = vpop.f32.mrf.mxu0 }
0x24c5   : > { %12554 = vst.msk [vmem:[%s20664_s29 + $0x60] sm:$0xff] %vm12541_vm10, %v12521_v16  ;;  %v12524_v3 = vadd.f32 %v20656_v56, %v12485_v37  ;;  %v12483_v27 = vadd.f32 %v12394_v58, %v11946_v44  ;;  %v16092_v44 = vpop.f32.mrf.mxu1  ;;  %v11963_v37 = vadd.f32 %v16091_v63, %v20515_v5 }
0x24c6   : > { %v16147_v26 = vpop.f32.mrf.mxu0  ;;  %v11964_v5 = vadd.f32 %v16092_v44, %v20519_v14 }
0x24c7   : > { %12557 = vst.msk [vmem:[%s20664_s29 + $0x78] sm:$0xff] %vm12541_vm10, %v12524_v3  ;;  %v12522_v53 = vadd.f32 %v20656_v56, %v12483_v27  ;;  %v12488_v21 = vadd.f32 %v16147_v26, %v11951_v12  ;;  %v11961_v12 = vadd.f32 %v11918_v8, %v20517_v57  ;;  %v11921_v27 = vpop.f32.mrf.mxu1 }
0x24c8   : > { %v12407_v22 = vpop.f32.mrf.mxu0  ;;  %v11962_v57 = vadd.f32 %v11921_v27, %v20521_v11 }
0x24c9   : > { %12555 = vst.msk [vmem:[%s20664_s29 + $0x68] sm:$0xff] %vm12541_vm10, %v12522_v53  ;;  %v12527_v55 = vadd.f32 %v20656_v56, %v12488_v21  ;;  %v12486_v51 = vadd.f32 %v12407_v22, %v11949_v31 }
0x24ca   : > { %v16148_v39 = vpop.f32.mrf.mxu0 }
0x24cb   : > { %12560 = vst.msk [vmem:[%s20664_s29 + $0x90] sm:$0xff] %vm12541_vm10, %v12527_v55  ;;  %v12525_v13 = vadd.f32 %v20656_v56, %v12486_v51  ;;  %v12489_v38 = vadd.f32 %v16148_v39, %v11952_v24 }
0x24cc   : > { %v12410_v23 = vpop.f32.mrf.mxu0 }
0x24cd   : > { %12558 = vst.msk [vmem:[%s20664_s29 + $0x80] sm:$0xff] %vm12541_vm10, %v12525_v13  ;;  %v12528_v19 = vadd.f32 %v20656_v56, %v12489_v38  ;;  %v12487_v30 = vadd.f32 %v12410_v23, %v11950_v9 }
0x24ce   : > { %v16151_v49 = vpop.f32.mrf.mxu0 }
0x24cf   : > { %12561 = vst.msk [vmem:[%s20664_s29 + $0x98] sm:$0xff] %vm12541_vm10, %v12528_v19  ;;  %v12526_v25 = vadd.f32 %v20656_v56, %v12487_v30  ;;  %v12492_v62 = vadd.f32 %v16151_v49, %v11955_v18 }
0x24d0   : > { %v12423_v45 = vpop.f32.mrf.mxu0 }
0x24d1   : > { %12559 = vst.msk [vmem:[%s20664_s29 + $0x88] sm:$0xff] %vm12541_vm10, %v12526_v25  ;;  %v12531_v61 = vadd.f32 %v20656_v56, %v12492_v62  ;;  %v12490_v50 = vadd.f32 %v12423_v45, %v11953_v34 }
0x24d2   : > { %v16152_v46 = vpop.f32.mrf.mxu0 }
0x24d3   : > { %12564 = vst.msk [vmem:[%s20664_s29 + $0xb0] sm:$0xff] %vm12541_vm10, %v12531_v61  ;;  %v12529_v17 = vadd.f32 %v20656_v56, %v12490_v50  ;;  %v12493_v10 = vadd.f32 %v16152_v46, %v11956_v29 }
0x24d4   : > { %v12426_v35 = vpop.f32.mrf.mxu0 }
0x24d5   : > { %12562 = vst.msk [vmem:[%s20664_s29 + $0xa0] sm:$0xff] %vm12541_vm10, %v12529_v17  ;;  %v12532_v7 = vadd.f32 %v20656_v56, %v12493_v10  ;;  %v12491_v6 = vadd.f32 %v12426_v35, %v11954_v36 }
0x24d6   : > { %v16155_v43 = vpop.f32.mrf.mxu0 }
0x24d7   : > { %12565 = vst.msk [vmem:[%s20664_s29 + $0xb8] sm:$0xff] %vm12541_vm10, %v12532_v7  ;;  %v12530_v42 = vadd.f32 %v20656_v56, %v12491_v6  ;;  %v12496_v33 = vadd.f32 %v16155_v43, %v11959_v60 }
0x24d8   : > { %v12439_v32 = vpop.f32.mrf.mxu0 }
0x24d9   : > { %12563 = vst.msk [vmem:[%s20664_s29 + $0xa8] sm:$0xff] %vm12541_vm10, %v12530_v42  ;;  %v12535_v4 = vadd.f32 %v20656_v56, %v12496_v33  ;;  %v12494_v0 = vadd.f32 %v12439_v32, %v11957_v28 }
0x24da   : > { %v16156_v59 = vpop.f32.mrf.mxu0 }
0x24db   : > { %12568 = vst.msk [vmem:[%s20664_s29 + $0xd0] sm:$0xff] %vm12541_vm10, %v12535_v4  ;;  %v12533_v20 = vadd.f32 %v20656_v56, %v12494_v0  ;;  %v12497_v2 = vadd.f32 %v16156_v59, %v11960_v1 }
0x24dc   : > { %v12442_v16 = vpop.f32.mrf.mxu0 }
0x24dd   : > { %12566 = vst.msk [vmem:[%s20664_s29 + $0xc0] sm:$0xff] %vm12541_vm10, %v12533_v20  ;;  %v12536_v41 = vadd.f32 %v20656_v56, %v12497_v2  ;;  %v12495_v15 = vadd.f32 %v12442_v16, %v11958_v48 }
0x24de   : > { %v16159_v58 = vpop.f32.mrf.mxu0 }
0x24df   : > { %12569 = vst.msk [vmem:[%s20664_s29 + $0xd8] sm:$0xff] %vm12541_vm10, %v12536_v41  ;;  %v12534_v54 = vadd.f32 %v20656_v56, %v12495_v15  ;;  %v12500_v3 = vadd.f32 %v16159_v58, %v11963_v37 }
0x24e0   : > { %v12455_v26 = vpop.f32.mrf.mxu0 }
0x24e1   : > { %12567 = vst.msk [vmem:[%s20664_s29 + $0xc8] sm:$0xff] %vm12541_vm10, %v12534_v54  ;;  %v12539_v31 = vadd.f32 %v20656_v56, %v12500_v3  ;;  %v12498_v53 = vadd.f32 %v12455_v26, %v11961_v12 }
0x24e2   : > { %v16160_v21 = vpop.f32.mrf.mxu0 }
0x24e3   : > { %12572 = vst.msk [vmem:[%s20664_s29 + $0xf0] sm:$0xff] %vm12541_vm10, %v12539_v31  ;;  %v12537_v40 = vadd.f32 %v20656_v56, %v12498_v53  ;;  %v12501_v22 = vadd.f32 %v16160_v21, %v11964_v5 }
0x24e4   : > { %v12458_v24 = vpop.f32.mrf.mxu0 }
0x24e5   : > { %12570 = vst.msk [vmem:[%s20664_s29 + $0xe0] sm:$0xff] %vm12541_vm10, %v12537_v40  ;;  %v12540_v55 = vadd.f32 %v20656_v56, %v12501_v22  ;;  %v12499_v51 = vadd.f32 %v12458_v24, %v11962_v57 }
0x24e7   : > { %12573 = vst.msk [vmem:[%s20664_s29 + $0xf8] sm:$0xff] %vm12541_vm10, %v12540_v55  ;;  %v12538_v14 = vadd.f32 %v20656_v56, %v12499_v51 }
0x24e9   : > { %12571 = vst.msk [vmem:[%s20664_s29 + $0xe8] sm:$0xff] %vm12541_vm10, %v12538_v14 }
0x24ea PF: > { %s20886_s30 = sld [smem:[#allocation29_spill]] }
0x24f0   : > { %s42_s29 = sadd.s32 1, %s20886_s30  }
0x24f1   : > { %p39_p6 = scmp.ge.s32.totalorder %s42_s29, 4  }
0x24f3   :  { %41 = sbr.rel (!%p39_p6) target bundleno = 20 (0x14), region = 291 }
0x24f8   :  { %12595 = vsyncpa [#allocation3], 1 }
0x24f9   :  { %12597 = vsyncpa [#allocation3 + $0x1], 1 }
0x24fa   :  { %12598 = vsyncpa [#allocation5], 1 }
0x24fb   :  { %12599 = vsyncpa [#allocation8], 1 }
0x24fc   :  { %12600 = vsyncpa [#allocation11], 1 }
0x24fd   :  { %12601 = vsyncpa [#allocation14], 1 }
0x24fe   :  { %12602 = vsyncpa [#allocation17], 1 }
0x24ff   :  { %12603 = vsyncpa [#allocation20], 1 }

</bundles_post_ra>
